<compile_context>
chip_gen: v5e
topology: v5e:2x2
jax: 0.10.0
libtpu: 0.0.40
codegen_flags: <defaults>
</compile_context>

<pallas_src>
import functools

import jax
import jax.numpy as jnp
import numpy as np
from jax.experimental import pallas as pl
from jax.experimental.pallas import tpu as pltpu


def _round_up(x, m):
    return (x + m - 1) // m * m


def _default_elementwise_bf16():
    """bf16 VPU/EUP elementwise is a win on v6e/v7x; v5e has no bf16 VPU/EUP."""
    try:
        kind = jax.devices()[0].device_kind.lower()
    except Exception:
        return False
    return any(t in kind for t in ("v6", "v7", "7x"))


# ----------------------------------------------------------------------------
# Pallas kernels
# ----------------------------------------------------------------------------
def _fused_backbone_gap_kernel(patches_ref, w1_ref, b1_ref, w2_ref, b2_ref,
                               padcorr_ref, o_ref, acc_ref, *, hw, elem_bf16):
    """Fused stem-conv (matmul) + swish + conv_head 1x1 + swish + GAP accumulate.

    Grid = (B, C2 // tn, M_pad // tm); last axis is the spatial reduction.
    patches_ref: (1, tm, Kp) bf16   w1_ref: (Kp, C1) bf16    b1_ref: (1, C1) f32
    w2_ref:      (C1, tn)   bf16    b2_ref: (1, tn)  f32     padcorr_ref: (1, tn) f32
    o_ref: (1, 1, tn) bf16          acc_ref: (1, tn) f32 scratch
    """
    m = pl.program_id(2)

    @pl.when(m == 0)
    def _():
        acc_ref[...] = jnp.zeros_like(acc_ref)

    # ---- stem: (tm, Kp) bf16 @ (Kp, C1) bf16 on the MXU, f32 accumulation; swish in f32
    x = patches_ref[0]
    h = jnp.dot(x, w1_ref[...], preferred_element_type=jnp.float32) + b1_ref[...]
    h = h * jax.nn.sigmoid(h)

    # ---- conv_head 1x1: bf16 operands on the MXU, f32 accumulation
    f = jnp.dot(h.astype(jnp.bfloat16), w2_ref[...],
                preferred_element_type=jnp.float32)

    if elem_bf16:
        # v6e/v7x: bias + swish on the bf16 VPU/EUP path (the binding slot);
        # upcast before the cross-sublane reduce so accumulation stays f32.
        fb = (f + b2_ref[...]).astype(jnp.bfloat16)
        fb = fb * jax.nn.sigmoid(fb)
        part = jnp.sum(fb.astype(jnp.float32), axis=0, keepdims=True)
    else:
        # v5e: no bf16 VPU/EUP -> stay in f32.
        f = f + b2_ref[...]
        f = f * jax.nn.sigmoid(f)
        part = jnp.sum(f, axis=0, keepdims=True)

    acc_ref[...] += part                                      # (1, tn) f32

    @pl.when(m == pl.num_programs(2) - 1)
    def _():
        # Zero-padded spatial rows contribute a constant per-row value
        # (swish(swish(b1) @ w2 + b2)); its pad_count multiple was precomputed
        # host-side, so no per-step masking is needed in the hot loop.
        pooled = (acc_ref[...] - padcorr_ref[...]) * (1.0 / hw)
        o_ref[...] = pooled[None].astype(o_ref.dtype)


def fused_backbone_gap(patches, w1, b1, w2, b2, pad_corr, *, hw, tm, tn, elem_bf16):
    """patches: (B, M_pad, Kp) bf16 -> pooled features (B, C2) bf16."""
    B, M_pad, Kp = patches.shape
    C1 = w1.shape[1]
    C2 = w2.shape[1]
    assert M_pad % tm == 0 and C2 % tn == 0 and w2.shape[0] == C1

    kernel = functools.partial(_fused_backbone_gap_kernel, hw=hw, elem_bf16=elem_bf16)
    out = pl.pallas_call(
        kernel,
        out_shape=jax.ShapeDtypeStruct((B, 1, C2), jnp.bfloat16),
        grid_spec=pltpu.PrefetchScalarGridSpec(
            num_scalar_prefetch=0,
            grid=(B, C2 // tn, M_pad // tm),
            in_specs=[
                pl.BlockSpec((1, tm, Kp), lambda b, n, m: (b, m, 0)),
                pl.BlockSpec((Kp, C1), lambda b, n, m: (0, 0)),
                pl.BlockSpec((1, C1), lambda b, n, m: (0, 0)),
                pl.BlockSpec((C1, tn), lambda b, n, m: (0, n)),
                pl.BlockSpec((1, tn), lambda b, n, m: (0, n)),
                pl.BlockSpec((1, tn), lambda b, n, m: (0, n)),
            ],
            out_specs=pl.BlockSpec((1, 1, tn), lambda b, n, m: (b, 0, n)),
            scratch_shapes=[pltpu.VMEM((1, tn), jnp.float32)],
        ),
        compiler_params=pltpu.CompilerParams(
            dimension_semantics=("parallel", "parallel", "arbitrary"),
        ),
    )(patches, w1, b1, w2, b2, pad_corr)
    return out.reshape(B, C2)


def _fc_kernel(x_ref, w_ref, b_ref, o_ref):
    """Final Linear head: out = x @ w + b  (bf16 operands, f32 accumulation)."""
    o_ref[...] = jnp.dot(x_ref[...], w_ref[...],
                         preferred_element_type=jnp.float32) + b_ref[...]


def linear_head(x_bf16, w_bf16, b, *, tn=1024):
    """x_bf16: (B, K) bf16, w_bf16: (K, N) bf16 (pre-transposed), b: (1, N) f32."""
    B, K = x_bf16.shape
    K2, N = w_bf16.shape
    assert K == K2 and N % tn == 0
    return pl.pallas_call(
        _fc_kernel,
        out_shape=jax.ShapeDtypeStruct((B, N), jnp.float32),
        grid_spec=pltpu.PrefetchScalarGridSpec(
            num_scalar_prefetch=0,
            grid=(N // tn,),
            in_specs=[
                pl.BlockSpec((B, K), lambda j: (0, 0)),
                pl.BlockSpec((K, tn), lambda j: (0, j)),
                pl.BlockSpec((1, tn), lambda j: (0, j)),
            ],
            out_specs=pl.BlockSpec((B, tn), lambda j: (0, j)),
        ),
        compiler_params=pltpu.CompilerParams(dimension_semantics=("parallel",)),
    )(x_bf16, w_bf16, b)


# ----------------------------------------------------------------------------
# Glue: im2col (K-padding folded in), BN folding, parameters
# ----------------------------------------------------------------------------
def build_stem_patches(x_nhwc, kp):
    """3x3/s2 'same' (asymmetric (0,1)) im2col, bf16, K zero-padded to kp in one concat.

    Returns (patches (B, Ho*Wo, kp) bf16, Ho*Wo).
    """
    xp = jnp.pad(x_nhwc, ((0, 0), (0, 1), (0, 1), (0, 0)))
    B, H, W, C = xp.shape
    Ho = (H - 3) // 2 + 1
    Wo = (W - 3) // 2 + 1
    cols = [xp[:, i:i + Ho * 2:2, j:j + Wo * 2:2, :].astype(jnp.bfloat16)
            for i in range(3) for j in range(3)]
    kpad = kp - 9 * C
    if kpad > 0:
        cols.append(jnp.zeros((B, Ho, Wo, kpad), jnp.bfloat16))
    patches = jnp.concatenate(cols, axis=-1).reshape(B, Ho * Wo, kp)
    return patches, Ho * Wo


def fold_bn(w_mat, gamma, beta, mean, var, eps=1e-3):
    """Fold eval-mode BatchNorm into a matmul weight (K, O) (conv has no bias)."""
    scale = gamma / jnp.sqrt(var + eps)
    return w_mat * scale[None, :], beta - mean * scale


def make_params(key):
    """Deterministic synthetic parameters matching the module's layer shapes."""
    feature_size = 2560          # efficientnet-b7
    n_latents, style_dim = 14, 512
    stem_c = 32
    ks = jax.random.split(key, 8)
    p = {
        # stem: Conv2d(3, 32, k=3, s=2, bias=False) + BatchNorm2d(32)
        "stem_w": jax.random.normal(ks[0], (stem_c, 3, 3, 3), jnp.float32) * 0.1,
        "stem_gamma": 1.0 + 0.05 * jax.random.normal(ks[1], (stem_c,), jnp.float32),
        "stem_beta": 0.05 * jax.random.normal(ks[2], (stem_c,), jnp.float32),
        "stem_mean": jnp.zeros((stem_c,), jnp.float32),
        "stem_var": jnp.ones((stem_c,), jnp.float32),
        # conv_head: Conv2d(stem_c, 2560, k=1, bias=False) + BatchNorm2d(2560)
        "head_conv_w": jax.random.normal(ks[3], (feature_size, stem_c, 1, 1), jnp.float32) * 0.05,
        "head_gamma": 1.0 + 0.05 * jax.random.normal(ks[4], (feature_size,), jnp.float32),
        "head_beta": 0.05 * jax.random.normal(ks[5], (feature_size,), jnp.float32),
        "head_mean": jnp.zeros((feature_size,), jnp.float32),
        "head_var": jnp.ones((feature_size,), jnp.float32),
        # head: Linear(2560, 14 * 512)
        "fc_w": jax.random.normal(ks[6], (n_latents * style_dim, feature_size), jnp.float32) * 0.02,
        "fc_b": 0.01 * jax.random.normal(ks[7], (n_latents * style_dim,), jnp.float32),
    }
    return p, feature_size, n_latents, style_dim


def prepare_inference_params(raw):
    """One-time param prep: BN folding, K-padding, pre-transpose, bf16 storage."""
    # stem: OIHW -> (kh*kw*Cin, Cout), fold BN, zero-pad K 27 -> 32, store bf16
    w1 = jnp.transpose(raw["stem_w"], (2, 3, 1, 0)).reshape(27, -1)
    w1, b1 = fold_bn(w1, raw["stem_gamma"], raw["stem_beta"],
                     raw["stem_mean"], raw["stem_var"])
    w1 = jnp.pad(w1, ((0, 32 - 27), (0, 0)))
    # conv_head 1x1: (Cout, Cin, 1, 1) -> (Cin, Cout), fold BN, store bf16
    w2 = raw["head_conv_w"].reshape(raw["head_conv_w"].shape[0], -1).T
    w2, b2 = fold_bn(w2, raw["head_gamma"], raw["head_beta"],
                     raw["head_mean"], raw["head_var"])
    # fc: pre-transpose once, store bf16; bias pre-shaped (1, N)
    return {
        "stem_w": w1.astype(jnp.bfloat16),         # (32, 32)     bf16
        "stem_b": b1.reshape(1, -1),               # (1, 32)      f32
        "head_w": w2.astype(jnp.bfloat16),         # (32, 2560)   bf16
        "head_b": b2.reshape(1, -1),               # (1, 2560)    f32
        "fc_w": raw["fc_w"].T.astype(jnp.bfloat16),  # (2560, 7168) bf16
        "fc_b": raw["fc_b"].reshape(1, -1),        # (1, 7168)    f32
    }


def _padded_row_correction(prep, pad_count, elem_bf16):
    """Per-padded-row head output is constant: swish(swish(b1) @ w2 + b2)."""
    C2 = prep["head_w"].shape[1]
    if pad_count == 0:
        return jnp.zeros((1, C2), jnp.float32)
    b1 = prep["stem_b"]
    hp = b1 * jax.nn.sigmoid(b1)                               # (1, C1) f32
    fp = jnp.dot(hp.astype(jnp.bfloat16), prep["head_w"],
                 preferred_element_type=jnp.float32) + prep["head_b"]
    if elem_bf16:
        fpb = fp.astype(jnp.bfloat16)
        fp = (fpb * jax.nn.sigmoid(fpb)).astype(jnp.float32)
    else:
        fp = fp * jax.nn.sigmoid(fp)
    return float(pad_count) * fp                               # (1, C2) f32


# ----------------------------------------------------------------------------
# Forward pass (EfficientNetEncoder.forward, pretrained=False)
# ----------------------------------------------------------------------------
def efficientnet_encoder_forward(x_nchw, prep, n_latents, style_dim, *,
                                 tm=512, tn_fused=None, tn_fc=1024, elem_bf16=None):
    if elem_bf16 is None:
        elem_bf16 = _default_elementwise_bf16()
    B = x_nchw.shape[0]
    x = jnp.transpose(x_nchw, (0, 2, 3, 1)).astype(jnp.float32)   # NCHW -> NHWC

    Kp = prep["stem_w"].shape[0]
    C2 = prep["head_w"].shape[1]

    # pretrained=False -> no imagenet renormalization.
    # TODO(synk): MBConv blocks of efficientnet-b7 omitted here.

    # stem conv3x3 s2 as im2col matmul; patches built directly in bf16 with K padded
    patches, HW = build_stem_patches(x, Kp)                       # (B, HW, Kp) bf16
    tm_eff = min(tm, _round_up(HW, 16))
    M_pad = _round_up(HW, tm_eff)
    pad_count = M_pad - HW
    if pad_count:
        patches = jnp.concatenate(
            [patches, jnp.zeros((B, pad_count, Kp), jnp.bfloat16)], axis=1)

    # one output-channel tile (w2 fully resident) so patches stream HBM exactly once;
    # keep >= 2 programs on a parallel axis when B == 1 (v7x has 2 TensorCores)
    if tn_fused is None:
        tn_fused = C2 if B > 1 else C2 // 2

    pad_corr = _padded_row_correction(prep, pad_count, elem_bf16)  # (1, C2) f32

    # fused: stem matmul + swish -> conv_head 1x1 + swish -> global average pool
    pooled = fused_backbone_gap(patches, prep["stem_w"], prep["stem_b"],
                                prep["head_w"], prep["head_b"], pad_corr,
                                hw=HW, tm=tm_eff, tn=tn_fused,
                                elem_bf16=elem_bf16)               # (B, 2560) bf16

    # head: Dropout (identity, eval) + Linear(2560, 14*512)
    out = linear_head(pooled, prep["fc_w"], prep["fc_b"], tn=tn_fc)  # (B, 7168) f32

    return out.reshape(-1, n_latents, style_dim)


# ----------------------------------------------------------------------------
# Pure-JAX reference (same math, no Pallas) for a sanity check
# ----------------------------------------------------------------------------
def reference_forward(x_nchw, prep, n_latents, style_dim, *, elem_bf16):
    x = jnp.transpose(x_nchw, (0, 2, 3, 1)).astype(jnp.float32)
    Kp = prep["stem_w"].shape[0]
    patches, HW = build_stem_patches(x, Kp)
    B = patches.shape[0]

    h = jnp.dot(patches.reshape(B * HW, Kp), prep["stem_w"],
                preferred_element_type=jnp.float32) + prep["stem_b"]
    h = h * jax.nn.sigmoid(h)

    f = jnp.dot(h.astype(jnp.bfloat16), prep["head_w"],
                preferred_element_type=jnp.float32) + prep["head_b"]
    if elem_bf16:
        fb = f.astype(jnp.bfloat16)
        f = (fb * jax.nn.sigmoid(fb)).astype(jnp.float32)
    else:
        f = f * jax.nn.sigmoid(f)

    pooled = f.reshape(B, HW, -1).mean(axis=1)

    out = jnp.dot(pooled.astype(jnp.bfloat16), prep["fc_w"],
                  preferred_element_type=jnp.float32) + prep["fc_b"]
    return out.reshape(-1, n_latents, style_dim)


if __name__ == "__main__":
    key = jax.random.PRNGKey(0)
    pkey, xkey = jax.random.split(key)
    raw, feature_size, n_latents, style_dim = make_params(pkey)
    prep = prepare_inference_params(raw)
    elem_bf16 = _default_elementwise_bf16()

    # Small synthetic image batch: (B=2, C=3, H=16, W=16), values in [-1, 1]
    x = jax.random.uniform(xkey, (2, 3, 16, 16), jnp.float32, minval=-1.0, maxval=1.0)

    out = efficientnet_encoder_forward(x, prep, n_latents, style_dim,
                                       elem_bf16=elem_bf16)
    out = jax.block_until_ready(out)
    assert out.shape == (2, n_latents, style_dim), out.shape

    ref = jax.block_until_ready(
        reference_forward(x, prep, n_latents, style_dim, elem_bf16=elem_bf16))
    np.testing.assert_allclose(np.asarray(out), np.asarray(ref), rtol=2e-2, atol=2e-2)

    print("KERNEL_OK")
</pallas_src>

<mosaic_0001>
module attributes {stable_mosaic.version = 11 : i64} {
  func.func @_fused_backbone_gap_kernel(%arg0: i32, %arg1: i32, %arg2: i32, %arg3: memref<1x64x32xbf16, #tpu.memory_space<vmem>>, %arg4: memref<32x32xbf16, #tpu.memory_space<vmem>>, %arg5: memref<1x32xf32, #tpu.memory_space<vmem>>, %arg6: memref<32x2560xbf16, #tpu.memory_space<vmem>>, %arg7: memref<1x2560xf32, #tpu.memory_space<vmem>>, %arg8: memref<1x2560xf32, #tpu.memory_space<vmem>>, %arg9: memref<1x1x2560xbf16, #tpu.memory_space<vmem>>, %arg10: memref<1x2560xf32, #tpu.memory_space<vmem>>) attributes {dimension_semantics = [#tpu.dimension_semantics<parallel>, #tpu.dimension_semantics<parallel>, #tpu.dimension_semantics<arbitrary>], iteration_bounds = array<i64: 2, 1, 1>, scalar_prefetch = 0 : i64, scratch_operands = 1 : i64, tpu.core_type = #tpu.core_type<tc>, window_params = [{transform_indices = @transform_0, window_bounds = array<i64: 1, 64, 32>}, {pipeline_mode = #tpu.pipeline_mode<synchronous>, transform_indices = @transform_1, window_bounds = array<i64: 32, 32>}, {pipeline_mode = #tpu.pipeline_mode<synchronous>, transform_indices = @transform_2, window_bounds = array<i64: 1, 32>}, {transform_indices = @transform_3, window_bounds = array<i64: 32, 2560>}, {transform_indices = @transform_4, window_bounds = array<i64: 1, 2560>}, {transform_indices = @transform_5, window_bounds = array<i64: 1, 2560>}, {transform_indices = @transform_6, window_bounds = array<i64: 1, 1, 2560>}]} {
    %c0_i32 = arith.constant 0 : i32
    %0 = arith.cmpi eq, %arg2, %c0_i32 : i32
    %1 = arith.extui %0 : i1 to i32
    %c0_i32_0 = arith.constant 0 : i32
    %2 = arith.cmpi ne, %1, %c0_i32_0 : i32
    scf.if %2 {
      %cst_21 = arith.constant 0.000000e+00 : f32
      %36 = vector.broadcast %cst_21 : f32 to vector<1x2560xf32>
      %c0_22 = arith.constant 0 : index
      %c0_23 = arith.constant 0 : index
      %37 = vector.load %arg10[%c0_22, %c0_23] : memref<1x2560xf32, #tpu.memory_space<vmem>>, vector<1x2560xf32>
      tpu.vector_store %arg10[%c0_22, %c0_23], %36 {strides = array<i32>} : memref<1x2560xf32, #tpu.memory_space<vmem>>, vector<1x2560xf32>,
    } else {
    }
    %c0 = arith.constant 0 : index
    %c0_1 = arith.constant 0 : index
    %c0_2 = arith.constant 0 : index
    %3 = vector.load %arg3[%c0, %c0_1, %c0_2] : memref<1x64x32xbf16, #tpu.memory_space<vmem>>, vector<1x64x32xbf16>
    %4 = vector.shape_cast %3 : vector<1x64x32xbf16> to vector<64x32xbf16>
    %c0_3 = arith.constant 0 : index
    %c0_4 = arith.constant 0 : index
    %5 = vector.load %arg4[%c0_3, %c0_4] : memref<32x32xbf16, #tpu.memory_space<vmem>>, vector<32x32xbf16>
    %cst = arith.constant dense<0.000000e+00> : vector<64x32xf32>
    %6 = tpu.matmul %4, %5, %cst {dimension_numbers = #tpu.dot_dimension_numbers<[1], [0], [0], [1], [0, 0, 1, 1], [], []>} : vector<64x32xbf16>, vector<32x32xbf16>, vector<64x32xf32> -> vector<64x32xf32>
    %c0_5 = arith.constant 0 : index
    %c0_6 = arith.constant 0 : index
    %7 = vector.load %arg5[%c0_5, %c0_6] : memref<1x32xf32, #tpu.memory_space<vmem>>, vector<1x32xf32>
    %8 = vector.broadcast %7 : vector<1x32xf32> to vector<64x32xf32>
    %9 = arith.addf %6, %8 : vector<64x32xf32>
    %10 = arith.negf %9 : vector<64x32xf32>
    %11 = math.exp %10 : vector<64x32xf32>
    %cst_7 = arith.constant 1.000000e+00 : f32
    %12 = vector.broadcast %cst_7 : f32 to vector<64x32xf32>
    %13 = arith.addf %12, %11 : vector<64x32xf32>
    %14 = arith.divf %12, %13 : vector<64x32xf32>
    %15 = arith.mulf %9, %14 : vector<64x32xf32>
    %16 = arith.truncf %15 : vector<64x32xf32> to vector<64x32xbf16>
    %c0_8 = arith.constant 0 : index
    %c0_9 = arith.constant 0 : index
    %17 = vector.load %arg6[%c0_8, %c0_9] : memref<32x2560xbf16, #tpu.memory_space<vmem>>, vector<32x2560xbf16>
    %cst_10 = arith.constant dense<0.000000e+00> : vector<64x2560xf32>
    %18 = tpu.matmul %16, %17, %cst_10 {dimension_numbers = #tpu.dot_dimension_numbers<[1], [0], [0], [1], [0, 0, 1, 1], [], []>} : vector<64x32xbf16>, vector<32x2560xbf16>, vector<64x2560xf32> -> vector<64x2560xf32>
    %c0_11 = arith.constant 0 : index
    %c0_12 = arith.constant 0 : index
    %19 = vector.load %arg7[%c0_11, %c0_12] : memref<1x2560xf32, #tpu.memory_space<vmem>>, vector<1x2560xf32>
    %20 = vector.broadcast %19 : vector<1x2560xf32> to vector<64x2560xf32>
    %21 = arith.addf %18, %20 : vector<64x2560xf32>
    %22 = arith.negf %21 : vector<64x2560xf32>
    %23 = math.exp %22 : vector<64x2560xf32>
    %cst_13 = arith.constant 1.000000e+00 : f32
    %24 = vector.broadcast %cst_13 : f32 to vector<64x2560xf32>
    %25 = arith.addf %24, %23 : vector<64x2560xf32>
    %26 = arith.divf %24, %25 : vector<64x2560xf32>
    %27 = arith.mulf %21, %26 : vector<64x2560xf32>
    %cst_14 = arith.constant dense<0.000000e+00> : vector<2560xf32>
    %28 = vector.multi_reduction <add>, %27, %cst_14 [0] : vector<64x2560xf32> to vector<2560xf32>
    %29 = vector.shape_cast %28 : vector<2560xf32> to vector<1x2560xf32>
    %c0_15 = arith.constant 0 : index
    %c0_16 = arith.constant 0 : index
    %30 = vector.load %arg10[%c0_15, %c0_16] : memref<1x2560xf32, #tpu.memory_space<vmem>>, vector<1x2560xf32>
    %31 = arith.addf %30, %29 : vector<1x2560xf32>
    %c0_17 = arith.constant 0 : index
    %c0_18 = arith.constant 0 : index
    %32 = vector.load %arg10[%c0_17, %c0_18] : memref<1x2560xf32, #tpu.memory_space<vmem>>, vector<1x2560xf32>
    tpu.vector_store %arg10[%c0_17, %c0_18], %31 {strides = array<i32>} : memref<1x2560xf32, #tpu.memory_space<vmem>>, vector<1x2560xf32>,
    %c0_i32_19 = arith.constant 0 : i32
    %33 = arith.cmpi eq, %arg2, %c0_i32_19 : i32
    %34 = arith.extui %33 : i1 to i32
    %c0_i32_20 = arith.constant 0 : i32
    %35 = arith.cmpi ne, %34, %c0_i32_20 : i32
    scf.if %35 {
      %c0_21 = arith.constant 0 : index
      %c0_22 = arith.constant 0 : index
      %36 = vector.load %arg10[%c0_21, %c0_22] : memref<1x2560xf32, #tpu.memory_space<vmem>>, vector<1x2560xf32>
      %c0_23 = arith.constant 0 : index
      %c0_24 = arith.constant 0 : index
      %37 = vector.load %arg8[%c0_23, %c0_24] : memref<1x2560xf32, #tpu.memory_space<vmem>>, vector<1x2560xf32>
      %38 = arith.subf %36, %37 : vector<1x2560xf32>
      %cst_25 = arith.constant 1.562500e-02 : f32
      %39 = vector.broadcast %cst_25 : f32 to vector<1x2560xf32>
      %40 = arith.mulf %38, %39 : vector<1x2560xf32>
      %41 = vector.shape_cast %40 : vector<1x2560xf32> to vector<1x1x2560xf32>
      %42 = arith.truncf %41 : vector<1x1x2560xf32> to vector<1x1x2560xbf16>
      %c0_26 = arith.constant 0 : index
      %c0_27 = arith.constant 0 : index
      %c0_28 = arith.constant 0 : index
      %43 = vector.load %arg9[%c0_26, %c0_27, %c0_28] : memref<1x1x2560xbf16, #tpu.memory_space<vmem>>, vector<1x1x2560xbf16>
      tpu.vector_store %arg9[%c0_26, %c0_27, %c0_28], %42 {strides = array<i32>} : memref<1x1x2560xbf16, #tpu.memory_space<vmem>>, vector<1x1x2560xbf16>,
    } else {
    }
    return
  }
  func.func @transform_0(%arg0: i32, %arg1: i32, %arg2: i32) -> (i32, i32, i32) {
    %c0_i32 = arith.constant 0 : i32
    %c0_i32_0 = arith.constant 0 : i32
    return %arg0, %arg2, %c0_i32 : i32, i32, i32
  }
  func.func @transform_1(%arg0: i32, %arg1: i32, %arg2: i32) -> (i32, i32) {
    %c0_i32 = arith.constant 0 : i32
    %c0_i32_0 = arith.constant 0 : i32
    %c0_i32_1 = arith.constant 0 : i32
    return %c0_i32, %c0_i32_0 : i32, i32
  }
  func.func @transform_2(%arg0: i32, %arg1: i32, %arg2: i32) -> (i32, i32) {
    %c0_i32 = arith.constant 0 : i32
    %c0_i32_0 = arith.constant 0 : i32
    %c0_i32_1 = arith.constant 0 : i32
    return %c0_i32, %c0_i32_0 : i32, i32
  }
  func.func @transform_3(%arg0: i32, %arg1: i32, %arg2: i32) -> (i32, i32) {
    %c0_i32 = arith.constant 0 : i32
    %c0_i32_0 = arith.constant 0 : i32
    return %c0_i32, %arg1 : i32, i32
  }
  func.func @transform_4(%arg0: i32, %arg1: i32, %arg2: i32) -> (i32, i32) {
    %c0_i32 = arith.constant 0 : i32
    %c0_i32_0 = arith.constant 0 : i32
    return %c0_i32, %arg1 : i32, i32
  }
  func.func @transform_5(%arg0: i32, %arg1: i32, %arg2: i32) -> (i32, i32) {
    %c0_i32 = arith.constant 0 : i32
    %c0_i32_0 = arith.constant 0 : i32
    return %c0_i32, %arg1 : i32, i32
  }
  func.func @transform_6(%arg0: i32, %arg1: i32, %arg2: i32) -> (i32, i32, i32) {
    %c0_i32 = arith.constant 0 : i32
    %c0_i32_0 = arith.constant 0 : i32
    return %arg0, %c0_i32, %arg1 : i32, i32, i32
  }
}

</mosaic_0001>

<bundles_post_ra>
// kernel: tpu_custom_call.1
= control target key start
LH: loop header
LB: loop body
LE: loop exit
PB: predicated region body
PF: predicated region fallthrough
CT: control target
= control target key end

     0   :  { %11 = vsyncpa [#allocation4], 0  ;;  %s6651_s21 = smov 0   ;;  %s6653_s22 = smov 0   ;;  %s12089_s0 = inlined_call_operand.vmem [shape: bf16[2,64,32], index: 0, kind: input, shape index: {}]   ;;  %s12090_s1 = inlined_call_operand.vmem [shape: bf16[32,32], index: 1, kind: input, shape index: {}]   ;;  %s12091_s2 = inlined_call_operand.vmem [shape: f32[1,32], index: 2, kind: input, shape index: {}]   ;;  %s12092_s3 = inlined_call_operand.hbm [shape: bf16[32,2560], index: 3, kind: input, shape index: {}]   ;;  %s12093_s4 = inlined_call_operand.vmem [shape: f32[1,2560], index: 4, kind: input, shape index: {}]   ;;  %s12094_s5 = inlined_call_operand.vmem [shape: f32[1,2560], index: 5, kind: input, shape index: {}]   ;;  %s12095_s6 = inlined_call_operand.vmem [shape: bf16[2,1,2560], index: 6, kind: output, shape index: {}]  }
   0x1   :  { %s6655_s23 = smov 0  }
   0x2 LB: > { %s5338_s24 = sadd.s32 4294967295, %s6610_s23   ;;  %s36_s25 = sadd.s32 1, %s6606_s22  ;;  %s6610_s23 = sphi %s6655_s23, %s17_s23   ;;  %s6606_s22 = sphi %s6653_s22, %s12612_s22   ;;  %s6602_s21 = sphi %s6651_s21, %s12611_s21  }
   0x3   : > { %p38_p0 = scmp.ge.s32.totalorder %s36_s25, 2  ;;  %p5340_p1 = scmp.ge.s32.totalorder %s6610_s23, 1 }
   0x4   : > { %p217_p2 = scmp.lt.s32.totalorder %s6610_s23, 3  ;;  %p5849_p4 = scmp.eq.s32.totalorder %s5338_s24, 0 }
   0x5   : > { %s12614_s25 = smov (%p38_p0, %s36_s25), 0  ;;  %s237_s28 = sshll.u32 %s12092_s3, 4  ;;  %s238_s28 = int_to_ptr.hbm [resolvable:$true] %s237_s28 }
   0x6   : > { %p218_p3 = pnand %p5340_p1, %p217_p2  ;;  %s6612_s29 = smov [#allocation3]  }
   0x7   : > { %s239_s30 = sshll.u32 %s6612_s29, 4  ;;  %s6613_s7 = smov 1280   ;;  %s240_s30 = int_to_ptr.vmem [resolvable:$true] %s239_s30 }
   0x8   : > { %p5845_p5 = pneg %p218_p3  ;;  %s6614_s8 = smov 80  }
   0x9   : > { %284 = sbr.rel (%p218_p3) target bundleno = 1192 (0x4a8), region = 44 }
   0xa   : > { %p5846_p6 = pnand %p5849_p4, %p5845_p5 }
   0xc   : > { %5848 = dma.hbm_to_vmem [thread:$0]  (!%p5846_p6), %s238_s28, 5120, %s240_s30, [#allocation4], %s6613_s7, %s6613_s7, %s6614_s8  }
   0xe   : > { %6597 = dma.done.wait (%p5849_p4), [#allocation4], 5120  }
   0xf   : > { %6599 = vsyncadd (%p5849_p4), [#allocation4], 4294962176  ;;  %p331_p7 = scmp.lt.s32.totalorder %s6602_s21, 1  ;;  %v5793_v0 = vld [vmem:[%s12090_s1 + $0x8] sm:$0xff]  ;;  %v5792_v1 = vld [vmem:[%s12090_s1] sm:$0xff]  ;;  %vm420_vm0 = vcmask 261120  }
  0x10   : > { %439 = vmatpush.bf16.msra.mxu0 %v5793_v0  ;;  %5834 = vmatpush.bf16.msra.mxu1 %v5793_v0  ;;  %v6692_v6 = vld [vmem:[%s12091_s2] ss:$0 sm:$0xff]  ;;  %v5814_v16 = vld [vmem:[#allocation3 + $0xa4] sm:$0xf]  ;;  %v5469_v17 = vld [vmem:[#allocation3 + $0xf0] sm:$0xf0] }
  0x11   : > { %s12616_s21 = smov (!%p331_p7, %s6602_s21), 1  ;;  %5835 = vmatpush.bf16.msra.mxu2 %v5793_v0  ;;  %5836 = vmatpush.bf16.msra.mxu3 %v5793_v0  ;;  %v5475_v18 = vld [vmem:[#allocation3 + $0xa8] sm:$0xf]  ;;  %v5472_v21 = vor.u32 %v5814_v16, %v5469_v17  ;;  %v5825_v22 = vld [vmem:[#allocation3 + $0xf4] sm:$0xf0] }
  0x12   : > { %s5787_s9 = sshll.u32 %s12616_s21, 5  ;;  %v5815_v23 = vld [vmem:[#allocation3 + $0xac] sm:$0xf]  ;;  %v5477_v24 = vld [vmem:[#allocation3 + $0xf8] sm:$0xf0]  ;;  %v5476_v25 = vor.u32 %v5825_v22, %v5475_v18  ;;  %s5840_s7 = smul.u32 20, %s12616_s21 }
  0x13   : > { %s338_s16 = scalar_lea.vmem %s12089_s0, %s5787_s9  ;;  %v5480_v26 = vor.u32 %v5815_v23, %v5477_v24  ;;  %v5467_v27 = vld [vmem:[#allocation3 + $0xa0] sm:$0xf]  ;;  %v5824_v31 = vld [vmem:[#allocation3 + $0xec] sm:$0xf0]  ;;  %v5794_v34 = vld [vmem:[#allocation3 + $0x4] sm:$0xf] }
  0x14   : > { %v5788_v2 = vld [vmem:[%s338_s16] sm:$0xff]  ;;  %v5789_v3 = vld [vmem:[%s338_s16 + $0x8] sm:$0xff]  ;;  %440 = vmatpush.bf16.msra.mxu0 %v5792_v1  ;;  %5837 = vmatpush.bf16.msra.mxu1 %v5792_v1  ;;  %v5790_v4 = vld [vmem:[%s338_s16 + $0x10] sm:$0xff]  ;;  %v5468_v33 = vor.u32 %v5824_v31, %v5467_v27  ;;  %s9302_s9 = scalar_lea.vmem %s12095_s6, %s5840_s7 }
  0x15   : > { %v5791_v5 = vld [vmem:[%s338_s16 + $0x18] sm:$0xff]  ;;  %5838 = vmatpush.bf16.msra.mxu2 %v5792_v1  ;;  %5839 = vmatpush.bf16.msra.mxu3 %v5792_v1  ;;  %v5389_v35 = vld [vmem:[#allocation3 + $0x50] sm:$0xf0]  ;;  %v5805_v39 = vld [vmem:[#allocation3 + $0x54] sm:$0xf0] }
  0x16   : > { %v5392_v36 = vor.u32 %v5794_v34, %v5389_v35  ;;  %v5395_v37 = vld [vmem:[#allocation3 + $0x8] sm:$0xf]  ;;  %v5387_v40 = vld [vmem:[#allocation3] sm:$0xf]  ;;  %v5804_v41 = vld [vmem:[#allocation3 + $0x4c] sm:$0xf0] }
  0x17   : > { %5373 = vmatmul.msk.bf16.vlgmr.msra.gmra.mxu0 %vm420_vm0, %v5788_v2  ;;  %5374 = vmatmul.msk.bf16.vlgmr.msra.gmra.mxu1 %vm420_vm0, %v5789_v3  ;;  %v5795_v42 = vld [vmem:[#allocation3 + $0xc] sm:$0xf]  ;;  %v5397_v43 = vld [vmem:[#allocation3 + $0x58] sm:$0xf0]  ;;  %v5396_v47 = vor.u32 %v5805_v39, %v5395_v37  ;;  %v5388_v48 = vor.u32 %v5804_v41, %v5387_v40  ;;  %v5491_v35 = vld [vmem:[#allocation3 + $0xb8] sm:$0xf] }
  0x18   : > { %5375 = vmatmul.msk.bf16.vlgmr.msra.gmra.mxu2 %vm420_vm0, %v5790_v4  ;;  %5376 = vmatmul.msk.bf16.vlgmr.msra.gmra.mxu3 %vm420_vm0, %v5791_v5  ;;  %v5400_v49 = vor.u32 %v5795_v42, %v5397_v43  ;;  %v5816_v4 = vld [vmem:[#allocation3 + $0xb4] sm:$0xf]  ;;  %v5485_v5 = vld [vmem:[#allocation3 + $0x100] sm:$0xf0]  ;;  %v5827_v37 = vld [vmem:[#allocation3 + $0x104] sm:$0xf0] }
  0x19   : > { %959 = vmatpush.bf16.msrb.mxu2 %v5472_v21  ;;  %988 = vmatpush.bf16.msrb.mxu3 %v5476_v25  ;;  %v5488_v23 = vor.u32 %v5816_v4, %v5485_v5  ;;  %v5493_v39 = vld [vmem:[#allocation3 + $0x108] sm:$0xf0] }
  0x1a   : > { %1017 = vmatpush.bf16.msrb.mxu0 %v5480_v26  ;;  %930 = vmatpush.bf16.msrb.mxu1 %v5468_v33  ;;  %v5413_v4 = vld [vmem:[#allocation3 + $0x68] sm:$0xf0] }
  0x1d   : > { %960 = vmatpush.bf16.msrb.mxu2 %v5392_v36  ;;  %989 = vmatpush.bf16.msrb.mxu3 %v5396_v47 }
  0x1e   : > { %931 = vmatpush.bf16.msrb.mxu1 %v5388_v48  ;;  %1018 = vmatpush.bf16.msrb.mxu0 %v5400_v49  ;;  %v5483_v48 = vld [vmem:[#allocation3 + $0xb0] sm:$0xf]  ;;  %v5826_v49 = vld [vmem:[#allocation3 + $0xfc] sm:$0xf0] }
  0x21   : > { %1075 = vmatpush.bf16.msra.mxu2 %v5488_v23 }
  0x94   : > { %v442_v7 = vpop.f32.mrf.mxu0  ;;  %v447_v8 = vpop.f32.mrf.mxu1 }
  0x95   : > { %v6695_v9 = vadd.f32 %v6692_v6, %v442_v7  ;;  %v6699_v11 = vadd.f32 %v6692_v6, %v447_v8 }
  0x97   : > { %v5377_v10 = vmul.f32 -1.442695, %v6695_v9  ;;  %v5379_v12 = vmul.f32 -1.442695, %v6699_v11 }
  0x99   : > { %5880 = vpow2.f32 %v5377_v10 }
  0x9a   : > { %5882 = vpow2.f32 %v5379_v12 }
  0x9b   : > { %v452_v13 = vpop.f32.mrf.mxu2  ;;  %v457_v51 = vpop.f32.mrf.mxu3 }
  0x9c   : > { %v444_v14 = vpop.f32.mrf.mxu0  ;;  %v449_v15 = vpop.f32.mrf.mxu1  ;;  %v6714_v45 = vadd.f32 %v6692_v6, %v452_v13  ;;  %v6729_v62 = vadd.f32 %v6692_v6, %v457_v51 }
  0x9d   : > { %v6703_v19 = vadd.f32 %v6692_v6, %v444_v14  ;;  %v6706_v20 = vadd.f32 %v6692_v6, %v449_v15 }
  0x9e   : > { %v5381_v56 = vmul.f32 -1.442695, %v6714_v45  ;;  %v5383_v14 = vmul.f32 -1.442695, %v6729_v62 }
  0x9f   : > { %v5881_v28 = vpop.eup %5880  ;;  %v5378_v29 = vmul.f32 -1.442695, %v6703_v19  ;;  %v5380_v30 = vmul.f32 -1.442695, %v6706_v20 }
  0xa0   : > { %v6710_v32 = vadd.f32 1.0, %v5881_v28  ;;  %v5883_v44 = vpop.eup %5882 }
  0xa1   : > { %5884 = vpow2.f32 %v5378_v29  ;;  %v6719_v53 = vadd.f32 1.0, %v5883_v44  ;;  %v5492_v44 = vor.u32 %v5827_v37, %v5491_v35 }
  0xa2   : > { %5886 = vrcp.f32 %v6710_v32  ;;  %v503_v8 = vand.u32 2147483647, %v6710_v32  ;;  %v505_v10 = vand.u32 2147483648, %v6710_v32  ;;  %vm499_vm2 = vweird.f32 %v6710_v32 }
  0xa3   : > { %v454_v38 = vpop.f32.mrf.mxu2  ;;  %5888 = vpow2.f32 %v5380_v30  ;;  %v459_v0 = vpop.f32.mrf.mxu3  ;;  %vm529_vm9 = vweird.f32 %v6719_v53  ;;  %1104 = vmatpush.bf16.msra.mxu3 %v5492_v44 }
  0xa4   : > { %v6717_v46 = vadd.f32 %v6692_v6, %v454_v38  ;;  %v6738_v15 = vadd.f32 %v6692_v6, %v459_v0  ;;  %vm504_vm5 = vcmp.eq.f32.partialorder %v503_v8, 8.507059e+37  ;;  %v506_v26 = vor.u32 1.1754944e-38, %v505_v10  ;;  %v5817_v38 = vld [vmem:[#allocation3 + $0xbc] sm:$0xf] }
  0xa5   : > { %v5496_v47 = vor.u32 %v5817_v38, %v5493_v39 }
  0xa6   : > { %v5382_v58 = vmul.f32 -1.442695, %v6717_v46  ;;  %v5384_v31 = vmul.f32 -1.442695, %v6738_v15 }
  0xa7   : > { %v5885_v50 = vpop.eup %5884  ;;  %1133 = vmatpush.bf16.msra.mxu0 %v5496_v47 }
  0xa8   : > { %v5887_v52 = vpop.eup %5886  ;;  %v487_v54 = vadd.f32 1.0, %v5885_v50 }
  0xa9   : > { %v495_v55 = vmul.f32 %v5887_v52, %v6710_v32  ;;  %v5889_v57 = vpop.eup %5888  ;;  %vm500_vm1 = vweird.f32 %v5887_v52 }
  0xaa   : > { %5890 = vrcp.f32 %v487_v54  ;;  %v6725_v60 = vadd.f32 1.0, %v5889_v57  ;;  %vm6742_vm3 = vmor %vm499_vm2, %vm500_vm1  ;;  %v518_v21 = vand.u32 2147483647, %v487_v54  ;;  %v520_v22 = vand.u32 2147483648, %v487_v54 }
  0xab   : > { %v496_v59 = vsub.f32 1.0, %v495_v55  ;;  %5892 = vrcp.f32 %v6719_v53  ;;  %vm514_vm6 = vweird.f32 %v487_v54  ;;  %v5484_v57 = vor.u32 %v5826_v49, %v5483_v48 }
  0xac   : > { %5894 = vpow2.f32 %v5381_v56  ;;  %vm519_vm8 = vcmp.eq.f32.partialorder %v518_v21, 8.507059e+37  ;;  %v521_v34 = vor.u32 1.1754944e-38, %v520_v22  ;;  %vm544_vm11 = vweird.f32 %v6725_v60 }
  0xad   : > { %v497_v61 = vmul.f32 %v5887_v52, %v496_v59  ;;  %5896 = vpow2.f32 %v5382_v58  ;;  %v550_v56 = vand.u32 2147483648, %v6725_v60  ;;  %v5405_v59 = vld [vmem:[#allocation3 + $0x60] sm:$0xf0]  ;;  %1046 = vmatpush.bf16.msra.mxu1 %v5484_v57 }
  0xae   : > { %5898 = vrcp.f32 %v6725_v60 }
  0xaf   : > { %v498_v2 = vadd.f32 %v5887_v52, %v497_v61  ;;  %v5411_v61 = vld [vmem:[#allocation3 + $0x18] sm:$0xf]  ;;  %v551_v23 = vor.u32 1.1754944e-38, %v550_v56 }
  0xb0   : > { %v5891_v63 = vpop.eup %5890 }
  0xb1   : > { %v6731_v1 = vpop.eup %5892  ;;  %v510_v3 = vmul.f32 %v5891_v63, %v487_v54  ;;  %v502_v24 = vsel %vm6742_vm3, %v5887_v52, %v498_v2  ;;  %vm515_vm4 = vweird.f32 %v5891_v63  ;;  %v548_v52 = vand.u32 2147483647, %v6725_v60  ;;  %v5807_v2 = vld [vmem:[#allocation3 + $0x64] sm:$0xf0] }
  0xb2   : > { %v5895_v7 = vpop.eup %5894  ;;  %v525_v18 = vmul.f32 %v6731_v1, %v6719_v53  ;;  %v507_v32 = vsel %vm504_vm5, %v506_v26, %v502_v24  ;;  %vm516_vm7 = vmor %vm514_vm6, %vm515_vm4  ;;  %vm530_vm10 = vweird.f32 %v6731_v1  ;;  %v5412_v10 = vor.u32 %v5807_v2, %v5411_v61  ;;  %v5818_v2 = vld [vmem:[#allocation3 + $0xc4] sm:$0xf] }
  0xb3   : > { %v5897_v12 = vpop.eup %5896  ;;  %v511_v13 = vsub.f32 1.0, %v510_v3  ;;  %v6752_v27 = vadd.f32 1.0, %v5895_v7  ;;  %v614_v41 = vmul.f32 %v507_v32, %v6695_v9  ;;  %v533_v9 = vand.u32 2147483647, %v6719_v53  ;;  %vm6775_vm12 = vmor %vm529_vm9, %vm530_vm10  ;;  %v5797_v3 = vld [vmem:[#allocation3 + $0x1c] sm:$0xf] }
  0xb4   : > { %v6740_v16 = vpop.eup %5898  ;;  %v6754_v28 = vadd.f32 1.0, %v5897_v12  ;;  %v526_v33 = vsub.f32 1.0, %v525_v18  ;;  %v5416_v12 = vor.u32 %v5797_v3, %v5413_v4  ;;  %1105 = vmatpush.bf16.msra.mxu3 %v5412_v10  ;;  %vm549_vm1 = vcmp.eq.f32.partialorder %v548_v52, 8.507059e+37  ;;  %v5501_v3 = vld [vmem:[#allocation3 + $0x110] sm:$0xf0] }
  0xb5   : > { %v512_v25 = vmul.f32 %v5891_v63, %v511_v13  ;;  %v540_v6 = vmul.f32 %v6740_v16, %v6725_v60  ;;  %vm545_vm13 = vweird.f32 %v6740_v16  ;;  %v5403_v13 = vld [vmem:[#allocation3 + $0x10] sm:$0xf]  ;;  %vm534_vm15 = vcmp.eq.f32.partialorder %v533_v9, 8.507059e+37  ;;  %v5507_v4 = vld [vmem:[#allocation3 + $0xc8] sm:$0xf] }
  0xb6   : > { %5900 = vrcp.f32 %v6754_v28  ;;  %v527_v50 = vmul.f32 %v6731_v1, %v526_v33  ;;  %vm6799_vm14 = vmor %vm544_vm11, %vm545_vm13  ;;  %1134 = vmatpush.bf16.msra.mxu0 %v5416_v12  ;;  %vm574_vm2 = vweird.f32 %v6754_v28  ;;  %vm559_vm4 = vweird.f32 %v6752_v27  ;;  %v5829_v7 = vld [vmem:[#allocation3 + $0x114] sm:$0xf0]  ;;  %v5509_v10 = vld [vmem:[#allocation3 + $0x118] sm:$0xf0] }
  0xb7   : > { %v513_v29 = vadd.f32 %v5891_v63, %v512_v25  ;;  %v541_v30 = vsub.f32 1.0, %v540_v6  ;;  %5902 = vpow2.f32 %v5383_v14  ;;  %v5806_v14 = vld [vmem:[#allocation3 + $0x5c] sm:$0xf0]  ;;  %v565_v39 = vand.u32 2147483648, %v6752_v27 }
  0xb8   : > { %5904 = vrcp.f32 %v6752_v27  ;;  %v528_v0 = vadd.f32 %v6731_v1, %v527_v50  ;;  %v5404_v22 = vor.u32 %v5806_v14, %v5403_v13  ;;  %v5508_v14 = vor.u32 %v5829_v7, %v5507_v4 }
  0xb9   : > { %v517_v36 = vsel %vm516_vm7, %v5891_v63, %v513_v29  ;;  %v542_v43 = vmul.f32 %v6740_v16, %v541_v30  ;;  %5906 = vpow2.f32 %v5384_v31  ;;  %v566_v47 = vor.u32 1.1754944e-38, %v565_v39 }
  0xba   : > { %v522_v40 = vsel %vm519_vm8, %v521_v34, %v517_v36  ;;  %v532_v24 = vsel %vm6775_vm12, %v6731_v1, %v528_v0  ;;  %1047 = vmatpush.bf16.msra.mxu1 %v5404_v22  ;;  %v580_v36 = vand.u32 2147483648, %v6754_v28 }
  0xbb   : > { %v615_v42 = vmul.f32 %v522_v40, %v6703_v19  ;;  %v535_v19 = vand.u32 2147483648, %v6719_v53  ;;  %v543_v55 = vadd.f32 %v6740_v16, %v542_v43  ;;  %v5796_v53 = vld [vmem:[#allocation3 + $0x14] sm:$0xf] }
  0xbc   : > { %v6786_v58 = vpop.eup %5900  ;;  %v5408_v8 = vor.u32 %v5796_v53, %v5405_v59 }
  0xbd   : > { %v6765_v51 = vpack.c.bf16 %v615_v42, %v614_v41  ;;  %v5903_v63 = vpop.eup %5902  ;;  %v547_v18 = vsel %vm6799_vm14, %v6740_v16, %v543_v55  ;;  %v570_v21 = vmul.f32 %v6786_v58, %v6754_v28  ;;  %v536_v60 = vor.u32 1.1754944e-38, %v535_v19 }
  0xbe   : > { %v6793_v5 = vpop.eup %5904  ;;  %1076 = vmatpush.bf16.msra.mxu2 %v5408_v8  ;;  %v6813_v6 = vadd.f32 1.0, %v5903_v63  ;;  %v552_v16 = vsel %vm549_vm1, %v551_v23, %v547_v18  ;;  %vm575_vm3 = vweird.f32 %v6786_v58  ;;  %v581_v41 = vor.u32 1.1754944e-38, %v580_v36  ;;  %v5819_v8 = vld [vmem:[#allocation3 + $0xcc] sm:$0xf]  ;;  %v5499_v18 = vld [vmem:[#allocation3 + $0xc0] sm:$0xf] }
  0xbf   : > { %5545 = vmatmul.msk.bf16.vlgmr.msrb.gmra.mxu1 %vm420_vm0, %v6765_v51  ;;  %5549 = vmatmul.msk.bf16.vlgmr.msrb.gmra.mxu2 %vm420_vm0, %v6765_v51  ;;  %v5907_v17 = vpop.eup %5906  ;;  %v555_v25 = vmul.f32 %v6793_v5, %v6752_v27  ;;  %v571_v29 = vsub.f32 1.0, %v570_v21  ;;  %v537_v30 = vsel %vm534_vm15, %v536_v60, %v532_v24  ;;  %v617_v32 = vmul.f32 %v552_v16, %v6706_v20  ;;  %vm576_vm6 = vmor %vm574_vm2, %vm575_vm3  ;;  %v5828_v21 = vld [vmem:[#allocation3 + $0x10c] sm:$0xf0]  ;;  %v5419_v36 = vld [vmem:[#allocation3 + $0x20] sm:$0xf] }
  0xc0   : > { %5553 = vmatmul.msk.bf16.vlgmr.msrb.gmra.mxu3 %vm420_vm0, %v6765_v51  ;;  %5557 = vmatmul.msk.bf16.vlgmr.msrb.gmra.mxu0 %vm420_vm0, %v6765_v51  ;;  %v6815_v26 = vadd.f32 1.0, %v5907_v17  ;;  %5908 = vrcp.f32 %v6813_v6  ;;  %v616_v1 = vmul.f32 %v537_v30, %v6699_v11  ;;  %vm560_vm5 = vweird.f32 %v6793_v5 }
  0xc1   : > { %v556_v31 = vsub.f32 1.0, %v555_v25  ;;  %v572_v33 = vmul.f32 %v6786_v58, %v571_v29  ;;  %v578_v20 = vand.u32 2147483647, %v6754_v28  ;;  %v563_v28 = vand.u32 2147483647, %v6752_v27  ;;  %vm561_vm7 = vmor %vm559_vm4, %vm560_vm5  ;;  %1220 = vmatpush.bf16.msrb.mxu3 %v5508_v14 }
  0xc2   : > { %5910 = vrcp.f32 %v6815_v26  ;;  %v6823_v35 = vpack.c.bf16 %v617_v32, %v616_v1  ;;  %vm589_vm10 = vweird.f32 %v6813_v6  ;;  %v593_v52 = vand.u32 2147483647, %v6813_v6  ;;  %v5427_v29 = vld [vmem:[#allocation3 + $0x28] sm:$0xf]  ;;  %v5799_v32 = vld [vmem:[#allocation3 + $0x2c] sm:$0xf] }
  0xc3   : > { %v557_v34 = vmul.f32 %v6793_v5, %v556_v31  ;;  %v573_v11 = vadd.f32 %v6786_v58, %v572_v33  ;;  %vm579_vm8 = vcmp.eq.f32.partialorder %v578_v20, 8.507059e+37  ;;  %vm564_vm9 = vcmp.eq.f32.partialorder %v563_v28, 8.507059e+37  ;;  %v5809_v31 = vld [vmem:[#allocation3 + $0x74] sm:$0xf0]  ;;  %v5429_v1 = vld [vmem:[#allocation3 + $0x78] sm:$0xf0] }
  0xc4   : > { %vm604_vm12 = vweird.f32 %v6815_v26  ;;  %vm6871_vm15 = vcmp.eq.f32.partialorder %v593_v52, 8.507059e+37  ;;  %v608_v0 = vand.u32 2147483647, %v6815_v26  ;;  %v5512_v17 = vor.u32 %v5819_v8, %v5509_v10  ;;  %v666_v20 = vld [vmem:[%s12093_s4] sm:$0xff]  ;;  %v5820_v28 = vld [vmem:[#allocation3 + $0xd4] sm:$0xf] }
  0xc5   : > { %v558_v40 = vadd.f32 %v6793_v5, %v557_v34  ;;  %v577_v43 = vsel %vm576_vm6, %v6786_v58, %v573_v11  ;;  %v595_v58 = vand.u32 2147483648, %v6813_v6  ;;  %v5500_v23 = vor.u32 %v5828_v21, %v5499_v18  ;;  %v5821_v8 = vld [vmem:[#allocation3 + $0xdc] sm:$0xf]  ;;  %v5515_v14 = vld [vmem:[#allocation3 + $0xd0] sm:$0xf] }
  0xc6   : > { %v6828_v37 = vpop.eup %5908  ;;  %v582_v49 = vsel %vm579_vm8, %v581_v41, %v577_v43  ;;  %vm609_vm2 = vcmp.eq.f32.partialorder %v608_v0, 8.507059e+37  ;;  %1249 = vmatpush.bf16.msrb.mxu0 %v5512_v17  ;;  %v5428_v33 = vor.u32 %v5809_v31, %v5427_v29  ;;  %v5432_v34 = vor.u32 %v5799_v32, %v5429_v1  ;;  %v5517_v41 = vld [vmem:[#allocation3 + $0x120] sm:$0xf0]  ;;  %v5830_v17 = vld [vmem:[#allocation3 + $0x11c] sm:$0xf0] }
  0xc7   : > { %v585_v42 = vmul.f32 %v6828_v37, %v6813_v6  ;;  %v562_v48 = vsel %vm561_vm7, %v6793_v5, %v558_v40  ;;  %v619_v27 = vmul.f32 %v582_v49, %v6717_v46  ;;  %vm590_vm11 = vweird.f32 %v6828_v37  ;;  %1162 = vmatpush.bf16.msrb.mxu1 %v5500_v23 }
  0xc8   : > { %v6838_v38 = vpop.eup %5910  ;;  %v567_v19 = vsel %vm564_vm9, %v566_v47, %v562_v48  ;;  %vm6864_vm14 = vmor %vm589_vm10, %vm590_vm11  ;;  %v5504_v5 = vor.u32 %v5818_v2, %v5501_v3  ;;  %v596_v12 = vor.u32 1.1754944e-38, %v595_v58  ;;  %1221 = vmatpush.bf16.msrb.mxu3 %v5428_v33  ;;  %v6946_v39 = vperm.slane %v666_v20, 3  ;;  %v5831_v48 = vld [vmem:[#allocation3 + $0x124] sm:$0xf0] }
  0xc9   : > { %v600_v44 = vmul.f32 %v6838_v38, %v6815_v26  ;;  %v586_v50 = vsub.f32 1.0, %v585_v42  ;;  %v618_v54 = vmul.f32 %v567_v19, %v6714_v45  ;;  %vm605_vm13 = vweird.f32 %v6838_v38  ;;  %v5523_v42 = vld [vmem:[#allocation3 + $0xd8] sm:$0xf] }
  0xca   : > { %v610_v45 = vand.u32 2147483648, %v6815_v26  ;;  %vm6876_vm1 = vmor %vm604_vm12, %vm605_vm13  ;;  %1191 = vmatpush.bf16.msrb.mxu2 %v5504_v5  ;;  %1250 = vmatpush.bf16.msrb.mxu0 %v5432_v34  ;;  %v5520_v47 = vor.u32 %v5820_v28, %v5517_v41  ;;  %v6959_v19 = vperm.slane %v666_v20, 1  ;;  %v6966_v52 = vperm.slane %v666_v20, 2 }
  0xcb   : > { %v601_v9 = vsub.f32 1.0, %v600_v44  ;;  %v587_v55 = vmul.f32 %v6828_v37, %v586_v50  ;;  %v6862_v57 = vpack.c.bf16 %v619_v27, %v618_v54  ;;  %v5524_v50 = vor.u32 %v5831_v48, %v5523_v42 }
  0xcc   : > { %v611_v13 = vor.u32 1.1754944e-38, %v610_v45  ;;  %v5516_v21 = vor.u32 %v5830_v17, %v5515_v14 }
  0xcd   : > { %v602_v56 = vmul.f32 %v6838_v38, %v601_v9  ;;  %v588_v53 = vadd.f32 %v6828_v37, %v587_v55 }
  0xcf   : > { %5546 = vmatmul.msk.bf16.gmra.mxu1 %vm420_vm0, %v6823_v35  ;;  %5550 = vmatmul.msk.bf16.gmra.mxu2 %vm420_vm0, %v6823_v35  ;;  %v603_v61 = vadd.f32 %v6838_v38, %v602_v56  ;;  %v592_v22 = vsel %vm6864_vm14, %v6828_v37, %v588_v53  ;;  %v5808_v37 = vld [vmem:[#allocation3 + $0x6c] sm:$0xf0] }
  0xd0   : > { %5554 = vmatmul.msk.bf16.gmra.mxu3 %vm420_vm0, %v6823_v35  ;;  %5558 = vmatmul.msk.bf16.gmra.mxu0 %vm420_vm0, %v6823_v35  ;;  %v597_v24 = vsel %vm6871_vm15, %v596_v12, %v592_v22  ;;  %v5420_v11 = vor.u32 %v5808_v37, %v5419_v36  ;;  %v5525_v12 = vld [vmem:[#allocation3 + $0x128] sm:$0xf0] }
  0xd1   : > { %v607_v60 = vsel %vm6876_vm1, %v6838_v38, %v603_v61  ;;  %v620_v6 = vmul.f32 %v597_v24, %v6729_v62  ;;  %v5798_v62 = vld [vmem:[#allocation3 + $0x24] sm:$0xf]  ;;  %v6944_v38 = vperm.slane %v666_v20, 0 }
  0xd2   : > { %v612_v25 = vsel %vm609_vm2, %v611_v13, %v607_v60  ;;  %1163 = vmatpush.bf16.msrb.mxu1 %v5420_v11  ;;  %v5528_v13 = vor.u32 %v5821_v8, %v5525_v12 }
  0xd3   : > { %v621_v16 = vmul.f32 %v612_v25, %v6738_v15  ;;  %v5421_v15 = vld [vmem:[#allocation3 + $0x70] sm:$0xf0] }
  0xd4   : > { %v5424_v30 = vor.u32 %v5798_v62, %v5421_v15 }
  0xd5   : > { %v6899_v26 = vpack.c.bf16 %v621_v16, %v620_v6 }
  0xd6   : > { %1192 = vmatpush.bf16.msrb.mxu2 %v5424_v30 }
  0xd7   : > { %12117 = vst [vmem:[#allocation6_spill] sm:$0xff] %v6899_v26 }
  0xdf   : > { %5547 = vmatmul.msk.bf16.gmra.mxu1 %vm420_vm0, %v6862_v57  ;;  %5551 = vmatmul.msk.bf16.gmra.mxu2 %vm420_vm0, %v6862_v57 }
  0xe0   : > { %5555 = vmatmul.msk.bf16.gmra.mxu3 %vm420_vm0, %v6862_v57  ;;  %5559 = vmatmul.msk.bf16.gmra.mxu0 %vm420_vm0, %v6862_v57 }
  0xef   : > { %5548 = vmatmul.msk.bf16.gmra.mxu1 %vm420_vm0, %v6899_v26  ;;  %5552 = vmatmul.msk.bf16.gmra.mxu2 %vm420_vm0, %v6899_v26 }
  0xf0   : > { %5556 = vmatmul.msk.bf16.gmra.mxu3 %vm420_vm0, %v6899_v26  ;;  %5560 = vmatmul.msk.bf16.gmra.mxu0 %vm420_vm0, %v6899_v26 }
  0xff   : > { %5561 = vmatmul.msk.bf16.vlgmr.msra.gmra.mxu1 %vm420_vm0, %v6765_v51  ;;  %5565 = vmatmul.msk.bf16.vlgmr.msra.gmra.mxu2 %vm420_vm0, %v6765_v51 }
 0x100   : > { %5569 = vmatmul.msk.bf16.vlgmr.msra.gmra.mxu3 %vm420_vm0, %v6765_v51  ;;  %5573 = vmatmul.msk.bf16.vlgmr.msra.gmra.mxu0 %vm420_vm0, %v6765_v51 }
 0x101   : > { %1307 = vmatpush.bf16.msra.mxu2 %v5520_v47  ;;  %1336 = vmatpush.bf16.msra.mxu3 %v5524_v50 }
 0x102   : > { %1365 = vmatpush.bf16.msra.mxu0 %v5528_v13  ;;  %1278 = vmatpush.bf16.msra.mxu1 %v5516_v21 }
 0x10f   : > { %5562 = vmatmul.msk.bf16.gmra.mxu1 %vm420_vm0, %v6823_v35  ;;  %5566 = vmatmul.msk.bf16.gmra.mxu2 %vm420_vm0, %v6823_v35 }
 0x110   : > { %5570 = vmatmul.msk.bf16.gmra.mxu3 %vm420_vm0, %v6823_v35  ;;  %5574 = vmatmul.msk.bf16.gmra.mxu0 %vm420_vm0, %v6823_v35 }
 0x11f   : > { %5563 = vmatmul.msk.bf16.gmra.mxu1 %vm420_vm0, %v6862_v57  ;;  %5567 = vmatmul.msk.bf16.gmra.mxu2 %vm420_vm0, %v6862_v57 }
 0x120   : > { %5571 = vmatmul.msk.bf16.gmra.mxu3 %vm420_vm0, %v6862_v57  ;;  %5575 = vmatmul.msk.bf16.gmra.mxu0 %vm420_vm0, %v6862_v57 }
 0x12f   : > { %5564 = vmatmul.msk.bf16.gmra.mxu1 %vm420_vm0, %v6899_v26  ;;  %5568 = vmatmul.msk.bf16.gmra.mxu2 %vm420_vm0, %v6899_v26 }
 0x130   : > { %5572 = vmatmul.msk.bf16.gmra.mxu3 %vm420_vm0, %v6899_v26  ;;  %5576 = vmatmul.msk.bf16.gmra.mxu0 %vm420_vm0, %v6899_v26 }
 0x13c   : > { %v933_v40 = vpop.f32.mrf.mxu1 }
 0x13d   : > { %v6949_v43 = vadd.f32 %v933_v40, %v6944_v38  ;;  %v1020_v44 = vpop.f32.mrf.mxu0 }
 0x13e   : > { %v6952_v49 = vadd.f32 %v1020_v44, %v6946_v39 }
 0x13f   : > { %v5625_v9 = vmul.f32 -1.442695, %v6949_v43  ;;  %5577 = vmatmul.msk.bf16.vlgmr.msrb.gmra.mxu1 %vm420_vm0, %v6765_v51  ;;  %5581 = vmatmul.msk.bf16.vlgmr.msrb.gmra.mxu2 %vm420_vm0, %v6765_v51 }
 0x140   : > { %v5628_v27 = vmul.f32 -1.442695, %v6952_v49  ;;  %5585 = vmatmul.msk.bf16.vlgmr.msrb.gmra.mxu3 %vm420_vm0, %v6765_v51  ;;  %5589 = vmatmul.msk.bf16.vlgmr.msrb.gmra.mxu0 %vm420_vm0, %v6765_v51 }
 0x141   : > { %5912 = vpow2.f32 %v5625_v9 }
 0x142   : > { %5914 = vpow2.f32 %v5628_v27  ;;  %v962_v54 = vpop.f32.mrf.mxu2 }
 0x143   : > { %v6969_v55 = vadd.f32 %v962_v54, %v6959_v19  ;;  %v991_v56 = vpop.f32.mrf.mxu3 }
 0x144   : > { %v6972_v46 = vadd.f32 %v991_v56, %v6966_v52  ;;  %v935_v58 = vpop.f32.mrf.mxu1 }
 0x145   : > { %v5626_v45 = vmul.f32 -1.442695, %v6969_v55  ;;  %v6976_v53 = vadd.f32 %v935_v58, %v6944_v38  ;;  %v1022_v59 = vpop.f32.mrf.mxu0 }
 0x146   : > { %v5627_v61 = vmul.f32 -1.442695, %v6972_v46  ;;  %v6980_v63 = vadd.f32 %v1022_v59, %v6946_v39 }
 0x147   : > { %v5913_v0 = vpop.eup %5912  ;;  %5916 = vpow2.f32 %v5626_v45  ;;  %v5645_v2 = vmul.f32 -1.442695, %v6976_v53 }
 0x148   : > { %v5915_v3 = vpop.eup %5914  ;;  %v6983_v4 = vadd.f32 1.0, %v5913_v0  ;;  %5918 = vpow2.f32 %v5627_v61  ;;  %v5648_v5 = vmul.f32 -1.442695, %v6980_v63 }
 0x149   : > { %v6986_v7 = vadd.f32 1.0, %v5915_v3  ;;  %5920 = vpow2.f32 %v5645_v2 }
 0x14a   : > { %5922 = vrcp.f32 %v6983_v4  ;;  %v964_v10 = vpop.f32.mrf.mxu2  ;;  %v2153_v16 = vand.u32 2147483647, %v6983_v4  ;;  %v2155_v62 = vand.u32 2147483648, %v6983_v4  ;;  %vm2149_vm3 = vweird.f32 %v6983_v4 }
 0x14b   : > { %5924 = vrcp.f32 %v6986_v7  ;;  %v6991_v22 = vadd.f32 %v964_v10, %v6959_v19  ;;  %v2198_v31 = vand.u32 2147483647, %v6986_v7  ;;  %v2200_v32 = vand.u32 2147483648, %v6986_v7  ;;  %v993_v37 = vpop.f32.mrf.mxu3 }
 0x14c   : > { %5926 = vpow2.f32 %v5648_v5  ;;  %vm2194_vm4 = vweird.f32 %v6986_v7  ;;  %v2156_v11 = vor.u32 1.1754944e-38, %v2155_v62  ;;  %vm7027_vm5 = vcmp.eq.f32.partialorder %v2153_v16, 8.507059e+37  ;;  %v938_v47 = vpop.f32.mrf.mxu1 }
 0x14d   : > { %v5917_v18 = vpop.eup %5916  ;;  %v5646_v15 = vmul.f32 -1.442695, %v6991_v22  ;;  %vm7031_vm6 = vcmp.eq.f32.partialorder %v2198_v31, 8.507059e+37  ;;  %v2201_v44 = vor.u32 1.1754944e-38, %v2200_v32  ;;  %v7042_v27 = vadd.f32 %v993_v37, %v6966_v52  ;;  %v1025_v54 = vpop.f32.mrf.mxu0 }
 0x14e   : > { %v5919_v60 = vpop.eup %5918  ;;  %v6993_v23 = vadd.f32 1.0, %v5917_v18  ;;  %v7056_v2 = vadd.f32 %v938_v47, %v6944_v38  ;;  %v7067_v10 = vadd.f32 %v1025_v54, %v6946_v39 }
 0x14f   : > { %v5921_v24 = vpop.eup %5920  ;;  %v6995_v25 = vadd.f32 1.0, %v5919_v60  ;;  %5582 = vmatmul.msk.bf16.gmra.mxu2 %vm420_vm0, %v6823_v35  ;;  %5578 = vmatmul.msk.bf16.gmra.mxu1 %vm420_vm0, %v6823_v35 }
 0x150   : > { %v6999_v6 = vpop.eup %5922  ;;  %5928 = vrcp.f32 %v6993_v23  ;;  %5586 = vmatmul.msk.bf16.gmra.mxu3 %vm420_vm0, %v6823_v35  ;;  %5590 = vmatmul.msk.bf16.gmra.mxu0 %vm420_vm0, %v6823_v35  ;;  %v7022_v36 = vadd.f32 1.0, %v5921_v24  ;;  %v2170_v9 = vand.u32 2147483648, %v6993_v23  ;;  %vm2164_vm10 = vweird.f32 %v6993_v23 }
 0x151   : > { %v7009_v29 = vpop.eup %5924  ;;  %v2145_v30 = vmul.f32 %v6999_v6, %v6983_v4  ;;  %5930 = vrcp.f32 %v6995_v25  ;;  %vm2150_vm7 = vweird.f32 %v6999_v6  ;;  %v2185_v0 = vand.u32 2147483648, %v6995_v25 }
 0x152   : > { %v5927_v1 = vpop.eup %5926  ;;  %v2190_v33 = vmul.f32 %v7009_v29, %v6986_v7  ;;  %5932 = vpow2.f32 %v5646_v15  ;;  %vm2195_vm8 = vweird.f32 %v7009_v29  ;;  %vm7060_vm9 = vmor %vm2149_vm3, %vm2150_vm7  ;;  %v2168_v8 = vand.u32 2147483647, %v6993_v23 }
 0x153   : > { %v2146_v34 = vsub.f32 1.0, %v2145_v30  ;;  %v7024_v40 = vadd.f32 1.0, %v5927_v1  ;;  %5934 = vrcp.f32 %v7022_v36  ;;  %vm7071_vm11 = vmor %vm2194_vm4, %vm2195_vm8  ;;  %v7075_v4 = vor.u32 1.1754944e-38, %v2170_v9  ;;  %v967_v1 = vpop.f32.mrf.mxu2 }
 0x154   : > { %v2191_v20 = vsub.f32 1.0, %v2190_v33  ;;  %v2183_v17 = vand.u32 2147483647, %v6995_v25  ;;  %v2453_v18 = vand.u32 2147483647, %v7022_v36  ;;  %v2455_v16 = vand.u32 2147483648, %v7022_v36 }
 0x155   : > { %v2147_v28 = vmul.f32 %v6999_v6, %v2146_v34  ;;  %5936 = vrcp.f32 %v7024_v40  ;;  %v7089_v62 = vor.u32 1.1754944e-38, %v2185_v0  ;;  %vm2449_vm12 = vweird.f32 %v7022_v36  ;;  %v940_v0 = vpop.f32.mrf.mxu1 }
 0x156   : > { %v7036_v48 = vpop.eup %5928  ;;  %v2192_v50 = vmul.f32 %v7009_v29, %v2191_v20  ;;  %v5647_v30 = vmul.f32 -1.442695, %v7042_v27  ;;  %vm7098_vm14 = vcmp.eq.f32.partialorder %v2168_v8, 8.507059e+37  ;;  %vm2179_vm15 = vweird.f32 %v6995_v25 }
 0x157   : > { %v7044_v56 = vpop.eup %5930  ;;  %v2148_v58 = vadd.f32 %v6999_v6, %v2147_v28  ;;  %v2160_v45 = vmul.f32 %v7036_v48, %v6993_v23  ;;  %vm2165_vm13 = vweird.f32 %v7036_v48  ;;  %vm7114_vm2 = vcmp.eq.f32.partialorder %v2453_v18, 8.507059e+37 }
 0x158   : > { %v2193_v59 = vadd.f32 %v7009_v29, %v2192_v50  ;;  %v2175_v61 = vmul.f32 %v7044_v56, %v6995_v25  ;;  %v5933_v12 = vpop.eup %5932  ;;  %vm2180_vm1 = vweird.f32 %v7044_v56  ;;  %v2456_v50 = vor.u32 1.1754944e-38, %v2455_v16  ;;  %v1027_v16 = vpop.f32.mrf.mxu0 }
 0x159   : > { %v2161_v5 = vsub.f32 1.0, %v2160_v45  ;;  %v7079_v21 = vpop.eup %5934  ;;  %v2152_v60 = vsel %vm7060_vm9, %v6999_v6, %v2148_v58  ;;  %v7105_v32 = vadd.f32 1.0, %v5933_v12  ;;  %vm2494_vm3 = vweird.f32 %v7024_v40 }
 0x15a   : > { %v2176_v14 = vsub.f32 1.0, %v2175_v61  ;;  %v2197_v7 = vsel %vm7071_vm11, %v7009_v29, %v2193_v59  ;;  %v2445_v15 = vmul.f32 %v7079_v21, %v7022_v36  ;;  %v2157_v33 = vsel %vm7027_vm5, %v2156_v11, %v2152_v60  ;;  %v996_v59 = vpop.f32.mrf.mxu3  ;;  %vm7196_vm11 = vmor %vm2179_vm15, %vm2180_vm1 }
 0x15b   : > { %v2162_v24 = vmul.f32 %v7036_v48, %v2161_v5  ;;  %v7095_v31 = vpop.eup %5936  ;;  %v2202_v34 = vsel %vm7031_vm6, %v2201_v44, %v2197_v7  ;;  %5938 = vrcp.f32 %v7105_v32  ;;  %v2498_v42 = vand.u32 2147483647, %v7024_v40  ;;  %vm7147_vm6 = vmor %vm2164_vm10, %vm2165_vm13 }
 0x15c   : > { %v2177_v29 = vmul.f32 %v7044_v56, %v2176_v14  ;;  %v2446_v37 = vsub.f32 1.0, %v2445_v15  ;;  %v2490_v20 = vmul.f32 %v7095_v31, %v7024_v40  ;;  %v2500_v44 = vand.u32 2147483648, %v7024_v40 }
 0x15d   : > { %v2163_v28 = vadd.f32 %v7036_v48, %v2162_v24  ;;  %v7130_v9 = vmul.f32 %v2157_v33, %v6949_v43  ;;  %v7133_v54 = vmul.f32 %v2202_v34, %v6952_v49  ;;  %vm7136_vm4 = vcmp.eq.f32.partialorder %v2183_v17, 8.507059e+37 }
 0x15e   : > { %v2447_v11 = vmul.f32 %v7079_v21, %v2446_v37  ;;  %v2491_v41 = vsub.f32 1.0, %v2490_v20  ;;  %v2178_v58 = vadd.f32 %v7044_v56, %v2177_v29  ;;  %vm2450_vm5 = vweird.f32 %v7079_v21 }
 0x15f   : > { %5583 = vmatmul.msk.bf16.gmra.mxu2 %vm420_vm0, %v6862_v57  ;;  %5579 = vmatmul.msk.bf16.gmra.mxu1 %vm420_vm0, %v6862_v57  ;;  %vm2495_vm7 = vweird.f32 %v7095_v31  ;;  %5940 = vpow2.f32 %v5647_v30  ;;  %v2167_v3 = vsel %vm7147_vm6, %v7036_v48, %v2163_v28  ;;  %v5665_v5 = vmul.f32 -1.442695, %v7056_v2  ;;  %vm7164_vm8 = vmor %vm2449_vm12, %vm2450_vm5 }
 0x160   : > { %5587 = vmatmul.msk.bf16.gmra.mxu3 %vm420_vm0, %v6862_v57  ;;  %5591 = vmatmul.msk.bf16.gmra.mxu0 %vm420_vm0, %v6862_v57  ;;  %v2448_v49 = vadd.f32 %v7079_v21, %v2447_v11  ;;  %v2492_v61 = vmul.f32 %v7095_v31, %v2491_v41  ;;  %v5668_v23 = vmul.f32 -1.442695, %v7067_v10  ;;  %v7160_v8 = vadd.f32 %v967_v1, %v6959_v19  ;;  %vm7181_vm10 = vmor %vm2494_vm3, %vm2495_vm7  ;;  %v969_v1 = vpop.f32.mrf.mxu2 }
 0x161   : > { %vm7169_vm9 = vcmp.eq.f32.partialorder %v2498_v42, 8.507059e+37  ;;  %v2501_v48 = vor.u32 1.1754944e-38, %v2500_v44  ;;  %v7174_v17 = vadd.f32 %v996_v59, %v6966_v52  ;;  %v5939_v18 = vpop.eup %5938  ;;  %5942 = vpow2.f32 %v5665_v5 }
 0x162   : > { %v2493_v13 = vadd.f32 %v7095_v31, %v2492_v61  ;;  %v2452_v60 = vsel %vm7164_vm8, %v7079_v21, %v2448_v49  ;;  %v5666_v7 = vmul.f32 -1.442695, %v7160_v8  ;;  %v7187_v24 = vadd.f32 %v940_v0, %v6944_v38  ;;  %v998_v43 = vpop.f32.mrf.mxu3 }
 0x163   : > { %v2172_v15 = vsel %vm7098_vm14, %v7075_v4, %v2167_v3  ;;  %v2460_v30 = vmul.f32 %v5939_v18, %v7105_v32  ;;  %v2468_v29 = vand.u32 2147483647, %v7105_v32  ;;  %v2182_v4 = vsel %vm7196_vm11, %v7044_v56, %v2178_v58 }
 0x164   : > { %v2497_v21 = vsel %vm7181_vm10, %v7095_v31, %v2493_v13  ;;  %v2470_v6 = vand.u32 2147483648, %v7105_v32  ;;  %5944 = vpow2.f32 %v5668_v23  ;;  %v5667_v25 = vmul.f32 -1.442695, %v7174_v17 }
 0x165   : > { %v5941_v33 = vpop.eup %5940  ;;  %v2457_v34 = vsel %vm7114_vm2, %v2456_v50, %v2452_v60  ;;  %v2461_v37 = vsub.f32 1.0, %v2460_v30  ;;  %5946 = vpow2.f32 %v5666_v7  ;;  %v7213_v31 = vadd.f32 %v1027_v16, %v6946_v39  ;;  %v943_v60 = vpop.f32.mrf.mxu1 }
 0x166   : > { %v2502_v20 = vsel %vm7169_vm9, %v2501_v48, %v2497_v21  ;;  %v7217_v28 = vadd.f32 1.0, %v5941_v33  ;;  %5948 = vpow2.f32 %v5667_v25  ;;  %v5685_v56 = vmul.f32 -1.442695, %v7187_v24 }
 0x167   : > { %v2187_v11 = vsel %vm7136_vm4, %v7089_v62, %v2182_v4  ;;  %v2462_v41 = vmul.f32 %v5939_v18, %v2461_v37  ;;  %vm2465_vm12 = vweird.f32 %v5939_v18  ;;  %v7224_v47 = vadd.f32 %v969_v1, %v6959_v19  ;;  %v5943_v50 = vpop.eup %5942 }
 0x168   : > { %v7227_v42 = vmul.f32 %v2172_v15, %v6969_v55  ;;  %v4564_v44 = vmul.f32 %v2457_v34, %v6976_v53  ;;  %vm2464_vm13 = vweird.f32 %v7105_v32  ;;  %5950 = vrcp.f32 %v7217_v28 }
 0x169   : > { %v4567_v58 = vmul.f32 %v2502_v20, %v6980_v63  ;;  %v2463_v59 = vadd.f32 %v5939_v18, %v2462_v41  ;;  %v7233_v45 = vadd.f32 1.0, %v5943_v50  ;;  %v5688_v62 = vmul.f32 -1.442695, %v7213_v31  ;;  %vm7239_vm14 = vmor %vm2464_vm13, %vm2465_vm12 }
 0x16a   : > { %v5945_v49 = vpop.eup %5944  ;;  %v7237_v61 = vmul.f32 %v2187_v11, %v6972_v46  ;;  %vm2469_vm15 = vcmp.eq.f32.partialorder %v2468_v29, 8.507059e+37  ;;  %v2471_v53 = vor.u32 1.1754944e-38, %v2470_v6  ;;  %5952 = vpow2.f32 %v5685_v56 }
 0x16b   : > { %v5947_v32 = vpop.eup %5946  ;;  %v2467_v63 = vsel %vm7239_vm14, %v5939_v18, %v2463_v59  ;;  %v2485_v0 = vand.u32 2147483648, %v7217_v28  ;;  %5954 = vrcp.f32 %v7233_v45  ;;  %v5686_v3 = vmul.f32 -1.442695, %v7224_v47 }
 0x16c   : > { %v5949_v5 = vpop.eup %5948  ;;  %v7249_v46 = vadd.f32 %v4564_v44, %v7130_v9  ;;  %v7251_v23 = vadd.f32 1.0, %v5945_v49  ;;  %v7253_v12 = vadd.f32 1.0, %v5947_v32  ;;  %v7256_v13 = vadd.f32 %v998_v43, %v6966_v52 }
 0x16d   : > { %v7261_v14 = vadd.f32 %v4567_v58, %v7133_v54  ;;  %v2472_v48 = vsel %vm2469_vm15, %v2471_v53, %v2467_v63  ;;  %v7263_v18 = vadd.f32 1.0, %v5949_v5  ;;  %5956 = vpow2.f32 %v5688_v62 }
 0x16e   : > { %v7269_v9 = vpop.eup %5950  ;;  %v2483_v36 = vand.u32 2147483647, %v7217_v28  ;;  %v2753_v7 = vand.u32 2147483647, %v7233_v45  ;;  %v2755_v54 = vand.u32 2147483648, %v7233_v45  ;;  %5958 = vrcp.f32 %v7251_v23 }
 0x16f   : > { %5584 = vmatmul.msk.bf16.gmra.mxu2 %vm420_vm0, %v6899_v26  ;;  %5580 = vmatmul.msk.bf16.gmra.mxu1 %vm420_vm0, %v6899_v26  ;;  %v2475_v16 = vmul.f32 %v7269_v9, %v7217_v28  ;;  %vm2479_vm1 = vweird.f32 %v7217_v28  ;;  %v2486_v15 = vor.u32 1.1754944e-38, %v2485_v0  ;;  %5960 = vpow2.f32 %v5686_v3 }
 0x170   : > { %5588 = vmatmul.msk.bf16.gmra.mxu3 %vm420_vm0, %v6899_v26  ;;  %5592 = vmatmul.msk.bf16.gmra.mxu0 %vm420_vm0, %v6899_v26  ;;  %v5953_v40 = vpop.eup %5952  ;;  %v4565_v21 = vmul.f32 %v2472_v48, %v6991_v22  ;;  %5962 = vrcp.f32 %v7253_v12  ;;  %v7283_v30 = vmul.f32 -1.442695, %v7256_v13  ;;  %v7286_v29 = vadd.f32 %v943_v60, %v6944_v38 }
 0x171   : > { %v5955_v4 = vpop.eup %5954  ;;  %v2476_v6 = vsub.f32 1.0, %v2475_v16  ;;  %v2798_v25 = vand.u32 2147483647, %v7251_v23  ;;  %v2800_v1 = vand.u32 2147483648, %v7251_v23  ;;  %5964 = vrcp.f32 %v7263_v18 }
 0x172   : > { %vm7291_vm2 = vcmp.eq.f32.partialorder %v2483_v36, 8.507059e+37  ;;  %v2745_v22 = vmul.f32 %v5955_v4, %v7233_v45  ;;  %vm2749_vm3 = vweird.f32 %v7233_v45  ;;  %vm7297_vm4 = vcmp.eq.f32.partialorder %v2753_v7, 8.507059e+37 }
 0x173   : > { %v2756_v37 = vor.u32 1.1754944e-38, %v2755_v54  ;;  %v5957_v20 = vpop.eup %5956  ;;  %v2477_v56 = vmul.f32 %v7269_v9, %v2476_v6  ;;  %vm2794_vm5 = vweird.f32 %v7251_v23  ;;  %v2768_v11 = vand.u32 2147483647, %v7253_v12 }
 0x174   : > { %v2770_v41 = vand.u32 2147483648, %v7253_v12  ;;  %v5959_v50 = vpop.eup %5958  ;;  %v7306_v44 = vadd.f32 %v4565_v21, %v7227_v42  ;;  %vm2480_vm6 = vweird.f32 %v7269_v9  ;;  %v2746_v58 = vsub.f32 1.0, %v2745_v22 }
 0x175   : > { %v7309_v59 = vadd.f32 1.0, %v5953_v40  ;;  %v5961_v62 = vpop.eup %5960  ;;  %v2478_v43 = vadd.f32 %v7269_v9, %v2477_v56  ;;  %vm2750_vm7 = vweird.f32 %v5955_v4  ;;  %v2790_v49 = vmul.f32 %v5959_v50, %v7251_v23  ;;  %vm7326_vm11 = vmor %vm2479_vm1, %vm2480_vm6 }
 0x176   : > { %vm7313_vm8 = vcmp.eq.f32.partialorder %v2798_v25, 8.507059e+37  ;;  %v2801_v53 = vor.u32 1.1754944e-38, %v2800_v1  ;;  %vm2764_vm9 = vweird.f32 %v7253_v12  ;;  %v5963_v42 = vpop.eup %5962  ;;  %v2747_v32 = vmul.f32 %v5955_v4, %v2746_v58  ;;  %vm2751_vm13 = vmor %vm2749_vm3, %vm2750_vm7 }
 0x177   : > { %vm2779_vm10 = vweird.f32 %v7263_v18  ;;  %5966 = vrcp.f32 %v7309_v59  ;;  %v7320_v63 = vadd.f32 1.0, %v5957_v20  ;;  %v5965_v0 = vpop.eup %5964  ;;  %v2791_v5 = vsub.f32 1.0, %v2790_v49 }
 0x178   : > { %v2760_v48 = vmul.f32 %v5963_v42, %v7253_v12  ;;  %vm7331_vm12 = vcmp.eq.f32.partialorder %v2768_v11, 8.507059e+37  ;;  %v2771_v36 = vor.u32 1.1754944e-38, %v2770_v41  ;;  %v2783_v7 = vand.u32 2147483647, %v7263_v18 }
 0x179   : > { %v2482_v54 = vsel %vm7326_vm11, %v7269_v9, %v2478_v43  ;;  %v2748_v16 = vadd.f32 %v5955_v4, %v2747_v32  ;;  %v2775_v28 = vmul.f32 %v5965_v0, %v7263_v18  ;;  %v2785_v40 = vand.u32 2147483648, %v7263_v18 }
 0x17a   : > { %v2792_v21 = vmul.f32 %v5959_v50, %v2791_v5  ;;  %vm2795_vm14 = vweird.f32 %v5959_v50  ;;  %v2761_v6 = vsub.f32 1.0, %v2760_v48  ;;  %v7344_v25 = vadd.f32 1.0, %v5961_v62  ;;  %v1030_v5 = vpop.f32.mrf.mxu0 }
 0x17b   : > { %v2752_v1 = vsel %vm2751_vm13, %v5955_v4, %v2748_v16  ;;  %vm2765_vm15 = vweird.f32 %v5963_v42  ;;  %v2776_v22 = vsub.f32 1.0, %v2775_v28  ;;  %5968 = vrcp.f32 %v7320_v63  ;;  %vm2796_vm1 = vmor %vm2794_vm5, %vm2795_vm14 }
 0x17c   : > { %v2487_v9 = vsel %vm7291_vm2, %v2486_v15, %v2482_v54  ;;  %v2757_v20 = vsel %vm7297_vm4, %v2756_v37, %v2752_v1  ;;  %v2793_v56 = vadd.f32 %v5959_v50, %v2792_v21  ;;  %v2762_v11 = vmul.f32 %v5963_v42, %v2761_v6  ;;  %vm2766_vm2 = vmor %vm2764_vm9, %vm2765_vm15  ;;  %v5800_v54 = vld [vmem:[#allocation3 + $0x34] sm:$0xf]  ;;  %v5443_v21 = vld [vmem:[#allocation3 + $0x38] sm:$0xf]  ;;  %v972_v6 = vpop.f32.mrf.mxu2 }
 0x17d   : > { %v7351_v45 = vpop.eup %5966  ;;  %v4584_v41 = vmul.f32 %v2757_v20, %v7056_v2  ;;  %v2777_v4 = vmul.f32 %v5965_v0, %v2776_v22  ;;  %vm2780_vm3 = vweird.f32 %v5965_v0  ;;  %vm7356_vm6 = vcmp.eq.f32.partialorder %v2783_v7, 8.507059e+37  ;;  %v5811_v20 = vld [vmem:[#allocation3 + $0x84] sm:$0xf0] }
 0x17e   : > { %v2797_v33 = vsel %vm2796_vm1, %v5959_v50, %v2793_v56  ;;  %v2763_v15 = vadd.f32 %v5963_v42, %v2762_v11  ;;  %v2786_v62 = vor.u32 1.1754944e-38, %v2785_v40  ;;  %v3045_v34 = vmul.f32 %v7351_v45, %v7309_v59  ;;  %vm2781_vm4 = vmor %vm2779_vm10, %vm2780_vm3  ;;  %v5437_v40 = vld [vmem:[#allocation3 + $0x80] sm:$0xf0]  ;;  %v1001_v56 = vpop.f32.mrf.mxu3 }
 0x17f   : > { %v4566_v37 = vmul.f32 %v2487_v9, %v7042_v27  ;;  %v7364_v43 = vadd.f32 %v7249_v46, %v4584_v41  ;;  %v2802_v2 = vsel %vm7313_vm8, %v2801_v53, %v2797_v33  ;;  %v2778_v23 = vadd.f32 %v5965_v0, %v2777_v4  ;;  %v945_v4 = vpop.f32.mrf.mxu1 }
 0x180   : > { %v4587_v50 = vmul.f32 %v2802_v2, %v7067_v10  ;;  %v2767_v49 = vsel %vm2766_vm2, %v5963_v42, %v2763_v15  ;;  %v3046_v32 = vsub.f32 1.0, %v3045_v34  ;;  %v3053_v27 = vand.u32 2147483647, %v7309_v59 }
 0x181   : > { %v7375_v3 = vpop.eup %5968  ;;  %v2772_v46 = vsel %vm7331_vm12, %v2771_v36, %v2767_v49  ;;  %v2782_v55 = vsel %vm2781_vm4, %v5965_v0, %v2778_v23  ;;  %v3055_v53 = vand.u32 2147483648, %v7309_v59  ;;  %5970 = vrcp.f32 %v7344_v25 }
 0x182   : > { %v7382_v12 = vadd.f32 %v7261_v14, %v4587_v50  ;;  %v4585_v10 = vmul.f32 %v2772_v46, %v7160_v8  ;;  %v2787_v18 = vsel %vm7356_vm6, %v2786_v62, %v2782_v55  ;;  %v3047_v42 = vmul.f32 %v7351_v45, %v3046_v32  ;;  %v5801_v8 = vld [vmem:[#allocation3 + $0x3c] sm:$0xf] }
 0x183   : > { %v4730_v48 = vadd.f32 %v4566_v37, %v7237_v61  ;;  %v4586_v60 = vmul.f32 %v2787_v18, %v7174_v17  ;;  %v3090_v0 = vmul.f32 %v7375_v3, %v7320_v63  ;;  %vm3049_vm5 = vweird.f32 %v7309_v59 }
 0x184   : > { %v7393_v36 = vadd.f32 %v7306_v44, %v4585_v10  ;;  %vm7396_vm7 = vcmp.eq.f32.partialorder %v3053_v27, 8.507059e+37  ;;  %v3100_v14 = vand.u32 2147483648, %v7320_v63  ;;  %vm3050_vm8 = vweird.f32 %v7351_v45 }
 0x185   : > { %v7401_v7 = vadd.f32 %v4730_v48, %v4586_v60  ;;  %v3056_v61 = vor.u32 1.1754944e-38, %v3055_v53  ;;  %v3091_v17 = vsub.f32 1.0, %v3090_v0  ;;  %v3048_v16 = vadd.f32 %v7351_v45, %v3047_v42  ;;  %vm7420_vm11 = vmor %vm3049_vm5, %vm3050_vm8  ;;  %v1032_v53 = vpop.f32.mrf.mxu0 }
 0x186   : > { %5972 = vpow2.f32 %v7283_v30  ;;  %v5705_v44 = vmul.f32 -1.442695, %v7286_v29  ;;  %v7408_v28 = vadd.f32 %v1030_v5, %v6946_v39  ;;  %vm3094_vm9 = vweird.f32 %v7320_v63 }
 0x187   : > { %v5971_v1 = vpop.eup %5970  ;;  %v3092_v22 = vmul.f32 %v7375_v3, %v3091_v17  ;;  %vm3095_vm10 = vweird.f32 %v7375_v3  ;;  %v3098_v9 = vand.u32 2147483647, %v7320_v63  ;;  %v3101_v30 = vor.u32 1.1754944e-38, %v3100_v14  ;;  %v5445_v14 = vld [vmem:[#allocation3 + $0x88] sm:$0xf0] }
 0x188   : > { %v3060_v11 = vmul.f32 %v5971_v1, %v7344_v25  ;;  %v3068_v41 = vand.u32 2147483647, %v7344_v25  ;;  %5974 = vpow2.f32 %v5705_v44  ;;  %v5708_v15 = vmul.f32 -1.442695, %v7408_v28  ;;  %vm7433_vm12 = vmor %vm3094_vm9, %vm3095_vm10 }
 0x189   : > { %v3093_v33 = vadd.f32 %v7375_v3, %v3092_v22  ;;  %v5440_v62 = vor.u32 %v5800_v54, %v5437_v40  ;;  %v5444_v34 = vor.u32 %v5811_v20, %v5443_v21  ;;  %v3052_v37 = vsel %vm7420_vm11, %v7351_v45, %v3048_v16  ;;  %v974_v54 = vpop.f32.mrf.mxu2  ;;  %v5810_v22 = vld [vmem:[#allocation3 + $0x7c] sm:$0xf0] }
 0x18a   : > { %v3061_v2 = vsub.f32 1.0, %v3060_v11  ;;  %v7438_v23 = vadd.f32 %v972_v6, %v6959_v19  ;;  %v7441_v50 = vadd.f32 %v1001_v56, %v6966_v52  ;;  %v3070_v45 = vand.u32 2147483648, %v7344_v25  ;;  %v5435_v6 = vld [vmem:[#allocation3 + $0x30] sm:$0xf] }
 0x18b   : > { %v3097_v49 = vsel %vm7433_vm12, %v7375_v3, %v3093_v33  ;;  %5976 = vpow2.f32 %v5708_v15  ;;  %1308 = vmatpush.bf16.msra.mxu2 %v5440_v62  ;;  %1337 = vmatpush.bf16.msra.mxu3 %v5444_v34  ;;  %v7448_v63 = vadd.f32 %v945_v4, %v6944_v38  ;;  %vm3065_vm13 = vweird.f32 %v5971_v1 }
 0x18c   : > { %v5973_v32 = vpop.eup %5972  ;;  %v3062_v27 = vmul.f32 %v5971_v1, %v3061_v2  ;;  %v5706_v46 = vmul.f32 -1.442695, %v7438_v23  ;;  %v5707_v55 = vmul.f32 -1.442695, %v7441_v50  ;;  %v3057_v10 = vsel %vm7396_vm7, %v3056_v61, %v3052_v37 }
 0x18d   : > { %vm3099_vm14 = vcmp.eq.f32.partialorder %v3098_v9, 8.507059e+37  ;;  %v7454_v3 = vadd.f32 1.0, %v5973_v32  ;;  %v5725_v18 = vmul.f32 -1.442695, %v7448_v63  ;;  %vm3064_vm15 = vweird.f32 %v7344_v25  ;;  %v1003_v9 = vpop.f32.mrf.mxu3 }
 0x18e   : > { %v5975_v42 = vpop.eup %5974  ;;  %v3102_v5 = vsel %vm3099_vm14, %v3101_v30, %v3097_v49  ;;  %v3063_v48 = vadd.f32 %v5971_v1, %v3062_v27  ;;  %5978 = vpow2.f32 %v5706_v46  ;;  %5597 = vmatmul.msk.bf16.vlgmr.msra.gmra.mxu2 %vm420_vm0, %v6765_v51  ;;  %5601 = vmatmul.msk.bf16.vlgmr.msra.gmra.mxu3 %vm420_vm0, %v6765_v51  ;;  %vm3066_vm1 = vmor %vm3064_vm15, %vm3065_vm13  ;;  %vm3069_vm3 = vcmp.eq.f32.partialorder %v3068_v41, 8.507059e+37 }
 0x18f   : > { %v3071_v60 = vor.u32 1.1754944e-38, %v3070_v45  ;;  %5980 = vrcp.f32 %v7454_v3  ;;  %v7465_v0 = vadd.f32 %v1032_v53, %v6946_v39  ;;  %v4604_v25 = vmul.f32 %v3057_v10, %v7187_v24  ;;  %v948_v53 = vpop.f32.mrf.mxu1 }
 0x190   : > { %v3067_v61 = vsel %vm3066_vm1, %v5971_v1, %v3063_v48  ;;  %v7468_v17 = vadd.f32 1.0, %v5975_v42  ;;  %5982 = vpow2.f32 %v5707_v55  ;;  %v4607_v44 = vmul.f32 %v3102_v5, %v7213_v31 }
 0x191   : > { %v5977_v16 = vpop.eup %5976  ;;  %v3072_v40 = vsel %vm3069_vm3, %v3071_v60, %v3067_v61  ;;  %5984 = vpow2.f32 %v5725_v18  ;;  %v5448_v21 = vor.u32 %v5801_v8, %v5445_v14  ;;  %v3083_v56 = vand.u32 2147483647, %v7454_v3 }
 0x192   : > { %v4605_v20 = vmul.f32 %v3072_v40, %v7224_v47  ;;  %v3085_v24 = vand.u32 2147483648, %v7454_v3  ;;  %5986 = vrcp.f32 %v7468_v17  ;;  %v7475_v1 = vadd.f32 1.0, %v5977_v16 }
 0x193   : > { %v5728_v30 = vmul.f32 -1.442695, %v7465_v0  ;;  %1366 = vmatpush.bf16.msra.mxu0 %v5448_v21  ;;  %v7479_v31 = vadd.f32 %v974_v54, %v6959_v19  ;;  %v3355_v47 = vand.u32 2147483648, %v7468_v17  ;;  %v5436_v4 = vor.u32 %v5810_v22, %v5435_v6 }
 0x194   : > { %v5979_v11 = vpop.eup %5978  ;;  %v7482_v41 = vadd.f32 %v7393_v36, %v4605_v20  ;;  %v7486_v58 = vadd.f32 %v1003_v9, %v6966_v52  ;;  %v7489_v15 = vadd.f32 %v7364_v43, %v4604_v25  ;;  %v7492_v62 = vadd.f32 %v7382_v12, %v4607_v44 }
 0x195   : > { %v5981_v33 = vpop.eup %5980  ;;  %v3353_v34 = vand.u32 2147483647, %v7468_v17  ;;  %5988 = vrcp.f32 %v7475_v1  ;;  %vm3079_vm6 = vweird.f32 %v7454_v3  ;;  %vm7498_vm2 = vcmp.eq.f32.partialorder %v3083_v56, 8.507059e+37  ;;  %1279 = vmatpush.bf16.msra.mxu1 %v5436_v4 }
 0x196   : > { %v5983_v37 = vpop.eup %5982  ;;  %v3075_v36 = vmul.f32 %v5981_v33, %v7454_v3  ;;  %v3086_v2 = vor.u32 1.1754944e-38, %v3085_v24  ;;  %5605 = vmatmul.msk.bf16.vlgmr.msra.gmra.mxu0 %vm420_vm0, %v6765_v51  ;;  %vm3349_vm4 = vweird.f32 %v7468_v17  ;;  %v7505_v12 = vadd.f32 1.0, %v5979_v11 }
 0x197   : > { %v5985_v43 = vpop.eup %5984  ;;  %v7507_v49 = vadd.f32 1.0, %v5983_v37  ;;  %v5726_v45 = vmul.f32 -1.442695, %v7479_v31  ;;  %v3356_v46 = vor.u32 1.1754944e-38, %v3355_v47  ;;  %5990 = vpow2.f32 %v5728_v30 }
 0x198   : > { %v5987_v32 = vpop.eup %5986  ;;  %v3076_v27 = vsub.f32 1.0, %v3075_v36  ;;  %v7511_v55 = vmul.f32 -1.442695, %v7486_v58  ;;  %vm7514_vm5 = vcmp.eq.f32.partialorder %v3353_v34, 8.507059e+37  ;;  %v3398_v42 = vand.u32 2147483647, %v7475_v1  ;;  %5593 = vmatmul.msk.bf16.vlgmr.msra.gmra.mxu1 %vm420_vm0, %v6765_v51 }
 0x199   : > { %v3345_v10 = vmul.f32 %v5987_v32, %v7468_v17  ;;  %v3400_v5 = vand.u32 2147483648, %v7475_v1  ;;  %5992 = vrcp.f32 %v7505_v12  ;;  %vm3080_vm7 = vweird.f32 %v5981_v33 }
 0x19a   : > { %v3077_v48 = vmul.f32 %v5981_v33, %v3076_v27  ;;  %5994 = vrcp.f32 %v7507_v49  ;;  %v7524_v60 = vadd.f32 1.0, %v5985_v43  ;;  %vm3394_vm8 = vweird.f32 %v7475_v1  ;;  %vm3081_vm9 = vmor %vm3079_vm6, %vm3080_vm7 }
 0x19b   : > { %v5989_v8 = vpop.eup %5988  ;;  %v3346_v14 = vsub.f32 1.0, %v3345_v10  ;;  %5996 = vpow2.f32 %v5726_v45  ;;  %v7528_v25 = vadd.f32 %v948_v53, %v6944_v38  ;;  %v3368_v16 = vand.u32 2147483647, %v7505_v12 }
 0x19c   : > { %v3078_v61 = vadd.f32 %v5981_v33, %v3077_v48  ;;  %v3390_v54 = vmul.f32 %v5989_v8, %v7475_v1  ;;  %v3370_v44 = vand.u32 2147483648, %v7505_v12  ;;  %vm3350_vm10 = vweird.f32 %v5987_v32 }
 0x19d   : > { %v3347_v40 = vmul.f32 %v5987_v32, %v3346_v14  ;;  %vm7535_vm11 = vcmp.eq.f32.partialorder %v3398_v42, 8.507059e+37  ;;  %v3401_v6 = vor.u32 1.1754944e-38, %v3400_v5  ;;  %v5991_v22 = vpop.eup %5990  ;;  %vm3364_vm12 = vweird.f32 %v7505_v12  ;;  %vm3351_vm15 = vmor %vm3349_vm4, %vm3350_vm10 }
 0x19e   : > { %v3082_v9 = vsel %vm3081_vm9, %v5981_v33, %v3078_v61  ;;  %v3391_v20 = vsub.f32 1.0, %v3390_v54  ;;  %v3383_v56 = vand.u32 2147483647, %v7507_v49  ;;  %5998 = vrcp.f32 %v7524_v60  ;;  %5598 = vmatmul.msk.bf16.gmra.mxu2 %vm420_vm0, %v6823_v35  ;;  %5602 = vmatmul.msk.bf16.gmra.mxu3 %vm420_vm0, %v6823_v35 }
 0x19f   : > { %v5993_v3 = vpop.eup %5992  ;;  %v3087_v24 = vsel %vm7498_vm2, %v3086_v2, %v3082_v9  ;;  %v3348_v30 = vadd.f32 %v5987_v32, %v3347_v40  ;;  %vm3395_vm13 = vweird.f32 %v5989_v8  ;;  %vm3379_vm14 = vweird.f32 %v7507_v49 }
 0x1a0   : > { %v3385_v11 = vand.u32 2147483648, %v7507_v49  ;;  %v5995_v47 = vpop.eup %5994  ;;  %v4606_v4 = vmul.f32 %v3087_v24, %v7256_v13  ;;  %v3392_v33 = vmul.f32 %v5989_v8, %v3391_v20  ;;  %v3360_v34 = vmul.f32 %v5993_v3, %v7505_v12  ;;  %vm3396_vm6 = vmor %vm3394_vm8, %vm3395_vm13 }
 0x1a1   : > { %vm7555_vm1 = vcmp.eq.f32.partialorder %v3368_v16, 8.507059e+37  ;;  %v3371_v36 = vor.u32 1.1754944e-38, %v3370_v44  ;;  %v5997_v59 = vpop.eup %5996  ;;  %v3352_v2 = vsel %vm3351_vm15, %v5987_v32, %v3348_v30  ;;  %vm3365_vm3 = vweird.f32 %v5993_v3 }
 0x1a2   : > { %v3375_v43 = vmul.f32 %v5995_v47, %v7507_v49  ;;  %v3653_v45 = vand.u32 2147483647, %v7524_v60  ;;  %v4732_v13 = vadd.f32 %v7401_v7, %v4606_v4  ;;  %v3357_v17 = vsel %vm7514_vm5, %v3356_v46, %v3352_v2  ;;  %vm3366_vm4 = vmor %vm3364_vm12, %vm3365_vm3 }
 0x1a3   : > { %v3393_v27 = vadd.f32 %v5989_v8, %v3392_v33  ;;  %v3361_v53 = vsub.f32 1.0, %v3360_v34  ;;  %v4624_v10 = vmul.f32 %v3357_v17, %v7286_v29  ;;  %vm3380_vm2 = vweird.f32 %v5995_v47 }
 0x1a4   : > { %v3376_v42 = vsub.f32 1.0, %v3375_v43  ;;  %v7568_v32 = vadd.f32 1.0, %v5991_v22  ;;  %v5999_v5 = vpop.eup %5998  ;;  %v7570_v61 = vadd.f32 1.0, %v5997_v59  ;;  %6000 = vpow2.f32 %v7511_v55  ;;  %vm3381_vm7 = vmor %vm3379_vm14, %vm3380_vm2  ;;  %v1035_v22 = vpop.f32.mrf.mxu0 }
 0x1a5   : > { %v3397_v48 = vsel %vm3396_vm6, %v5989_v8, %v3393_v27  ;;  %v3362_v14 = vmul.f32 %v5993_v3, %v3361_v53  ;;  %v4707_v7 = vadd.f32 %v7489_v15, %v4624_v10  ;;  %v3645_v1 = vmul.f32 %v5999_v5, %v7524_v60 }
 0x1a6   : > { %v3402_v29 = vsel %vm7535_vm11, %v3401_v6, %v3397_v48  ;;  %v3377_v46 = vmul.f32 %v5995_v47, %v3376_v42  ;;  %v3655_v16 = vand.u32 2147483648, %v7524_v60  ;;  %6002 = vrcp.f32 %v7568_v32  ;;  %5606 = vmatmul.msk.bf16.gmra.mxu0 %vm420_vm0, %v6823_v35 }
 0x1a7   : > { %v4627_v18 = vmul.f32 %v3402_v29, %v7408_v28  ;;  %v3363_v54 = vadd.f32 %v5993_v3, %v3362_v14  ;;  %vm7585_vm5 = vcmp.eq.f32.partialorder %v3383_v56, 8.507059e+37  ;;  %v3386_v8 = vor.u32 1.1754944e-38, %v3385_v11 }
 0x1a8   : > { %v3378_v15 = vadd.f32 %v5995_v47, %v3377_v46  ;;  %v3646_v44 = vsub.f32 1.0, %v3645_v1  ;;  %vm3649_vm8 = vweird.f32 %v7524_v60  ;;  %6004 = vrcp.f32 %v7570_v61  ;;  %5594 = vmatmul.msk.bf16.gmra.mxu1 %vm420_vm0, %v6823_v35 }
 0x1a9   : > { %v7590_v28 = vadd.f32 %v7492_v62, %v4627_v18  ;;  %v3367_v40 = vsel %vm3366_vm4, %v5993_v3, %v3363_v54  ;;  %vm3650_vm9 = vweird.f32 %v5999_v5  ;;  %vm7604_vm10 = vcmp.eq.f32.partialorder %v3653_v45, 8.507059e+37  ;;  %v1006_v45 = vpop.f32.mrf.mxu3 }
 0x1aa   : > { %v3372_v12 = vsel %vm7555_vm1, %v3371_v36, %v3367_v40  ;;  %v3382_v21 = vsel %vm3381_vm7, %v5995_v47, %v3378_v15  ;;  %v3647_v6 = vmul.f32 %v5999_v5, %v3646_v44  ;;  %v6001_v62 = vpop.eup %6000  ;;  %v3656_v56 = vor.u32 1.1754944e-38, %v3655_v16  ;;  %v977_v47 = vpop.f32.mrf.mxu2  ;;  %vm3651_vm11 = vmor %vm3649_vm8, %vm3650_vm9 }
 0x1ab   : > { %v4625_v9 = vmul.f32 %v3372_v12, %v7438_v23  ;;  %v3387_v49 = vsel %vm7585_vm5, %v3386_v8, %v3382_v21  ;;  %v3698_v30 = vand.u32 2147483647, %v7568_v32  ;;  %v3700_v11 = vand.u32 2147483648, %v7568_v32 }
 0x1ac   : > { %v4626_v3 = vmul.f32 %v3387_v49, %v7441_v50  ;;  %v3648_v24 = vadd.f32 %v5999_v5, %v3647_v6  ;;  %v6003_v4 = vpop.eup %6002  ;;  %v3668_v23 = vand.u32 2147483647, %v7570_v61  ;;  %v7618_v34 = vadd.f32 1.0, %v6001_v62 }
 0x1ad   : > { %v7612_v33 = vadd.f32 %v7482_v41, %v4625_v9  ;;  %v5745_v50 = vmul.f32 -1.442695, %v7528_v25  ;;  %v3690_v59 = vmul.f32 %v6003_v4, %v7568_v32  ;;  %v7625_v2 = vadd.f32 %v1035_v22, %v6946_v39 }
 0x1ae   : > { %v7621_v37 = vadd.f32 %v4732_v13, %v4626_v3  ;;  %v3652_v36 = vsel %vm3651_vm11, %v5999_v5, %v3648_v24  ;;  %v6005_v41 = vpop.eup %6004  ;;  %vm3694_vm12 = vweird.f32 %v7568_v32  ;;  %v3670_v60 = vand.u32 2147483648, %v7570_v61  ;;  %5599 = vmatmul.msk.bf16.gmra.mxu2 %vm420_vm0, %v6862_v57  ;;  %5603 = vmatmul.msk.bf16.gmra.mxu3 %vm420_vm0, %v6862_v57  ;;  %v950_v5 = vpop.f32.mrf.mxu1 }
 0x1af   : > { %v3657_v43 = vsel %vm7604_vm10, %v3656_v56, %v3652_v36  ;;  %6006 = vrcp.f32 %v7618_v34  ;;  %v3691_v17 = vsub.f32 1.0, %v3690_v59  ;;  %vm7637_vm13 = vcmp.eq.f32.partialorder %v3698_v30, 8.507059e+37 }
 0x1b0   : > { %v4644_v13 = vmul.f32 %v3657_v43, %v7448_v63  ;;  %v3660_v53 = vmul.f32 %v6005_v41, %v7570_v61  ;;  %vm3695_vm14 = vweird.f32 %v6003_v4  ;;  %v3701_v10 = vor.u32 1.1754944e-38, %v3700_v11 }
 0x1b1   : > { %vm7642_vm15 = vcmp.eq.f32.partialorder %v3668_v23, 8.507059e+37  ;;  %6008 = vpow2.f32 %v5745_v50  ;;  %v3692_v14 = vmul.f32 %v6003_v4, %v3691_v17  ;;  %v5748_v63 = vmul.f32 -1.442695, %v7625_v2  ;;  %vm3696_vm3 = vmor %vm3694_vm12, %vm3695_vm14  ;;  %v1008_v11 = vpop.f32.mrf.mxu3 }
 0x1b2   : > { %v7646_v48 = vadd.f32 %v4707_v7, %v4644_v13  ;;  %v3661_v29 = vsub.f32 1.0, %v3660_v53  ;;  %vm3665_vm1 = vweird.f32 %v6005_v41  ;;  %v3671_v46 = vor.u32 1.1754944e-38, %v3670_v60  ;;  %v1037_v7 = vpop.f32.mrf.mxu0  ;;  %v979_v22 = vpop.f32.mrf.mxu2 }
 0x1b3   : > { %v7650_v1 = vadd.f32 %v977_v47, %v6959_v19  ;;  %v7653_v18 = vadd.f32 %v1006_v45, %v6966_v52  ;;  %v3693_v54 = vadd.f32 %v6003_v4, %v3692_v14  ;;  %6010 = vpow2.f32 %v5748_v63 }
 0x1b4   : > { %v3662_v16 = vmul.f32 %v6005_v41, %v3661_v29  ;;  %v7656_v15 = vadd.f32 %v950_v5, %v6944_v38  ;;  %vm3664_vm6 = vweird.f32 %v7570_v61  ;;  %v3683_v8 = vand.u32 2147483647, %v7618_v34 }
 0x1b5   : > { %v6007_v55 = vpop.eup %6006  ;;  %v5746_v44 = vmul.f32 -1.442695, %v7650_v1  ;;  %v5747_v40 = vmul.f32 -1.442695, %v7653_v18  ;;  %v3697_v12 = vsel %vm3696_vm3, %v6003_v4, %v3693_v54  ;;  %v3685_v38 = vand.u32 2147483648, %v7618_v34  ;;  %vm3666_vm2 = vmor %vm3664_vm6, %vm3665_vm1 }
 0x1b6   : > { %v3663_v21 = vadd.f32 %v6005_v41, %v3662_v16  ;;  %v3675_v6 = vmul.f32 %v6007_v55, %v7618_v34  ;;  %v3702_v32 = vsel %vm7637_vm13, %v3701_v10, %v3697_v12  ;;  %v5765_v61 = vmul.f32 -1.442695, %v7656_v15  ;;  %5607 = vmatmul.msk.bf16.gmra.mxu0 %vm420_vm0, %v6862_v57 }
 0x1b7   : > { %v6009_v62 = vpop.eup %6008  ;;  %6012 = vpow2.f32 %v5746_v44  ;;  %v7672_v9 = vadd.f32 %v1037_v7, %v6946_v39  ;;  %v4647_v49 = vmul.f32 %v3702_v32, %v7465_v0  ;;  %vm3680_vm4 = vweird.f32 %v6007_v55 }
 0x1b8   : > { %v3667_v20 = vsel %vm3666_vm2, %v6005_v41, %v3663_v21  ;;  %v3676_v56 = vsub.f32 1.0, %v3675_v6  ;;  %v7677_v3 = vadd.f32 1.0, %v6009_v62  ;;  %6014 = vpow2.f32 %v5747_v40  ;;  %5595 = vmatmul.msk.bf16.gmra.mxu1 %vm420_vm0, %v6862_v57 }
 0x1b9   : > { %v3672_v24 = vsel %vm7642_vm15, %v3671_v46, %v3667_v20  ;;  %v7682_v30 = vadd.f32 %v979_v22, %v6959_v19  ;;  %v6011_v39 = vpop.eup %6010  ;;  %v7685_v47 = vadd.f32 %v7590_v28, %v4647_v49  ;;  %vm3679_vm5 = vweird.f32 %v7618_v34 }
 0x1ba   : > { %v4645_v4 = vmul.f32 %v3672_v24, %v7479_v31  ;;  %v3677_v0 = vmul.f32 %v6007_v55, %v3676_v56  ;;  %6016 = vrcp.f32 %v7677_v3  ;;  %v7692_v23 = vadd.f32 1.0, %v6011_v39  ;;  %vm3681_vm7 = vmor %vm3679_vm5, %vm3680_vm4 }
 0x1bb   : > { %v5768_v19 = vmul.f32 -1.442695, %v7672_v9  ;;  %6018 = vpow2.f32 %v5765_v61  ;;  %v7699_v28 = vadd.f32 %v1008_v11, %v6966_v52  ;;  %v3686_v59 = vor.u32 1.1754944e-38, %v3685_v38 }
 0x1bc   : > { %v7696_v50 = vadd.f32 %v7612_v33, %v4645_v4  ;;  %v3678_v36 = vadd.f32 %v6007_v55, %v3677_v0  ;;  %v3953_v41 = vand.u32 2147483647, %v7677_v3  ;;  %v3955_v34 = vand.u32 2147483648, %v7677_v3 }
 0x1bd   : > { %v6013_v31 = vpop.eup %6012  ;;  %6020 = vrcp.f32 %v7692_v23  ;;  %vm3684_vm8 = vcmp.eq.f32.partialorder %v3683_v8, 8.507059e+37  ;;  %v5766_v33 = vmul.f32 -1.442695, %v7682_v30  ;;  %vm3949_vm9 = vweird.f32 %v7677_v3 }
 0x1be   : > { %v3682_v43 = vsel %vm3681_vm7, %v6007_v55, %v3678_v36  ;;  %v7705_v60 = vadd.f32 1.0, %v6013_v31  ;;  %v6015_v45 = vpop.eup %6014  ;;  %6022 = vpow2.f32 %v5768_v19  ;;  %5600 = vmatmul.msk.bf16.gmra.mxu2 %vm420_vm0, %v6899_v26  ;;  %5604 = vmatmul.msk.bf16.gmra.mxu3 %vm420_vm0, %v6899_v26  ;;  %v5767_v27 = vmul.f32 -1.442695, %v7699_v28 }
 0x1bf   : > { %v3687_v13 = vsel %vm3684_vm8, %v3686_v59, %v3682_v43  ;;  %vm7717_vm10 = vcmp.eq.f32.partialorder %v3953_v41, 8.507059e+37  ;;  %v3956_v42 = vor.u32 1.1754944e-38, %v3955_v34  ;;  %v3998_v5 = vand.u32 2147483647, %v7692_v23 }
 0x1c0   : > { %v6017_v52 = vpop.eup %6016  ;;  %v4646_v17 = vmul.f32 %v3687_v13, %v7486_v58  ;;  %6024 = vrcp.f32 %v7705_v60  ;;  %v4000_v58 = vand.u32 2147483648, %v7692_v23  ;;  %v7726_v63 = vadd.f32 1.0, %v6015_v45 }
 0x1c1   : > { %v3945_v53 = vmul.f32 %v6017_v52, %v7677_v3  ;;  %v6019_v14 = vpop.eup %6018  ;;  %6026 = vpow2.f32 %v5766_v33  ;;  %vm3994_vm11 = vweird.f32 %v7692_v23  ;;  %v3968_v16 = vand.u32 2147483647, %v7705_v60 }
 0x1c2   : > { %v7723_v29 = vadd.f32 %v7621_v37, %v4646_v17  ;;  %v7730_v7 = vadd.f32 1.0, %v6019_v14  ;;  %v3970_v8 = vand.u32 2147483648, %v7705_v60  ;;  %6028 = vrcp.f32 %v7726_v63  ;;  %v7738_v37 = vld [vmem:[%s12093_s4] sm:$0xff] }
 0x1c3   : > { %v6021_v46 = vpop.eup %6020  ;;  %v3946_v54 = vsub.f32 1.0, %v3945_v53  ;;  %v7741_v44 = vperm.slane %v7738_v37, 4  ;;  %vm3950_vm12 = vweird.f32 %v6017_v52  ;;  %6030 = vpow2.f32 %v5767_v27 }
 0x1c4   : > { %v3990_v55 = vmul.f32 %v6021_v46, %v7692_v23  ;;  %v6023_v40 = vpop.eup %6022  ;;  %v7744_v21 = vperm.slane %v7738_v37, 7  ;;  %vm7746_vm13 = vcmp.eq.f32.partialorder %v3998_v5, 8.507059e+37  ;;  %v4001_v62 = vor.u32 1.1754944e-38, %v4000_v58  ;;  %vm3951_vm1 = vmor %vm3949_vm9, %vm3950_vm12 }
 0x1c5   : > { %v3947_v12 = vmul.f32 %v6017_v52, %v3946_v54  ;;  %6032 = vrcp.f32 %v7730_v7  ;;  %vm3964_vm14 = vweird.f32 %v7705_v60  ;;  %vm7753_vm15 = vcmp.eq.f32.partialorder %v3968_v16, 8.507059e+37 }
 0x1c6   : > { %v6025_v6 = vpop.eup %6024  ;;  %v3991_v38 = vsub.f32 1.0, %v3990_v55  ;;  %5608 = vmatmul.msk.bf16.gmra.mxu0 %vm420_vm0, %v6899_v26  ;;  %vm3995_vm3 = vweird.f32 %v6021_v46  ;;  %v3971_v24 = vor.u32 1.1754944e-38, %v3970_v8  ;;  %v3983_v11 = vand.u32 2147483647, %v7726_v63 }
 0x1c7   : > { %v3948_v32 = vadd.f32 %v6017_v52, %v3947_v12  ;;  %v3960_v61 = vmul.f32 %v6025_v6, %v7705_v60  ;;  %v6027_v20 = vpop.eup %6026  ;;  %vm3979_vm6 = vweird.f32 %v7726_v63  ;;  %v7763_v0 = vadd.f32 1.0, %v6023_v40  ;;  %vm3996_vm4 = vmor %vm3994_vm11, %vm3995_vm3 }
 0x1c8   : > { %v3992_v56 = vmul.f32 %v6021_v46, %v3991_v38  ;;  %v6029_v19 = vpop.eup %6028  ;;  %vm3965_vm2 = vweird.f32 %v6025_v6  ;;  %v3985_v3 = vand.u32 2147483648, %v7726_v63  ;;  %5596 = vmatmul.msk.bf16.gmra.mxu1 %vm420_vm0, %v6899_v26  ;;  %v7775_v33 = vadd.f32 1.0, %v6027_v20 }
 0x1c9   : > { %v3952_v39 = vsel %vm3951_vm1, %v6017_v52, %v3948_v32  ;;  %v3961_v4 = vsub.f32 1.0, %v3960_v61  ;;  %v6031_v59 = vpop.eup %6030  ;;  %v3975_v43 = vmul.f32 %v6029_v19, %v7726_v63  ;;  %vm7777_vm5 = vcmp.eq.f32.partialorder %v3983_v11, 8.507059e+37  ;;  %vm3966_vm8 = vmor %vm3964_vm14, %vm3965_vm2  ;;  %v1049_v11 = vpop.f32.mrf.mxu1  ;;  %v5822_v52 = vld [vmem:[#allocation3 + $0xe4] sm:$0xf] }
 0x1ca   : > { %v3957_v36 = vsel %vm7717_vm10, %v3956_v42, %v3952_v39  ;;  %v3993_v31 = vadd.f32 %v6021_v46, %v3992_v56  ;;  %vm4249_vm7 = vweird.f32 %v7730_v7  ;;  %v4253_v17 = vand.u32 2147483647, %v7730_v7 }
 0x1cb   : > { %v4664_v41 = vmul.f32 %v3957_v36, %v7528_v25  ;;  %v3962_v34 = vmul.f32 %v6025_v6, %v3961_v4  ;;  %v6033_v45 = vpop.eup %6032  ;;  %6034 = vrcp.f32 %v7763_v0  ;;  %v3976_v53 = vsub.f32 1.0, %v3975_v43 }
 0x1cc   : > { %v3997_v13 = vsel %vm3996_vm4, %v6021_v46, %v3993_v31  ;;  %v4245_v42 = vmul.f32 %v6033_v45, %v7730_v7  ;;  %v4255_v5 = vand.u32 2147483648, %v7730_v7  ;;  %v7793_v14 = vadd.f32 1.0, %v6031_v59  ;;  %v1136_v31 = vpop.f32.mrf.mxu0 }
 0x1cd   : > { %v4709_v25 = vadd.f32 %v7646_v48, %v4664_v41  ;;  %v4002_v23 = vsel %vm7746_vm13, %v4001_v62, %v3997_v13  ;;  %v3963_v27 = vadd.f32 %v6025_v6, %v3962_v34  ;;  %v3977_v46 = vmul.f32 %v6029_v19, %v3976_v53 }
 0x1ce   : > { %v4667_v10 = vmul.f32 %v4002_v23, %v7625_v2  ;;  %vm3980_vm9 = vweird.f32 %v6029_v19  ;;  %6036 = vrcp.f32 %v7775_v33  ;;  %v3986_v54 = vor.u32 1.1754944e-38, %v3985_v3 }
 0x1cf   : > { %v3967_v58 = vsel %vm3966_vm8, %v6025_v6, %v3963_v27  ;;  %v4246_v60 = vsub.f32 1.0, %v4245_v42  ;;  %v3978_v55 = vadd.f32 %v6029_v19, %v3977_v46  ;;  %vm7802_vm10 = vcmp.eq.f32.partialorder %v4253_v17, 8.507059e+37  ;;  %vm3981_vm11 = vmor %vm3979_vm6, %vm3980_vm9  ;;  %v5533_v17 = vld [vmem:[#allocation3 + $0x130] sm:$0xf0]  ;;  %v5833_v42 = vld [vmem:[#allocation3 + $0x134] sm:$0xf0] }
 0x1d0   : > { %v7797_v48 = vadd.f32 %v7685_v47, %v4667_v10  ;;  %v3972_v2 = vsel %vm7753_vm15, %v3971_v24, %v3967_v58  ;;  %v4298_v40 = vand.u32 2147483647, %v7763_v0  ;;  %vm4250_vm12 = vweird.f32 %v6033_v45  ;;  %v5539_v10 = vld [vmem:[#allocation3 + $0xe8] sm:$0xf] }
 0x1d1   : > { %v4665_v16 = vmul.f32 %v3972_v2, %v7650_v1  ;;  %v6035_v12 = vpop.eup %6034  ;;  %v4247_v47 = vmul.f32 %v6033_v45, %v4246_v60  ;;  %v4300_v6 = vand.u32 2147483648, %v7763_v0  ;;  %6038 = vrcp.f32 %v7793_v14  ;;  %vm4251_vm13 = vmor %vm4249_vm7, %vm4250_vm12 }
 0x1d2   : > { %v3982_v1 = vsel %vm3981_vm11, %v6029_v19, %v3978_v55  ;;  %v4256_v22 = vor.u32 1.1754944e-38, %v4255_v5  ;;  %v4290_v62 = vmul.f32 %v6035_v12, %v7763_v0  ;;  %v4268_v63 = vand.u32 2147483647, %v7775_v33 }
 0x1d3   : > { %v7812_v38 = vadd.f32 %v7696_v50, %v4665_v16  ;;  %v3987_v32 = vsel %vm7777_vm5, %v3986_v54, %v3982_v1  ;;  %v4248_v61 = vadd.f32 %v6033_v45, %v4247_v47  ;;  %v4270_v49 = vand.u32 2147483648, %v7775_v33 }
 0x1d4   : > { %v6037_v20 = vpop.eup %6036  ;;  %v4666_v56 = vmul.f32 %v3987_v32, %v7653_v18  ;;  %v4291_v50 = vsub.f32 1.0, %v4290_v62  ;;  %vm4294_vm14 = vweird.f32 %v7763_v0  ;;  %vm7823_vm15 = vcmp.eq.f32.partialorder %v4298_v40, 8.507059e+37  ;;  %v1078_v40 = vpop.f32.mrf.mxu2 }
 0x1d5   : > { %v4252_v39 = vsel %vm4251_vm13, %v6033_v45, %v4248_v61  ;;  %v4301_v4 = vor.u32 1.1754944e-38, %v4300_v6  ;;  %v4260_v19 = vmul.f32 %v6037_v20, %v7775_v33  ;;  %vm4264_vm1 = vweird.f32 %v7775_v33  ;;  %v1051_v32 = vpop.f32.mrf.mxu1 }
 0x1d6   : > { %v7830_v36 = vadd.f32 %v7723_v29, %v4666_v56  ;;  %v4257_v18 = vsel %vm7802_vm10, %v4256_v22, %v4252_v39  ;;  %v4292_v7 = vmul.f32 %v6035_v12, %v4291_v50  ;;  %vm4295_vm3 = vweird.f32 %v6035_v12  ;;  %v1138_v56 = vpop.f32.mrf.mxu0 }
 0x1d7   : > { %v6039_v3 = vpop.eup %6038  ;;  %v4684_v59 = vmul.f32 %v4257_v18, %v7656_v15  ;;  %v4261_v41 = vsub.f32 1.0, %v4260_v19  ;;  %vm7835_vm6 = vcmp.eq.f32.partialorder %v4268_v63, 8.507059e+37  ;;  %v4271_v43 = vor.u32 1.1754944e-38, %v4270_v49  ;;  %vm4296_vm4 = vmor %vm4294_vm14, %vm4295_vm3 }
 0x1d8   : > { %v4293_v45 = vadd.f32 %v6035_v12, %v4292_v7  ;;  %vm4265_vm2 = vweird.f32 %v6037_v20  ;;  %v4275_v29 = vmul.f32 %v6039_v3, %v7793_v14  ;;  %v4283_v13 = vand.u32 2147483647, %v7793_v14 }
 0x1d9   : > { %v4710_v23 = vadd.f32 %v4709_v25, %v4684_v59  ;;  %v4262_v27 = vmul.f32 %v6037_v20, %v4261_v41  ;;  %v7844_v15 = vadd.f32 %v1049_v11, %v7741_v44  ;;  %v7847_v53 = vadd.f32 %v1136_v31, %v7744_v21  ;;  %vm4266_vm5 = vmor %vm4264_vm1, %vm4265_vm2 }
 0x1da   : > { %v4297_v5 = vsel %vm4296_vm4, %v6035_v12, %v4293_v45  ;;  %v4276_v58 = vsub.f32 1.0, %v4275_v29  ;;  %v5536_v46 = vor.u32 %v5822_v52, %v5533_v17  ;;  %v5540_v2 = vor.u32 %v5833_v42, %v5539_v10 }
 0x1db   : > { %v4711_v54 = vrot.slane %v4710_v23, 4  ;;  %v4302_v25 = vsel %vm7823_vm15, %v4301_v4, %v4297_v5  ;;  %v4263_v60 = vadd.f32 %v6037_v20, %v4262_v27  ;;  %v4285_v0 = vand.u32 2147483648, %v7793_v14 }
 0x1dc   : > { %v4687_v16 = vmul.f32 %v4302_v25, %v7672_v9  ;;  %v4277_v55 = vmul.f32 %v6039_v3, %v4276_v58  ;;  %vm4280_vm7 = vweird.f32 %v6039_v3  ;;  %1423 = vmatpush.bf16.msrb.mxu2 %v5536_v46  ;;  %1452 = vmatpush.bf16.msrb.mxu3 %v5540_v2  ;;  %v7857_v8 = vperm.slane %v7738_v37, 5  ;;  %v1107_v9 = vpop.f32.mrf.mxu3 }
 0x1dd   : > { %v4267_v12 = vsel %vm4266_vm5, %v6037_v20, %v4263_v60  ;;  %vm4279_vm8 = vweird.f32 %v7793_v14  ;;  %v5629_v47 = vmul.f32 -1.442695, %v7844_v15  ;;  %v7862_v6 = vperm.slane %v7738_v37, 6 }
 0x1de   : > { %v4749_v33 = vadd.f32 %v7797_v48, %v4687_v16  ;;  %v4272_v1 = vsel %vm7835_vm6, %v4271_v43, %v4267_v12  ;;  %v4278_v22 = vadd.f32 %v6039_v3, %v4277_v55  ;;  %v5632_v62 = vmul.f32 -1.442695, %v7847_v53  ;;  %vm4281_vm9 = vmor %vm4279_vm8, %vm4280_vm7 }
 0x1df   : > { %v4712_v61 = vadd.f32 %v4711_v54, %v4710_v23  ;;  %v4685_v63 = vmul.f32 %v4272_v1, %v7682_v30  ;;  %v4286_v14 = vor.u32 1.1754944e-38, %v4285_v0  ;;  %v7871_v49 = vadd.f32 %v1078_v40, %v7857_v8  ;;  %v1080_v1 = vpop.f32.mrf.mxu2 }
 0x1e0   : > { %v4750_v37 = vrot.slane %v4749_v33, 4  ;;  %v4282_v20 = vsel %vm4281_vm9, %v6039_v3, %v4278_v22  ;;  %vm4284_vm10 = vcmp.eq.f32.partialorder %v4283_v13, 8.507059e+37  ;;  %v7874_v48 = vadd.f32 %v1107_v9, %v7862_v6 }
 0x1e1   : > { %v4723_v50 = vadd.f32 %v7812_v38, %v4685_v63  ;;  %v4287_v24 = vsel %vm4284_vm10, %v4286_v14, %v4282_v20  ;;  %6040 = vpow2.f32 %v5629_v47  ;;  %v7878_v11 = vadd.f32 %v1051_v32, %v7741_v44 }
 0x1e2   : > { %v4751_v30 = vadd.f32 %v4750_v37, %v4749_v33  ;;  %v4686_v39 = vmul.f32 %v4287_v24, %v7699_v28  ;;  %6042 = vpow2.f32 %v5632_v62  ;;  %v4713_v4 = vrot.slane %v4712_v61, 2  ;;  %v5823_v24 = vld [vmem:[#allocation3 + $0xec] sm:$0xf] }
 0x1e3   : > { %v4724_v19 = vrot.slane %v4723_v50, 4  ;;  %v5630_v18 = vmul.f32 -1.442695, %v7871_v49  ;;  %v7883_v7 = vadd.f32 %v1138_v56, %v7744_v21  ;;  %v5631_v38 = vmul.f32 -1.442695, %v7874_v48 }
 0x1e4   : > { %v4752_v31 = vrot.slane %v4751_v30, 2  ;;  %v4736_v3 = vadd.f32 %v7830_v36, %v4686_v39  ;;  %v5649_v41 = vmul.f32 -1.442695, %v7878_v11  ;;  %v4714_v28 = vadd.f32 %v4713_v4, %v4712_v61  ;;  %v1109_v56 = vpop.f32.mrf.mxu3 }
 0x1e5   : > { %v4725_v59 = vadd.f32 %v4724_v19, %v4723_v50  ;;  %6044 = vpow2.f32 %v5630_v18  ;;  %v5652_v13 = vmul.f32 -1.442695, %v7883_v7  ;;  %vm12099_vm11 = vcmask 1040384   ;;  %v5531_v18 = vld [vmem:[#allocation3 + $0xe0] sm:$0xf] }
 0x1e6   : > { %v4753_v34 = vadd.f32 %v4752_v31, %v4751_v30  ;;  %v4737_v43 = vrot.slane %v4736_v3, 4  ;;  %6046 = vpow2.f32 %v5631_v38  ;;  %v4715_v10 = vrot.slane %v4714_v28, 1  ;;  %v5541_v30 = vld [vmem:[#allocation3 + $0x138] sm:$0xf0]  ;;  %v5832_v31 = vld [vmem:[#allocation3 + $0x12c] sm:$0xf0] }
 0x1e7   : > { %v6041_v45 = vpop.eup %6040  ;;  %v4726_v29 = vrot.slane %v4725_v59, 2  ;;  %6048 = vpow2.f32 %v5649_v41  ;;  %vm12100_vm12 = vcmask 1042434   ;;  %vm12096_vm13 = vcmask 1041408   ;;  %v1054_v41 = vpop.f32.mrf.mxu1 }
 0x1e8   : > { %v6043_v52 = vpop.eup %6042  ;;  %v4738_v17 = vadd.f32 %v4737_v43, %v4736_v3  ;;  %v4754_v27 = vrot.slane %v4753_v34, 1  ;;  %v7889_v5 = vadd.f32 1.0, %v6041_v45  ;;  %6050 = vpow2.f32 %v5652_v13  ;;  %v1141_v45 = vpop.f32.mrf.mxu0 }
 0x1e9   : > { %v4727_v23 = vadd.f32 %v4726_v29, %v4725_v59  ;;  %v7891_v46 = vadd.f32 1.0, %v6043_v52  ;;  %v4716_v55 = vadd.f32 %v4715_v10, %v4714_v28  ;;  %v5544_v59 = vor.u32 %v5823_v24, %v5541_v30  ;;  %v1083_v28 = vpop.f32.mrf.mxu2 }
 0x1ea   : > { %v4739_v36 = vrot.slane %v4738_v17, 2  ;;  %v4755_v60 = vadd.f32 %v4754_v27, %v4753_v34  ;;  %6052 = vrcp.f32 %v7889_v5  ;;  %v2215_v4 = vand.u32 2147483648, %v7889_v5 }
 0x1eb   : > { %v4728_v42 = vrot.slane %v4727_v23, 1  ;;  %v6045_v2 = vpop.eup %6044  ;;  %6054 = vrcp.f32 %v7891_v46  ;;  %v2260_v38 = vand.u32 2147483648, %v7891_v46  ;;  %v2213_v52 = vand.u32 2147483647, %v7889_v5  ;;  %1481 = vmatpush.bf16.msrb.mxu0 %v5544_v59 }
 0x1ec   : > { %v4740_v58 = vadd.f32 %v4739_v36, %v4738_v17  ;;  %v6047_v25 = vpop.eup %6046  ;;  %v7896_v33 = vadd.f32 1.0, %v6045_v2  ;;  %v4989_v22 = vrot.slane %v4755_v60, 5  ;;  %v2258_v17 = vand.u32 2147483647, %v7891_v46 }
 0x1ed   : > { %v4729_v54 = vadd.f32 %v4728_v42, %v4727_v23  ;;  %v6049_v16 = vpop.eup %6048  ;;  %v7898_v32 = vadd.f32 1.0, %v6047_v25  ;;  %v5532_v23 = vor.u32 %v5832_v31, %v5531_v18  ;;  %v7932_v27 = vor.u32 1.1754944e-38, %v2215_v4 }
 0x1ee   : > { %v4741_v0 = vrot.slane %v4740_v58, 1  ;;  %v6051_v47 = vpop.eup %6050  ;;  %v7900_v61 = vadd.f32 1.0, %v6049_v16  ;;  %v7935_v10 = vadd.f32 %v1080_v1, %v7857_v8  ;;  %v7938_v42 = vadd.f32 %v1109_v56, %v7862_v6 }
 0x1ef   : > { %v4987_v40 = vrot.slane %v4729_v54, 7  ;;  %v7904_v14 = vadd.f32 1.0, %v6051_v47  ;;  %vm2209_vm14 = vweird.f32 %v7889_v5  ;;  %v7943_v2 = vor.u32 1.1754944e-38, %v2260_v38  ;;  %1394 = vmatpush.bf16.msrb.mxu1 %v5532_v23 }
 0x1f0   : > { %v4742_v12 = vadd.f32 %v4741_v0, %v4740_v58  ;;  %6056 = vrcp.f32 %v7900_v61  ;;  %v7906_v37 = vpop.eup %6052  ;;  %v7946_v54 = vadd.f32 %v1054_v41, %v7741_v44  ;;  %v7949_v25 = vadd.f32 %v1141_v45, %v7744_v21 }
 0x1f1   : > { %v5005_v9 = vsel %vm12099_vm11, %v4716_v55, %v4987_v40  ;;  %6058 = vrcp.f32 %v7896_v33  ;;  %v7912_v50 = vpop.eup %6054  ;;  %v2205_v39 = vmul.f32 %v7906_v37, %v7889_v5  ;;  %v7952_v60 = vadd.f32 %v1083_v28, %v7857_v8 }
 0x1f2   : > { %v4988_v62 = vrot.slane %v4742_v12, 6  ;;  %6060 = vrcp.f32 %v7898_v32  ;;  %v2250_v19 = vmul.f32 %v7912_v50, %v7891_v46  ;;  %vm2254_vm15 = vweird.f32 %v7891_v46  ;;  %v1112_v12 = vpop.f32.mrf.mxu3 }
 0x1f3   : > { %6062 = vrcp.f32 %v7904_v14  ;;  %v2206_v13 = vsub.f32 1.0, %v2205_v39  ;;  %v2230_v16 = vand.u32 2147483648, %v7896_v33  ;;  %v5651_v1 = vmul.f32 -1.442695, %v7938_v42 }
 0x1f4   : > { %v5007_v63 = vsel %vm12100_vm12, %v4988_v62, %v4989_v22  ;;  %v2251_v36 = vsub.f32 1.0, %v2250_v19  ;;  %v5669_v22 = vmul.f32 -1.442695, %v7946_v54  ;;  %vm2210_vm1 = vweird.f32 %v7906_v37 }
 0x1f5   : > { %v7909_v20 = vsel %vm12096_vm13, %v5005_v9, %v5007_v63  ;;  %v2207_v47 = vmul.f32 %v7906_v37, %v2206_v13  ;;  %v5650_v9 = vmul.f32 -1.442695, %v7935_v10  ;;  %v5672_v56 = vmul.f32 -1.442695, %v7949_v25  ;;  %v1056_v13 = vpop.f32.mrf.mxu1  ;;  %vm7993_vm4 = vmor %vm2209_vm14, %vm2210_vm1 }
 0x1f6   : > { %12192 = vst [vmem:[#allocation7_spill] sm:$0xff] %v7909_v20  ;;  %v7921_v3 = vpop.eup %6056  ;;  %v2252_v62 = vmul.f32 %v7912_v50, %v2251_v36  ;;  %v2228_v24 = vand.u32 2147483647, %v7896_v33  ;;  %v5670_v30 = vmul.f32 -1.442695, %v7952_v60  ;;  %v7972_v39 = vadd.f32 %v1112_v12, %v7862_v6 }
 0x1f7   : > { %v7924_v34 = vpop.eup %6058  ;;  %v2505_v43 = vmul.f32 %v7921_v3, %v7900_v61  ;;  %6064 = vpow2.f32 %v5650_v9  ;;  %vm2255_vm3 = vweird.f32 %v7912_v50  ;;  %v7976_v18 = vadd.f32 %v7906_v37, %v2207_v47 }
 0x1f8   : > { %v7928_v29 = vpop.eup %6060  ;;  %v2220_v0 = vmul.f32 %v7924_v34, %v7896_v33  ;;  %6066 = vpow2.f32 %v5651_v1  ;;  %vm2224_vm6 = vweird.f32 %v7896_v33  ;;  %v7979_v31 = vor.u32 1.1754944e-38, %v2230_v16  ;;  %vm8013_vm8 = vmor %vm2254_vm15, %vm2255_vm3 }
 0x1f9   : > { %v7940_v58 = vpop.eup %6062  ;;  %v2235_v55 = vmul.f32 %v7928_v29, %v7898_v32  ;;  %v2506_v40 = vsub.f32 1.0, %v2505_v43  ;;  %6068 = vpow2.f32 %v5669_v22  ;;  %v7983_v59 = vadd.f32 %v7912_v50, %v2252_v62 }
 0x1fa   : > { %v2550_v63 = vmul.f32 %v7940_v58, %v7904_v14  ;;  %v2221_v4 = vsub.f32 1.0, %v2220_v0  ;;  %v2243_v41 = vand.u32 2147483647, %v7898_v32  ;;  %6070 = vpow2.f32 %v5672_v56 }
 0x1fb   : > { %v2236_v19 = vsub.f32 1.0, %v2235_v55  ;;  %v2507_v38 = vmul.f32 %v7921_v3, %v2506_v40  ;;  %vm2239_vm2 = vweird.f32 %v7898_v32  ;;  %v2245_v45 = vand.u32 2147483648, %v7898_v32 }
 0x1fc   : > { %v2551_v43 = vsub.f32 1.0, %v2550_v63  ;;  %6072 = vpow2.f32 %v5670_v30  ;;  %v5671_v28 = vmul.f32 -1.442695, %v7972_v39  ;;  %vm7997_vm5 = vcmp.eq.f32.partialorder %v2213_v52, 8.507059e+37  ;;  %v1143_v63 = vpop.f32.mrf.mxu0 }
 0x1fd   : > { %v2222_v0 = vmul.f32 %v7924_v34, %v2221_v4  ;;  %vm2225_vm7 = vweird.f32 %v7924_v34  ;;  %v2237_v16 = vmul.f32 %v7928_v29, %v2236_v19  ;;  %v2513_v55 = vand.u32 2147483647, %v7900_v61  ;;  %v6065_v40 = vpop.eup %6064 }
 0x1fe   : > { %v2212_v5 = vsel %vm7993_vm4, %v7906_v37, %v7976_v18  ;;  %vm8017_vm9 = vcmp.eq.f32.partialorder %v2258_v17, 8.507059e+37  ;;  %v2508_v47 = vadd.f32 %v7921_v3, %v2507_v38  ;;  %vm2509_vm10 = vweird.f32 %v7900_v61  ;;  %v6067_v9 = vpop.eup %6066 }
 0x1ff   : > { %vm2510_vm14 = vweird.f32 %v7921_v3  ;;  %v2257_v46 = vsel %vm8013_vm8, %v7912_v50, %v7983_v59  ;;  %vm8028_vm15 = vcmp.eq.f32.partialorder %v2228_v24, 8.507059e+37  ;;  %vm8032_vm1 = vcmp.eq.f32.partialorder %v2243_v41, 8.507059e+37  ;;  %v6069_v56 = vpop.eup %6068 }
 0x200   : > { %v2552_v1 = vmul.f32 %v7940_v58, %v2551_v43  ;;  %v8037_v22 = vadd.f32 1.0, %v6065_v40  ;;  %v8040_v62 = vadd.f32 %v1056_v13, %v7741_v44  ;;  %vm2240_vm3 = vweird.f32 %v7928_v29  ;;  %v6071_v30 = vpop.eup %6070  ;;  %vm8052_vm4 = vmor %vm2509_vm10, %vm2510_vm14 }
 0x201   : > { %v2515_v50 = vand.u32 2147483648, %v7900_v61  ;;  %v8044_v24 = vadd.f32 1.0, %v6067_v9  ;;  %6074 = vpow2.f32 %v5671_v28  ;;  %v2223_v4 = vadd.f32 %v7924_v34, %v2222_v0  ;;  %vm8073_vm10 = vmor %vm2224_vm6, %vm2225_vm7 }
 0x202   : > { %v2238_v19 = vadd.f32 %v7928_v29, %v2237_v16  ;;  %vm8056_vm8 = vcmp.eq.f32.partialorder %v2513_v55, 8.507059e+37  ;;  %6076 = vrcp.f32 %v8037_v22  ;;  %v6073_v59 = vpop.eup %6072  ;;  %v2512_v41 = vsel %vm8052_vm4, %v7921_v3, %v2508_v47  ;;  %vm8087_vm14 = vmor %vm2239_vm2, %vm2240_vm3 }
 0x203   : > { %vm2555_vm13 = vweird.f32 %v7940_v58  ;;  %6078 = vrcp.f32 %v8044_v24  ;;  %v8067_v61 = vadd.f32 %v1143_v63, %v7744_v21  ;;  %v2553_v28 = vadd.f32 %v7940_v58, %v2552_v1 }
 0x204   : > { %v8078_v13 = vadd.f32 1.0, %v6069_v56  ;;  %v8080_v3 = vadd.f32 1.0, %v6071_v30  ;;  %v5689_v23 = vmul.f32 -1.442695, %v8040_v62  ;;  %v2516_v33 = vor.u32 1.1754944e-38, %v2515_v50  ;;  %v1146_v18 = vpop.f32.mrf.mxu0 }
 0x205   : > { %vm2554_vm6 = vweird.f32 %v7904_v14  ;;  %v2558_v16 = vand.u32 2147483647, %v7904_v14  ;;  %v2560_v55 = vand.u32 2147483648, %v7904_v14  ;;  %v2227_v40 = vsel %vm8073_vm10, %v7924_v34, %v2223_v4  ;;  %v1059_v4 = vpop.f32.mrf.mxu1 }
 0x206   : > { %v2242_v52 = vsel %vm8087_vm14, %v7928_v29, %v2238_v19  ;;  %6080 = vrcp.f32 %v8078_v13  ;;  %v8101_v32 = vadd.f32 1.0, %v6073_v59  ;;  %v2217_v9 = vsel %vm7997_vm5, %v7932_v27, %v2212_v5  ;;  %vm8110_vm2 = vmor %vm2554_vm6, %vm2555_vm13  ;;  %v1085_v29 = vpop.f32.mrf.mxu2  ;;  %v1114_v5 = vpop.f32.mrf.mxu3 }
 0x207   : > { %v6075_v47 = vpop.eup %6074  ;;  %v2246_v1 = vor.u32 1.1754944e-38, %v2245_v45  ;;  %v2517_v14 = vsel %vm8056_vm8, %v2516_v33, %v2512_v41  ;;  %6082 = vrcp.f32 %v8080_v3  ;;  %v2262_v36 = vsel %vm8017_vm9, %v7943_v2, %v2257_v46 }
 0x208   : > { %v8115_v63 = vpop.eup %6076  ;;  %v2557_v27 = vsel %vm8110_vm2, %v7940_v58, %v2553_v28  ;;  %6084 = vpow2.f32 %v5689_v23  ;;  %v5692_v45 = vmul.f32 -1.442695, %v8067_v61  ;;  %v2232_v50 = vsel %vm8028_vm15, %v7979_v31, %v2227_v40 }
 0x209   : > { %v8124_v56 = vpop.eup %6078  ;;  %v2247_v30 = vsel %vm8032_vm1, %v2246_v1, %v2242_v52  ;;  %vm2559_vm13 = vcmp.eq.f32.partialorder %v2558_v16, 8.507059e+37  ;;  %v2561_v12 = vor.u32 1.1754944e-38, %v2560_v55  ;;  %v4568_v2 = vmul.f32 %v2517_v14, %v7878_v11 }
 0x20a   : > { %v2520_v58 = vmul.f32 %v8115_v63, %v8037_v22  ;;  %6086 = vrcp.f32 %v8101_v32  ;;  %v8136_v46 = vadd.f32 %v1085_v29, %v7857_v8  ;;  %v2535_v31 = vmul.f32 %v8124_v56, %v8044_v24 }
 0x20b   : > { %v2562_v19 = vsel %vm2559_vm13, %v2561_v12, %v2557_v27  ;;  %v8140_v37 = vadd.f32 1.0, %v6075_v47  ;;  %v8143_v17 = vadd.f32 %v1114_v5, %v7862_v6  ;;  %v4548_v38 = vmul.f32 %v2217_v9, %v7844_v15 }
 0x20c   : > { %v8145_v11 = vpop.eup %6080  ;;  %v4551_v59 = vmul.f32 %v2262_v36, %v7847_v53  ;;  %6088 = vpow2.f32 %v5692_v45  ;;  %v8152_v43 = vmul.f32 %v2232_v50, %v7871_v49  ;;  %v8155_v28 = vmul.f32 %v2247_v30, %v7874_v48 }
 0x20d   : > { %v8149_v41 = vpop.eup %6082  ;;  %v2805_v23 = vmul.f32 %v8145_v11, %v8078_v13  ;;  %v8160_v0 = vadd.f32 %v1059_v4, %v7741_v44  ;;  %v4571_v15 = vmul.f32 %v2562_v19, %v7883_v7  ;;  %v2521_v16 = vsub.f32 1.0, %v2520_v58 }
 0x20e   : > { %v6085_v33 = vpop.eup %6084  ;;  %v5690_v53 = vmul.f32 -1.442695, %v8136_v46  ;;  %v8165_v55 = vadd.f32 %v1146_v18, %v7744_v21  ;;  %v8167_v49 = vadd.f32 %v4568_v2, %v4548_v38  ;;  %v2536_v40 = vsub.f32 1.0, %v2535_v31 }
 0x20f   : > { %6090 = vrcp.f32 %v8140_v37  ;;  %v8171_v48 = vmul.f32 -1.442695, %v8143_v17  ;;  %v2528_v47 = vand.u32 2147483647, %v8037_v22  ;;  %v2530_v7 = vand.u32 2147483648, %v8037_v22 }
 0x210   : > { %v8173_v52 = vpop.eup %6086  ;;  %v2545_v9 = vand.u32 2147483648, %v8044_v24  ;;  %v2850_v1 = vmul.f32 %v8149_v41, %v8080_v3  ;;  %v2543_v14 = vand.u32 2147483647, %v8044_v24  ;;  %v2806_v34 = vsub.f32 1.0, %v2805_v23 }
 0x211   : > { %v8181_v29 = vadd.f32 1.0, %v6085_v33  ;;  %v8184_v36 = vmul.f32 -1.442695, %v8160_v0  ;;  %v8186_v45 = vadd.f32 %v4571_v15, %v4551_v59  ;;  %v2522_v5 = vmul.f32 %v8115_v63, %v2521_v16 }
 0x212   : > { %v6089_v27 = vpop.eup %6088  ;;  %6092 = vpow2.f32 %v5690_v53  ;;  %v8190_v50 = vmul.f32 -1.442695, %v8165_v55  ;;  %vm2524_vm5 = vweird.f32 %v8037_v22  ;;  %v2537_v30 = vmul.f32 %v8124_v56, %v2536_v40 }
 0x213   : > { %vm2539_vm7 = vweird.f32 %v8044_v24  ;;  %v2820_v12 = vmul.f32 %v8173_v52, %v8101_v32  ;;  %vm8197_vm9 = vcmp.eq.f32.partialorder %v2528_v47, 8.507059e+37  ;;  %v2531_v58 = vor.u32 1.1754944e-38, %v2530_v7 }
 0x214   : > { %v2546_v4 = vor.u32 1.1754944e-38, %v2545_v9  ;;  %v2813_v19 = vand.u32 2147483647, %v8078_v13  ;;  %v2851_v31 = vsub.f32 1.0, %v2850_v1  ;;  %vm8204_vm15 = vcmp.eq.f32.partialorder %v2543_v14, 8.507059e+37 }
 0x215   : > { %v8202_v18 = vpop.eup %6090  ;;  %v2807_v59 = vmul.f32 %v8145_v11, %v2806_v34  ;;  %v2815_v23 = vand.u32 2147483648, %v8078_v13  ;;  %6094 = vrcp.f32 %v8181_v29  ;;  %v8211_v33 = vadd.f32 1.0, %v6089_v27 }
 0x216   : > { %v2523_v15 = vadd.f32 %v8115_v63, %v2522_v5  ;;  %vm2525_vm1 = vweird.f32 %v8115_v63  ;;  %v2858_v16 = vand.u32 2147483647, %v8080_v3  ;;  %v2860_v53 = vand.u32 2147483648, %v8080_v3 }
 0x217   : > { %v2538_v40 = vadd.f32 %v8124_v56, %v2537_v30  ;;  %vm2540_vm3 = vweird.f32 %v8124_v56  ;;  %vm2809_vm4 = vweird.f32 %v8078_v13  ;;  %v2821_v47 = vsub.f32 1.0, %v2820_v12  ;;  %vm8230_vm14 = vmor %vm2524_vm5, %vm2525_vm1  ;;  %v5802_v13 = vld [vmem:[#allocation3 + $0x44] sm:$0xf] }
 0x218   : > { %v6093_v7 = vpop.eup %6092  ;;  %vm8220_vm8 = vcmp.eq.f32.partialorder %v2813_v19, 8.507059e+37  ;;  %v2852_v1 = vmul.f32 %v8149_v41, %v2851_v31  ;;  %vm2854_vm10 = vweird.f32 %v8080_v3  ;;  %v2835_v14 = vmul.f32 %v8202_v18, %v8140_v37  ;;  %vm8242_vm2 = vmor %vm2539_vm7, %vm2540_vm3 }
 0x219   : > { %v2808_v27 = vadd.f32 %v8145_v11, %v2807_v59  ;;  %vm2810_vm6 = vweird.f32 %v8145_v11  ;;  %v2816_v5 = vor.u32 1.1754944e-38, %v2815_v23  ;;  %6096 = vrcp.f32 %v8211_v33 }
 0x21a   : > { %v2527_v30 = vsel %vm8230_vm14, %v8115_v63, %v2523_v15  ;;  %vm8246_vm13 = vcmp.eq.f32.partialorder %v2858_v16, 8.507059e+37  ;;  %v2861_v19 = vor.u32 1.1754944e-38, %v2860_v53  ;;  %vm2824_vm5 = vweird.f32 %v8101_v32  ;;  %v1088_v16 = vpop.f32.mrf.mxu2  ;;  %vm8264_vm7 = vmor %vm2809_vm4, %vm2810_vm6 }
 0x21b   : > { %v2828_v31 = vand.u32 2147483647, %v8101_v32  ;;  %v8252_v59 = vpop.eup %6094  ;;  %v2542_v63 = vsel %vm8242_vm2, %v8124_v56, %v2538_v40  ;;  %v2822_v24 = vmul.f32 %v8173_v52, %v2821_v47  ;;  %v2830_v23 = vand.u32 2147483648, %v8101_v32 }
 0x21c   : > { %v2843_v15 = vand.u32 2147483647, %v8140_v37  ;;  %v2853_v34 = vadd.f32 %v8149_v41, %v2852_v1  ;;  %vm2855_vm1 = vweird.f32 %v8149_v41  ;;  %v2836_v56 = vsub.f32 1.0, %v2835_v14 }
 0x21d   : > { %v2845_v40 = vand.u32 2147483648, %v8140_v37  ;;  %v2532_v47 = vsel %vm8197_vm9, %v2531_v58, %v2527_v30  ;;  %v2812_v12 = vsel %vm8264_vm7, %v8145_v11, %v2808_v27  ;;  %v8276_v20 = vadd.f32 1.0, %v6093_v7  ;;  %v5453_v11 = vld [vmem:[#allocation3 + $0x90] sm:$0xf0]  ;;  %v5459_v58 = vld [vmem:[#allocation3 + $0x48] sm:$0xf]  ;;  %vm8298_vm9 = vmor %vm2854_vm10, %vm2855_vm1 }
 0x21e   : > { %6098 = vpow2.f32 %v8171_v48  ;;  %v2547_v1 = vsel %vm8204_vm15, %v2546_v4, %v2542_v63  ;;  %vm8281_vm3 = vcmp.eq.f32.partialorder %v2828_v31, 8.507059e+37  ;;  %vm2839_vm4 = vweird.f32 %v8140_v37  ;;  %v5813_v7 = vld [vmem:[#allocation3 + $0x94] sm:$0xf0]  ;;  %v1117_v63 = vpop.f32.mrf.mxu3  ;;  %v1148_v4 = vpop.f32.mrf.mxu0 }
 0x21f   : > { %v3105_v2 = vmul.f32 %v8252_v59, %v8181_v29  ;;  %6100 = vpow2.f32 %v8184_v36  ;;  %v8290_v48 = vadd.f32 %v1088_v16, %v7857_v8  ;;  %v8292_v14 = vpop.eup %6096  ;;  %v2823_v38 = vadd.f32 %v8173_v52, %v2822_v24 }
 0x220   : > { %vm2825_vm15 = vweird.f32 %v8173_v52  ;;  %v2831_v36 = vor.u32 1.1754944e-38, %v2830_v23  ;;  %6102 = vrcp.f32 %v8276_v20  ;;  %v2817_v27 = vsel %vm8220_vm8, %v2816_v5, %v2812_v12 }
 0x221   : > { %v2857_v30 = vsel %vm8298_vm9, %v8149_v41, %v2853_v34  ;;  %v2837_v3 = vmul.f32 %v8202_v18, %v2836_v56  ;;  %v3150_v31 = vmul.f32 %v8292_v14, %v8211_v33  ;;  %v4569_v24 = vmul.f32 %v2532_v47, %v7935_v10  ;;  %vm8325_vm8 = vmor %vm2824_vm5, %vm2825_vm15 }
 0x222   : > { %v4570_v16 = vmul.f32 %v2547_v1, %v7938_v42  ;;  %v5456_v23 = vor.u32 %v5802_v13, %v5453_v11  ;;  %v5460_v53 = vor.u32 %v5813_v7, %v5459_v58  ;;  %vm2840_vm10 = vweird.f32 %v8202_v18  ;;  %v1061_v7 = vpop.f32.mrf.mxu1 }
 0x223   : > { %v3106_v9 = vsub.f32 1.0, %v3105_v2  ;;  %6104 = vpow2.f32 %v8190_v50  ;;  %v5710_v5 = vmul.f32 -1.442695, %v8290_v48  ;;  %v4588_v34 = vmul.f32 %v2817_v27, %v7946_v54  ;;  %vm8367_vm2 = vmor %vm2839_vm4, %vm2840_vm10 }
 0x224   : > { %v6099_v41 = vpop.eup %6098  ;;  %v2862_v56 = vsel %vm8246_vm13, %v2861_v19, %v2857_v30  ;;  %v3151_v42 = vsub.f32 1.0, %v3150_v31  ;;  %1424 = vmatpush.bf16.msrb.mxu2 %v5456_v23  ;;  %1453 = vmatpush.bf16.msrb.mxu3 %v5460_v53  ;;  %v8330_v50 = vadd.f32 %v1117_v63, %v7862_v6  ;;  %v2827_v54 = vsel %vm8325_vm8, %v8173_v52, %v2823_v38 }
 0x225   : > { %v6101_v47 = vpop.eup %6100  ;;  %v2838_v22 = vadd.f32 %v8202_v18, %v2837_v3  ;;  %vm8336_vm14 = vcmp.eq.f32.partialorder %v2843_v15, 8.507059e+37  ;;  %v8340_v32 = vadd.f32 1.0, %v6099_v41  ;;  %6106 = vpow2.f32 %v5710_v5 }
 0x226   : > { %v8342_v12 = vpop.eup %6102  ;;  %v8345_v13 = vadd.f32 %v4569_v24, %v8152_v43  ;;  %v8348_v1 = vadd.f32 %v4570_v16, %v8155_v28  ;;  %v2846_v2 = vor.u32 1.1754944e-38, %v2845_v40  ;;  %v8350_v11 = vadd.f32 1.0, %v6101_v47 }
 0x227   : > { %v4591_v52 = vmul.f32 %v2862_v56, %v7949_v25  ;;  %v3107_v15 = vmul.f32 %v8252_v59, %v3106_v9  ;;  %vm3109_vm6 = vweird.f32 %v8181_v29  ;;  %v3120_v58 = vmul.f32 %v8342_v12, %v8276_v20  ;;  %5613 = vmatmul.msk.bf16.vlgmr.msrb.gmra.mxu2 %vm420_vm0, %v6765_v51  ;;  %5617 = vmatmul.msk.bf16.vlgmr.msrb.gmra.mxu3 %vm420_vm0, %v6765_v51  ;;  %v5461_v25 = vld [vmem:[#allocation3 + $0x98] sm:$0xf0] }
 0x228   : > { %v2832_v43 = vsel %vm8281_vm3, %v2831_v36, %v2827_v54  ;;  %v3152_v28 = vmul.f32 %v8292_v14, %v3151_v42  ;;  %6108 = vrcp.f32 %v8340_v32  ;;  %v5711_v40 = vmul.f32 -1.442695, %v8330_v50 }
 0x229   : > { %v6105_v38 = vpop.eup %6104  ;;  %v8375_v27 = vadd.f32 %v8167_v49, %v4588_v34  ;;  %v2842_v26 = vsel %vm8367_vm2, %v8202_v18, %v2838_v22  ;;  %v3113_v37 = vand.u32 2147483647, %v8181_v29  ;;  %v3115_v36 = vand.u32 2147483648, %v8181_v29 }
 0x22a   : > { %v3158_v30 = vand.u32 2147483647, %v8211_v33  ;;  %v3121_v3 = vsub.f32 1.0, %v3120_v58  ;;  %6110 = vrcp.f32 %v8350_v11  ;;  %v8385_v31 = vadd.f32 %v1061_v7, %v7741_v44 }
 0x22b   : > { %v6107_v63 = vpop.eup %6106  ;;  %v3108_v49 = vadd.f32 %v8252_v59, %v3107_v15  ;;  %vm3110_vm13 = vweird.f32 %v8252_v59  ;;  %vm3155_vm5 = vweird.f32 %v8292_v14  ;;  %v8391_v18 = vadd.f32 %v1148_v4, %v7744_v21 }
 0x22c   : > { %v3153_v24 = vadd.f32 %v8292_v14, %v3152_v28  ;;  %v8394_v16 = vadd.f32 1.0, %v6105_v38  ;;  %v8396_v23 = vadd.f32 1.0, %v6107_v63  ;;  %6112 = vpow2.f32 %v5711_v40  ;;  %vm8411_vm3 = vmor %vm3109_vm6, %vm3110_vm13 }
 0x22d   : > { %v4589_v53 = vmul.f32 %v2832_v43, %v7952_v60  ;;  %vm8399_vm7 = vcmp.eq.f32.partialorder %v3113_v37, 8.507059e+37  ;;  %vm3154_vm1 = vweird.f32 %v8211_v33  ;;  %v3160_v5 = vand.u32 2147483648, %v8211_v33  ;;  %v5803_v43 = vld [vmem:[#allocation3 + $0x4c] sm:$0xf] }
 0x22e   : > { %v8405_v41 = vpop.eup %6108  ;;  %v2847_v34 = vsel %vm8336_vm14, %v2846_v2, %v2842_v26  ;;  %v3122_v60 = vmul.f32 %v8342_v12, %v3121_v3  ;;  %6114 = vrcp.f32 %v8394_v16  ;;  %v5729_v10 = vmul.f32 -1.442695, %v8385_v31  ;;  %vm8423_vm4 = vmor %vm3154_vm1, %vm3155_vm5 }
 0x22f   : > { %v3112_v33 = vsel %vm8411_vm3, %v8252_v59, %v3108_v49  ;;  %v3116_v42 = vor.u32 1.1754944e-38, %v3115_v36  ;;  %6116 = vrcp.f32 %v8396_v23  ;;  %v5732_v29 = vmul.f32 -1.442695, %v8391_v18  ;;  %v1090_v36 = vpop.f32.mrf.mxu2 }
 0x230   : > { %v8429_v54 = vpop.eup %6110  ;;  %v3157_v22 = vsel %vm8423_vm4, %v8292_v14, %v3153_v24  ;;  %vm3159_vm9 = vcmp.eq.f32.partialorder %v3158_v30, 8.507059e+37  ;;  %v3128_v59 = vand.u32 2147483647, %v8276_v20  ;;  %v3135_v19 = vmul.f32 %v8405_v41, %v8340_v32  ;;  %v5812_v24 = vld [vmem:[#allocation3 + $0x8c] sm:$0xf0] }
 0x231   : > { %v4796_v2 = vadd.f32 %v8186_v45, %v4591_v52  ;;  %v4590_v15 = vmul.f32 %v2847_v34, %v7972_v39  ;;  %v3161_v58 = vor.u32 1.1754944e-38, %v3160_v5  ;;  %v3130_v7 = vand.u32 2147483648, %v8276_v20 }
 0x232   : > { %v6113_v28 = vpop.eup %6112  ;;  %v3117_v40 = vsel %vm8399_vm7, %v3116_v42, %v3112_v33  ;;  %v3123_v14 = vadd.f32 %v8342_v12, %v3122_v60  ;;  %vm3125_vm15 = vweird.f32 %v8342_v12  ;;  %6118 = vpow2.f32 %v5729_v10 }
 0x233   : > { %v3162_v4 = vsel %vm3159_vm9, %v3161_v58, %v3157_v22  ;;  %v3405_v45 = vmul.f32 %v8429_v54, %v8350_v11  ;;  %v8446_v52 = vadd.f32 1.0, %v6113_v28  ;;  %6120 = vpow2.f32 %v5732_v29 }
 0x234   : > { %v8448_v39 = vpop.eup %6114  ;;  %v8451_v38 = vadd.f32 %v8345_v13, %v4589_v53  ;;  %vm3124_vm10 = vweird.f32 %v8276_v20  ;;  %v3136_v26 = vsub.f32 1.0, %v3135_v19  ;;  %v5464_v37 = vor.u32 %v5803_v43, %v5461_v25  ;;  %v5451_v20 = vld [vmem:[#allocation3 + $0x40] sm:$0xf] }
 0x235   : > { %v8454_v30 = vpop.eup %6116  ;;  %v8457_v3 = vadd.f32 %v8348_v1, %v4590_v15  ;;  %v4608_v63 = vmul.f32 %v3117_v40, %v8040_v62  ;;  %vm8462_vm8 = vmor %vm3124_vm10, %vm3125_vm15  ;;  %v3145_v13 = vand.u32 2147483648, %v8340_v32  ;;  %6122 = vrcp.f32 %v8446_v52  ;;  %v1119_v40 = vpop.f32.mrf.mxu3 }
 0x236   : > { %v4611_v53 = vmul.f32 %v3162_v4, %v8067_v61  ;;  %v3127_v1 = vsel %vm8462_vm8, %v8342_v12, %v3123_v14  ;;  %vm8472_vm14 = vcmp.eq.f32.partialorder %v3128_v59, 8.507059e+37  ;;  %v3143_v9 = vand.u32 2147483647, %v8340_v32  ;;  %1482 = vmatpush.bf16.msrb.mxu0 %v5464_v37 }
 0x237   : > { %v3131_v5 = vor.u32 1.1754944e-38, %v3130_v7  ;;  %v3406_v34 = vsub.f32 1.0, %v3405_v45  ;;  %v3450_v56 = vmul.f32 %v8448_v39, %v8394_v16  ;;  %v8480_v60 = vadd.f32 %v1090_v36, %v7857_v8  ;;  %5614 = vmatmul.msk.bf16.gmra.mxu2 %vm420_vm0, %v6823_v35  ;;  %5618 = vmatmul.msk.bf16.gmra.mxu3 %vm420_vm0, %v6823_v35 }
 0x238   : > { %v6119_v61 = vpop.eup %6118  ;;  %v3137_v12 = vmul.f32 %v8405_v41, %v3136_v26  ;;  %vm3139_vm6 = vweird.f32 %v8340_v32  ;;  %v3420_v10 = vmul.f32 %v8454_v30, %v8396_v23  ;;  %v5452_v33 = vor.u32 %v5812_v24, %v5451_v20  ;;  %v1064_v26 = vpop.f32.mrf.mxu1 }
 0x239   : > { %v6121_v42 = vpop.eup %6120  ;;  %v8491_v47 = vadd.f32 %v8375_v27, %v4608_v63  ;;  %v3132_v29 = vsel %vm8472_vm14, %v3131_v5, %v3127_v1  ;;  %v3146_v22 = vor.u32 1.1754944e-38, %v3145_v13  ;;  %v3413_v59 = vand.u32 2147483647, %v8350_v11  ;;  %5621 = vmatmul.msk.bf16.vlgmr.msrb.gmra.mxu0 %vm420_vm0, %v6765_v51  ;;  %v1151_v20 = vpop.f32.mrf.mxu0 }
 0x23a   : > { %v8498_v19 = vadd.f32 %v4796_v2, %v4611_v53  ;;  %vm8500_vm2 = vcmp.eq.f32.partialorder %v3143_v9, 8.507059e+37  ;;  %vm3409_vm13 = vweird.f32 %v8350_v11  ;;  %v3415_v27 = vand.u32 2147483648, %v8350_v11  ;;  %1395 = vmatpush.bf16.msrb.mxu1 %v5452_v33 }
 0x23b   : > { %v8506_v58 = vadd.f32 1.0, %v6119_v61  ;;  %v8508_v7 = vpop.eup %6122  ;;  %v3407_v43 = vmul.f32 %v8429_v54, %v3406_v34  ;;  %v3451_v25 = vsub.f32 1.0, %v3450_v56  ;;  %v3460_v28 = vand.u32 2147483648, %v8394_v16  ;;  %v1093_v61 = vpop.f32.mrf.mxu2 }
 0x23c   : > { %v8512_v2 = vadd.f32 1.0, %v6121_v42  ;;  %v4609_v14 = vmul.f32 %v3132_v29, %v8136_v46  ;;  %v3138_v4 = vadd.f32 %v8405_v41, %v3137_v12  ;;  %vm3140_vm5 = vweird.f32 %v8405_v41 }
 0x23d   : > { %v3421_v45 = vsub.f32 1.0, %v3420_v10  ;;  %vm8517_vm7 = vcmp.eq.f32.partialorder %v3413_v59, 8.507059e+37  ;;  %v3430_v36 = vand.u32 2147483648, %v8396_v23  ;;  %v3435_v63 = vmul.f32 %v8508_v7, %v8446_v52  ;;  %5609 = vmatmul.msk.bf16.vlgmr.msrb.gmra.mxu1 %vm420_vm0, %v6765_v51  ;;  %vm8533_vm4 = vmor %vm3139_vm6, %vm3140_vm5 }
 0x23e   : > { %6124 = vrcp.f32 %v8506_v58  ;;  %v5730_v49 = vmul.f32 -1.442695, %v8480_v60  ;;  %vm3410_vm1 = vweird.f32 %v8429_v54  ;;  %v3416_v46 = vor.u32 1.1754944e-38, %v3415_v27 }
 0x23f   : > { %vm3454_vm3 = vweird.f32 %v8394_v16  ;;  %v3458_v13 = vand.u32 2147483647, %v8394_v16  ;;  %v3408_v53 = vadd.f32 %v8429_v54, %v3407_v43  ;;  %v3452_v1 = vmul.f32 %v8448_v39, %v3451_v25  ;;  %vm8553_vm15 = vmor %vm3409_vm13, %vm3410_vm1 }
 0x240   : > { %v3428_v51 = vand.u32 2147483647, %v8396_v23  ;;  %6126 = vrcp.f32 %v8512_v2  ;;  %v3142_v62 = vsel %vm8533_vm4, %v8405_v41, %v3138_v4  ;;  %v3461_v9 = vor.u32 1.1754944e-38, %v3460_v28 }
 0x241   : > { %v3422_v5 = vmul.f32 %v8454_v30, %v3421_v45  ;;  %vm3424_vm9 = vweird.f32 %v8396_v23  ;;  %v8547_v32 = vadd.f32 %v8451_v38, %v4609_v14  ;;  %v3431_v34 = vor.u32 1.1754944e-38, %v3430_v36  ;;  %v1122_v45 = vpop.f32.mrf.mxu3 }
 0x242   : > { %v3436_v56 = vsub.f32 1.0, %v3435_v63  ;;  %6128 = vpow2.f32 %v5730_v49  ;;  %vm3455_vm10 = vweird.f32 %v8448_v39  ;;  %vm8558_vm8 = vcmp.eq.f32.partialorder %v3458_v13, 8.507059e+37 }
 0x243   : > { %vm3425_vm14 = vweird.f32 %v8454_v30  ;;  %v8564_v38 = vadd.f32 %v1119_v40, %v7862_v6  ;;  %v8567_v10 = vadd.f32 %v1064_v26, %v7741_v44  ;;  %v3147_v11 = vsel %vm8500_vm2, %v3146_v22, %v3142_v62  ;;  %vm8605_vm2 = vmor %vm3454_vm3, %vm3455_vm10 }
 0x244   : > { %v8569_v33 = vpop.eup %6124  ;;  %v3412_v42 = vsel %vm8553_vm15, %v8429_v54, %v3408_v53  ;;  %v3453_v29 = vadd.f32 %v8448_v39, %v3452_v1  ;;  %vm8577_vm6 = vcmp.eq.f32.partialorder %v3428_v51, 8.507059e+37  ;;  %vm3439_vm13 = vweird.f32 %v8446_v52  ;;  %vm8618_vm5 = vmor %vm3424_vm9, %vm3425_vm14  ;;  %v1153_v1 = vpop.f32.mrf.mxu0 }
 0x245   : > { %v8583_v27 = vadd.f32 %v1151_v20, %v7744_v21  ;;  %v3423_v43 = vadd.f32 %v8454_v30, %v3422_v5  ;;  %v3705_v22 = vmul.f32 %v8569_v33, %v8506_v58  ;;  %v5731_v15 = vmul.f32 -1.442695, %v8564_v38  ;;  %v1066_v20 = vpop.f32.mrf.mxu1 }
 0x246   : > { %v8590_v54 = vadd.f32 %v1093_v61, %v7857_v8  ;;  %v8592_v25 = vpop.eup %6126  ;;  %v3437_v28 = vmul.f32 %v8508_v7, %v3436_v56  ;;  %v3443_v40 = vand.u32 2147483647, %v8446_v52  ;;  %v3445_v14 = vand.u32 2147483648, %v8446_v52 }
 0x247   : > { %v5749_v4 = vmul.f32 -1.442695, %v8567_v10  ;;  %v4610_v26 = vmul.f32 %v3147_v11, %v8143_v17  ;;  %v3417_v36 = vsel %vm8517_vm7, %v3416_v46, %v3412_v42  ;;  %v3706_v49 = vsub.f32 1.0, %v3705_v22  ;;  %5615 = vmatmul.msk.bf16.gmra.mxu2 %vm420_vm0, %v6862_v57  ;;  %5619 = vmatmul.msk.bf16.gmra.mxu3 %vm420_vm0, %v6862_v57 }
 0x248   : > { %v3750_v13 = vmul.f32 %v8592_v25, %v8512_v2  ;;  %v6129_v24 = vpop.eup %6128  ;;  %v3457_v17 = vsel %vm8605_vm2, %v8448_v39, %v3453_v29  ;;  %vm3440_vm7 = vweird.f32 %v8508_v7  ;;  %6130 = vpow2.f32 %v5731_v15 }
 0x249   : > { %v5752_v37 = vmul.f32 -1.442695, %v8583_v27  ;;  %v3427_v39 = vsel %vm8618_vm5, %v8454_v30, %v3423_v43  ;;  %v8631_v23 = vadd.f32 1.0, %v6129_v24  ;;  %v5750_v46 = vmul.f32 -1.442695, %v8590_v54  ;;  %5622 = vmatmul.msk.bf16.gmra.mxu0 %vm420_vm0, %v6823_v35  ;;  %vm8664_vm3 = vmor %vm3439_vm13, %vm3440_vm7 }
 0x24a   : > { %v8635_v53 = vadd.f32 %v1122_v45, %v7862_v6  ;;  %v3438_v51 = vadd.f32 %v8508_v7, %v3437_v28  ;;  %v3707_v62 = vmul.f32 %v8569_v33, %v3706_v49  ;;  %6132 = vpow2.f32 %v5749_v4 }
 0x24b   : > { %v8640_v5 = vadd.f32 %v1066_v20, %v7741_v44  ;;  %v8645_v30 = vmul.f32 %v3417_v36, %v8160_v0  ;;  %vm8647_vm1 = vcmp.eq.f32.partialorder %v3443_v40, 8.507059e+37  ;;  %v3751_v61 = vsub.f32 1.0, %v3750_v13  ;;  %v1095_v20 = vpop.f32.mrf.mxu2 }
 0x24c   : > { %6134 = vrcp.f32 %v8631_v23  ;;  %v3462_v12 = vsel %vm8558_vm8, %v3461_v9, %v3457_v17  ;;  %v3713_v11 = vand.u32 2147483647, %v8506_v58  ;;  %v8656_v44 = vadd.f32 %v1153_v1, %v7744_v21 }
 0x24d   : > { %6136 = vpow2.f32 %v5752_v37  ;;  %v3432_v0 = vsel %vm8577_vm6, %v3431_v34, %v3427_v39  ;;  %v3715_v41 = vand.u32 2147483648, %v8506_v58  ;;  %v5751_v9 = vmul.f32 -1.442695, %v8635_v53  ;;  %5610 = vmatmul.msk.bf16.gmra.mxu1 %vm420_vm0, %v6823_v35  ;;  %v1124_v39 = vpop.f32.mrf.mxu3 }
 0x24e   : > { %6138 = vpow2.f32 %v5750_v46  ;;  %v6131_v29 = vpop.eup %6130  ;;  %v3442_v21 = vsel %vm8664_vm3, %v8508_v7, %v3438_v51  ;;  %v3708_v34 = vadd.f32 %v8569_v33, %v3707_v62  ;;  %vm3710_vm4 = vweird.f32 %v8569_v33 }
 0x24f   : > { %v5769_v52 = vmul.f32 -1.442695, %v8640_v5  ;;  %v4784_v59 = vadd.f32 %v8457_v3, %v4610_v26  ;;  %v3446_v43 = vor.u32 1.1754944e-38, %v3445_v14  ;;  %v3752_v22 = vmul.f32 %v8592_v25, %v3751_v61 }
 0x250   : > { %v8680_v15 = vadd.f32 1.0, %v6131_v29  ;;  %v6133_v28 = vpop.eup %6132  ;;  %v4631_v40 = vmul.f32 %v3462_v12, %v8165_v55  ;;  %vm3709_vm9 = vweird.f32 %v8506_v58  ;;  %vm8684_vm15 = vcmp.eq.f32.partialorder %v3713_v11, 8.507059e+37 }
 0x251   : > { %v5772_v4 = vmul.f32 -1.442695, %v8656_v44  ;;  %v4629_v35 = vmul.f32 %v3432_v0, %v8290_v48  ;;  %v3447_v3 = vsel %vm8647_vm1, %v3446_v43, %v3442_v21  ;;  %vm8696_vm10 = vmor %vm3709_vm9, %vm3710_vm4  ;;  %v3716_v55 = vor.u32 1.1754944e-38, %v3715_v41  ;;  %v12275_v41 = vld [vmem:[#allocation6_spill] sm:$0xff] }
 0x252   : > { %v8689_v45 = vpop.eup %6134  ;;  %6140 = vpow2.f32 %v5751_v9  ;;  %v3712_v26 = vsel %vm8696_vm10, %v8569_v33, %v3708_v34  ;;  %vm3755_vm8 = vweird.f32 %v8592_v25  ;;  %v3753_v63 = vadd.f32 %v8592_v25, %v3752_v22 }
 0x253   : > { %v6137_v58 = vpop.eup %6136  ;;  %v3720_v48 = vmul.f32 %v8689_v45, %v8631_v23  ;;  %6142 = vpow2.f32 %v5769_v52  ;;  %v8708_v49 = vadd.f32 1.0, %v6133_v28  ;;  %v3760_v24 = vand.u32 2147483648, %v8512_v2 }
 0x254   : > { %v6139_v36 = vpop.eup %6138  ;;  %6144 = vrcp.f32 %v8680_v15  ;;  %v8710_v13 = vadd.f32 1.0, %v6137_v58  ;;  %v4630_v16 = vmul.f32 %v3447_v3, %v8330_v50  ;;  %vm3754_vm14 = vweird.f32 %v8512_v2 }
 0x255   : > { %v3721_v17 = vsub.f32 1.0, %v3720_v48  ;;  %v8713_v33 = vadd.f32 1.0, %v6139_v36  ;;  %6146 = vpow2.f32 %v5772_v4  ;;  %v3758_v37 = vand.u32 2147483647, %v8512_v2  ;;  %vm8723_vm6 = vmor %vm3754_vm14, %vm3755_vm8 }
 0x256   : > { %6148 = vrcp.f32 %v8708_v49  ;;  %v3717_v46 = vsel %vm8684_vm15, %v3716_v55, %v3712_v26  ;;  %v8730_v50 = vadd.f32 %v1095_v20, %v7857_v8  ;;  %v3757_v62 = vsel %vm8723_vm6, %v8592_v25, %v3753_v63 }
 0x257   : > { %v3722_v51 = vmul.f32 %v8689_v45, %v3721_v17  ;;  %6150 = vrcp.f32 %v8710_v13  ;;  %v3728_v56 = vand.u32 2147483647, %v8631_v23  ;;  %v3730_v61 = vand.u32 2147483648, %v8631_v23  ;;  %5616 = vmatmul.msk.bf16.gmra.mxu2 %vm420_vm0, %v12275_v41  ;;  %5620 = vmatmul.msk.bf16.gmra.mxu3 %vm420_vm0, %v12275_v41 }
 0x258   : > { %v6141_v2 = vpop.eup %6140  ;;  %6152 = vrcp.f32 %v8713_v33  ;;  %v4759_v11 = vadd.f32 %v8491_v47, %v8645_v30  ;;  %v4798_v0 = vadd.f32 %v8498_v19, %v4631_v40  ;;  %v3761_v42 = vor.u32 1.1754944e-38, %v3760_v24 }
 0x259   : > { %v6143_v12 = vpop.eup %6142  ;;  %v8742_v8 = vadd.f32 %v1124_v39, %v7862_v6  ;;  %v8751_v9 = vadd.f32 %v8547_v32, %v4629_v35  ;;  %v8753_v29 = vadd.f32 %v4784_v59, %v4630_v16  ;;  %v4648_v47 = vmul.f32 %v3717_v46, %v8385_v31  ;;  %5623 = vmatmul.msk.bf16.gmra.mxu0 %vm420_vm0, %v6862_v57 }
 0x25a   : > { %v8748_v25 = vpop.eup %6144  ;;  %vm3759_vm13 = vcmp.eq.f32.partialorder %v3758_v37, 8.507059e+37  ;;  %v3723_v6 = vadd.f32 %v8689_v45, %v3722_v51  ;;  %vm3725_vm2 = vweird.f32 %v8689_v45  ;;  %v5770_v21 = vmul.f32 -1.442695, %v8730_v50 }
 0x25b   : > { %v6147_v19 = vpop.eup %6146  ;;  %v3762_v30 = vsel %vm3759_vm13, %v3761_v42, %v3757_v62  ;;  %vm3724_vm5 = vweird.f32 %v8631_v23  ;;  %vm8764_vm7 = vcmp.eq.f32.partialorder %v3728_v56, 8.507059e+37  ;;  %v3731_v31 = vor.u32 1.1754944e-38, %v3730_v61 }
 0x25c   : > { %v8761_v34 = vpop.eup %6148  ;;  %v8768_v52 = vadd.f32 1.0, %v6141_v2  ;;  %v3735_v43 = vmul.f32 %v8748_v25, %v8680_v15  ;;  %v8776_v28 = vadd.f32 1.0, %v6143_v12  ;;  %v8779_v40 = vmul.f32 -1.442695, %v8742_v8  ;;  %vm8788_vm1 = vmor %vm3724_vm5, %vm3725_vm2 }
 0x25d   : > { %v8770_v59 = vpop.eup %6150  ;;  %v4005_v22 = vmul.f32 %v8761_v34, %v8708_v49  ;;  %v8783_v7 = vadd.f32 %v4759_v11, %v4648_v47  ;;  %v4651_v4 = vmul.f32 %v3762_v30, %v8391_v18  ;;  %v3743_v3 = vand.u32 2147483647, %v8680_v15  ;;  %5611 = vmatmul.msk.bf16.gmra.mxu1 %vm420_vm0, %v6862_v57 }
 0x25e   : > { %v8781_v23 = vpop.eup %6152  ;;  %v4050_v14 = vmul.f32 %v8770_v59, %v8710_v13  ;;  %v3727_v55 = vsel %vm8788_vm1, %v8689_v45, %v3723_v6  ;;  %6154 = vpow2.f32 %v5770_v21  ;;  %v3745_v18 = vand.u32 2147483648, %v8680_v15 }
 0x25f   : > { %v4006_v58 = vsub.f32 1.0, %v4005_v22  ;;  %v4020_v26 = vmul.f32 %v8781_v23, %v8713_v33  ;;  %6156 = vrcp.f32 %v8768_v52  ;;  %v8804_v36 = vadd.f32 1.0, %v6147_v19 }
 0x260   : > { %v4051_v48 = vsub.f32 1.0, %v4050_v14  ;;  %v3736_v63 = vsub.f32 1.0, %v3735_v43  ;;  %v4013_v45 = vand.u32 2147483647, %v8708_v49  ;;  %6158 = vrcp.f32 %v8776_v28 }
 0x261   : > { %v4007_v20 = vmul.f32 %v8761_v34, %v4006_v58  ;;  %v3732_v24 = vsel %vm8764_vm7, %v3731_v31, %v3727_v55  ;;  %vm4010_vm3 = vweird.f32 %v8761_v34  ;;  %v4015_v57 = vand.u32 2147483648, %v8708_v49 }
 0x262   : > { %v4052_v17 = vmul.f32 %v8770_v59, %v4051_v48  ;;  %v4058_v37 = vand.u32 2147483647, %v8710_v13  ;;  %v4060_v39 = vand.u32 2147483648, %v8710_v13  ;;  %v4021_v46 = vsub.f32 1.0, %v4020_v26 }
 0x263   : > { %v4008_v16 = vadd.f32 %v8761_v34, %v4007_v20  ;;  %v8817_v1 = vadd.f32 %v4798_v0, %v4651_v4  ;;  %vm4009_vm4 = vweird.f32 %v8708_v49  ;;  %v4030_v51 = vand.u32 2147483648, %v8713_v33 }
 0x264   : > { %6160 = vrcp.f32 %v8804_v36  ;;  %v6155_v2 = vpop.eup %6154  ;;  %v4649_v62 = vmul.f32 %v3732_v24, %v8480_v60  ;;  %v3737_v56 = vmul.f32 %v8748_v25, %v3736_v63  ;;  %v8824_v61 = vor.u32 1.1754944e-38, %v3745_v18  ;;  %vm8828_vm9 = vmor %vm4009_vm4, %vm4010_vm3  ;;  %v8878_v18 = vld [vmem:[%s12093_s4 + $0x8] sm:$0xff] }
 0x265   : > { %vm4054_vm15 = vweird.f32 %v8710_v13  ;;  %v8833_v49 = vpop.eup %6156  ;;  %v4012_v11 = vsel %vm8828_vm9, %v8761_v34, %v4008_v16  ;;  %vm4014_vm10 = vcmp.eq.f32.partialorder %v4013_v45, 8.507059e+37  ;;  %v4053_v60 = vadd.f32 %v8770_v59, %v4052_v17 }
 0x266   : > { %vm4055_vm8 = vweird.f32 %v8770_v59  ;;  %v6159_v0 = vpop.eup %6158  ;;  %v4016_v42 = vor.u32 1.1754944e-38, %v4015_v57  ;;  %vm8840_vm14 = vcmp.eq.f32.partialorder %v4058_v37, 8.507059e+37  ;;  %v4061_v19 = vor.u32 1.1754944e-38, %v4060_v39 }
 0x267   : > { %v4022_v30 = vmul.f32 %v8781_v23, %v4021_v46  ;;  %vm3740_vm6 = vweird.f32 %v8748_v25  ;;  %vm4024_vm13 = vweird.f32 %v8713_v33  ;;  %v4028_v6 = vand.u32 2147483647, %v8713_v33  ;;  %vm8859_vm2 = vmor %vm4054_vm15, %vm4055_vm8  ;;  %v1165_v46 = vpop.f32.mrf.mxu1 }
 0x268   : > { %v8848_v21 = vor.u32 1.1754944e-38, %v4030_v51  ;;  %v4305_v34 = vmul.f32 %v6159_v0, %v8776_v28  ;;  %v8852_v32 = vadd.f32 %v8751_v9, %v4649_v62  ;;  %v8855_v31 = vadd.f32 %v8748_v25, %v3737_v56 }
 0x269   : > { %v4017_v43 = vsel %vm4014_vm10, %v4016_v42, %v4012_v11  ;;  %v4035_v4 = vmul.f32 %v8833_v49, %v8768_v52  ;;  %vm3739_vm5 = vweird.f32 %v8680_v15  ;;  %v4057_v9 = vsel %vm8859_vm2, %v8770_v59, %v4053_v60  ;;  %5624 = vmatmul.msk.bf16.gmra.mxu0 %vm420_vm0, %v12275_v41 }
 0x26a   : > { %v6161_v35 = vpop.eup %6160  ;;  %vm4025_vm7 = vweird.f32 %v8781_v23  ;;  %v4306_v14 = vsub.f32 1.0, %v4305_v34  ;;  %vm4309_vm1 = vweird.f32 %v8776_v28  ;;  %v4023_v13 = vadd.f32 %v8781_v23, %v4022_v30 }
 0x26b   : > { %v4313_v55 = vand.u32 2147483647, %v8776_v28  ;;  %v4315_v58 = vand.u32 2147483648, %v8776_v28  ;;  %v4350_v26 = vmul.f32 %v6161_v35, %v8804_v36  ;;  %v4668_v59 = vmul.f32 %v4017_v43, %v8567_v10  ;;  %vm8896_vm9 = vmor %vm4024_vm13, %vm4025_vm7 }
 0x26c   : > { %vm8883_vm3 = vcmp.eq.f32.partialorder %v4028_v6, 8.507059e+37  ;;  %v4307_v63 = vmul.f32 %v6159_v0, %v4306_v14  ;;  %vm4310_vm4 = vweird.f32 %v6159_v0  ;;  %v8887_v20 = vadd.f32 1.0, %v6155_v2  ;;  %vm8933_vm7 = vmor %vm3739_vm5, %vm3740_vm6 }
 0x26d   : > { %v4062_v45 = vsel %vm8840_vm14, %v4061_v19, %v4057_v9  ;;  %v4036_v24 = vsub.f32 1.0, %v4035_v4  ;;  %v4351_v57 = vsub.f32 1.0, %v4350_v26  ;;  %6162 = vpow2.f32 %v8779_v40  ;;  %vm4311_vm15 = vmor %vm4309_vm1, %vm4310_vm4  ;;  %5612 = vmatmul.msk.bf16.gmra.mxu1 %vm420_vm0, %v12275_v41 }
 0x26e   : > { %v4308_v17 = vadd.f32 %v6159_v0, %v4307_v63  ;;  %v4360_v16 = vand.u32 2147483648, %v8804_v36  ;;  %6164 = vrcp.f32 %v8887_v20  ;;  %v8903_v37 = vperm.slane %v8878_v18, 0 }
 0x26f   : > { %v4316_v40 = vor.u32 1.1754944e-38, %v4315_v58  ;;  %v4352_v39 = vmul.f32 %v6161_v35, %v4351_v57  ;;  %vm4355_vm10 = vweird.f32 %v6161_v35  ;;  %v4358_v33 = vand.u32 2147483647, %v8804_v36  ;;  %v1223_v57 = vpop.f32.mrf.mxu3 }
 0x270   : > { %v4027_v51 = vsel %vm8896_vm9, %v8781_v23, %v4023_v13  ;;  %v4043_v2 = vand.u32 2147483647, %v8768_v52  ;;  %v4312_v62 = vsel %vm4311_vm15, %v6159_v0, %v4308_v17  ;;  %vm4314_vm8 = vcmp.eq.f32.partialorder %v4313_v55, 8.507059e+37  ;;  %v1252_v13 = vpop.f32.mrf.mxu0 }
 0x271   : > { %vm8916_vm14 = vcmp.eq.f32.partialorder %v3743_v3, 8.507059e+37  ;;  %v4671_v56 = vmul.f32 %v4062_v45, %v8583_v27  ;;  %v4317_v12 = vsel %vm4314_vm8, %v4316_v40, %v4312_v62  ;;  %v4353_v11 = vadd.f32 %v6161_v35, %v4352_v39  ;;  %v1167_v62 = vpop.f32.mrf.mxu1 }
 0x272   : > { %vm4354_vm0 = vweird.f32 %v8804_v36  ;;  %v4761_v41 = vadd.f32 %v8783_v7, %v4668_v59  ;;  %vm4039_vm13 = vweird.f32 %v8768_v52  ;;  %v4688_v23 = vmul.f32 %v4317_v12, %v8640_v5  ;;  %v1194_v59 = vpop.f32.mrf.mxu2 }
 0x273   : > { %vm4356_vm2 = vmor %vm4354_vm0, %vm4355_vm10  ;;  %v4361_v60 = vor.u32 1.1754944e-38, %v4360_v16  ;;  %v8927_v3 = vadd.f32 %v1165_v46, %v8903_v37  ;;  %v6163_v0 = vpop.eup %6162  ;;  %v4037_v7 = vmul.f32 %v8833_v49, %v4036_v24  ;;  %v4045_v36 = vand.u32 2147483648, %v8768_v52 }
 0x274   : > { %v4357_v5 = vsel %vm4356_vm2, %v6161_v35, %v4353_v11  ;;  %vm4359_vm1 = vcmp.eq.f32.partialorder %v4358_v33, 8.507059e+37  ;;  %v6165_v42 = vpop.eup %6164  ;;  %v3742_v47 = vsel %vm8933_vm7, %v8748_v25, %v8855_v31  ;;  %vm4040_vm4 = vweird.f32 %v8833_v49 }
 0x275   : > { %v4762_v19 = vadd.f32 %v4761_v41, %v4688_v23  ;;  %v4362_v15 = vsel %vm4359_vm1, %v4361_v60, %v4357_v5  ;;  %v4800_v30 = vadd.f32 %v8817_v1, %v4671_v56  ;;  %v4032_v6 = vsel %vm8883_vm3, %v8848_v21, %v4027_v51  ;;  %vm8977_vm5 = vmor %vm4039_vm13, %vm4040_vm4 }
 0x276   : > { %v4691_v34 = vmul.f32 %v4362_v15, %v8656_v44  ;;  %v4320_v43 = vmul.f32 %v6165_v42, %v8887_v20  ;;  %v8950_v4 = vadd.f32 1.0, %v6163_v0  ;;  %v5633_v35 = vmul.f32 -1.442695, %v8927_v3 }
 0x277   : > { %v4763_v22 = vrot.slane %v4762_v19, 4  ;;  %v8954_v25 = vperm.slane %v8878_v18, 3  ;;  %v4038_v31 = vadd.f32 %v8833_v49, %v4037_v7  ;;  %v4328_v14 = vand.u32 2147483647, %v8887_v20 }
 0x278   : > { %v4801_v9 = vadd.f32 %v4800_v30, %v4691_v34  ;;  %v4321_v1 = vsub.f32 1.0, %v4320_v43  ;;  %v4330_v44 = vand.u32 2147483648, %v8887_v20  ;;  %6166 = vrcp.f32 %v8950_v4 }
 0x279   : > { %v4764_v21 = vadd.f32 %v4763_v22, %v4762_v19  ;;  %v8961_v55 = vperm.slane %v8878_v18, 1  ;;  %vm4325_vm6 = vweird.f32 %v6165_v42  ;;  %v8964_v48 = vperm.slane %v8878_v18, 2 }
 0x27a   : > { %v4802_v58 = vrot.slane %v4801_v9, 4  ;;  %v4322_v26 = vmul.f32 %v6165_v42, %v4321_v1  ;;  %v3747_v63 = vsel %vm8916_vm14, %v8824_v61, %v3742_v47  ;;  %v4046_v45 = vor.u32 1.1754944e-38, %v4045_v36 }
 0x27b   : > { %6168 = vpow2.f32 %v5633_v35  ;;  %v8970_v24 = vadd.f32 %v1252_v13, %v8954_v25  ;;  %v4669_v10 = vmul.f32 %v4032_v6, %v8590_v54  ;;  %vm4324_vm3 = vweird.f32 %v8887_v20 }
 0x27c   : > { %v4803_v18 = vadd.f32 %v4802_v58, %v4801_v9  ;;  %v4323_v16 = vadd.f32 %v6165_v42, %v4322_v26  ;;  %v4765_v61 = vrot.slane %v4764_v21, 2  ;;  %vm4326_vm9 = vmor %vm4324_vm3, %vm4325_vm6  ;;  %v4331_v40 = vor.u32 1.1754944e-38, %v4330_v44 }
 0x27d   : > { %v5636_v39 = vmul.f32 -1.442695, %v8970_v24  ;;  %v8984_v33 = vadd.f32 %v1194_v59, %v8961_v55  ;;  %v4042_v54 = vsel %vm8977_vm5, %v8833_v49, %v4038_v31  ;;  %vm4329_vm15 = vcmp.eq.f32.partialorder %v4328_v14, 8.507059e+37 }
 0x27e   : > { %v4327_v46 = vsel %vm4326_vm9, %v6165_v42, %v4323_v16  ;;  %v8990_v51 = vadd.f32 %v1223_v57, %v8964_v48  ;;  %v6167_v28 = vpop.eup %6166  ;;  %v4804_v20 = vrot.slane %v4803_v18, 2  ;;  %v4774_v11 = vadd.f32 %v8852_v32, %v4669_v10  ;;  %v1196_v57 = vpop.f32.mrf.mxu2 }
 0x27f   : > { %v4332_v56 = vsel %vm4329_vm15, %v4331_v40, %v4327_v46  ;;  %6170 = vpow2.f32 %v5636_v39  ;;  %v5634_v12 = vmul.f32 -1.442695, %v8984_v33  ;;  %vm4044_vm10 = vcmp.eq.f32.partialorder %v4043_v2, 8.507059e+37 }
 0x280   : > { %v4689_v41 = vmul.f32 %v4332_v56, %v8730_v50  ;;  %v4335_v49 = vmul.f32 %v6167_v28, %v8950_v4  ;;  %v4047_v60 = vsel %vm4044_vm10, %v4046_v45, %v4042_v54  ;;  %v4766_v0 = vadd.f32 %v4765_v61, %v4764_v21 }
 0x281   : > { %v6169_v23 = vpop.eup %6168  ;;  %6172 = vpow2.f32 %v5634_v12  ;;  %v8999_v27 = vadd.f32 %v1167_v62, %v8903_v37  ;;  %v5635_v32 = vmul.f32 -1.442695, %v8990_v51  ;;  %v4650_v52 = vmul.f32 %v3747_v63, %v8564_v38  ;;  %v1225_v62 = vpop.f32.mrf.mxu3 }
 0x282   : > { %v4775_v7 = vadd.f32 %v4774_v11, %v4689_v41  ;;  %v4336_v36 = vsub.f32 1.0, %v4335_v49  ;;  %v9001_v5 = vadd.f32 1.0, %v6169_v23  ;;  %v4805_v2 = vadd.f32 %v4804_v20, %v4803_v18 }
 0x283   : > { %v4343_v50 = vand.u32 2147483647, %v8950_v4  ;;  %v4345_v42 = vand.u32 2147483648, %v8950_v4  ;;  %vm4340_vm8 = vweird.f32 %v6167_v28  ;;  %v4670_v30 = vmul.f32 %v4047_v60, %v8635_v53  ;;  %v1254_v53 = vpop.f32.mrf.mxu0 }
 0x284   : > { %v4776_v47 = vrot.slane %v4775_v7, 4  ;;  %v4337_v19 = vmul.f32 %v6167_v28, %v4336_v36  ;;  %6174 = vrcp.f32 %v9001_v5  ;;  %v4767_v6 = vrot.slane %v4766_v0, 1 }
 0x285   : > { %v6171_v15 = vpop.eup %6170  ;;  %vm4339_vm14 = vweird.f32 %v8950_v4  ;;  %v5653_v34 = vmul.f32 -1.442695, %v8999_v27  ;;  %6176 = vpow2.f32 %v5635_v32  ;;  %v4786_v31 = vadd.f32 %v8753_v29, %v4650_v52 }
 0x286   : > { %v4777_v43 = vadd.f32 %v4776_v47, %v4775_v7  ;;  %v4338_v38 = vadd.f32 %v6167_v28, %v4337_v19  ;;  %v9011_v22 = vadd.f32 1.0, %v6171_v15  ;;  %vm4341_vm0 = vmor %vm4339_vm14, %vm4340_vm8  ;;  %vm4344_vm13 = vcmp.eq.f32.partialorder %v4343_v50, 8.507059e+37 }
 0x287   : > { %v6173_v35 = vpop.eup %6172  ;;  %v4346_v9 = vor.u32 1.1754944e-38, %v4345_v42  ;;  %v4806_v1 = vrot.slane %v4805_v2, 1  ;;  %v4787_v4 = vadd.f32 %v4786_v31, %v4670_v30  ;;  %vm5177_vm2 = vsmask.f32 256 }
 0x288   : > { %v4778_v14 = vrot.slane %v4777_v43, 2  ;;  %v4342_v13 = vsel %vm4341_vm0, %v6167_v28, %v4338_v38  ;;  %6178 = vrcp.f32 %v9011_v22  ;;  %v9015_v44 = vadd.f32 1.0, %v6173_v35  ;;  %vm9040_vm15 = vmand %vm12099_vm11, %vm5177_vm2 }
 0x289   : > { %v4347_v21 = vsel %vm4344_vm13, %v4346_v9, %v4342_v13  ;;  %v9019_v26 = vadd.f32 %v4767_v6, %v4766_v0  ;;  %6180 = vpow2.f32 %v5653_v34  ;;  %vm5179_vm7 = vcmask 1041409  }
 0x28a   : > { %v9017_v58 = vpop.eup %6174  ;;  %v4779_v59 = vadd.f32 %v4778_v14, %v4777_v43  ;;  %v4690_v29 = vmul.f32 %v4347_v21, %v8742_v8  ;;  %vm5180_vm1 = vsmask.f32 1280  ;;  %v9025_v45 = vadd.f32 %v1254_v53, %v8954_v25 }
 0x28b   : > { %v2265_v63 = vmul.f32 %v9017_v58, %v9001_v5  ;;  %v6177_v10 = vpop.eup %6176  ;;  %v9027_v17 = vadd.f32 %v4806_v1, %v4805_v2  ;;  %vm5184_vm4 = vsmask.f32 2304  ;;  %v2273_v16 = vand.u32 2147483647, %v9001_v5  ;;  %vm9053_vm10 = vmand %vm5179_vm7, %vm5180_vm1 }
 0x28c   : > { %v4788_v18 = vadd.f32 %v4787_v4, %v4690_v29  ;;  %v4780_v61 = vrot.slane %v4779_v59, 1  ;;  %6182 = vrcp.f32 %v9015_v44  ;;  %v4990_v39 = vrot.slane %v9019_v26, 4  ;;  %vm5182_vm7 = vmor %vm9053_vm10, %vm9040_vm15 }
 0x28d   : > { %v2266_v40 = vsub.f32 1.0, %v2265_v63  ;;  %vm12101_vm6 = vcmask 1044484   ;;  %vm5187_vm5 = vcmask 1043459   ;;  %vm5188_vm3 = vsmask.f32 3328  ;;  %vm9079_vm11 = vmand %vm12100_vm12, %vm5184_vm4 }
 0x28e   : > { %v9031_v8 = vpop.eup %6178  ;;  %v4789_v54 = vrot.slane %v4788_v18, 4  ;;  %vm2269_vm9 = vweird.f32 %v9001_v5  ;;  %v9036_v46 = vadd.f32 %v1196_v57, %v8961_v55  ;;  %v9047_v56 = vadd.f32 1.0, %v6177_v10  ;;  %vm9128_vm15 = vmand %vm5187_vm5, %vm5188_vm3 }
 0x28f   : > { %v2267_v28 = vmul.f32 %v9017_v58, %v2266_v40  ;;  %v2310_v20 = vmul.f32 %v9031_v8, %v9011_v22  ;;  %v5656_v12 = vmul.f32 -1.442695, %v9025_v45  ;;  %v6181_v11 = vpop.eup %6180  ;;  %v4993_v41 = vrot.slane %v9027_v17, 1 }
 0x290   : > { %v4790_v23 = vadd.f32 %v4789_v54, %v4788_v18  ;;  %vm9057_vm8 = vcmp.eq.f32.partialorder %v2273_v16, 8.507059e+37  ;;  %v2275_v0 = vand.u32 2147483648, %v9001_v5  ;;  %v4781_v7 = vadd.f32 %v4780_v61, %v4779_v59 }
 0x291   : > { %vm12103_vm14 = vcmask 1046534   ;;  %v2311_v36 = vsub.f32 1.0, %v2310_v20  ;;  %v2318_v32 = vand.u32 2147483647, %v9011_v22  ;;  %6184 = vrcp.f32 %v9047_v56 }
 0x292   : > { %v4791_v52 = vrot.slane %v4790_v23, 2  ;;  %v2268_v2 = vadd.f32 %v9017_v58, %v2267_v28  ;;  %vm2270_vm2 = vweird.f32 %v9017_v58  ;;  %v5654_v50 = vmul.f32 -1.442695, %v9036_v46  ;;  %v9067_v42 = vpop.eup %6182 }
 0x293   : > { %v2312_v47 = vmul.f32 %v9031_v8, %v2311_v36  ;;  %v2320_v19 = vand.u32 2147483648, %v9011_v22  ;;  %v9075_v15 = vadd.f32 1.0, %v6181_v11  ;;  %6186 = vpow2.f32 %v5656_v12  ;;  %vm9090_vm1 = vmor %vm2269_vm9, %vm2270_vm2 }
 0x294   : > { %v4792_v6 = vadd.f32 %v4791_v52, %v4790_v23  ;;  %v2276_v34 = vor.u32 1.1754944e-38, %v2275_v0  ;;  %vm2314_vm13 = vweird.f32 %v9011_v22  ;;  %v2280_v43 = vmul.f32 %v9067_v42, %v9015_v44  ;;  %vm9115_vm2 = vmor %vm9079_vm11, %vm5182_vm7 }
 0x295   : > { %v4991_v38 = vrot.slane %v4781_v7, 3  ;;  %vm9094_vm4 = vcmp.eq.f32.partialorder %v2318_v32, 8.507059e+37  ;;  %v2288_v9 = vand.u32 2147483647, %v9015_v44  ;;  %v2290_v1 = vand.u32 2147483648, %v9015_v44 }
 0x296   : > { %v4793_v14 = vrot.slane %v4792_v6, 1  ;;  %vm5195_vm12 = vcmask 1045509   ;;  %vm5196_vm0 = vsmask.f32 5376  ;;  %v2272_v13 = vsel %vm9090_vm1, %v9017_v58, %v2268_v2  ;;  %v1170_v2 = vpop.f32.mrf.mxu1 }
 0x297   : > { %v2281_v5 = vsub.f32 1.0, %v2280_v43  ;;  %6188 = vrcp.f32 %v9075_v15  ;;  %v9104_v53 = vpop.eup %6184  ;;  %v2313_v4 = vadd.f32 %v9031_v8, %v2312_v47  ;;  %vm2315_vm9 = vweird.f32 %v9031_v8  ;;  %v1199_v43 = vpop.f32.mrf.mxu2 }
 0x298   : > { %v2321_v21 = vor.u32 1.1754944e-38, %v2320_v19  ;;  %6190 = vpow2.f32 %v5654_v50  ;;  %v4794_v59 = vadd.f32 %v4793_v14, %v4792_v6  ;;  %vm2284_vm1 = vweird.f32 %v9015_v44  ;;  %vm9143_vm5 = vmor %vm2314_vm13, %vm2315_vm9  ;;  %v12320_v50 = vld [vmem:[#allocation7_spill] sm:$0xff] }
 0x299   : > { %v2282_v29 = vmul.f32 %v9067_v42, %v2281_v5  ;;  %v2295_v63 = vmul.f32 %v9104_v53, %v9047_v56  ;;  %v6187_v57 = vpop.eup %6186  ;;  %v5011_v10 = vsel %vm12101_vm6, %v4990_v39, %v4991_v38  ;;  %v2277_v16 = vsel %vm9057_vm8, %v2276_v34, %v2272_v13  ;;  %vm12102_vm8 = vmor %vm9128_vm15, %vm9115_vm2  ;;  %v5047_v19 = vld [vmem:[%s12094_s5] sm:$0xff]  ;;  %v1257_v34 = vpop.f32.mrf.mxu0 }
 0x29a   : > { %vm9134_vm11 = vcmp.eq.f32.partialorder %v2288_v9, 8.507059e+37  ;;  %v2291_v40 = vor.u32 1.1754944e-38, %v2290_v1  ;;  %v2305_v54 = vand.u32 2147483648, %v9047_v56  ;;  %v4992_v26 = vrot.slane %v4794_v59, 2 }
 0x29b   : > { %vm5200_vm10 = vsmask.f32 6400  ;;  %vm2285_vm3 = vweird.f32 %v9067_v42  ;;  %v2296_v28 = vsub.f32 1.0, %v2295_v63  ;;  %v9148_v20 = vadd.f32 1.0, %v6187_v57 }
 0x29c   : > { %v2317_v12 = vsel %vm9143_vm5, %v9031_v8, %v2313_v4  ;;  %v2283_v11 = vadd.f32 %v9067_v42, %v2282_v29  ;;  %v2573_v49 = vand.u32 2147483647, %v9075_v15  ;;  %v2575_v23 = vand.u32 2147483648, %v9075_v15 }
 0x29d   : > { %v9156_v22 = vpop.eup %6188  ;;  %v5013_v60 = vsel %vm12103_vm14, %v4992_v26, %v4993_v41  ;;  %v2303_v0 = vand.u32 2147483647, %v9047_v56  ;;  %6192 = vrcp.f32 %v9148_v20  ;;  %v9168_v8 = vadd.f32 %v1225_v62, %v8964_v48 }
 0x29e   : > { %v6191_v7 = vpop.eup %6190  ;;  %vm12316_vm13 = vsmask.f32 4352  ;;  %vm12319_vm9 = vcmask 1045508   ;;  %v9178_v17 = vmul.f32 %v2277_v16, %v8927_v3  ;;  %v9180_v41 = vor.u32 1.1754944e-38, %v2305_v54 }
 0x29f   : > { %vm9172_vm7 = vmand %vm12101_vm6, %vm12316_vm13  ;;  %v5015_v32 = vsel %vm12319_vm9, %v5011_v10, %v5013_v60  ;;  %v2565_v52 = vmul.f32 %v9156_v22, %v9075_v15  ;;  %vm12321_vm5 = vcmask 1043456   ;;  %vm5203_vm13 = vcmask 1047559  }
 0x2a0   : > { %v5017_v47 = vsel %vm12321_vm5, %v12320_v50, %v5015_v32  ;;  %vm5204_vm6 = vsmask.f32 7424  ;;  %v9191_v30 = vsel %vm9094_vm4, %v2321_v21, %v2317_v12  ;;  %vm9197_vm9 = vmor %vm2284_vm1, %vm2285_vm3  ;;  %v2297_v6 = vmul.f32 %v9104_v53, %v2296_v28 }
 0x2a1   : > { %vm2569_vm5 = vweird.f32 %v9075_v15  ;;  %v2287_v38 = vsel %vm9197_vm9, %v9067_v42, %v2283_v11  ;;  %v2566_v35 = vsub.f32 1.0, %v2565_v52  ;;  %vm9206_vm4 = vcmp.eq.f32.partialorder %v2573_v49, 8.507059e+37  ;;  %vm9217_vm1 = vmor %vm9172_vm7, %vm12102_vm8 }
 0x2a2   : > { %v2576_v44 = vor.u32 1.1754944e-38, %v2575_v23  ;;  %v2620_v1 = vand.u32 2147483648, %v9148_v20  ;;  %v9222_v42 = vadd.f32 1.0, %v6191_v7  ;;  %v5655_v14 = vmul.f32 -1.442695, %v9168_v8  ;;  %vm9230_vm3 = vmand %vm5195_vm12, %vm5196_vm0 }
 0x2a3   : > { %v9226_v13 = vadd.f32 %v1170_v2, %v8903_v37  ;;  %v5050_v5 = vsub.f32 %v5017_v47, %v5047_v19  ;;  %v2567_v21 = vmul.f32 %v9156_v22, %v2566_v35  ;;  %v9236_v59 = vadd.f32 %v1257_v34, %v8954_v25  ;;  %v9241_v63 = vpop.eup %6192  ;;  %vm5198_vm0 = vmor %vm9230_vm3, %vm9217_vm1 }
 0x2a4   : > { %v9239_v29 = vadd.f32 %v1199_v43, %v8961_v55  ;;  %v9245_v57 = vsel %vm9134_vm11, %v2291_v40, %v2287_v38  ;;  %v9248_v10 = vadd.f32 %v9104_v53, %v2297_v6  ;;  %vm2570_vm12 = vweird.f32 %v9156_v22  ;;  %vm9267_vm7 = vmand %vm12103_vm14, %vm5200_vm10 }
 0x2a5   : > { %v2618_v16 = vand.u32 2147483647, %v9148_v20  ;;  %v5053_v54 = vmul.f32 0.015625, %v5050_v5  ;;  %v2568_v62 = vadd.f32 %v9156_v22, %v2567_v21  ;;  %v2610_v26 = vmul.f32 %v9241_v63, %v9148_v20  ;;  %vm2571_vm11 = vmor %vm2569_vm5, %vm2570_vm12 }
 0x2a6   : > { %6194 = vrcp.f32 %v9222_v42  ;;  %v9261_v61 = vor.u32 1.1754944e-38, %v2620_v1  ;;  %v5673_v40 = vmul.f32 -1.442695, %v9226_v13  ;;  %vm2300_vm9 = vweird.f32 %v9104_v53  ;;  %vm9290_vm5 = vmor %vm9267_vm7, %vm5198_vm0 }
 0x2a7   : > { %6196 = vpow2.f32 %v5655_v14  ;;  %v5059_v39 = vperm.slane %v5053_v54, 0  ;;  %v5060_v28 = vperm.slane %v5053_v54, 1  ;;  %v5061_v12 = vperm.slane %v5053_v54, 2  ;;  %vm9306_vm1 = vmand %vm5203_vm13, %vm5204_vm6 }
 0x2a8   : > { %v5062_v11 = vperm.slane %v5053_v54, 3  ;;  %vm2614_vm8 = vweird.f32 %v9148_v20  ;;  %v5063_v23 = vperm.slane %v5053_v54, 4  ;;  %v5064_v60 = vperm.slane %v5053_v54, 5 }
 0x2a9   : > { %v5065_v7 = vperm.slane %v5053_v54, 6  ;;  %v5066_v36 = vperm.slane %v5053_v54, 7  ;;  %v5099_v32 = vpack.c.bf16 %v5060_v28, %v5059_v39  ;;  %vm2299_vm10 = vweird.f32 %v9047_v56 }
 0x2aa   : > { %v5100_v52 = vpack.c.bf16 %v5062_v11, %v5061_v12  ;;  %v2572_v2 = vsel %vm2571_vm11, %v9156_v22, %v2568_v62  ;;  %v2611_v50 = vsub.f32 1.0, %v2610_v26  ;;  %vm9279_vm14 = vcmp.eq.f32.partialorder %v2618_v16, 8.507059e+37  ;;  %vm12104_vm11 = vmor %vm9306_vm1, %vm9290_vm5 }
 0x2ab   : > { %v5101_v19 = vpack.c.bf16 %v5064_v60, %v5063_v23  ;;  %v5102_v3 = vpack.c.bf16 %v5066_v36, %v5065_v7  ;;  %v2577_v22 = vsel %vm9206_vm4, %v2576_v44, %v2572_v2  ;;  %v5676_v6 = vmul.f32 -1.442695, %v9236_v59 }
 0x2ac   : > { %v9297_v34 = vpop.eup %6194  ;;  %v5119_v43 = vrot.slane %v5099_v32, 3  ;;  %v5120_v38 = vrot.slane %v5100_v52, 6  ;;  %v5121_v35 = vrot.slane %v5100_v52, 1  ;;  %v4572_v31 = vmul.f32 %v2577_v22, %v8999_v27 }
 0x2ad   : > { %v6197_v44 = vpop.eup %6196  ;;  %v5122_v1 = vrot.slane %v5101_v19, 4  ;;  %v5123_v14 = vrot.slane %v5101_v19, 7  ;;  %v5124_v5 = vrot.slane %v5102_v3, 2  ;;  %v5125_v4 = vrot.slane %v5102_v3, 5  ;;  %v1172_v19 = vpop.f32.mrf.mxu1 }
 0x2ae   : > { %vm12338_vm4 = vcmask 1040384   ;;  %vm12339_vm3 = vcmask 1042434   ;;  %vm9315_vm12 = vcmp.eq.f32.partialorder %v2303_v0, 8.507059e+37  ;;  %v9320_v62 = vadd.f32 %v4572_v31, %v9178_v17  ;;  %v5207_v0 = vld [vmem:[%s9302_s9] sm:$0xff]  ;;  %v1259_v3 = vpop.f32.mrf.mxu0 }
 0x2af   : > { %v5138_v21 = vsel %vm12338_vm4, %v5099_v32, %v5119_v43  ;;  %v5141_v16 = vsel %vm12339_vm3, %v5120_v38, %v5121_v35  ;;  %v2612_v27 = vmul.f32 %v9241_v63, %v2611_v50  ;;  %vm12342_vm6 = vcmask 1041408   ;;  %v1228_v50 = vpop.f32.mrf.mxu3 }
 0x2b0   : > { %v5142_v26 = vsel %vm12342_vm6, %v5138_v21, %v5141_v16  ;;  %vm12343_vm13 = vcmask 1044484   ;;  %vm12344_vm0 = vcmask 1046534   ;;  %v2580_v12 = vmul.f32 %v9297_v34, %v9222_v42 }
 0x2b1   : > { %v5145_v39 = vsel %vm12343_vm13, %v5122_v1, %v5123_v14  ;;  %v5148_v28 = vsel %vm12344_vm0, %v5124_v5, %v5125_v4  ;;  %vm12345_vm7 = vcmask 1045508   ;;  %v2613_v11 = vadd.f32 %v9241_v63, %v2612_v27  ;;  %v1201_v14 = vpop.f32.mrf.mxu2 }
 0x2b2   : > { %v5149_v17 = vsel %vm12345_vm7, %v5145_v39, %v5148_v28  ;;  %v2588_v49 = vand.u32 2147483647, %v9222_v42  ;;  %v2590_v23 = vand.u32 2147483648, %v9222_v42  ;;  %vm12346_vm4 = vcmask 1043456  }
 0x2b3   : > { %v5150_v60 = vsel %vm12346_vm4, %v5142_v26, %v5149_v17  ;;  %vm12347_vm3 = vweird.f32 %v9241_v63  ;;  %v2581_v7 = vsub.f32 1.0, %v2580_v12  ;;  %v9342_v36 = vadd.f32 1.0, %v6197_v44 }
 0x2b4   : > { %vm2616_vm6 = vmor %vm2614_vm8, %vm12347_vm3  ;;  %6198 = vpow2.f32 %v5673_v40  ;;  %v5208_v32 = vsel %vm12104_vm11, %v5150_v60, %v5207_v0  ;;  %v5674_v2 = vmul.f32 -1.442695, %v9239_v29  ;;  %vm2585_vm13 = vweird.f32 %v9297_v34 }
 0x2b5   : > { %v2617_v52 = vsel %vm2616_vm6, %v9241_v63, %v2613_v11  ;;  %6200 = vpow2.f32 %v5676_v6  ;;  %5209 = vst [vmem:[%s9302_s9] sm:$0xff] %v5208_v32  ;;  %vm9356_vm8 = vmor %vm2299_vm10, %vm2300_vm9  ;;  %v2582_v63 = vmul.f32 %v9297_v34, %v2581_v7  ;;  %v4555_v22 = vmul.f32 %v9191_v30, %v8970_v24  ;;  %v1175_v17 = vpop.f32.mrf.mxu1 }
 0x2b6   : > { %v2622_v40 = vsel %vm9279_vm14, %v9261_v61, %v2617_v52  ;;  %6202 = vrcp.f32 %v9342_v36  ;;  %v2302_v56 = vsel %vm9356_vm8, %v9104_v53, %v9248_v10  ;;  %vm2584_vm14 = vweird.f32 %v9222_v42 }
 0x2b7   : > { %v4575_v6 = vmul.f32 %v2622_v40, %v9025_v45  ;;  %6204 = vpow2.f32 %v5674_v2  ;;  %v2583_v61 = vadd.f32 %v9297_v34, %v2582_v63  ;;  %v9376_v47 = vadd.f32 %v1228_v50, %v8964_v48  ;;  %vm2586_vm9 = vmor %vm2584_vm14, %vm2585_vm13  ;;  %v1230_v12 = vpop.f32.mrf.mxu3 }
 0x2b8   : > { %v9379_v43 = vadd.f32 %v1172_v19, %v8903_v37  ;;  %v4553_v24 = vmul.f32 %v9245_v57, %v8984_v33  ;;  %v2591_v53 = vor.u32 1.1754944e-38, %v2590_v23  ;;  %v9386_v45 = vadd.f32 %v1259_v3, %v8954_v25 }
 0x2b9   : > { %v9383_v30 = vadd.f32 %v4575_v6, %v4555_v22  ;;  %v2307_v42 = vsel %vm9315_vm12, %v9180_v41, %v2302_v56  ;;  %v2587_v38 = vsel %vm2586_vm9, %v9297_v34, %v2583_v61  ;;  %vm2589_vm10 = vcmp.eq.f32.partialorder %v2588_v49, 8.507059e+37 }
 0x2ba   : > { %v6199_v10 = vpop.eup %6198  ;;  %v5675_v35 = vmul.f32 -1.442695, %v9376_v47  ;;  %v2592_v44 = vsel %vm2589_vm10, %v2591_v53, %v2587_v38  ;;  %v2603_v33 = vand.u32 2147483647, %v9342_v36  ;;  %v2605_v57 = vand.u32 2147483648, %v9342_v36 }
 0x2bb   : > { %v6201_v31 = vpop.eup %6200  ;;  %v9395_v1 = vadd.f32 1.0, %v6199_v10  ;;  %v4573_v4 = vmul.f32 %v2592_v44, %v9036_v46  ;;  %v5693_v41 = vmul.f32 -1.442695, %v9379_v43  ;;  %v4554_v16 = vmul.f32 %v2307_v42, %v8990_v51 }
 0x2bc   : > { %v6203_v5 = vpop.eup %6202  ;;  %v9398_v21 = vadd.f32 1.0, %v6201_v31  ;;  %6206 = vpow2.f32 %v5675_v35  ;;  %v5696_v27 = vmul.f32 -1.442695, %v9386_v45  ;;  %vm2599_vm12 = vweird.f32 %v9342_v36 }
 0x2bd   : > { %v6205_v34 = vpop.eup %6204  ;;  %v2595_v54 = vmul.f32 %v6203_v5, %v9342_v36  ;;  %6208 = vrcp.f32 %v9395_v1  ;;  %v9405_v26 = vadd.f32 %v4573_v4, %v4553_v24  ;;  %v9410_v46 = vadd.f32 %v1201_v14, %v8961_v55 }
 0x2be   : > { %6210 = vrcp.f32 %v9398_v21  ;;  %vm9412_vm0 = vcmp.eq.f32.partialorder %v2603_v33, 8.507059e+37  ;;  %v2606_v51 = vor.u32 1.1754944e-38, %v2605_v57  ;;  %v2873_v0 = vand.u32 2147483647, %v9395_v1 }
 0x2bf   : > { %v2596_v39 = vsub.f32 1.0, %v2595_v54  ;;  %v2875_v11 = vand.u32 2147483648, %v9395_v1  ;;  %v2920_v49 = vand.u32 2147483648, %v9398_v21  ;;  %v9419_v23 = vadd.f32 1.0, %v6205_v34 }
 0x2c0   : > { %6212 = vpow2.f32 %v5693_v41  ;;  %vm2600_vm7 = vweird.f32 %v6203_v5  ;;  %v2918_v7 = vand.u32 2147483647, %v9398_v21  ;;  %v5694_v52 = vmul.f32 -1.442695, %v9410_v46 }
 0x2c1   : > { %v2597_v60 = vmul.f32 %v6203_v5, %v2596_v39  ;;  %6214 = vpow2.f32 %v5696_v27  ;;  %v9425_v2 = vadd.f32 %v1230_v12, %v8964_v48  ;;  %v9428_v50 = vadd.f32 %v1175_v17, %v8903_v37  ;;  %vm2601_vm6 = vmor %vm2599_vm12, %vm2600_vm7 }
 0x2c2   : > { %v6207_v32 = vpop.eup %6206  ;;  %6216 = vrcp.f32 %v9419_v23  ;;  %vm2869_vm4 = vweird.f32 %v9395_v1  ;;  %vm2914_vm3 = vweird.f32 %v9398_v21  ;;  %vm9437_vm8 = vcmp.eq.f32.partialorder %v2873_v0, 8.507059e+37 }
 0x2c3   : > { %v6209_v19 = vpop.eup %6208  ;;  %v2598_v20 = vadd.f32 %v6203_v5, %v2597_v60  ;;  %v9432_v40 = vadd.f32 1.0, %v6207_v32  ;;  %v2876_v56 = vor.u32 1.1754944e-38, %v2875_v11  ;;  %v2921_v6 = vor.u32 1.1754944e-38, %v2920_v49 }
 0x2c4   : > { %v6211_v63 = vpop.eup %6210  ;;  %v2865_v3 = vmul.f32 %v6209_v19, %v9395_v1  ;;  %vm9442_vm13 = vcmp.eq.f32.partialorder %v2918_v7, 8.507059e+37  ;;  %v2888_v10 = vand.u32 2147483647, %v9419_v23  ;;  %v2890_v35 = vand.u32 2147483648, %v9419_v23 }
 0x2c5   : > { %v2602_v61 = vsel %vm2601_vm6, %v6203_v5, %v2598_v20  ;;  %v2910_v24 = vmul.f32 %v6211_v63, %v9398_v21  ;;  %6218 = vrcp.f32 %v9432_v40  ;;  %v5695_v14 = vmul.f32 -1.442695, %v9425_v2 }
 0x2c6   : > { %v6213_v36 = vpop.eup %6212  ;;  %v2607_v42 = vsel %vm9412_vm0, %v2606_v51, %v2602_v61  ;;  %v2866_v38 = vsub.f32 1.0, %v2865_v3  ;;  %6220 = vpow2.f32 %v5694_v52  ;;  %vm2870_vm14 = vweird.f32 %v6209_v19 }
 0x2c7   : > { %v6215_v31 = vpop.eup %6214  ;;  %v4574_v44 = vmul.f32 %v2607_v42, %v9168_v8  ;;  %v2911_v33 = vsub.f32 1.0, %v2910_v24  ;;  %v9452_v57 = vadd.f32 1.0, %v6213_v36  ;;  %vm2884_vm9 = vweird.f32 %v9419_v23  ;;  %vm2871_vm0 = vmor %vm2869_vm4, %vm2870_vm14 }
 0x2c8   : > { %v6217_v5 = vpop.eup %6216  ;;  %v2867_v4 = vmul.f32 %v6209_v19, %v2866_v38  ;;  %v9456_v41 = vadd.f32 1.0, %v6215_v31  ;;  %vm2915_vm10 = vweird.f32 %v6211_v63  ;;  %vm9461_vm12 = vcmp.eq.f32.partialorder %v2888_v10, 8.507059e+37 }
 0x2c9   : > { %v9458_v34 = vadd.f32 %v4574_v44, %v4554_v16  ;;  %v2912_v54 = vmul.f32 %v6211_v63, %v2911_v33  ;;  %v2880_v27 = vmul.f32 %v6217_v5, %v9419_v23  ;;  %v2891_v28 = vor.u32 1.1754944e-38, %v2890_v35  ;;  %vm2916_vm7 = vmor %vm2914_vm3, %vm2915_vm10  ;;  %v1262_v35 = vpop.f32.mrf.mxu0 }
 0x2ca   : > { %v2868_v39 = vadd.f32 %v6209_v19, %v2867_v4  ;;  %6222 = vrcp.f32 %v9452_v57  ;;  %v2903_v16 = vand.u32 2147483647, %v9432_v40  ;;  %v2905_v60 = vand.u32 2147483648, %v9432_v40 }
 0x2cb   : > { %v6219_v51 = vpop.eup %6218  ;;  %v2913_v0 = vadd.f32 %v6211_v63, %v2912_v54  ;;  %v2881_v12 = vsub.f32 1.0, %v2880_v27  ;;  %6224 = vpow2.f32 %v5695_v14  ;;  %vm2885_vm4 = vweird.f32 %v6217_v5  ;;  %v1204_v27 = vpop.f32.mrf.mxu2 }
 0x2cc   : > { %v6221_v17 = vpop.eup %6220  ;;  %v2872_v11 = vsel %vm2871_vm0, %v6209_v19, %v2868_v39  ;;  %v2895_v49 = vmul.f32 %v6219_v51, %v9432_v40  ;;  %6226 = vrcp.f32 %v9456_v41  ;;  %vm2899_vm3 = vweird.f32 %v9432_v40 }
 0x2cd   : > { %v2877_v1 = vsel %vm9437_vm8, %v2876_v56, %v2872_v11  ;;  %v2917_v7 = vsel %vm2916_vm7, %v6211_v63, %v2913_v0  ;;  %v2882_v32 = vmul.f32 %v6217_v5, %v2881_v12  ;;  %vm9481_vm6 = vcmp.eq.f32.partialorder %v2903_v16, 8.507059e+37  ;;  %vm2886_vm8 = vmor %vm2884_vm9, %vm2885_vm4 }
 0x2ce   : > { %v4592_v52 = vmul.f32 %v2877_v1, %v9226_v13  ;;  %v2922_v19 = vsel %vm9442_vm13, %v2921_v6, %v2917_v7  ;;  %v2896_v20 = vsub.f32 1.0, %v2895_v49  ;;  %v3173_v22 = vand.u32 2147483647, %v9452_v57  ;;  %v1233_v1 = vpop.f32.mrf.mxu3 }
 0x2cf   : > { %v4595_v21 = vmul.f32 %v2922_v19, %v9236_v59  ;;  %v2883_v3 = vadd.f32 %v6217_v5, %v2882_v32  ;;  %vm2900_vm13 = vweird.f32 %v6219_v51  ;;  %v9491_v6 = vadd.f32 1.0, %v6221_v17 }
 0x2d0   : > { %v6223_v63 = vpop.eup %6222  ;;  %v9487_v56 = vadd.f32 %v9320_v62, %v4592_v52  ;;  %v2897_v13 = vmul.f32 %v6219_v51, %v2896_v20  ;;  %v2906_v10 = vor.u32 1.1754944e-38, %v2905_v60  ;;  %vm3169_vm14 = vweird.f32 %v9452_v57  ;;  %vm2901_vm9 = vmor %vm2899_vm3, %vm2900_vm13 }
 0x2d1   : > { %v6225_v24 = vpop.eup %6224  ;;  %v9494_v59 = vadd.f32 %v9383_v30, %v4595_v21  ;;  %v2887_v53 = vsel %vm2886_vm8, %v6217_v5, %v2883_v3  ;;  %v3165_v36 = vmul.f32 %v6223_v63, %v9452_v57  ;;  %v3175_v23 = vand.u32 2147483648, %v9452_v57  ;;  %v1264_v3 = vpop.f32.mrf.mxu0 }
 0x2d2   : > { %v6227_v42 = vpop.eup %6226  ;;  %v2892_v62 = vsel %vm9461_vm12, %v2891_v28, %v2887_v53  ;;  %v2898_v38 = vadd.f32 %v6219_v51, %v2897_v13  ;;  %vm9504_vm10 = vcmp.eq.f32.partialorder %v3173_v22, 8.507059e+37  ;;  %vm3170_vm12 = vweird.f32 %v6223_v63 }
 0x2d3   : > { %v4593_v31 = vmul.f32 %v2892_v62, %v9239_v29  ;;  %v3166_v30 = vsub.f32 1.0, %v3165_v36  ;;  %v3210_v33 = vmul.f32 %v6227_v42, %v9456_v41  ;;  %v3220_v5 = vand.u32 2147483648, %v9456_v41  ;;  %vm3171_vm7 = vmor %vm3169_vm14, %vm3170_vm12  ;;  %v1206_v62 = vpop.f32.mrf.mxu2 }
 0x2d4   : > { %v2902_v14 = vsel %vm2901_vm9, %v6219_v51, %v2898_v38  ;;  %6228 = vrcp.f32 %v9491_v6  ;;  %vm3215_vm0 = vweird.f32 %v6227_v42  ;;  %v3218_v8 = vand.u32 2147483647, %v9456_v41 }
 0x2d5   : > { %v9512_v4 = vadd.f32 %v9405_v26, %v4593_v31  ;;  %v2907_v29 = vsel %vm9481_vm6, %v2906_v10, %v2902_v14  ;;  %v3167_v40 = vmul.f32 %v6223_v63, %v3166_v30  ;;  %v3211_v54 = vsub.f32 1.0, %v3210_v33 }
 0x2d6   : > { %v4594_v39 = vmul.f32 %v2907_v29, %v9376_v47  ;;  %v9518_v28 = vadd.f32 1.0, %v6225_v24  ;;  %v5713_v12 = vmul.f32 -1.442695, %v9428_v50  ;;  %v9522_v26 = vadd.f32 %v1262_v35, %v8954_v25 }
 0x2d7   : > { %v3168_v51 = vadd.f32 %v6223_v63, %v3167_v40  ;;  %v3212_v0 = vmul.f32 %v6227_v42, %v3211_v54  ;;  %v3176_v47 = vor.u32 1.1754944e-38, %v3175_v23  ;;  %vm3214_vm4 = vweird.f32 %v9456_v41  ;;  %v1177_v41 = vpop.f32.mrf.mxu1 }
 0x2d8   : > { %v9525_v16 = vadd.f32 %v9458_v34, %v4594_v39  ;;  %6230 = vrcp.f32 %v9518_v28  ;;  %v3221_v49 = vor.u32 1.1754944e-38, %v3220_v5  ;;  %v3188_v60 = vand.u32 2147483647, %v9491_v6  ;;  %vm3216_vm3 = vmor %vm3214_vm4, %vm3215_vm0  ;;  %v1235_v39 = vpop.f32.mrf.mxu3 }
 0x2d9   : > { %v3172_v17 = vsel %vm3171_vm7, %v6223_v63, %v3168_v51  ;;  %v3213_v11 = vadd.f32 %v6227_v42, %v3212_v0  ;;  %6232 = vpow2.f32 %v5713_v12  ;;  %v5716_v57 = vmul.f32 -1.442695, %v9522_v26 }
 0x2da   : > { %v6229_v7 = vpop.eup %6228  ;;  %v3177_v34 = vsel %vm9504_vm10, %v3176_v47, %v3172_v17  ;;  %v9538_v32 = vadd.f32 %v1204_v27, %v8961_v55  ;;  %vm3219_vm6 = vcmp.eq.f32.partialorder %v3218_v8, 8.507059e+37  ;;  %vm3184_vm8 = vweird.f32 %v9491_v6 }
 0x2db   : > { %v4612_v52 = vmul.f32 %v3177_v34, %v9379_v43  ;;  %v3217_v19 = vsel %vm3216_vm3, %v6227_v42, %v3213_v11  ;;  %v3180_v20 = vmul.f32 %v6229_v7, %v9491_v6  ;;  %6234 = vpow2.f32 %v5716_v57 }
 0x2dc   : > { %v3222_v21 = vsel %vm3219_vm6, %v3221_v49, %v3217_v19  ;;  %v5714_v13 = vmul.f32 -1.442695, %v9538_v32  ;;  %vm9548_vm13 = vcmp.eq.f32.partialorder %v3188_v60, 8.507059e+37  ;;  %v3190_v53 = vand.u32 2147483648, %v9491_v6 }
 0x2dd   : > { %v9544_v61 = vadd.f32 %v9487_v56, %v4612_v52  ;;  %v4615_v22 = vmul.f32 %v3222_v21, %v9386_v45  ;;  %v3181_v63 = vsub.f32 1.0, %v3180_v20  ;;  %v9554_v10 = vadd.f32 %v1233_v1, %v8964_v48 }
 0x2de   : > { %v6231_v24 = vpop.eup %6230  ;;  %v9557_v36 = vadd.f32 %v1177_v41, %v8903_v37  ;;  %vm3185_vm14 = vweird.f32 %v6229_v7  ;;  %v3203_v23 = vand.u32 2147483647, %v9518_v28  ;;  %6236 = vpow2.f32 %v5714_v13 }
 0x2df   : > { %v9560_v56 = vadd.f32 %v9494_v59, %v4615_v22  ;;  %v3182_v45 = vmul.f32 %v6229_v7, %v3181_v63  ;;  %v3195_v42 = vmul.f32 %v6231_v24, %v9518_v28  ;;  %v6233_v38 = vpop.eup %6232  ;;  %v5715_v35 = vmul.f32 -1.442695, %v9554_v10  ;;  %vm3186_vm9 = vmor %vm3184_vm8, %vm3185_vm14  ;;  %v1180_v0 = vpop.f32.mrf.mxu1 }
 0x2e0   : > { %v9566_v31 = vadd.f32 %v1264_v3, %v8954_v25  ;;  %v9568_v33 = vadd.f32 1.0, %v6233_v38  ;;  %v5733_v59 = vmul.f32 -1.442695, %v9557_v36  ;;  %v3191_v5 = vor.u32 1.1754944e-38, %v3190_v53 }
 0x2e1   : > { %v3183_v30 = vadd.f32 %v6229_v7, %v3182_v45  ;;  %v3196_v44 = vsub.f32 1.0, %v3195_v42  ;;  %v6235_v14 = vpop.eup %6234  ;;  %v3205_v29 = vand.u32 2147483648, %v9518_v28  ;;  %6238 = vpow2.f32 %v5715_v35 }
 0x2e2   : > { %v9575_v40 = vadd.f32 %v1206_v62, %v8961_v55  ;;  %vm3200_vm10 = vweird.f32 %v6231_v24  ;;  %6240 = vrcp.f32 %v9568_v33  ;;  %vm3199_vm12 = vweird.f32 %v9518_v28  ;;  %v1267_v28 = vpop.f32.mrf.mxu0 }
 0x2e3   : > { %v3187_v54 = vsel %vm3186_vm9, %v6229_v7, %v3183_v30  ;;  %v3197_v27 = vmul.f32 %v6231_v24, %v3196_v44  ;;  %v9581_v6 = vadd.f32 1.0, %v6235_v14  ;;  %v5736_v51 = vmul.f32 -1.442695, %v9566_v31  ;;  %vm3201_vm7 = vmor %vm3199_vm12, %vm3200_vm10 }
 0x2e4   : > { %v3192_v8 = vsel %vm9548_vm13, %v3191_v5, %v3187_v54  ;;  %vm3204_vm0 = vcmp.eq.f32.partialorder %v3203_v23, 8.507059e+37  ;;  %6242 = vpow2.f32 %v5733_v59  ;;  %v6237_v17 = vpop.eup %6236  ;;  %v3206_v11 = vor.u32 1.1754944e-38, %v3205_v29 }
 0x2e5   : > { %v4613_v12 = vmul.f32 %v3192_v8, %v9410_v46  ;;  %v3198_v47 = vadd.f32 %v6231_v24, %v3197_v27  ;;  %6244 = vrcp.f32 %v9581_v6  ;;  %v5734_v49 = vmul.f32 -1.442695, %v9575_v40 }
 0x2e6   : > { %v9588_v60 = vadd.f32 %v1235_v39, %v8964_v48  ;;  %v3473_v46 = vand.u32 2147483647, %v9568_v33  ;;  %v9595_v34 = vadd.f32 %v1180_v0, %v8903_v37  ;;  %v3475_v52 = vand.u32 2147483648, %v9568_v33 }
 0x2e7   : > { %v9591_v1 = vadd.f32 %v9512_v4, %v4613_v12  ;;  %v3202_v7 = vsel %vm3201_vm7, %v6231_v24, %v3198_v47  ;;  %v6239_v57 = vpop.eup %6238  ;;  %v9598_v19 = vadd.f32 1.0, %v6237_v17  ;;  %6246 = vpow2.f32 %v5736_v51 }
 0x2e8   : > { %v3207_v41 = vsel %vm3204_vm0, %v3206_v11, %v3202_v7  ;;  %v6241_v20 = vpop.eup %6240  ;;  %v3518_v3 = vand.u32 2147483647, %v9581_v6  ;;  %v9602_v4 = vadd.f32 1.0, %v6239_v57  ;;  %v9605_v22 = vadd.f32 %v1267_v28, %v8954_v25 }
 0x2e9   : > { %v4614_v21 = vmul.f32 %v3207_v41, %v9425_v2  ;;  %v3465_v63 = vmul.f32 %v6241_v20, %v9568_v33  ;;  %vm3469_vm4 = vweird.f32 %v9568_v33  ;;  %6248 = vrcp.f32 %v9598_v19 }
 0x2ea   : > { %v9611_v13 = vmul.f32 -1.442695, %v9588_v60  ;;  %v6243_v24 = vpop.eup %6242  ;;  %vm9616_vm3 = vcmp.eq.f32.partialorder %v3473_v46, 8.507059e+37  ;;  %v3520_v53 = vand.u32 2147483648, %v9581_v6  ;;  %6250 = vrcp.f32 %v9602_v4 }
 0x2eb   : > { %v9614_v43 = vadd.f32 %v9525_v16, %v4614_v21  ;;  %v6245_v45 = vpop.eup %6244  ;;  %v3466_v42 = vsub.f32 1.0, %v3465_v63  ;;  %v3476_v62 = vor.u32 1.1754944e-38, %v3475_v52  ;;  %vm3514_vm6 = vweird.f32 %v9581_v6 }
 0x2ec   : > { %v9624_v38 = vmul.f32 -1.442695, %v9595_v34  ;;  %vm3470_vm8 = vweird.f32 %v6241_v20  ;;  %v3510_v16 = vmul.f32 %v6245_v45, %v9581_v6  ;;  %vm9627_vm13 = vcmp.eq.f32.partialorder %v3518_v3, 8.507059e+37 }
 0x2ed   : > { %v3488_v35 = vand.u32 2147483647, %v9598_v19  ;;  %v3490_v30 = vand.u32 2147483648, %v9598_v19  ;;  %v6247_v44 = vpop.eup %6246  ;;  %v3467_v59 = vmul.f32 %v6241_v20, %v3466_v42  ;;  %v3503_v14 = vand.u32 2147483647, %v9602_v4  ;;  %vm3471_vm12 = vmor %vm3469_vm4, %vm3470_vm8 }
 0x2ee   : > { %v3505_v5 = vand.u32 2147483648, %v9602_v4  ;;  %v9635_v29 = vadd.f32 1.0, %v6243_v24  ;;  %v3511_v54 = vsub.f32 1.0, %v3510_v16  ;;  %v3521_v27 = vor.u32 1.1754944e-38, %v3520_v53 }
 0x2ef   : > { %vm3484_vm14 = vweird.f32 %v9598_v19  ;;  %6252 = vpow2.f32 %v5734_v49  ;;  %v6249_v39 = vpop.eup %6248  ;;  %v3468_v8 = vadd.f32 %v6241_v20, %v3467_v59  ;;  %vm3515_vm9 = vweird.f32 %v6245_v45 }
 0x2f0   : > { %vm3499_vm10 = vweird.f32 %v9602_v4  ;;  %6254 = vrcp.f32 %v9635_v29  ;;  %v9640_v51 = vadd.f32 1.0, %v6247_v44  ;;  %v6251_v0 = vpop.eup %6250  ;;  %v3512_v12 = vmul.f32 %v6245_v45, %v3511_v54  ;;  %vm3516_vm4 = vmor %vm3514_vm6, %vm3515_vm9 }
 0x2f1   : > { %v3480_v47 = vmul.f32 %v6249_v39, %v9598_v19  ;;  %vm9646_vm0 = vcmp.eq.f32.partialorder %v3488_v35, 8.507059e+37  ;;  %v3491_v11 = vor.u32 1.1754944e-38, %v3490_v30  ;;  %v3472_v49 = vsel %vm3471_vm12, %v6241_v20, %v3468_v8 }
 0x2f2   : > { %v3495_v28 = vmul.f32 %v6251_v0, %v9602_v4  ;;  %vm9651_vm7 = vcmp.eq.f32.partialorder %v3503_v14, 8.507059e+37  ;;  %v3506_v46 = vor.u32 1.1754944e-38, %v3505_v5  ;;  %v9656_v57 = vmul.f32 -1.442695, %v9605_v22 }
 0x2f3   : > { %v3477_v33 = vsel %vm9616_vm3, %v3476_v62, %v3472_v49  ;;  %v3513_v41 = vadd.f32 %v6245_v45, %v3512_v12  ;;  %v3481_v52 = vsub.f32 1.0, %v3480_v47  ;;  %v3773_v21 = vand.u32 2147483647, %v9635_v29  ;;  %v1209_v47 = vpop.f32.mrf.mxu2  ;;  %v1238_v49 = vpop.f32.mrf.mxu3 }
 0x2f4   : > { %v4632_v3 = vmul.f32 %v3477_v33, %v9428_v50  ;;  %vm3485_vm8 = vweird.f32 %v6249_v39  ;;  %v3496_v20 = vsub.f32 1.0, %v3495_v28  ;;  %6256 = vrcp.f32 %v9640_v51 }
 0x2f5   : > { %v6253_v63 = vpop.eup %6252  ;;  %v3517_v24 = vsel %vm3516_vm4, %v6245_v45, %v3513_v41  ;;  %v3482_v53 = vmul.f32 %v6249_v39, %v3481_v52  ;;  %vm3500_vm12 = vweird.f32 %v6251_v0  ;;  %v3775_v2 = vand.u32 2147483648, %v9635_v29  ;;  %vm3486_vm6 = vmor %vm3484_vm14, %vm3485_vm8 }
 0x2f6   : > { %v6255_v42 = vpop.eup %6254  ;;  %v4811_v62 = vadd.f32 %v9544_v61, %v4632_v3  ;;  %v3522_v50 = vsel %vm9627_vm13, %v3521_v27, %v3517_v24  ;;  %v3497_v16 = vmul.f32 %v6251_v0, %v3496_v20  ;;  %v9670_v35 = vadd.f32 1.0, %v6253_v63  ;;  %vm3501_vm13 = vmor %vm3499_vm10, %vm3500_vm12 }
 0x2f7   : > { %v4635_v6 = vmul.f32 %v3522_v50, %v9522_v26  ;;  %v3483_v30 = vadd.f32 %v6249_v39, %v3482_v53  ;;  %v3765_v44 = vmul.f32 %v6255_v42, %v9635_v29  ;;  %vm3769_vm3 = vweird.f32 %v9635_v29 }
 0x2f8   : > { %v3498_v45 = vadd.f32 %v6251_v0, %v3497_v16  ;;  %v3818_v61 = vand.u32 2147483647, %v9640_v51  ;;  %v3820_v23 = vand.u32 2147483648, %v9640_v51  ;;  %6258 = vrcp.f32 %v9670_v35 }
 0x2f9   : > { %v9682_v59 = vadd.f32 %v9560_v56, %v4635_v6  ;;  %v3487_v26 = vsel %vm3486_vm6, %v6249_v39, %v3483_v30  ;;  %v3766_v14 = vsub.f32 1.0, %v3765_v44  ;;  %vm9687_vm9 = vcmp.eq.f32.partialorder %v3773_v21, 8.507059e+37  ;;  %v1182_v21 = vpop.f32.mrf.mxu1 }
 0x2fa   : > { %v6257_v19 = vpop.eup %6256  ;;  %v3492_v54 = vsel %vm9646_vm0, %v3491_v11, %v3487_v26  ;;  %v3502_v27 = vsel %vm3501_vm13, %v6251_v0, %v3498_v45  ;;  %vm3770_vm14 = vweird.f32 %v6255_v42  ;;  %v3776_v8 = vor.u32 1.1754944e-38, %v3775_v2 }
 0x2fb   : > { %v4633_v56 = vmul.f32 %v3492_v54, %v9538_v32  ;;  %v3507_v39 = vsel %vm9651_vm7, %v3506_v46, %v3502_v27  ;;  %v3767_v12 = vmul.f32 %v6255_v42, %v3766_v14  ;;  %v3810_v4 = vmul.f32 %v6257_v19, %v9640_v51  ;;  %vm3771_vm0 = vmor %vm3769_vm3, %vm3770_vm14 }
 0x2fc   : > { %v4634_v28 = vmul.f32 %v3507_v39, %v9554_v10  ;;  %vm3814_vm10 = vweird.f32 %v9640_v51  ;;  %vm9699_vm4 = vcmp.eq.f32.partialorder %v3818_v61, 8.507059e+37  ;;  %v3821_v0 = vor.u32 1.1754944e-38, %v3820_v23  ;;  %v1269_v51 = vpop.f32.mrf.mxu0  ;;  %v1211_v61 = vpop.f32.mrf.mxu2 }
 0x2fd   : > { %v9704_v11 = vadd.f32 %v9591_v1, %v4633_v56  ;;  %v3768_v32 = vadd.f32 %v6255_v42, %v3767_v12  ;;  %v3811_v7 = vsub.f32 1.0, %v3810_v4  ;;  %6260 = vpow2.f32 %v9611_v13 }
 0x2fe   : > { %v6259_v46 = vpop.eup %6258  ;;  %v9708_v33 = vadd.f32 %v9614_v43, %v4634_v28  ;;  %6262 = vpow2.f32 %v9624_v38  ;;  %v9715_v10 = vadd.f32 %v1209_v47, %v8961_v55  ;;  %v9718_v1 = vadd.f32 %v1238_v49, %v8964_v48 }
 0x2ff   : > { %v3772_v41 = vsel %vm3771_vm0, %v6255_v42, %v3768_v32  ;;  %v3812_v52 = vmul.f32 %v6257_v19, %v3811_v7  ;;  %vm3815_vm7 = vweird.f32 %v6257_v19  ;;  %v3780_v13 = vmul.f32 %v6259_v46, %v9670_v35 }
 0x300   : > { %v3777_v43 = vsel %vm9687_vm9, %v3776_v8, %v3772_v41  ;;  %6264 = vpow2.f32 %v9656_v57  ;;  %v5754_v29 = vmul.f32 -1.442695, %v9715_v10  ;;  %v5755_v38 = vmul.f32 -1.442695, %v9718_v1  ;;  %vm3816_vm8 = vmor %vm3814_vm10, %vm3815_vm7 }
 0x301   : > { %v4652_v3 = vmul.f32 %v3777_v43, %v9557_v36  ;;  %v3813_v20 = vadd.f32 %v6257_v19, %v3812_v52  ;;  %v3781_v63 = vsub.f32 1.0, %v3780_v13  ;;  %v3788_v24 = vand.u32 2147483647, %v9670_v35 }
 0x302   : > { %vm3785_vm12 = vweird.f32 %v6259_v46  ;;  %v3790_v53 = vand.u32 2147483648, %v9670_v35  ;;  %6266 = vpow2.f32 %v5754_v29  ;;  %v9732_v2 = vadd.f32 %v1182_v21, %v8903_v37 }
 0x303   : > { %v6261_v57 = vpop.eup %6260  ;;  %v9734_v42 = vadd.f32 %v4811_v62, %v4652_v3  ;;  %v3817_v50 = vsel %vm3816_vm8, %v6257_v19, %v3813_v20  ;;  %v3782_v16 = vmul.f32 %v6259_v46, %v3781_v63  ;;  %6268 = vpow2.f32 %v5755_v38 }
 0x304   : > { %v6263_v36 = vpop.eup %6262  ;;  %v3822_v6 = vsel %vm9699_vm4, %v3821_v0, %v3817_v50  ;;  %v9738_v30 = vadd.f32 1.0, %v6261_v57  ;;  %vm3784_vm3 = vweird.f32 %v9670_v35  ;;  %vm3789_vm13 = vcmp.eq.f32.partialorder %v3788_v24, 8.507059e+37  ;;  %v1240_v35 = vpop.f32.mrf.mxu3 }
 0x305   : > { %v4655_v44 = vmul.f32 %v3822_v6, %v9566_v31  ;;  %v3783_v45 = vadd.f32 %v6259_v46, %v3782_v16  ;;  %v9742_v37 = vadd.f32 1.0, %v6263_v36  ;;  %vm3786_vm6 = vmor %vm3784_vm3, %vm3785_vm12  ;;  %v3791_v23 = vor.u32 1.1754944e-38, %v3790_v53  ;;  %v1281_v6 = vpop.f32.mrf.mxu1 }
 0x306   : > { %v6265_v62 = vpop.eup %6264  ;;  %6270 = vrcp.f32 %v9738_v30  ;;  %v5773_v26 = vmul.f32 -1.442695, %v9732_v2  ;;  %v9752_v31 = vadd.f32 %v1269_v51, %v8954_v25  ;;  %v3803_v27 = vand.u32 2147483647, %v9738_v30 }
 0x307   : > { %v9748_v14 = vadd.f32 %v9682_v59, %v4655_v44  ;;  %v3787_v5 = vsel %vm3786_vm6, %v6259_v46, %v3783_v45  ;;  %6272 = vrcp.f32 %v9742_v37  ;;  %v9756_v8 = vadd.f32 %v1211_v61, %v8961_v55 }
 0x308   : > { %v6267_v19 = vpop.eup %6266  ;;  %v3792_v54 = vsel %vm3789_vm13, %v3791_v23, %v3787_v5  ;;  %v3805_v59 = vand.u32 2147483648, %v9738_v30  ;;  %v9760_v12 = vadd.f32 1.0, %v6265_v62  ;;  %v4073_v25 = vand.u32 2147483647, %v9742_v37 }
 0x309   : > { %v6269_v56 = vpop.eup %6268  ;;  %v4653_v39 = vmul.f32 %v3792_v54, %v9575_v40  ;;  %v9762_v4 = vadd.f32 1.0, %v6267_v19  ;;  %6274 = vpow2.f32 %v5773_v26  ;;  %v9766_v47 = vadd.f32 %v1240_v35, %v8964_v48 }
 0x30a   : > { %6276 = vrcp.f32 %v9760_v12  ;;  %v9772_v55 = vadd.f32 1.0, %v6269_v56  ;;  %v5776_v40 = vmul.f32 -1.442695, %v9752_v31  ;;  %vm3799_vm9 = vweird.f32 %v9738_v30 }
 0x30b   : > { %v9769_v49 = vadd.f32 %v9704_v11, %v4653_v39  ;;  %v4075_v17 = vand.u32 2147483648, %v9742_v37  ;;  %6278 = vrcp.f32 %v9762_v4  ;;  %v9779_v0 = vmul.f32 -1.442695, %v9756_v8 }
 0x30c   : > { %v6271_v28 = vpop.eup %6270  ;;  %vm9782_vm14 = vcmp.eq.f32.partialorder %v3803_v27, 8.507059e+37  ;;  %v3806_v7 = vor.u32 1.1754944e-38, %v3805_v59  ;;  %vm4069_vm10 = vweird.f32 %v9742_v37  ;;  %vm9788_vm4 = vcmp.eq.f32.partialorder %v4073_v25, 8.507059e+37 }
 0x30d   : > { %v6273_v48 = vpop.eup %6272  ;;  %v3795_v11 = vmul.f32 %v6271_v28, %v9738_v30  ;;  %v4118_v52 = vand.u32 2147483647, %v9760_v12  ;;  %v4120_v13 = vand.u32 2147483648, %v9760_v12  ;;  %v9795_v21 = vmul.f32 -1.442695, %v9766_v47 }
 0x30e   : > { %v4065_v46 = vmul.f32 %v6273_v48, %v9742_v37  ;;  %v4088_v29 = vand.u32 2147483647, %v9762_v4  ;;  %v4090_v38 = vand.u32 2147483648, %v9762_v4  ;;  %6280 = vrcp.f32 %v9772_v55 }
 0x30f   : > { %v3796_v43 = vsub.f32 1.0, %v3795_v11  ;;  %v6275_v3 = vpop.eup %6274  ;;  %vm3800_vm0 = vweird.f32 %v6271_v28  ;;  %v4076_v63 = vor.u32 1.1754944e-38, %v4075_v17  ;;  %vm4070_vm8 = vweird.f32 %v6273_v48 }
 0x310   : > { %v4066_v20 = vsub.f32 1.0, %v4065_v46  ;;  %v6277_v24 = vpop.eup %6276  ;;  %v9802_v57 = vadd.f32 1.0, %v6275_v3  ;;  %6282 = vpow2.f32 %v5776_v40  ;;  %vm9805_vm3 = vcmp.eq.f32.partialorder %v4118_v52, 8.507059e+37  ;;  %vm3801_vm13 = vmor %vm3799_vm9, %vm3800_vm0 }
 0x311   : > { %v3797_v53 = vmul.f32 %v6271_v28, %v3796_v43  ;;  %v6279_v50 = vpop.eup %6278  ;;  %v4110_v36 = vmul.f32 %v6277_v24, %v9760_v12  ;;  %v4121_v51 = vor.u32 1.1754944e-38, %v4120_v13  ;;  %vm9810_vm6 = vcmp.eq.f32.partialorder %v4088_v29, 8.507059e+37  ;;  %vm4071_vm12 = vmor %vm4069_vm10, %vm4070_vm8 }
 0x312   : > { %v4067_v16 = vmul.f32 %v6273_v48, %v4066_v20  ;;  %v4080_v45 = vmul.f32 %v6279_v50, %v9762_v4  ;;  %v4091_v62 = vor.u32 1.1754944e-38, %v4090_v38  ;;  %vm4099_vm11 = vweird.f32 %v9772_v55 }
 0x313   : > { %v3798_v44 = vadd.f32 %v6271_v28, %v3797_v53  ;;  %v4111_v26 = vsub.f32 1.0, %v4110_v36  ;;  %6284 = vrcp.f32 %v9802_v57  ;;  %vm4115_vm7 = vweird.f32 %v6277_v24 }
 0x314   : > { %v4068_v23 = vadd.f32 %v6273_v48, %v4067_v16  ;;  %v6281_v5 = vpop.eup %6280  ;;  %v4081_v19 = vsub.f32 1.0, %v4080_v45  ;;  %v4103_v54 = vand.u32 2147483647, %v9772_v55  ;;  %vm4085_vm9 = vweird.f32 %v6279_v50 }
 0x315   : > { %v3802_v35 = vsel %vm3801_vm13, %v6271_v28, %v3798_v44  ;;  %v4112_v56 = vmul.f32 %v6277_v24, %v4111_v26  ;;  %v4095_v39 = vmul.f32 %v6281_v5, %v9772_v55  ;;  %v4105_v46 = vand.u32 2147483648, %v9772_v55 }
 0x316   : > { %v3807_v30 = vsel %vm9782_vm14, %v3806_v7, %v3802_v35  ;;  %v4072_v27 = vsel %vm4071_vm12, %v6273_v48, %v4068_v23  ;;  %v6283_v59 = vpop.eup %6282  ;;  %v4082_v28 = vmul.f32 %v6279_v50, %v4081_v19  ;;  %vm12384_vm14 = vweird.f32 %v9760_v12 }
 0x317   : > { %v4654_v25 = vmul.f32 %v3807_v30, %v9588_v60  ;;  %v4077_v40 = vsel %vm9788_vm4, %v4076_v63, %v4072_v27  ;;  %v4113_v17 = vadd.f32 %v6277_v24, %v4112_v56  ;;  %v4096_v11 = vsub.f32 1.0, %v4095_v39  ;;  %vm4116_vm10 = vmor %vm12384_vm14, %vm4115_vm7 }
 0x318   : > { %v4672_v37 = vmul.f32 %v4077_v40, %v9595_v34  ;;  %v4083_v48 = vadd.f32 %v6279_v50, %v4082_v28  ;;  %vm4100_vm0 = vweird.f32 %v6281_v5  ;;  %v9835_v60 = vadd.f32 1.0, %v6283_v59 }
 0x319   : > { %v4838_v32 = vadd.f32 %v9708_v33, %v4654_v25  ;;  %v6285_v7 = vpop.eup %6284  ;;  %v4117_v52 = vsel %vm4116_vm10, %v6277_v24, %v4113_v17  ;;  %vm12385_vm4 = vweird.f32 %v9762_v4  ;;  %v4097_v34 = vmul.f32 %v6281_v5, %v4096_v11  ;;  %vm4101_vm7 = vmor %vm4099_vm11, %vm4100_vm0  ;;  %v1310_v11 = vpop.f32.mrf.mxu2 }
 0x31a   : > { %v4813_v41 = vadd.f32 %v9734_v42, %v4672_v37  ;;  %vm4086_vm8 = vmor %vm12385_vm4, %vm4085_vm9  ;;  %6286 = vpow2.f32 %v9779_v0  ;;  %v4122_v33 = vsel %vm9805_vm3, %v4121_v51, %v4117_v52  ;;  %vm9843_vm12 = vcmp.eq.f32.partialorder %v4103_v54, 8.507059e+37  ;;  %v1368_v54 = vpop.f32.mrf.mxu0  ;;  %v1339_v52 = vpop.f32.mrf.mxu3 }
 0x31b   : > { %v4087_v13 = vsel %vm4086_vm8, %v6279_v50, %v4083_v48  ;;  %v4365_v43 = vmul.f32 %v6285_v7, %v9802_v57  ;;  %v4675_v29 = vmul.f32 %v4122_v33, %v9605_v22  ;;  %v4098_v4 = vadd.f32 %v6281_v5, %v4097_v34 }
 0x31c   : > { %v4092_v42 = vsel %vm9810_vm6, %v4091_v62, %v4087_v13  ;;  %6288 = vrcp.f32 %v9835_v60  ;;  %v4106_v38 = vor.u32 1.1754944e-38, %v4105_v46  ;;  %v4373_v20 = vand.u32 2147483647, %v9802_v57 }
 0x31d   : > { %v4673_v0 = vmul.f32 %v4092_v42, %v9715_v10  ;;  %v4366_v3 = vsub.f32 1.0, %v4365_v43  ;;  %v9858_v63 = vadd.f32 %v9748_v14, %v4675_v29  ;;  %v4102_v22 = vsel %vm4101_vm7, %v6281_v5, %v4098_v4  ;;  %v6553_v14 = vld [vmem:[%s12093_s4 + $0x8] sm:$0xff] }
 0x31e   : > { %v4375_v24 = vand.u32 2147483648, %v9802_v57  ;;  %6290 = vpow2.f32 %v9795_v21  ;;  %v4107_v10 = vsel %vm9843_vm12, %v4106_v38, %v4102_v22  ;;  %vm4370_vm11 = vweird.f32 %v6285_v7 }
 0x31f   : > { %v9863_v53 = vadd.f32 %v9769_v49, %v4673_v0  ;;  %v4367_v55 = vmul.f32 %v6285_v7, %v4366_v3  ;;  %v4674_v16 = vmul.f32 %v4107_v10, %v9718_v1  ;;  %v9871_v36 = vperm.slane %v6553_v14, 4 }
 0x320   : > { %v6287_v50 = vpop.eup %6286  ;;  %vm4369_vm3 = vweird.f32 %v9802_v57  ;;  %v4376_v45 = vor.u32 1.1754944e-38, %v4375_v24  ;;  %vm4374_vm13 = vcmp.eq.f32.partialorder %v4373_v20, 8.507059e+37  ;;  %v9880_v5 = vperm.slane %v6553_v14, 7 }
 0x321   : > { %v4368_v51 = vadd.f32 %v6285_v7, %v4367_v55  ;;  %v2133_v49 = vadd.f32 1.0, %v6287_v50  ;;  %v9874_v44 = vadd.f32 %v4838_v32, %v4674_v16  ;;  %vm4371_vm6 = vmor %vm4369_vm3, %vm4370_vm11  ;;  %v9878_v26 = vadd.f32 %v1281_v6, %v9871_v36  ;;  %v1283_v32 = vpop.f32.mrf.mxu1 }
 0x322   : > { %v6289_v21 = vpop.eup %6288  ;;  %v4418_v30 = vand.u32 2147483647, %v9835_v60  ;;  %v4420_v27 = vand.u32 2147483648, %v9835_v60  ;;  %v9890_v25 = vadd.f32 %v1368_v54, %v9880_v5  ;;  %vm4414_vm14 = vweird.f32 %v9835_v60 }
 0x323   : > { %v4372_v61 = vsel %vm4371_vm6, %v6285_v7, %v4368_v51  ;;  %v4410_v1 = vmul.f32 %v6289_v21, %v9835_v60  ;;  %6292 = vrcp.f32 %v2133_v49  ;;  %vm4415_vm9 = vweird.f32 %v6289_v21 }
 0x324   : > { %v6291_v62 = vpop.eup %6290  ;;  %v4377_v23 = vsel %vm4374_vm13, %v4376_v45, %v4372_v61  ;;  %v5637_v59 = vmul.f32 -1.442695, %v9878_v26  ;;  %v9893_v28 = vperm.slane %v6553_v14, 5  ;;  %vm4416_vm10 = vmor %vm4414_vm14, %vm4415_vm9  ;;  %v4421_v37 = vor.u32 1.1754944e-38, %v4420_v27 }
 0x325   : > { %v4692_v57 = vmul.f32 %v4377_v23, %v9732_v2  ;;  %v4411_v35 = vsub.f32 1.0, %v4410_v1  ;;  %v9883_v19 = vadd.f32 1.0, %v6291_v62  ;;  %v9895_v46 = vperm.slane %v6553_v14, 6 }
 0x326   : > { %vm4419_vm0 = vcmp.eq.f32.partialorder %v4418_v30, 8.507059e+37  ;;  %v4388_v7 = vand.u32 2147483647, %v2133_v49  ;;  %v5640_v13 = vmul.f32 -1.442695, %v9890_v25  ;;  %v9900_v43 = vadd.f32 %v1310_v11, %v9893_v28 }
 0x327   : > { %v4814_v56 = vadd.f32 %v4813_v41, %v4692_v57  ;;  %v4412_v39 = vmul.f32 %v6289_v21, %v4411_v35  ;;  %6294 = vrcp.f32 %v9883_v19  ;;  %v4390_v41 = vand.u32 2147483648, %v2133_v49 }
 0x328   : > { %6296 = vpow2.f32 %v5637_v59  ;;  %v9903_v29 = vadd.f32 %v1283_v32, %v9871_v36  ;;  %v9907_v0 = vadd.f32 %v1339_v52, %v9895_v46  ;;  %vm4384_vm8 = vweird.f32 %v2133_v49 }
 0x329   : > { %v6293_v40 = vpop.eup %6292  ;;  %v4413_v2 = vadd.f32 %v6289_v21, %v4412_v39  ;;  %v4815_v38 = vrot.slane %v4814_v56, 4  ;;  %vm9910_vm12 = vcmp.eq.f32.partialorder %v4388_v7, 8.507059e+37  ;;  %v4391_v22 = vor.u32 1.1754944e-38, %v4390_v41 }
 0x32a   : > { %v4380_v17 = vmul.f32 %v6293_v40, %v2133_v49  ;;  %vm4385_vm4 = vweird.f32 %v6293_v40  ;;  %6298 = vpow2.f32 %v5640_v13  ;;  %v4403_v55 = vand.u32 2147483647, %v9883_v19 }
 0x32b   : > { %v4417_v48 = vsel %vm4416_vm10, %v6289_v21, %v4413_v2  ;;  %vm4386_vm7 = vmor %vm4384_vm8, %vm4385_vm4  ;;  %v4405_v50 = vand.u32 2147483648, %v9883_v19  ;;  %v5638_v16 = vmul.f32 -1.442695, %v9900_v43  ;;  %v5639_v51 = vmul.f32 -1.442695, %v9907_v0 }
 0x32c   : > { %v4422_v34 = vsel %vm4419_vm0, %v4421_v37, %v4417_v48  ;;  %v4381_v33 = vsub.f32 1.0, %v4380_v17  ;;  %v4816_v49 = vadd.f32 %v4815_v38, %v4814_v56  ;;  %v5657_v45 = vmul.f32 -1.442695, %v9903_v29  ;;  %v1370_v37 = vpop.f32.mrf.mxu0 }
 0x32d   : > { %v6295_v60 = vpop.eup %6294  ;;  %v4695_v12 = vmul.f32 %v4422_v34, %v9752_v31  ;;  %vm4399_vm3 = vweird.f32 %v9883_v19  ;;  %v4406_v23 = vor.u32 1.1754944e-38, %v4405_v50  ;;  %6300 = vpow2.f32 %v5638_v16 }
 0x32e   : > { %v4382_v42 = vmul.f32 %v6293_v40, %v4381_v33  ;;  %v4395_v4 = vmul.f32 %v6295_v60, %v9883_v19  ;;  %v6297_v14 = vpop.eup %6296  ;;  %vm4400_vm11 = vweird.f32 %v6295_v60  ;;  %vm4404_vm13 = vcmp.eq.f32.partialorder %v4403_v55, 8.507059e+37 }
 0x32f   : > { %v4853_v3 = vadd.f32 %v9858_v63, %v4695_v12  ;;  %vm4401_vm6 = vmor %vm4399_vm3, %vm4400_vm11  ;;  %v9923_v57 = vadd.f32 1.0, %v6297_v14  ;;  %6302 = vpow2.f32 %v5639_v51  ;;  %v4817_v27 = vrot.slane %v4816_v49, 2 }
 0x330   : > { %v4383_v31 = vadd.f32 %v6293_v40, %v4382_v42  ;;  %v4396_v24 = vsub.f32 1.0, %v4395_v4  ;;  %v6299_v35 = vpop.eup %6298  ;;  %6304 = vpow2.f32 %v5657_v45  ;;  %v9933_v52 = vadd.f32 %v1370_v37, %v9880_v5  ;;  %v1286_v45 = vpop.f32.mrf.mxu1 }
 0x331   : > { %v4854_v10 = vrot.slane %v4853_v3, 4  ;;  %6306 = vrcp.f32 %v9923_v57  ;;  %v9928_v19 = vadd.f32 1.0, %v6299_v35  ;;  %vm12390_vm9 = vcmask 1040384  }
 0x332   : > { %v4387_v6 = vsel %vm4386_vm7, %v6293_v40, %v4383_v31  ;;  %v4397_v63 = vmul.f32 %v6295_v60, %v4396_v24  ;;  %v1312_v24 = vpop.f32.mrf.mxu2  ;;  %vm12391_vm14 = vcmask 1042434   ;;  %vm12392_vm10 = vcmask 1041408  }
 0x333   : > { %v4392_v21 = vsel %vm9910_vm12, %v4391_v22, %v4387_v6  ;;  %v4855_v61 = vadd.f32 %v4854_v10, %v4853_v3  ;;  %v6301_v17 = vpop.eup %6300  ;;  %6308 = vrcp.f32 %v9928_v19  ;;  %v5660_v3 = vmul.f32 -1.442695, %v9933_v52  ;;  %v1341_v6 = vpop.f32.mrf.mxu3 }
 0x334   : > { %v4693_v1 = vmul.f32 %v4392_v21, %v9756_v8  ;;  %v4398_v62 = vadd.f32 %v6295_v60, %v4397_v63  ;;  %v9935_v33 = vadd.f32 1.0, %v6301_v17  ;;  %vm2329_vm0 = vweird.f32 %v9923_v57 }
 0x335   : > { %v4856_v39 = vrot.slane %v4855_v61, 2  ;;  %v6303_v11 = vpop.eup %6302  ;;  %vm2374_vm12 = vweird.f32 %v9928_v19 }
 0x336   : > { %v4827_v54 = vadd.f32 %v9863_v53, %v4693_v1  ;;  %v4402_v30 = vsel %vm4401_vm6, %v6295_v60, %v4398_v62  ;;  %v4818_v53 = vadd.f32 %v4817_v27, %v4816_v49  ;;  %v6305_v41 = vpop.eup %6304  ;;  %v9939_v60 = vadd.f32 1.0, %v6303_v11  ;;  %v1373_v62 = vpop.f32.mrf.mxu0 }
 0x337   : > { %v4407_v56 = vsel %vm4404_vm13, %v4406_v23, %v4402_v30  ;;  %v4857_v32 = vadd.f32 %v4856_v39, %v4855_v61  ;;  %v9937_v13 = vpop.eup %6306  ;;  %v9941_v38 = vadd.f32 1.0, %v6305_v41  ;;  %6310 = vrcp.f32 %v9935_v33 }
 0x338   : > { %v4828_v59 = vrot.slane %v4827_v54, 4  ;;  %v4694_v8 = vmul.f32 %v4407_v56, %v9766_v47  ;;  %v2325_v22 = vmul.f32 %v9937_v13, %v9923_v57  ;;  %6312 = vrcp.f32 %v9939_v60 }
 0x339   : > { %v4858_v12 = vrot.slane %v4857_v32, 1  ;;  %v9947_v10 = vpop.eup %6308  ;;  %6314 = vrcp.f32 %v9941_v38  ;;  %v9955_v61 = vadd.f32 %v1312_v24, %v9893_v28  ;;  %v9958_v1 = vadd.f32 %v1341_v6, %v9895_v46 }
 0x33a   : > { %v4829_v40 = vadd.f32 %v4828_v59, %v4827_v54  ;;  %v4840_v2 = vadd.f32 %v9874_v44, %v4694_v8  ;;  %v4819_v44 = vrot.slane %v4818_v53, 1  ;;  %6316 = vpow2.f32 %v5660_v3 }
 0x33b   : > { %v4859_v50 = vadd.f32 %v4858_v12, %v4857_v32  ;;  %v2326_v49 = vsub.f32 1.0, %v2325_v22  ;;  %v2370_v21 = vmul.f32 %v9947_v10, %v9928_v19  ;;  %v2333_v27 = vand.u32 2147483647, %v9923_v57 }
 0x33c   : > { %v4830_v48 = vrot.slane %v4829_v40, 2  ;;  %v4841_v7 = vrot.slane %v4840_v2, 4  ;;  %v4820_v55 = vadd.f32 %v4819_v44, %v4818_v53  ;;  %v5658_v56 = vmul.f32 -1.442695, %v9955_v61 }
 0x33d   : > { %v9960_v23 = vpop.eup %6310  ;;  %v4996_v35 = vrot.slane %v4859_v50, 5  ;;  %v5659_v39 = vmul.f32 -1.442695, %v9958_v1  ;;  %v9968_v59 = vadd.f32 %v1286_v45, %v9871_v36  ;;  %v2371_v37 = vsub.f32 1.0, %v2370_v21 }
 0x33e   : > { %v4831_v47 = vadd.f32 %v4830_v48, %v4829_v40  ;;  %v4842_v34 = vadd.f32 %v4841_v7, %v4840_v2  ;;  %v9962_v30 = vpop.eup %6312  ;;  %v2327_v2 = vmul.f32 %v9937_v13, %v2326_v49  ;;  %v9975_v17 = vadd.f32 %v1373_v62, %v9880_v5 }
 0x33f   : > { %v9970_v8 = vpop.eup %6314  ;;  %v2340_v32 = vmul.f32 %v9960_v23, %v9935_v33  ;;  %6318 = vpow2.f32 %v5658_v56  ;;  %v5677_v48 = vmul.f32 -1.442695, %v9968_v59  ;;  %v2335_v7 = vand.u32 2147483648, %v9923_v57 }
 0x340   : > { %v4832_v42 = vrot.slane %v4831_v47, 1  ;;  %v4843_v4 = vrot.slane %v4842_v34, 2  ;;  %v6317_v53 = vpop.eup %6316  ;;  %v2355_v41 = vmul.f32 %v9962_v30, %v9939_v60  ;;  %6320 = vpow2.f32 %v5659_v39 }
 0x341   : > { %v2378_v44 = vand.u32 2147483647, %v9928_v19  ;;  %v2380_v12 = vand.u32 2147483648, %v9928_v19  ;;  %vm2330_vm4 = vweird.f32 %v9937_v13  ;;  %6322 = vpow2.f32 %v5677_v48 }
 0x342   : > { %v4833_v20 = vadd.f32 %v4832_v42, %v4831_v47  ;;  %v4844_v31 = vadd.f32 %v4843_v4, %v4842_v34  ;;  %v9986_v47 = vadd.f32 1.0, %v6317_v53  ;;  %v1315_v34 = vpop.f32.mrf.mxu2  ;;  %v2625_v42 = vmul.f32 %v9970_v8, %v9941_v38  ;;  %vm10012_vm7 = vmor %vm2329_vm0, %vm2330_vm4 }
 0x343   : > { %v2372_v4 = vmul.f32 %v9947_v10, %v2371_v37  ;;  %v5680_v3 = vmul.f32 -1.442695, %v9975_v17  ;;  %v9999_v22 = vadd.f32 %v1315_v34, %v9893_v28  ;;  %vm10001_vm8 = vcmp.eq.f32.partialorder %v2333_v27, 8.507059e+37 }
 0x344   : > { %v4994_v16 = vrot.slane %v4833_v20, 7  ;;  %v4845_v14 = vrot.slane %v4844_v31, 1  ;;  %v2328_v20 = vadd.f32 %v9937_v13, %v2327_v2  ;;  %6324 = vrcp.f32 %v9986_v47 }
 0x345   : > { %v2356_v50 = vsub.f32 1.0, %v2355_v41  ;;  %v2381_v6 = vor.u32 1.1754944e-38, %v2380_v12  ;;  %v2626_v49 = vsub.f32 1.0, %v2625_v42  ;;  %v2373_v62 = vadd.f32 %v9947_v10, %v2372_v4 }
 0x346   : > { %v5018_v63 = vsel %vm12390_vm9, %v4820_v55, %v4994_v16  ;;  %v4846_v51 = vadd.f32 %v4845_v14, %v4844_v31  ;;  %v2341_v31 = vsub.f32 1.0, %v2340_v32  ;;  %v2336_v55 = vor.u32 1.1754944e-38, %v2335_v7  ;;  %v1344_v16 = vpop.f32.mrf.mxu3  ;;  %v6319_v14 = vpop.eup %6318 }
 0x347   : > { %v6321_v21 = vpop.eup %6320  ;;  %vm2375_vm11 = vweird.f32 %v9947_v10  ;;  %6326 = vpow2.f32 %v5680_v3  ;;  %v2332_v27 = vsel %vm10012_vm7, %v9937_v13, %v2328_v20  ;;  %vm10023_vm3 = vcmp.eq.f32.partialorder %v2378_v44, 8.507059e+37 }
 0x348   : > { %v4995_v54 = vrot.slane %v4846_v51, 6  ;;  %v2350_v51 = vand.u32 2147483648, %v9935_v33  ;;  %v2342_v57 = vmul.f32 %v9960_v23, %v2341_v31  ;;  %v5678_v39 = vmul.f32 -1.442695, %v9999_v22  ;;  %v6323_v2 = vpop.eup %6322  ;;  %vm10043_vm13 = vmor %vm2374_vm12, %vm2375_vm11  ;;  %v1375_v31 = vpop.f32.mrf.mxu0 }
 0x349   : > { %vm2344_vm6 = vweird.f32 %v9935_v33  ;;  %v2357_v37 = vmul.f32 %v9962_v30, %v2356_v50  ;;  %v10035_v53 = vadd.f32 1.0, %v6321_v21  ;;  %v2627_v41 = vmul.f32 %v9970_v8, %v2626_v49 }
 0x34a   : > { %v5019_v40 = vsel %vm12391_vm14, %v4995_v54, %v4996_v35  ;;  %v10018_v35 = vadd.f32 1.0, %v6319_v14  ;;  %v1288_v54 = vpop.f32.mrf.mxu1  ;;  %v10037_v13 = vpop.eup %6324  ;;  %v2351_v7 = vor.u32 1.1754944e-38, %v2350_v51  ;;  %v2337_v44 = vsel %vm10001_vm8, %v2336_v55, %v2332_v27 }
 0x34b   : > { %v9978_v11 = vsel %vm12392_vm10, %v5018_v63, %v5019_v40  ;;  %v2348_v63 = vand.u32 2147483647, %v9935_v33  ;;  %v10030_v40 = vadd.f32 %v1344_v16, %v9895_v46  ;;  %v10053_v34 = vadd.f32 %v1288_v54, %v9871_v36 }
 0x34c   : > { %6328 = vrcp.f32 %v10018_v35  ;;  %v2377_v19 = vsel %vm10043_vm13, %v9947_v10, %v2373_v62  ;;  %vm2345_vm14 = vweird.f32 %v9960_v23  ;;  %vm2359_vm10 = vweird.f32 %v9939_v60 }
 0x34d   : > { %vm10047_vm9 = vcmp.eq.f32.partialorder %v2348_v63, 8.507059e+37  ;;  %v2343_v12 = vadd.f32 %v9960_v23, %v2342_v57  ;;  %vm2360_vm0 = vweird.f32 %v9962_v30  ;;  %6330 = vpow2.f32 %v5678_v39  ;;  %v6327_v4 = vpop.eup %6326  ;;  %vm10081_vm8 = vmor %vm2344_vm6, %vm2345_vm14 }
 0x34e   : > { %v5679_v42 = vmul.f32 -1.442695, %v10030_v40  ;;  %v2358_v3 = vadd.f32 %v9962_v30, %v2357_v37  ;;  %v2670_v20 = vmul.f32 %v10037_v13, %v9986_v47  ;;  %6332 = vrcp.f32 %v10035_v53  ;;  %vm10096_vm7 = vmor %vm2359_vm10, %vm2360_vm0 }
 0x34f   : > { %v10069_v10 = vadd.f32 1.0, %v6323_v2  ;;  %v2365_v24 = vand.u32 2147483648, %v9939_v60  ;;  %v2628_v55 = vadd.f32 %v9970_v8, %v2627_v41  ;;  %vm2630_vm4 = vweird.f32 %v9970_v8 }
 0x350   : > { %v5697_v50 = vmul.f32 -1.442695, %v10053_v34  ;;  %v2363_v63 = vand.u32 2147483647, %v9939_v60  ;;  %vm2629_vm12 = vweird.f32 %v9941_v38  ;;  %v2633_v51 = vand.u32 2147483647, %v9941_v38 }
 0x351   : > { %v2635_v49 = vand.u32 2147483648, %v9941_v38  ;;  %v2347_v21 = vsel %vm10081_vm8, %v9960_v23, %v2343_v12  ;;  %v10100_v45 = vadd.f32 1.0, %v6327_v4  ;;  %6334 = vpow2.f32 %v5679_v42  ;;  %vm10112_vm11 = vmor %vm2629_vm12, %vm2630_vm4 }
 0x352   : > { %v10075_v16 = vpop.eup %6328  ;;  %v10103_v62 = vadd.f32 %v1375_v31, %v9880_v5  ;;  %v2382_v38 = vsel %vm10023_vm3, %v2381_v6, %v2377_v19  ;;  %v2362_v23 = vsel %vm10096_vm7, %v9962_v30, %v2358_v3  ;;  %v2671_v54 = vsub.f32 1.0, %v2670_v20 }
 0x353   : > { %6336 = vrcp.f32 %v10069_v10  ;;  %v6331_v27 = vpop.eup %6330  ;;  %v2366_v57 = vor.u32 1.1754944e-38, %v2365_v24  ;;  %v2632_v56 = vsel %vm10112_vm11, %v9970_v8, %v2628_v55  ;;  %v2640_v6 = vmul.f32 %v10075_v16, %v10018_v35 }
 0x354   : > { %6338 = vpow2.f32 %v5697_v50  ;;  %v10122_v30 = vpop.eup %6332  ;;  %v2352_v39 = vsel %vm10047_vm9, %v2351_v7, %v2347_v21  ;;  %vm2364_vm3 = vcmp.eq.f32.partialorder %v2363_v63, 8.507059e+37  ;;  %vm2634_vm6 = vcmp.eq.f32.partialorder %v2633_v51, 8.507059e+37 }
 0x355   : > { %v2636_v2 = vor.u32 1.1754944e-38, %v2635_v49  ;;  %v2367_v37 = vsel %vm2364_vm3, %v2366_v57, %v2362_v23  ;;  %v2678_v32 = vand.u32 2147483647, %v9986_v47  ;;  %6340 = vrcp.f32 %v10100_v45 }
 0x356   : > { %v5700_v41 = vmul.f32 -1.442695, %v10103_v62  ;;  %v2672_v19 = vmul.f32 %v10037_v13, %v2671_v54  ;;  %v2680_v12 = vand.u32 2147483648, %v9986_v47  ;;  %v2641_v4 = vsub.f32 1.0, %v2640_v6 }
 0x357   : > { %v2637_v8 = vsel %vm2634_vm6, %v2636_v2, %v2632_v56  ;;  %v6335_v42 = vpop.eup %6334  ;;  %v2655_v48 = vmul.f32 %v10122_v30, %v10035_v53  ;;  %v10133_v7 = vadd.f32 1.0, %v6331_v27  ;;  %v4556_v20 = vmul.f32 %v2337_v44, %v9878_v26  ;;  %v1317_v26 = vpop.f32.mrf.mxu2 }
 0x358   : > { %v10139_v31 = vmul.f32 %v2382_v38, %v9890_v25  ;;  %v10142_v24 = vmul.f32 %v2352_v39, %v9900_v43  ;;  %v10145_v55 = vmul.f32 %v2367_v37, %v9907_v0  ;;  %v4576_v14 = vmul.f32 %v2637_v8, %v9903_v29  ;;  %v1346_v44 = vpop.f32.mrf.mxu3 }
 0x359   : > { %v10135_v3 = vpop.eup %6336  ;;  %vm2674_vm13 = vweird.f32 %v9986_v47  ;;  %vm10149_vm9 = vcmp.eq.f32.partialorder %v2678_v32, 8.507059e+37  ;;  %6342 = vpow2.f32 %v5700_v41  ;;  %v2673_v25 = vadd.f32 %v10037_v13, %v2672_v19 }
 0x35a   : > { %v6339_v50 = vpop.eup %6338  ;;  %vm2675_vm14 = vweird.f32 %v10037_v13  ;;  %v2681_v43 = vor.u32 1.1754944e-38, %v2680_v12  ;;  %v10155_v51 = vadd.f32 1.0, %v6335_v42  ;;  %v2642_v29 = vmul.f32 %v10075_v16, %v2641_v4  ;;  %v1291_v12 = vpop.f32.mrf.mxu1 }
 0x35b   : > { %v10157_v0 = vpop.eup %6340  ;;  %v2656_v49 = vsub.f32 1.0, %v2655_v48  ;;  %v2925_v21 = vmul.f32 %v10135_v3, %v10069_v10  ;;  %6344 = vrcp.f32 %v10133_v7  ;;  %v2648_v33 = vand.u32 2147483647, %v10018_v35  ;;  %vm10181_vm0 = vmor %vm2674_vm13, %vm2675_vm14 }
 0x35c   : > { %v10164_v38 = vadd.f32 1.0, %v6339_v50  ;;  %v10167_v23 = vadd.f32 %v1317_v26, %v9893_v28  ;;  %v10170_v60 = vadd.f32 %v1346_v44, %v9895_v46  ;;  %v10172_v54 = vadd.f32 %v4576_v14, %v4556_v20 }
 0x35d   : > { %vm2644_vm10 = vweird.f32 %v10018_v35  ;;  %v2650_v27 = vand.u32 2147483648, %v10018_v35  ;;  %v2665_v57 = vand.u32 2147483648, %v10035_v53  ;;  %vm2645_vm4 = vweird.f32 %v10075_v16 }
 0x35e   : > { %v2663_v6 = vand.u32 2147483647, %v10035_v53  ;;  %v2970_v39 = vmul.f32 %v10157_v0, %v10100_v45  ;;  %6346 = vrcp.f32 %v10155_v51  ;;  %v2677_v37 = vsel %vm10181_vm0, %v10037_v13, %v2673_v25  ;;  %vm10212_vm7 = vmor %vm2644_vm10, %vm2645_vm4 }
 0x35f   : > { %v6343_v2 = vpop.eup %6342  ;;  %v2643_v47 = vadd.f32 %v10075_v16, %v2642_v29  ;;  %v2657_v32 = vmul.f32 %v10122_v30, %v2656_v49  ;;  %v2926_v41 = vsub.f32 1.0, %v2925_v21  ;;  %vm10195_vm8 = vcmp.eq.f32.partialorder %v2648_v33, 8.507059e+37 }
 0x360   : > { %vm2659_vm12 = vweird.f32 %v10035_v53  ;;  %v2935_v19 = vand.u32 2147483648, %v10069_v10  ;;  %6348 = vrcp.f32 %v10164_v38  ;;  %v2651_v4 = vor.u32 1.1754944e-38, %v2650_v27  ;;  %v1349_v26 = vpop.f32.mrf.mxu3 }
 0x361   : > { %v10202_v42 = vpop.eup %6344  ;;  %v2666_v13 = vor.u32 1.1754944e-38, %v2665_v57  ;;  %v2933_v48 = vand.u32 2147483647, %v10069_v10  ;;  %v2980_v20 = vand.u32 2147483648, %v10100_v45  ;;  %v2682_v50 = vsel %vm10149_vm9, %v2681_v43, %v2677_v37 }
 0x362   : > { %vm10216_vm11 = vcmp.eq.f32.partialorder %v2663_v6, 8.507059e+37  ;;  %vm2929_vm3 = vweird.f32 %v10069_v10  ;;  %v2971_v44 = vsub.f32 1.0, %v2970_v39  ;;  %v10221_v25 = vadd.f32 1.0, %v6343_v2  ;;  %v1378_v39 = vpop.f32.mrf.mxu0  ;;  %v1320_v2 = vpop.f32.mrf.mxu2 }
 0x363   : > { %v5698_v63 = vmul.f32 -1.442695, %v10167_v23  ;;  %v2647_v43 = vsel %vm10212_vm7, %v10075_v16, %v2643_v47  ;;  %v2658_v35 = vadd.f32 %v10122_v30, %v2657_v32  ;;  %vm2660_vm6 = vweird.f32 %v10122_v30 }
 0x364   : > { %v2927_v29 = vmul.f32 %v10135_v3, %v2926_v41  ;;  %v10230_v49 = vpop.eup %6346  ;;  %v2936_v21 = vor.u32 1.1754944e-38, %v2935_v19  ;;  %vm2974_vm13 = vweird.f32 %v10100_v45  ;;  %v2978_v33 = vand.u32 2147483647, %v10100_v45  ;;  %vm10250_vm9 = vmor %vm2659_vm12, %vm2660_vm6 }
 0x365   : > { %v2940_v27 = vmul.f32 %v10202_v42, %v10133_v7  ;;  %6350 = vrcp.f32 %v10221_v25  ;;  %v4579_v16 = vmul.f32 %v2682_v50, %v9933_v52  ;;  %v10238_v57 = vor.u32 1.1754944e-38, %v2980_v20 }
 0x366   : > { %v2948_v56 = vand.u32 2147483647, %v10133_v7  ;;  %v2950_v6 = vand.u32 2147483648, %v10133_v7  ;;  %v10242_v37 = vpop.eup %6348  ;;  %v2652_v47 = vsel %vm10195_vm8, %v2651_v4, %v2647_v43  ;;  %vm2930_vm14 = vweird.f32 %v10135_v3 }
 0x367   : > { %vm10255_vm10 = vcmp.eq.f32.partialorder %v2933_v48, 8.507059e+37  ;;  %v2972_v41 = vmul.f32 %v10157_v0, %v2971_v44  ;;  %6352 = vpow2.f32 %v5698_v63  ;;  %v2662_v8 = vsel %vm10250_vm9, %v10122_v30, %v2658_v35  ;;  %vm10302_vm12 = vmor %vm2929_vm3, %vm2930_vm14 }
 0x368   : > { %v2928_v19 = vadd.f32 %v10135_v3, %v2927_v29  ;;  %v2955_v53 = vmul.f32 %v10230_v49, %v10155_v51  ;;  %v5699_v4 = vmul.f32 -1.442695, %v10170_v60  ;;  %vm10267_vm0 = vcmp.eq.f32.partialorder %v2978_v33, 8.507059e+37 }
 0x369   : > { %v2941_v48 = vsub.f32 1.0, %v2940_v27  ;;  %v10272_v50 = vadd.f32 %v1291_v12, %v9871_v36  ;;  %v10275_v14 = vadd.f32 %v1378_v39, %v9880_v5  ;;  %v10278_v30 = vadd.f32 %v1320_v2, %v9893_v28 }
 0x36a   : > { %v10281_v44 = vadd.f32 %v4579_v16, %v10139_v31  ;;  %vm2975_vm4 = vweird.f32 %v10157_v0  ;;  %v3225_v63 = vmul.f32 %v10242_v37, %v10164_v38  ;;  %6354 = vpow2.f32 %v5699_v4  ;;  %v1293_v31 = vpop.f32.mrf.mxu1  ;;  %v1380_v10 = vpop.f32.mrf.mxu0 }
 0x36b   : > { %v10286_v43 = vpop.eup %6350  ;;  %v2973_v12 = vadd.f32 %v10157_v0, %v2972_v41  ;;  %vm2944_vm8 = vweird.f32 %v10133_v7  ;;  %v5717_v35 = vmul.f32 -1.442695, %v10272_v50  ;;  %v5720_v29 = vmul.f32 -1.442695, %v10275_v14  ;;  %vm10318_vm7 = vmor %vm2974_vm13, %vm2975_vm4 }
 0x36c   : > { %v5718_v33 = vmul.f32 -1.442695, %v10278_v30  ;;  %v10294_v27 = vmul.f32 %v2652_v47, %v9955_v61  ;;  %v2667_v16 = vsel %vm10216_vm11, %v2666_v13, %v2662_v8  ;;  %v10306_v2 = vor.u32 1.1754944e-38, %v2950_v6 }
 0x36d   : > { %v2956_v32 = vsub.f32 1.0, %v2955_v53  ;;  %v6353_v41 = vpop.eup %6352  ;;  %v2932_v61 = vsel %vm10302_vm12, %v10135_v3, %v2928_v19  ;;  %v2942_v47 = vmul.f32 %v10202_v42, %v2941_v48  ;;  %v3270_v13 = vmul.f32 %v10286_v43, %v10221_v25 }
 0x36e   : > { %6356 = vpow2.f32 %v5717_v35  ;;  %v3226_v6 = vsub.f32 1.0, %v3225_v63  ;;  %v10322_v8 = vadd.f32 1.0, %v6353_v41  ;;  %v10325_v3 = vadd.f32 %v1293_v31, %v9871_v36 }
 0x36f   : > { %6358 = vpow2.f32 %v5720_v29  ;;  %v2977_v19 = vsel %vm10318_vm7, %v10157_v0, %v2973_v12  ;;  %v2963_v53 = vand.u32 2147483647, %v10155_v51  ;;  %v2965_v4 = vand.u32 2147483648, %v10155_v51 }
 0x370   : > { %6360 = vpow2.f32 %v5718_v33  ;;  %v6355_v45 = vpop.eup %6354  ;;  %v2937_v48 = vsel %vm10255_vm10, %v2936_v21, %v2932_v61  ;;  %vm10334_vm11 = vcmp.eq.f32.partialorder %v2948_v56, 8.507059e+37  ;;  %v2957_v35 = vmul.f32 %v10230_v49, %v2956_v32 }
 0x371   : > { %6362 = vrcp.f32 %v10322_v8  ;;  %v10341_v29 = vadd.f32 %v1349_v26, %v9895_v46  ;;  %v10344_v0 = vmul.f32 %v2667_v16, %v9958_v1  ;;  %v2943_v12 = vadd.f32 %v10202_v42, %v2942_v47 }
 0x372   : > { %vm2945_vm3 = vweird.f32 %v10202_v42  ;;  %v3271_v52 = vsub.f32 1.0, %v3270_v13  ;;  %v2982_v21 = vsel %vm10267_vm0, %v10238_v57, %v2977_v19  ;;  %v3227_v56 = vmul.f32 %v10242_v37, %v3226_v6 }
 0x373   : > { %v10352_v33 = vadd.f32 1.0, %v6355_v45  ;;  %v5737_v31 = vmul.f32 -1.442695, %v10325_v3  ;;  %v4596_v32 = vmul.f32 %v2937_v48, %v9968_v59  ;;  %vm2959_vm6 = vweird.f32 %v10155_v51  ;;  %vm10363_vm9 = vmor %vm2944_vm8, %vm2945_vm3 }
 0x374   : > { %v6357_v39 = vpop.eup %6356  ;;  %vm10357_vm13 = vcmp.eq.f32.partialorder %v2963_v53, 8.507059e+37  ;;  %v2966_v16 = vor.u32 1.1754944e-38, %v2965_v4  ;;  %v2958_v20 = vadd.f32 %v10230_v49, %v2957_v35  ;;  %vm2960_vm14 = vweird.f32 %v10230_v49 }
 0x375   : > { %v6359_v41 = vpop.eup %6358  ;;  %6364 = vrcp.f32 %v10352_v33  ;;  %v5719_v59 = vmul.f32 -1.442695, %v10341_v29  ;;  %v4599_v47 = vmul.f32 %v2982_v21, %v9975_v17  ;;  %v2947_v13 = vsel %vm10363_vm9, %v10202_v42, %v2943_v12  ;;  %vm10385_vm0 = vmor %vm2959_vm6, %vm2960_vm14 }
 0x376   : > { %v6361_v61 = vpop.eup %6360  ;;  %v3235_v7 = vand.u32 2147483648, %v10164_v38  ;;  %v3272_v26 = vmul.f32 %v10286_v43, %v3271_v52  ;;  %v3228_v19 = vadd.f32 %v10242_v37, %v3227_v56  ;;  %vm3230_vm10 = vweird.f32 %v10242_v37 }
 0x377   : > { %v10377_v6 = vpop.eup %6362  ;;  %v10381_v53 = vadd.f32 1.0, %v6357_v39  ;;  %6366 = vpow2.f32 %v5737_v31  ;;  %vm3229_vm4 = vweird.f32 %v10164_v38  ;;  %v3233_v42 = vand.u32 2147483647, %v10164_v38 }
 0x378   : > { %v3240_v4 = vmul.f32 %v10377_v6, %v10322_v8  ;;  %v10393_v45 = vadd.f32 1.0, %v6359_v41  ;;  %v2962_v48 = vsel %vm10385_vm0, %v10230_v49, %v2958_v20  ;;  %v10398_v35 = vadd.f32 1.0, %v6361_v61  ;;  %vm10406_vm8 = vmor %vm3229_vm4, %vm3230_vm10 }
 0x379   : > { %6368 = vpow2.f32 %v5719_v59  ;;  %v10401_v51 = vadd.f32 %v1380_v10, %v9880_v5  ;;  %v2952_v12 = vsel %vm10334_vm11, %v10306_v2, %v2947_v13  ;;  %v3236_v52 = vor.u32 1.1754944e-38, %v3235_v7 }
 0x37a   : > { %v3273_v21 = vadd.f32 %v10286_v43, %v3272_v26  ;;  %vm3275_vm12 = vweird.f32 %v10286_v43  ;;  %v3232_v56 = vsel %vm10406_vm8, %v10242_v37, %v3228_v19  ;;  %vm3274_vm7 = vweird.f32 %v10221_v25  ;;  %v1322_v19 = vpop.f32.mrf.mxu2 }
 0x37b   : > { %v10412_v49 = vpop.eup %6364  ;;  %v3280_v63 = vand.u32 2147483648, %v10221_v25  ;;  %6370 = vrcp.f32 %v10381_v53  ;;  %v2967_v2 = vsel %vm10357_vm13, %v2966_v16, %v2962_v48  ;;  %v3278_v31 = vand.u32 2147483647, %v10221_v25  ;;  %vm10424_vm3 = vmor %vm3274_vm7, %vm3275_vm12 }
 0x37c   : > { %v3241_v39 = vsub.f32 1.0, %v3240_v4  ;;  %6372 = vrcp.f32 %v10393_v45  ;;  %vm3234_vm11 = vcmp.eq.f32.partialorder %v3233_v42, 8.507059e+37  ;;  %v3255_v37 = vmul.f32 %v10412_v49, %v10352_v33 }
 0x37d   : > { %v6367_v41 = vpop.eup %6366  ;;  %6374 = vrcp.f32 %v10398_v35  ;;  %v5740_v20 = vmul.f32 -1.442695, %v10401_v51  ;;  %v4873_v1 = vadd.f32 %v10294_v27, %v10142_v24  ;;  %v4597_v25 = vmul.f32 %v2952_v12, %v9999_v22 }
 0x37e   : > { %v3237_v16 = vsel %vm3234_vm11, %v3236_v52, %v3232_v56  ;;  %v3277_v59 = vsel %vm10424_vm3, %v10286_v43, %v3273_v21  ;;  %v4886_v13 = vadd.f32 %v10344_v0, %v10145_v55  ;;  %v4861_v7 = vadd.f32 %v10172_v54, %v4596_v32 }
 0x37f   : > { %v6369_v61 = vpop.eup %6368  ;;  %v4598_v26 = vmul.f32 %v2967_v2, %v10030_v40  ;;  %v3281_v10 = vor.u32 1.1754944e-38, %v3280_v63  ;;  %v4900_v17 = vadd.f32 %v10281_v44, %v4599_v47  ;;  %vm3279_vm6 = vcmp.eq.f32.partialorder %v3278_v31, 8.507059e+37 }
 0x380   : > { %v3242_v22 = vmul.f32 %v10377_v6, %v3241_v39  ;;  %v10444_v24 = vadd.f32 1.0, %v6367_v41  ;;  %v4616_v43 = vmul.f32 %v3237_v16, %v10053_v34  ;;  %v3256_v4 = vsub.f32 1.0, %v3255_v37 }
 0x381   : > { %v10446_v27 = vpop.eup %6370  ;;  %v3282_v42 = vsel %vm3279_vm6, %v3281_v10, %v3277_v59  ;;  %6376 = vpow2.f32 %v5740_v20  ;;  %v10451_v54 = vadd.f32 %v4873_v1, %v4597_v25  ;;  %v3248_v40 = vand.u32 2147483647, %v10322_v8  ;;  %v1351_v59 = vpop.f32.mrf.mxu3 }
 0x382   : > { %v10449_v55 = vpop.eup %6372  ;;  %v10454_v0 = vadd.f32 1.0, %v6369_v61  ;;  %v10457_v44 = vadd.f32 %v1322_v19, %v9893_v28  ;;  %v10461_v47 = vadd.f32 %v4886_v13, %v4598_v26  ;;  %v3250_v34 = vand.u32 2147483648, %v10322_v8 }
 0x383   : > { %v10459_v32 = vpop.eup %6374  ;;  %v3263_v48 = vand.u32 2147483647, %v10352_v33  ;;  %v3265_v12 = vand.u32 2147483648, %v10352_v33  ;;  %v4619_v38 = vmul.f32 %v3282_v42, %v10103_v62  ;;  %v3243_v52 = vadd.f32 %v10377_v6, %v3242_v22  ;;  %v1296_v22 = vpop.f32.mrf.mxu1 }
 0x384   : > { %vm3245_vm13 = vweird.f32 %v10377_v6  ;;  %6378 = vrcp.f32 %v10444_v24  ;;  %v10470_v21 = vadd.f32 %v4861_v7, %v4616_v43  ;;  %vm3244_vm9 = vweird.f32 %v10322_v8 }
 0x385   : > { %v3257_v56 = vmul.f32 %v10412_v49, %v3256_v4  ;;  %v3525_v63 = vmul.f32 %v10446_v27, %v10381_v53  ;;  %vm10476_vm14 = vcmp.eq.f32.partialorder %v3248_v40, 8.507059e+37  ;;  %v3570_v62 = vmul.f32 %v10449_v55, %v10393_v45  ;;  %vm10485_vm10 = vmor %vm3244_vm9, %vm3245_vm13 }
 0x386   : > { %v3540_v31 = vmul.f32 %v10459_v32, %v10398_v35  ;;  %6380 = vrcp.f32 %v10454_v0  ;;  %v3251_v41 = vor.u32 1.1754944e-38, %v3250_v34  ;;  %vm3259_vm0 = vweird.f32 %v10352_v33 }
 0x387   : > { %v6377_v39 = vpop.eup %6376  ;;  %v3535_v57 = vand.u32 2147483648, %v10381_v53  ;;  %v3580_v37 = vand.u32 2147483648, %v10393_v45  ;;  %v10492_v20 = vadd.f32 %v4900_v17, %v4619_v38  ;;  %v3247_v1 = vsel %vm10485_vm10, %v10377_v6, %v3243_v52 }
 0x388   : > { %vm10497_vm4 = vcmp.eq.f32.partialorder %v3263_v48, 8.507059e+37  ;;  %v3266_v16 = vor.u32 1.1754944e-38, %v3265_v12  ;;  %v3258_v61 = vadd.f32 %v10412_v49, %v3257_v56  ;;  %vm3260_vm8 = vweird.f32 %v10412_v49 }
 0x389   : > { %v3526_v13 = vsub.f32 1.0, %v3525_v63  ;;  %v3550_v7 = vand.u32 2147483648, %v10398_v35  ;;  %vm3529_vm12 = vweird.f32 %v10381_v53  ;;  %v3533_v10 = vand.u32 2147483647, %v10381_v53  ;;  %vm10524_vm11 = vmor %vm3259_vm0, %vm3260_vm8 }
 0x38a   : > { %v10504_v26 = vpop.eup %6378  ;;  %v3571_v6 = vsub.f32 1.0, %v3570_v62  ;;  %v3541_v19 = vsub.f32 1.0, %v3540_v31  ;;  %v10508_v17 = vadd.f32 1.0, %v6377_v39  ;;  %v3252_v43 = vsel %vm10476_vm14, %v3251_v41, %v3247_v1  ;;  %v1383_v41 = vpop.f32.mrf.mxu0 }
 0x38b   : > { %v10512_v42 = vor.u32 1.1754944e-38, %v3535_v57  ;;  %vm3574_vm7 = vweird.f32 %v10393_v45  ;;  %v3578_v4 = vand.u32 2147483647, %v10393_v45  ;;  %v10516_v40 = vor.u32 1.1754944e-38, %v3580_v37  ;;  %v1325_v57 = vpop.f32.mrf.mxu2 }
 0x38c   : > { %v10518_v34 = vpop.eup %6380  ;;  %vm3530_vm3 = vweird.f32 %v10446_v27  ;;  %vm3544_vm6 = vweird.f32 %v10398_v35  ;;  %v3548_v12 = vand.u32 2147483647, %v10398_v35  ;;  %v3825_v38 = vmul.f32 %v10504_v26, %v10444_v24 }
 0x38d   : > { %v3262_v52 = vsel %vm10524_vm11, %v10412_v49, %v3258_v61  ;;  %v3527_v56 = vmul.f32 %v10446_v27, %v3526_v13  ;;  %v10537_v33 = vor.u32 1.1754944e-38, %v3550_v7  ;;  %6382 = vrcp.f32 %v10508_v17 }
 0x38e   : > { %v4617_v63 = vmul.f32 %v3252_v43, %v10167_v23  ;;  %v3572_v2 = vmul.f32 %v10449_v55, %v3571_v6  ;;  %vm3575_vm13 = vweird.f32 %v10449_v55  ;;  %v3542_v62 = vmul.f32 %v10459_v32, %v3541_v19  ;;  %v1354_v43 = vpop.f32.mrf.mxu3 }
 0x38f   : > { %v3555_v31 = vmul.f32 %v10518_v34, %v10454_v0  ;;  %v5738_v39 = vmul.f32 -1.442695, %v10457_v44  ;;  %v10548_v49 = vadd.f32 %v1351_v59, %v9895_v46  ;;  %v10551_v8 = vadd.f32 %v1296_v22, %v9871_v36  ;;  %vm10599_vm8 = vmor %vm3574_vm7, %vm3575_vm13 }
 0x390   : > { %v3267_v23 = vsel %vm10497_vm4, %v3266_v16, %v3262_v52  ;;  %vm10555_vm9 = vcmp.eq.f32.partialorder %v3533_v10, 8.507059e+37  ;;  %vm3545_vm14 = vweird.f32 %v10459_v32  ;;  %v3565_v1 = vand.u32 2147483648, %v10454_v0  ;;  %vm10589_vm4 = vmor %vm3529_vm12, %vm3530_vm3 }
 0x391   : > { %v3826_v61 = vsub.f32 1.0, %v3825_v38  ;;  %v3528_v59 = vadd.f32 %v10446_v27, %v3527_v56  ;;  %vm10562_vm10 = vcmp.eq.f32.partialorder %v3578_v4, 8.507059e+37  ;;  %6384 = vpow2.f32 %v5738_v39  ;;  %vm10610_vm12 = vmor %vm3544_vm6, %vm3545_vm14 }
 0x392   : > { %v5739_v7 = vmul.f32 -1.442695, %v10548_v49  ;;  %v5757_v25 = vmul.f32 -1.442695, %v10551_v8  ;;  %v3573_v16 = vadd.f32 %v10449_v55, %v3572_v2  ;;  %v3543_v10 = vadd.f32 %v10459_v32, %v3542_v62  ;;  %v1298_v2 = vpop.f32.mrf.mxu1 }
 0x393   : > { %vm10570_vm0 = vcmp.eq.f32.partialorder %v3548_v12, 8.507059e+37  ;;  %v10575_v19 = vadd.f32 %v1383_v41, %v9880_v5  ;;  %v10578_v22 = vadd.f32 %v1325_v57, %v9893_v28  ;;  %v10580_v4 = vpop.eup %6382  ;;  %v10583_v48 = vadd.f32 %v10451_v54, %v4617_v63 }
 0x394   : > { %v3556_v38 = vsub.f32 1.0, %v3555_v31  ;;  %v3563_v52 = vand.u32 2147483647, %v10454_v0  ;;  %6386 = vpow2.f32 %v5739_v7  ;;  %v4618_v56 = vmul.f32 %v3267_v23, %v10170_v60 }
 0x395   : > { %v3827_v53 = vmul.f32 %v10504_v26, %v3826_v61  ;;  %v3870_v63 = vmul.f32 %v10580_v4, %v10508_v17  ;;  %6388 = vpow2.f32 %v5757_v25  ;;  %vm3559_vm7 = vweird.f32 %v10454_v0 }
 0x396   : > { %v10615_v45 = vor.u32 1.1754944e-38, %v3565_v1  ;;  %v5760_v62 = vmul.f32 -1.442695, %v10575_v19  ;;  %v5758_v31 = vmul.f32 -1.442695, %v10578_v22  ;;  %v10620_v39 = vadd.f32 %v1354_v43, %v9895_v46 }
 0x397   : > { %v3532_v41 = vsel %vm10589_vm4, %v10446_v27, %v3528_v59  ;;  %v3577_v35 = vsel %vm10599_vm8, %v10449_v55, %v3573_v16  ;;  %v3547_v57 = vsel %vm10610_vm12, %v10459_v32, %v3543_v10  ;;  %vm3829_vm11 = vweird.f32 %v10444_v24  ;;  %v6385_v23 = vpop.eup %6384 }
 0x398   : > { %v3557_v1 = vmul.f32 %v10518_v34, %v3556_v38  ;;  %vm3830_vm3 = vweird.f32 %v10504_v26  ;;  %6390 = vpow2.f32 %v5760_v62  ;;  %v10635_v61 = vadd.f32 %v1298_v2, %v9871_v36 }
 0x399   : > { %v3828_v27 = vadd.f32 %v10504_v26, %v3827_v53  ;;  %v3871_v59 = vsub.f32 1.0, %v3870_v63  ;;  %v10638_v7 = vadd.f32 1.0, %v6385_v23  ;;  %6392 = vpow2.f32 %v5758_v31 }
 0x39a   : > { %v6387_v55 = vpop.eup %6386  ;;  %v3537_v32 = vsel %vm10555_vm9, %v10512_v42, %v3532_v41  ;;  %v3833_v25 = vand.u32 2147483647, %v10444_v24  ;;  %v3835_v16 = vand.u32 2147483648, %v10444_v24  ;;  %v5759_v10 = vmul.f32 -1.442695, %v10620_v39  ;;  %v1385_v42 = vpop.f32.mrf.mxu0  ;;  %vm10666_vm9 = vmor %vm3829_vm11, %vm3830_vm3 }
 0x39b   : > { %v6389_v43 = vpop.eup %6388  ;;  %v10647_v36 = vadd.f32 %v10461_v47, %v4618_v56  ;;  %v3582_v12 = vsel %vm10562_vm10, %v10516_v40, %v3577_v35  ;;  %vm3560_vm6 = vweird.f32 %v10518_v34  ;;  %vm10653_vm13 = vcmp.eq.f32.partialorder %v3563_v52, 8.507059e+37 }
 0x39c   : > { %6394 = vrcp.f32 %v10638_v7  ;;  %v3552_v37 = vsel %vm10570_vm0, %v10537_v33, %v3547_v57  ;;  %v3558_v47 = vadd.f32 %v10518_v34, %v3557_v1  ;;  %v10670_v13 = vadd.f32 1.0, %v6389_v43  ;;  %vm10689_vm10 = vmor %vm3559_vm7, %vm3560_vm6  ;;  %v1327_v1 = vpop.f32.mrf.mxu2 }
 0x39d   : > { %v5777_v52 = vmul.f32 -1.442695, %v10635_v61  ;;  %v4636_v56 = vmul.f32 %v3537_v32, %v10272_v50  ;;  %v3832_v33 = vsel %vm10666_vm9, %v10504_v26, %v3828_v27  ;;  %v3872_v6 = vmul.f32 %v10580_v4, %v3871_v59  ;;  %v1356_v27 = vpop.f32.mrf.mxu3 }
 0x39e   : > { %v10678_v54 = vadd.f32 1.0, %v6387_v55  ;;  %v6391_v53 = vpop.eup %6390  ;;  %vm3834_vm14 = vcmp.eq.f32.partialorder %v3833_v25, 8.507059e+37  ;;  %v3836_v24 = vor.u32 1.1754944e-38, %v3835_v16  ;;  %6396 = vpow2.f32 %v5759_v10  ;;  %v1397_v25 = vpop.f32.mrf.mxu1 }
 0x39f   : > { %v10681_v63 = vadd.f32 %v1385_v42, %v9880_v5  ;;  %v6393_v2 = vpop.eup %6392  ;;  %v4639_v60 = vmul.f32 %v3582_v12, %v10275_v14  ;;  %v4637_v50 = vmul.f32 %v3552_v37, %v10278_v30  ;;  %v3880_v62 = vand.u32 2147483648, %v10508_v17  ;;  %v10698_v5 = vld [vmem:[%s12093_s4 + $0x10] sm:$0xf] }
 0x3a0   : > { %6398 = vrcp.f32 %v10670_v13  ;;  %v3562_v14 = vsel %vm10689_vm10, %v10518_v34, %v3558_v47  ;;  %v3837_v30 = vsel %vm3834_vm14, %v3836_v24, %v3832_v33  ;;  %v10703_v31 = vadd.f32 1.0, %v6391_v53 }
 0x3a1   : > { %6400 = vpow2.f32 %v5777_v52  ;;  %v3873_v41 = vadd.f32 %v10580_v4, %v3872_v6  ;;  %vm3875_vm0 = vweird.f32 %v10580_v4  ;;  %v10710_v35 = vadd.f32 1.0, %v6393_v2 }
 0x3a2   : > { %v10705_v0 = vpop.eup %6394  ;;  %6402 = vrcp.f32 %v10678_v54  ;;  %v4863_v57 = vadd.f32 %v10470_v21, %v4636_v56  ;;  %v5780_v34 = vmul.f32 -1.442695, %v10681_v63  ;;  %v10717_v59 = vperm.slane %v10698_v5, 0 }
 0x3a3   : > { %v3840_v23 = vmul.f32 %v10705_v0, %v10638_v7  ;;  %v4656_v55 = vmul.f32 %v3837_v30, %v10325_v3  ;;  %vm3874_vm4 = vweird.f32 %v10508_v17  ;;  %v3878_v32 = vand.u32 2147483647, %v10508_v17 }
 0x3a4   : > { %6404 = vrcp.f32 %v10703_v31  ;;  %v6397_v21 = vpop.eup %6396  ;;  %v4902_v16 = vadd.f32 %v10492_v20, %v4639_v60  ;;  %v10725_v10 = vadd.f32 %v10583_v48, %v4637_v50  ;;  %v3567_v43 = vsel %vm10653_vm13, %v10615_v45, %v3562_v14  ;;  %vm10732_vm8 = vmor %vm3874_vm4, %vm3875_vm0 }
 0x3a5   : > { %6406 = vrcp.f32 %v10710_v35  ;;  %v3877_v20 = vsel %vm10732_vm8, %v10580_v4, %v3873_v41  ;;  %v3881_v48 = vor.u32 1.1754944e-38, %v3880_v62  ;;  %v10743_v12 = vadd.f32 %v1327_v1, %v9893_v28 }
 0x3a6   : > { %v10737_v17 = vpop.eup %6398  ;;  %v10746_v45 = vadd.f32 %v1356_v27, %v9895_v46  ;;  %v3841_v42 = vsub.f32 1.0, %v3840_v23  ;;  %6408 = vpow2.f32 %v5780_v34  ;;  %v10751_v47 = vadd.f32 %v1397_v25, %v10717_v59 }
 0x3a7   : > { %v6401_v38 = vpop.eup %6400  ;;  %v4125_v37 = vmul.f32 %v10737_v17, %v10670_v13  ;;  %v10756_v4 = vmul.f32 %v3567_v43, %v10341_v29  ;;  %v10758_v52 = vadd.f32 %v4863_v57, %v4656_v55  ;;  %vm3879_vm12 = vcmp.eq.f32.partialorder %v3878_v32, 8.507059e+37 }
 0x3a8   : > { %v10753_v40 = vpop.eup %6402  ;;  %v3850_v28 = vand.u32 2147483648, %v10638_v7  ;;  %v3882_v46 = vsel %vm3879_vm12, %v3881_v48, %v3877_v20  ;;  %v3848_v56 = vand.u32 2147483647, %v10638_v7  ;;  %v10762_v6 = vadd.f32 1.0, %v6397_v21 }
 0x3a9   : > { %v4126_v33 = vsub.f32 1.0, %v4125_v37  ;;  %vm3844_vm7 = vweird.f32 %v10638_v7  ;;  %v10767_v24 = vadd.f32 1.0, %v6401_v38  ;;  %v5778_v29 = vmul.f32 -1.442695, %v10743_v12 }
 0x3aa   : > { %v10764_v53 = vpop.eup %6404  ;;  %v10771_v2 = vmul.f32 -1.442695, %v10746_v45  ;;  %v3842_v50 = vmul.f32 %v10705_v0, %v3841_v42  ;;  %v3855_v26 = vmul.f32 %v10753_v40, %v10678_v54  ;;  %v10781_v14 = vmul.f32 -1.442695, %v10751_v47 }
 0x3ab   : > { %v10773_v60 = vpop.eup %6406  ;;  %v4170_v62 = vmul.f32 %v10764_v53, %v10703_v31  ;;  %v4659_v30 = vmul.f32 %v3882_v46, %v10401_v51  ;;  %v3851_v41 = vor.u32 1.1754944e-38, %v3850_v28  ;;  %v4127_v57 = vmul.f32 %v10737_v17, %v4126_v33 }
 0x3ac   : > { %v4140_v23 = vmul.f32 %v10773_v60, %v10710_v35  ;;  %v6409_v34 = vpop.eup %6408  ;;  %vm10787_vm11 = vcmp.eq.f32.partialorder %v3848_v56, 8.507059e+37  ;;  %v3863_v27 = vand.u32 2147483647, %v10678_v54  ;;  %v3865_v55 = vand.u32 2147483648, %v10678_v54 }
 0x3ad   : > { %v4171_v32 = vsub.f32 1.0, %v4170_v62  ;;  %6410 = vrcp.f32 %v10762_v6  ;;  %vm3845_vm3 = vweird.f32 %v10705_v0  ;;  %v4133_v51 = vand.u32 2147483647, %v10670_v13 }
 0x3ae   : > { %v4135_v25 = vand.u32 2147483648, %v10670_v13  ;;  %6412 = vrcp.f32 %v10767_v24  ;;  %v3843_v21 = vadd.f32 %v10705_v0, %v3842_v50  ;;  %v3856_v43 = vsub.f32 1.0, %v3855_v26  ;;  %vm10815_vm14 = vmor %vm3844_vm7, %vm3845_vm3 }
 0x3af   : > { %vm4130_vm6 = vweird.f32 %v10737_v17  ;;  %6414 = vpow2.f32 %v5778_v29  ;;  %v4128_v3 = vadd.f32 %v10737_v17, %v4127_v57  ;;  %v4172_v20 = vmul.f32 %v10764_v53, %v4171_v32 }
 0x3b0   : > { %v4141_v48 = vsub.f32 1.0, %v4140_v23  ;;  %v10802_v38 = vadd.f32 1.0, %v6409_v34  ;;  %v10804_v42 = vadd.f32 %v4902_v16, %v4659_v30  ;;  %vm3859_vm13 = vweird.f32 %v10678_v54 }
 0x3b1   : > { %v10807_v37 = vor.u32 1.1754944e-38, %v3865_v55  ;;  %vm4129_vm9 = vweird.f32 %v10670_v13  ;;  %v4178_v28 = vand.u32 2147483647, %v10703_v31  ;;  %vm10819_vm10 = vcmp.eq.f32.partialorder %v4133_v51, 8.507059e+37 }
 0x3b2   : > { %v4136_v16 = vor.u32 1.1754944e-38, %v4135_v25  ;;  %vm4174_vm0 = vweird.f32 %v10703_v31  ;;  %v4180_v33 = vand.u32 2147483648, %v10703_v31  ;;  %v3847_v29 = vsel %vm10815_vm14, %v10705_v0, %v3843_v21  ;;  %vm10833_vm4 = vmor %vm4129_vm9, %vm4130_vm6 }
 0x3b3   : > { %v10825_v13 = vpop.eup %6410  ;;  %v3857_v7 = vmul.f32 %v10753_v40, %v3856_v43  ;;  %vm4175_vm8 = vweird.f32 %v10764_v53  ;;  %v4148_v26 = vand.u32 2147483647, %v10710_v35  ;;  %v4132_v30 = vsel %vm10833_vm4, %v10737_v17, %v4128_v3 }
 0x3b4   : > { %v6413_v62 = vpop.eup %6412  ;;  %v4173_v57 = vadd.f32 %v10764_v53, %v4172_v20  ;;  %v4142_v0 = vmul.f32 %v10773_v60, %v4141_v48  ;;  %6416 = vrcp.f32 %v10802_v38  ;;  %vm3860_vm12 = vweird.f32 %v10753_v40  ;;  %vm10866_vm6 = vmor %vm4174_vm0, %vm4175_vm8 }
 0x3b5   : > { %v6415_v23 = vpop.eup %6414  ;;  %vm10846_vm7 = vcmp.eq.f32.partialorder %v4178_v28, 8.507059e+37  ;;  %vm4144_vm3 = vweird.f32 %v10710_v35  ;;  %v4425_v55 = vmul.f32 %v6413_v62, %v10767_v24  ;;  %v3852_v17 = vsel %vm10787_vm11, %v3851_v41, %v3847_v29 }
 0x3b6   : > { %v4181_v32 = vor.u32 1.1754944e-38, %v4180_v33  ;;  %v4150_v51 = vand.u32 2147483648, %v10710_v35  ;;  %v4155_v25 = vmul.f32 %v10825_v13, %v10762_v6  ;;  %v10858_v21 = vadd.f32 %v10753_v40, %v3857_v7 }
 0x3b7   : > { %v4137_v43 = vsel %vm10819_vm10, %v4136_v16, %v4132_v30  ;;  %vm4145_vm11 = vweird.f32 %v10773_v60  ;;  %vm10871_vm9 = vcmp.eq.f32.partialorder %v4148_v26, 8.507059e+37  ;;  %v4426_v1 = vsub.f32 1.0, %v4425_v55  ;;  %vm10889_vm10 = vmor %vm3859_vm13, %vm3860_vm12 }
 0x3b8   : > { %v4177_v20 = vsel %vm10866_vm6, %v10764_v53, %v4173_v57  ;;  %v4143_v48 = vadd.f32 %v10773_v60, %v4142_v0  ;;  %v4435_v28 = vand.u32 2147483648, %v10767_v24  ;;  %v10880_v31 = vadd.f32 1.0, %v6415_v23  ;;  %vm10900_vm0 = vmor %vm4144_vm3, %vm4145_vm11 }
 0x3b9   : > { %v4427_v46 = vmul.f32 %v6413_v62, %v4426_v1  ;;  %vm4430_vm14 = vweird.f32 %v6413_v62  ;;  %v4433_v56 = vand.u32 2147483647, %v10767_v24  ;;  %6418 = vpow2.f32 %v10771_v2 }
 0x3ba   : > { %v6417_v16 = vpop.eup %6416  ;;  %v4657_v33 = vmul.f32 %v3852_v17, %v10457_v44  ;;  %v4151_v29 = vor.u32 1.1754944e-38, %v4150_v51  ;;  %v4156_v7 = vsub.f32 1.0, %v4155_v25  ;;  %6420 = vrcp.f32 %v10880_v31 }
 0x3bb   : > { %v4182_v50 = vsel %vm10846_vm7, %v4181_v32, %v4177_v20  ;;  %v4428_v2 = vadd.f32 %v6413_v62, %v4427_v46  ;;  %vm4429_vm13 = vweird.f32 %v10767_v24  ;;  %v4470_v26 = vmul.f32 %v6417_v16, %v10802_v38 }
 0x3bc   : > { %v3862_v30 = vsel %vm10889_vm10, %v10753_v40, %v10858_v21  ;;  %v4676_v57 = vmul.f32 %v4137_v43, %v10551_v8  ;;  %vm4159_vm4 = vweird.f32 %v10762_v6  ;;  %v4163_v35 = vand.u32 2147483647, %v10762_v6  ;;  %vm4431_vm8 = vmor %vm4429_vm13, %vm4430_vm14 }
 0x3bd   : > { %v4436_v0 = vor.u32 1.1754944e-38, %v4435_v28  ;;  %vm10916_vm12 = vcmp.eq.f32.partialorder %v3863_v27, 8.507059e+37  ;;  %v4147_v23 = vsel %vm10900_vm0, %v10773_v60, %v4143_v48  ;;  %v4432_v40 = vsel %vm4431_vm8, %v6413_v62, %v4428_v2 }
 0x3be   : > { %vm4434_vm7 = vcmp.eq.f32.partialorder %v4433_v56, 8.507059e+37  ;;  %v4471_v8 = vsub.f32 1.0, %v4470_v26  ;;  %v4679_v34 = vmul.f32 %v4182_v50, %v10575_v19  ;;  %v4157_v55 = vmul.f32 %v10825_v13, %v4156_v7  ;;  %v1484_v7 = vpop.f32.mrf.mxu0 }
 0x3bf   : > { %v4437_v17 = vsel %vm4434_vm7, %v4436_v0, %v4432_v40  ;;  %v4480_v32 = vand.u32 2147483648, %v10802_v38  ;;  %v6419_v51 = vpop.eup %6418  ;;  %v4165_v54 = vand.u32 2147483648, %v10762_v6  ;;  %vm4475_vm3 = vweird.f32 %v6417_v16 }
 0x3c0   : > { %v4472_v27 = vmul.f32 %v6417_v16, %v4471_v8  ;;  %v4478_v25 = vand.u32 2147483647, %v10802_v38  ;;  %v6421_v21 = vpop.eup %6420  ;;  %v4865_v60 = vadd.f32 %v10758_v52, %v4676_v57  ;;  %v4152_v62 = vsel %vm10871_vm9, %v4151_v29, %v4147_v23 }
 0x3c1   : > { %vm4160_vm6 = vweird.f32 %v10825_v13  ;;  %v10932_v19 = vadd.f32 1.0, %v6419_v51  ;;  %v4696_v43 = vmul.f32 %v4437_v17, %v10635_v61  ;;  %vm4474_vm11 = vweird.f32 %v10802_v38 }
 0x3c2   : > { %v4473_v3 = vadd.f32 %v6417_v16, %v4472_v27  ;;  %v4440_v1 = vmul.f32 %v6421_v21, %v10880_v31  ;;  %v4904_v20 = vadd.f32 %v10804_v42, %v4679_v34  ;;  %v4158_v48 = vadd.f32 %v10825_v13, %v4157_v55  ;;  %vm4476_vm14 = vmor %vm4474_vm11, %vm4475_vm3 }
 0x3c3   : > { %v4481_v52 = vor.u32 1.1754944e-38, %v4480_v32  ;;  %6422 = vrcp.f32 %v10932_v19  ;;  %vm4479_vm9 = vcmp.eq.f32.partialorder %v4478_v25, 8.507059e+37  ;;  %v10941_v46 = vperm.slane %v10698_v5, 3  ;;  %vm10950_vm10 = vmor %vm4159_vm4, %vm4160_vm6 }
 0x3c4   : > { %v4477_v41 = vsel %vm4476_vm14, %v6417_v16, %v4473_v3  ;;  %v4441_v28 = vsub.f32 1.0, %v4440_v1  ;;  %v4448_v56 = vand.u32 2147483647, %v10880_v31  ;;  %v4450_v38 = vand.u32 2147483648, %v10880_v31 }
 0x3c5   : > { %v4482_v61 = vsel %vm4479_vm9, %v4481_v52, %v4477_v41  ;;  %6424 = vpow2.f32 %v10781_v14  ;;  %v4866_v16 = vadd.f32 %v4865_v60, %v4696_v43  ;;  %vm4445_vm0 = vweird.f32 %v6421_v21  ;;  %v1455_v43 = vpop.f32.mrf.mxu3 }
 0x3c6   : > { %v4699_v53 = vmul.f32 %v4482_v61, %v10681_v63  ;;  %v4442_v29 = vmul.f32 %v6421_v21, %v4441_v28  ;;  %v4877_v50 = vadd.f32 %v10725_v10, %v4657_v33  ;;  %v3867_v14 = vsel %vm10916_vm12, %v10807_v37, %v3862_v30 }
 0x3c7   : > { %v4677_v44 = vmul.f32 %v4152_v62, %v10578_v22  ;;  %v4162_v6 = vsel %vm10950_vm10, %v10825_v13, %v4158_v48  ;;  %vm4444_vm13 = vweird.f32 %v10880_v31  ;;  %v10965_v63 = vperm.slane %v10698_v5, 1  ;;  %v1426_v22 = vpop.f32.mrf.mxu2  ;;  %v1399_v48 = vpop.f32.mrf.mxu1 }
 0x3c8   : > { %v4905_v2 = vadd.f32 %v4904_v20, %v4699_v53  ;;  %v4443_v26 = vadd.f32 %v6421_v21, %v4442_v29  ;;  %vm4164_vm4 = vcmp.eq.f32.partialorder %v4163_v35, 8.507059e+37  ;;  %v4166_v10 = vor.u32 1.1754944e-38, %v4165_v54  ;;  %vm4446_vm8 = vmor %vm4444_vm13, %vm4445_vm0 }
 0x3c9   : > { %v6423_v57 = vpop.eup %6422  ;;  %v4451_v33 = vor.u32 1.1754944e-38, %v4450_v38  ;;  %v10968_v37 = vadd.f32 %v1484_v7, %v10941_v46  ;;  %v4867_v30 = vrot.slane %v4866_v16, 4  ;;  %vm4449_vm12 = vcmp.eq.f32.partialorder %v4448_v56, 8.507059e+37 }
 0x3ca   : > { %v4447_v0 = vsel %vm4446_vm8, %v6421_v21, %v4443_v26  ;;  %v4455_v13 = vmul.f32 %v6423_v57, %v10932_v19  ;;  %v4658_v31 = vmul.f32 %v3867_v14, %v10548_v49  ;;  %v4878_v23 = vadd.f32 %v4877_v50, %v4677_v44 }
 0x3cb   : > { %v6425_v24 = vpop.eup %6424  ;;  %v4167_v40 = vsel %vm4164_vm4, %v4166_v10, %v4162_v6  ;;  %v4452_v8 = vsel %vm4449_vm12, %v4451_v33, %v4447_v0  ;;  %v4906_v34 = vrot.slane %v4905_v2, 4  ;;  %v10974_v17 = vadd.f32 %v1426_v22, %v10965_v63 }
 0x3cc   : > { %v4697_v35 = vmul.f32 %v4452_v8, %v10743_v12  ;;  %v4456_v55 = vsub.f32 1.0, %v4455_v13  ;;  %v4463_v32 = vand.u32 2147483647, %v10932_v19  ;;  %v4465_v51 = vand.u32 2147483648, %v10932_v19 }
 0x3cd   : > { %v5644_v54 = vmul.f32 -1.442695, %v10968_v37  ;;  %v10980_v27 = vperm.slane %v10698_v5, 2  ;;  %v4868_v49 = vadd.f32 %v4867_v30, %v4866_v16  ;;  %vm4460_vm7 = vweird.f32 %v6423_v57  ;;  %v1486_v30 = vpop.f32.mrf.mxu0 }
 0x3ce   : > { %v4879_v25 = vadd.f32 %v4878_v23, %v4697_v35  ;;  %v4457_v21 = vmul.f32 %v6423_v57, %v4456_v55  ;;  %v4889_v12 = vadd.f32 %v10647_v36, %v10756_v4  ;;  %v4678_v60 = vmul.f32 %v4167_v40, %v10620_v39 }
 0x3cf   : > { %vm4459_vm3 = vweird.f32 %v10932_v19  ;;  %v10986_v62 = vadd.f32 1.0, %v6425_v24  ;;  %v4907_v3 = vadd.f32 %v4906_v34, %v4905_v2  ;;  %v5642_v5 = vmul.f32 -1.442695, %v10974_v17 }
 0x3d0   : > { %v4880_v1 = vrot.slane %v4879_v25, 4  ;;  %v4458_v20 = vadd.f32 %v6423_v57, %v4457_v21  ;;  %v4890_v52 = vadd.f32 %v4889_v12, %v4658_v31  ;;  %vm4461_vm6 = vmor %vm4459_vm3, %vm4460_vm7  ;;  %vm4464_vm11 = vcmp.eq.f32.partialorder %v4463_v32, 8.507059e+37  ;;  %v1428_v21 = vpop.f32.mrf.mxu2 }
 0x3d1   : > { %v4466_v41 = vor.u32 1.1754944e-38, %v4465_v51  ;;  %6426 = vpow2.f32 %v5644_v54  ;;  %v4869_v28 = vrot.slane %v4868_v49, 2  ;;  %v10990_v39 = vadd.f32 %v1455_v43, %v10980_v27  ;;  %v1457_v43 = vpop.f32.mrf.mxu3 }
 0x3d2   : > { %v4881_v36 = vadd.f32 %v4880_v1, %v4879_v25  ;;  %v4462_v4 = vsel %vm4461_vm6, %v6423_v57, %v4458_v20  ;;  %v4891_v19 = vadd.f32 %v4890_v52, %v4678_v60  ;;  %6428 = vrcp.f32 %v10986_v62 }
 0x3d3   : > { %v4467_v61 = vsel %vm4464_vm11, %v4466_v41, %v4462_v4  ;;  %v10994_v56 = vadd.f32 %v1399_v48, %v10717_v59  ;;  %v4908_v38 = vrot.slane %v4907_v3, 2  ;;  %6430 = vpow2.f32 %v5642_v5 }
 0x3d4   : > { %v4882_v42 = vrot.slane %v4881_v36, 2  ;;  %v4698_v16 = vmul.f32 %v4467_v61, %v10746_v45  ;;  %v4870_v53 = vadd.f32 %v4869_v28, %v4868_v49  ;;  %v5643_v50 = vmul.f32 -1.442695, %v10990_v39 }
 0x3d5   : > { %v5661_v44 = vmul.f32 -1.442695, %v10994_v56  ;;  %v4909_v6 = vadd.f32 %v4908_v38, %v4907_v3  ;;  %v11008_v40 = vadd.f32 %v1486_v30, %v10941_v46  ;;  %vm12491_vm14 = vcmask 1044484  }
 0x3d6   : > { %v4883_v29 = vadd.f32 %v4882_v42, %v4881_v36  ;;  %v4892_v7 = vadd.f32 %v4891_v19, %v4698_v16  ;;  %v4871_v33 = vrot.slane %v4870_v53, 1  ;;  %6432 = vpow2.f32 %v5643_v50  ;;  %v1402_v42 = vpop.f32.mrf.mxu1  ;;  %vm12500_vm6 = vmmov %vm12491_vm14 }
 0x3d7   : > { %v6427_v14 = vpop.eup %6426  ;;  %6434 = vpow2.f32 %v5661_v44  ;;  %v4910_v45 = vrot.slane %v4909_v6, 1  ;;  %v5664_v25 = vmul.f32 -1.442695, %v11008_v40  ;;  %v11017_v48 = vadd.f32 %v1428_v21, %v10965_v63 }
 0x3d8   : > { %v4884_v2 = vrot.slane %v4883_v29, 1  ;;  %v4893_v26 = vrot.slane %v4892_v7, 4  ;;  %v10999_v57 = vpop.eup %6428  ;;  %v11001_v24 = vadd.f32 1.0, %v6427_v14  ;;  %v4872_v8 = vadd.f32 %v4871_v33, %v4870_v53  ;;  %v5048_v53 = vld [vmem:[%s12094_s5 + $0x8] sm:$0xff] }
 0x3d9   : > { %v6431_v10 = vpop.eup %6430  ;;  %v2385_v31 = vmul.f32 %v10999_v57, %v10986_v62  ;;  %v4911_v55 = vadd.f32 %v4910_v45, %v4909_v6  ;;  %v11023_v28 = vadd.f32 %v1457_v43, %v10980_v27  ;;  %vm12492_vm9 = vcmask 1046534   ;;  %v1489_v6 = vpop.f32.mrf.mxu0 }
 0x3da   : > { %v4894_v22 = vadd.f32 %v4893_v26, %v4892_v7  ;;  %v4885_v0 = vadd.f32 %v4884_v2, %v4883_v29  ;;  %v11005_v23 = vadd.f32 1.0, %v6431_v10  ;;  %6436 = vrcp.f32 %v11001_v24  ;;  %vm12501_vm11 = vmmov %vm12492_vm9 }
 0x3db   : > { %v2386_v49 = vsub.f32 1.0, %v2385_v31  ;;  %v4997_v12 = vrot.slane %v4872_v8, 4  ;;  %v5000_v1 = vrot.slane %v4911_v55, 1  ;;  %vm12493_vm10 = vcmask 1045508  }
 0x3dc   : > { %v4895_v13 = vrot.slane %v4894_v22, 2  ;;  %v6433_v35 = vpop.eup %6432  ;;  %v4998_v32 = vrot.slane %v4885_v0, 3  ;;  %6438 = vrcp.f32 %v11005_v23  ;;  %v2395_v38 = vand.u32 2147483648, %v10986_v62 }
 0x3dd   : > { %v6435_v54 = vpop.eup %6434  ;;  %v11013_v3 = vadd.f32 1.0, %v6433_v35  ;;  %v2387_v52 = vmul.f32 %v10999_v57, %v2386_v49  ;;  %6440 = vpow2.f32 %v5664_v25  ;;  %vm12494_vm0 = vcmask 1043456  }
 0x3de   : > { %v4896_v34 = vadd.f32 %v4895_v13, %v4894_v22  ;;  %v5021_v20 = vsel %vm12491_vm14, %v4997_v12, %v4998_v32  ;;  %v11020_v41 = vadd.f32 1.0, %v6435_v54  ;;  %vm2390_vm13 = vweird.f32 %v10999_v57  ;;  %vm12502_vm14 = vmmov %vm12493_vm10 }
 0x3df   : > { %6442 = vrcp.f32 %v11013_v3  ;;  %v5662_v29 = vmul.f32 -1.442695, %v11017_v48  ;;  %v11041_v7 = vadd.f32 %v10999_v57, %v2387_v52  ;;  %v5663_v50 = vmul.f32 -1.442695, %v11023_v28 }
 0x3e0   : > { %v4897_v51 = vrot.slane %v4896_v34, 1  ;;  %v11025_v36 = vpop.eup %6436  ;;  %6444 = vrcp.f32 %v11020_v41  ;;  %v11054_v44 = vadd.f32 %v1402_v42, %v10717_v59  ;;  %vm2389_vm4 = vweird.f32 %v10986_v62 }
 0x3e1   : > { %vm11057_vm8 = vmor %vm2389_vm4, %vm2390_vm13  ;;  %v2393_v33 = vand.u32 2147483647, %v10986_v62  ;;  %v2396_v22 = vor.u32 1.1754944e-38, %v2395_v38  ;;  %v2440_v30 = vand.u32 2147483648, %v11001_v24  ;;  %6446 = vpow2.f32 %v5662_v29 }
 0x3e2   : > { %v4898_v60 = vadd.f32 %v4897_v51, %v4896_v34  ;;  %v11028_v19 = vpop.eup %6438  ;;  %v2392_v0 = vsel %vm11057_vm8, %v10999_v57, %v11041_v7  ;;  %6448 = vpow2.f32 %v5663_v50  ;;  %v11068_v13 = vadd.f32 %v1489_v6, %v10941_v46 }
 0x3e3   : > { %v11051_v14 = vmul.f32 %v11028_v19, %v11005_v23  ;;  %v6441_v2 = vpop.eup %6440  ;;  %v5681_v35 = vmul.f32 -1.442695, %v11054_v44  ;;  %vm12497_vm12 = vcmask 1040384   ;;  %vm12498_vm7 = vcmask 1042434  }
 0x3e4   : > { %v4999_v5 = vrot.slane %v4898_v60, 2  ;;  %v11074_v34 = vadd.f32 1.0, %v6441_v2  ;;  %vm12499_vm3 = vcmask 1041408   ;;  %vm2434_vm13 = vweird.f32 %v11001_v24 }
 0x3e5   : > { %v11070_v31 = vpop.eup %6442  ;;  %v2401_v62 = vsub.f32 1.0, %v11051_v14  ;;  %6450 = vpow2.f32 %v5681_v35  ;;  %v2425_v15 = vand.u32 2147483648, %v11013_v3 }
 0x3e6   : > { %v5022_v4 = vsel %vm12492_vm9, %v4999_v5, %v5000_v1  ;;  %v11077_v55 = vpop.eup %6444  ;;  %v2415_v1 = vmul.f32 %v11070_v31, %v11013_v3  ;;  %6452 = vrcp.f32 %v11074_v34  ;;  %vm2394_vm9 = vcmp.eq.f32.partialorder %v2393_v33, 8.507059e+37 }
 0x3e7   : > { %v5023_v61 = vsel %vm12493_vm10, %v5021_v20, %v5022_v4  ;;  %v5684_v20 = vmul.f32 -1.442695, %v11068_v13  ;;  %v6447_v5 = vpop.eup %6446  ;;  %vm12503_vm10 = vmmov %vm12494_vm0 }
 0x3e8   : > { %v5024_v16 = vsel %vm12494_vm0, %v9978_v11, %v5023_v61  ;;  %v11047_v11 = vmul.f32 %v11025_v36, %v11001_v24  ;;  %v2685_v61 = vmul.f32 %v11077_v55, %v11020_v41  ;;  %v6449_v38 = vpop.eup %6448  ;;  %v11087_v2 = vadd.f32 1.0, %v6447_v5  ;;  %vm12504_vm0 = vmor %vm9306_vm1, %vm9290_vm5 }
 0x3e9   : > { %v5051_v26 = vsub.f32 %v5024_v16, %v5048_v53  ;;  %6454 = vpow2.f32 %v5684_v20  ;;  %v2410_v20 = vand.u32 2147483648, %v11005_v23  ;;  %vm2404_vm5 = vweird.f32 %v11005_v23 }
 0x3ea   : > { %v2431_v8 = vsub.f32 1.0, %v11047_v11  ;;  %6456 = vrcp.f32 %v11087_v2  ;;  %vm2435_vm1 = vweird.f32 %v11025_v36 }
 0x3eb   : > { %v5054_v45 = vmul.f32 0.015625, %v5051_v26  ;;  %v5210_v26 = vld [vmem:[%s9302_s9 + $0x8] sm:$0xff] }
 0x3ed   : > { %v5067_v32 = vperm.slane %v5054_v45, 0  ;;  %v5068_v51 = vperm.slane %v5054_v45, 1  ;;  %v5069_v54 = vperm.slane %v5054_v45, 2  ;;  %v5070_v57 = vperm.slane %v5054_v45, 3 }
 0x3ee   : > { %v5071_v49 = vperm.slane %v5054_v45, 4  ;;  %v5072_v25 = vperm.slane %v5054_v45, 5  ;;  %v5073_v21 = vperm.slane %v5054_v45, 6  ;;  %v5074_v12 = vperm.slane %v5054_v45, 7 }
 0x3ef   : > { %v5103_v60 = vpack.c.bf16 %v5068_v51, %v5067_v32  ;;  %v5104_v43 = vpack.c.bf16 %v5070_v57, %v5069_v54  ;;  %v11093_v32 = vadd.f32 1.0, %v6449_v38  ;;  %v1431_v51 = vpop.f32.mrf.mxu2  ;;  %v2438_v57 = vand.u32 2147483647, %v11001_v24 }
 0x3f0   : > { %v5105_v52 = vpack.c.bf16 %v5072_v25, %v5071_v49  ;;  %v5106_v4 = vpack.c.bf16 %v5074_v12, %v5073_v21  ;;  %v2408_v49 = vand.u32 2147483647, %v11005_v23  ;;  %v1460_v25 = vpop.f32.mrf.mxu3  ;;  %v6451_v21 = vpop.eup %6450 }
 0x3f1   : > { %v5126_v42 = vrot.slane %v5103_v60, 3  ;;  %v5127_v16 = vrot.slane %v5104_v43, 6  ;;  %v5128_v53 = vrot.slane %v5104_v43, 1  ;;  %v2432_v43 = vmul.f32 %v11025_v36, %v2431_v8  ;;  %v11101_v5 = vpop.eup %6452 }
 0x3f2   : > { %v5129_v29 = vrot.slane %v5105_v52, 4  ;;  %v5130_v7 = vrot.slane %v5105_v52, 7  ;;  %v5131_v50 = vrot.slane %v5106_v4, 2  ;;  %v5132_v11 = vrot.slane %v5106_v4, 5  ;;  %v6455_v8 = vpop.eup %6454 }
 0x3f3   : > { %v5153_v14 = vsel %vm12497_vm12, %v5103_v60, %v5126_v42  ;;  %v5156_v6 = vsel %vm12498_vm7, %v5127_v16, %v5128_v53  ;;  %v2397_v60 = vsel %vm2394_vm9, %v2396_v22, %v2392_v0  ;;  %v2402_v52 = vmul.f32 %v11028_v19, %v2401_v62 }
 0x3f4   : > { %v5157_v10 = vsel %vm12499_vm3, %v5153_v14, %v5156_v6  ;;  %v5160_v45 = vsel %vm12500_vm6, %v5129_v29, %v5130_v7  ;;  %v5163_v35 = vsel %vm12501_vm11, %v5131_v50, %v5132_v11  ;;  %v2416_v4 = vsub.f32 1.0, %v2415_v1  ;;  %v1404_v50 = vpop.f32.mrf.mxu1  ;;  %v11143_v11 = vpop.eup %6456  ;;  %vm11147_vm3 = vmor %vm2434_vm13, %vm2435_vm1 }
 0x3f5   : > { %v5164_v54 = vsel %vm12502_vm14, %v5160_v45, %v5163_v35  ;;  %v2441_v22 = vor.u32 1.1754944e-38, %v2440_v30  ;;  %v2686_v0 = vsub.f32 1.0, %v2685_v61  ;;  %6458 = vrcp.f32 %v11093_v32  ;;  %v1491_v45 = vpop.f32.mrf.mxu0 }
 0x3f6   : > { %v5165_v12 = vsel %vm12503_vm10, %v5157_v10, %v5164_v54  ;;  %v11116_v9 = vmul.f32 %v2397_v60, %v10751_v47  ;;  %v11120_v62 = vadd.f32 1.0, %v6451_v21  ;;  %v2433_v1 = vadd.f32 %v11025_v36, %v2432_v43 }
 0x3f7   : > { %v5211_v33 = vsel %vm12504_vm0, %v5165_v12, %v5210_v26  ;;  %vm11124_vm4 = vcmp.eq.f32.partialorder %v2438_v57, 8.507059e+37  ;;  %vm11128_vm8 = vcmp.eq.f32.partialorder %v2408_v49, 8.507059e+37  ;;  %v2423_v47 = vand.u32 2147483647, %v11013_v3 }
 0x3f8   : > { %5212 = vst [vmem:[%s9302_s9 + $0x8] sm:$0xff] %v5211_v33  ;;  %v2403_v61 = vadd.f32 %v11028_v19, %v2402_v52  ;;  %vm2405_vm12 = vweird.f32 %v11028_v19  ;;  %v2411_v42 = vor.u32 1.1754944e-38, %v2410_v20  ;;  %v2417_v16 = vmul.f32 %v11070_v31, %v2416_v4  ;;  %v1462_v60 = vpop.f32.mrf.mxu3 }
 0x3f9   : > { %vm2419_vm7 = vweird.f32 %v11013_v3  ;;  %v2687_v53 = vmul.f32 %v11077_v55, %v2686_v0  ;;  %v2730_v29 = vmul.f32 %v11101_v5, %v11074_v34  ;;  %v11141_v7 = vadd.f32 %v1431_v51, %v10965_v63  ;;  %vm11164_vm6 = vmor %vm2404_vm5, %vm2405_vm12 }
 0x3fa   : > { %v2426_v6 = vor.u32 1.1754944e-38, %v2425_v15  ;;  %v2693_v26 = vand.u32 2147483647, %v11020_v41  ;;  %6460 = vrcp.f32 %v11120_v62  ;;  %v11153_v10 = vadd.f32 1.0, %v6455_v8 }
 0x3fb   : > { %v11155_v35 = vpop.eup %6458  ;;  %v2437_v51 = vsel %vm11147_vm3, %v11025_v36, %v2433_v1  ;;  %vm2420_vm11 = vweird.f32 %v11070_v31  ;;  %vm11169_vm14 = vcmp.eq.f32.partialorder %v2423_v47, 8.507059e+37  ;;  %v2695_v57 = vand.u32 2147483648, %v11020_v41  ;;  %v1433_v36 = vpop.f32.mrf.mxu2 }
 0x3fc   : > { %v11175_v49 = vadd.f32 %v1460_v25, %v10980_v27  ;;  %v2407_v23 = vsel %vm11164_vm6, %v11028_v19, %v2403_v61  ;;  %v2418_v21 = vadd.f32 %v11070_v31, %v2417_v16  ;;  %vm2690_vm9 = vweird.f32 %v11077_v55  ;;  %vm11202_vm10 = vmor %vm2419_vm7, %vm2420_vm11 }
 0x3fd   : > { %v11183_v12 = vadd.f32 %v1404_v50, %v10717_v59  ;;  %v2688_v43 = vadd.f32 %v11077_v55, %v2687_v53  ;;  %v2731_v20 = vsub.f32 1.0, %v2730_v29  ;;  %v5682_v33 = vmul.f32 -1.442695, %v11141_v7 }
 0x3fe   : > { %v11188_v25 = vadd.f32 %v1491_v45, %v10941_v46  ;;  %v2700_v52 = vmul.f32 %v11143_v11, %v11087_v2  ;;  %v2715_v19 = vmul.f32 %v11155_v35, %v11093_v32  ;;  %6462 = vrcp.f32 %v11153_v10 }
 0x3ff   : > { %v11196_v4 = vadd.f32 %v1433_v36, %v10965_v63  ;;  %vm2689_vm0 = vweird.f32 %v11020_v41  ;;  %vm11207_vm13 = vcmp.eq.f32.partialorder %v2693_v26, 8.507059e+37  ;;  %v5683_v15 = vmul.f32 -1.442695, %v11175_v49 }
 0x400   : > { %v11213_v1 = vadd.f32 %v1462_v60, %v10980_v27  ;;  %v11215_v47 = vpop.eup %6460  ;;  %v2442_v3 = vsel %vm11124_vm4, %v2441_v22, %v2437_v51  ;;  %v2412_v61 = vsel %vm11128_vm8, %v2411_v42, %v2407_v23  ;;  %vm11223_vm5 = vmor %vm2689_vm0, %vm2690_vm9  ;;  %v2696_v16 = vor.u32 1.1754944e-38, %v2695_v57 }
 0x401   : > { %v5701_v53 = vmul.f32 -1.442695, %v11183_v12  ;;  %v2422_v29 = vsel %vm11202_vm10, %v11070_v31, %v2418_v21  ;;  %v2692_v22 = vsel %vm11223_vm5, %v11077_v55, %v2688_v43  ;;  %v2732_v38 = vmul.f32 %v11101_v5, %v2731_v20 }
 0x402   : > { %v5704_v30 = vmul.f32 -1.442695, %v11188_v25  ;;  %v2701_v42 = vsub.f32 1.0, %v2700_v52  ;;  %v2716_v50 = vsub.f32 1.0, %v2715_v19  ;;  %6464 = vpow2.f32 %v5682_v33 }
 0x403   : > { %v5702_v14 = vmul.f32 -1.442695, %v11196_v4  ;;  %v11238_v26 = vmul.f32 %v2442_v3, %v10968_v37  ;;  %v2985_v45 = vmul.f32 %v11215_v47, %v11120_v62  ;;  %6466 = vpow2.f32 %v5683_v15 }
 0x404   : > { %v5703_v31 = vmul.f32 -1.442695, %v11213_v1  ;;  %v11243_v51 = vpop.eup %6462  ;;  %v11246_v55 = vmul.f32 %v2412_v61, %v10974_v17  ;;  %v11250_v24 = vsel %vm11169_vm14, %v2426_v6, %v2422_v29  ;;  %v2738_v57 = vand.u32 2147483647, %v11074_v34 }
 0x405   : > { %6468 = vpow2.f32 %v5701_v53  ;;  %v2697_v37 = vsel %vm11207_vm13, %v2696_v16, %v2692_v22  ;;  %vm2735_vm1 = vweird.f32 %v11101_v5  ;;  %v2740_v36 = vand.u32 2147483648, %v11074_v34 }
 0x406   : > { %6470 = vpow2.f32 %v5704_v30  ;;  %v2733_v23 = vadd.f32 %v11101_v5, %v2732_v38  ;;  %v2702_v17 = vmul.f32 %v11143_v11, %v2701_v42  ;;  %v2717_v21 = vmul.f32 %v11155_v35, %v2716_v50 }
 0x407   : > { %6472 = vpow2.f32 %v5702_v14  ;;  %vm2734_vm4 = vweird.f32 %v11074_v34  ;;  %v2986_v6 = vsub.f32 1.0, %v2985_v45  ;;  %v3030_v54 = vmul.f32 %v11243_v51, %v11153_v10 }
 0x408   : > { %6474 = vpow2.f32 %v5703_v31  ;;  %v6465_v60 = vpop.eup %6464  ;;  %v11264_v43 = vmul.f32 %v2697_v37, %v10994_v56  ;;  %vm11266_vm8 = vcmp.eq.f32.partialorder %v2738_v57, 8.507059e+37  ;;  %v2708_v33 = vand.u32 2147483647, %v11087_v2  ;;  %vm11274_vm12 = vmor %vm2734_vm4, %vm2735_vm1 }
 0x409   : > { %v2710_v52 = vand.u32 2147483648, %v11087_v2  ;;  %v6467_v19 = vpop.eup %6466  ;;  %v2741_v0 = vor.u32 1.1754944e-38, %v2740_v36  ;;  %vm2705_vm7 = vweird.f32 %v11143_v11  ;;  %v2723_v56 = vand.u32 2147483647, %v11093_v32 }
 0x40a   : > { %v2725_v8 = vand.u32 2147483648, %v11093_v32  ;;  %v2737_v3 = vsel %vm11274_vm12, %v11101_v5, %v2733_v23  ;;  %v2703_v61 = vadd.f32 %v11143_v11, %v2702_v17  ;;  %v2718_v41 = vadd.f32 %v11155_v35, %v2717_v21 }
 0x40b   : > { %v6469_v15 = vpop.eup %6468  ;;  %vm2720_vm3 = vweird.f32 %v11155_v35  ;;  %vm2704_vm6 = vweird.f32 %v11087_v2  ;;  %v2987_v53 = vmul.f32 %v11215_v47, %v2986_v6  ;;  %v3031_v29 = vsub.f32 1.0, %v3030_v54  ;;  %v1407_v54 = vpop.f32.mrf.mxu1 }
 0x40c   : > { %v6471_v16 = vpop.eup %6470  ;;  %v11289_v22 = vadd.f32 1.0, %v6465_v60  ;;  %vm11291_vm11 = vmor %vm2704_vm6, %vm2705_vm7  ;;  %vm11295_vm14 = vcmp.eq.f32.partialorder %v2708_v33, 8.507059e+37  ;;  %v2711_v42 = vor.u32 1.1754944e-38, %v2710_v52  ;;  %vm2719_vm9 = vweird.f32 %v11093_v32  ;;  %v1494_v52 = vpop.f32.mrf.mxu0 }
 0x40d   : > { %v6473_v38 = vpop.eup %6472  ;;  %v11300_v50 = vadd.f32 1.0, %v6467_v19  ;;  %v2742_v14 = vsel %vm11266_vm8, %v2741_v0, %v2737_v3  ;;  %vm11304_vm10 = vmor %vm2719_vm9, %vm2720_vm3  ;;  %vm11308_vm0 = vcmp.eq.f32.partialorder %v2723_v56, 8.507059e+37  ;;  %v2726_v57 = vor.u32 1.1754944e-38, %v2725_v8 }
 0x40e   : > { %v6475_v2 = vpop.eup %6474  ;;  %v11312_v37 = vadd.f32 1.0, %v6469_v15  ;;  %v2707_v32 = vsel %vm11291_vm11, %v11143_v11, %v2703_v61  ;;  %v2722_v36 = vsel %vm11304_vm10, %v11155_v35, %v2718_v41  ;;  %vm2990_vm13 = vweird.f32 %v11215_v47  ;;  %v1436_v61 = vpop.f32.mrf.mxu2 }
 0x40f   : > { %v11321_v23 = vadd.f32 1.0, %v6471_v16  ;;  %v2988_v17 = vadd.f32 %v11215_v47, %v2987_v53  ;;  %v3032_v21 = vmul.f32 %v11243_v51, %v3031_v29  ;;  %6476 = vrcp.f32 %v11289_v22 }
 0x410   : > { %v11326_v6 = vadd.f32 1.0, %v6473_v38  ;;  %v4583_v60 = vmul.f32 %v2742_v14, %v11008_v40  ;;  %v2995_v11 = vand.u32 2147483648, %v11120_v62  ;;  %6478 = vrcp.f32 %v11300_v50 }
 0x411   : > { %v11331_v35 = vadd.f32 1.0, %v6475_v2  ;;  %v2712_v20 = vsel %vm11295_vm14, %v2711_v42, %v2707_v32  ;;  %vm2989_vm5 = vweird.f32 %v11120_v62  ;;  %v2993_v33 = vand.u32 2147483647, %v11120_v62  ;;  %v1465_v32 = vpop.f32.mrf.mxu3 }
 0x412   : > { %6480 = vrcp.f32 %v11312_v37  ;;  %v2727_v19 = vsel %vm11308_vm0, %v2726_v57, %v2722_v36  ;;  %vm11342_vm1 = vmor %vm2989_vm5, %vm2990_vm13  ;;  %vm3035_vm4 = vweird.f32 %v11243_v51  ;;  %v3038_v34 = vand.u32 2147483647, %v11153_v10 }
 0x413   : > { %6482 = vrcp.f32 %v11321_v23  ;;  %v2992_v62 = vsel %vm11342_vm1, %v11215_v47, %v2988_v17  ;;  %v3033_v0 = vadd.f32 %v11243_v51, %v3032_v21  ;;  %v11355_v56 = vadd.f32 %v1407_v54, %v10717_v59  ;;  %v1409_v36 = vpop.f32.mrf.mxu1 }
 0x414   : > { %6484 = vrcp.f32 %v11326_v6  ;;  %v4581_v8 = vmul.f32 %v2712_v20, %v11017_v48  ;;  %v2996_v15 = vor.u32 1.1754944e-38, %v2995_v11  ;;  %v3040_v3 = vand.u32 2147483648, %v11153_v10 }
 0x415   : > { %6486 = vrcp.f32 %v11331_v35  ;;  %v11360_v41 = vpop.eup %6476  ;;  %v4582_v16 = vmul.f32 %v2727_v19, %v11023_v28  ;;  %vm2994_vm8 = vcmp.eq.f32.partialorder %v2993_v33, 8.507059e+37  ;;  %vm3034_vm12 = vweird.f32 %v11153_v10  ;;  %v1496_v33 = vpop.f32.mrf.mxu0 }
 0x416   : > { %v11365_v47 = vadd.f32 %v1494_v52, %v10941_v46  ;;  %v11367_v53 = vpop.eup %6478  ;;  %v4562_v48 = vmul.f32 %v11250_v24, %v10990_v39  ;;  %v11373_v29 = vadd.f32 %v11264_v43, %v11116_v9  ;;  %v2997_v38 = vsel %vm2994_vm8, %v2996_v15, %v2992_v62  ;;  %vm11377_vm7 = vmor %vm3034_vm12, %vm3035_vm4 }
 0x417   : > { %v3010_v10 = vand.u32 2147483648, %v11289_v22  ;;  %v11385_v5 = vadd.f32 %v4583_v60, %v11238_v26  ;;  %v3037_v39 = vsel %vm11377_vm7, %v11243_v51, %v3033_v0  ;;  %v5721_v9 = vmul.f32 -1.442695, %v11355_v56 }
 0x418   : > { %v11382_v30 = vpop.eup %6480  ;;  %v11392_v24 = vadd.f32 %v1436_v61, %v10965_v63  ;;  %v11397_v42 = vadd.f32 %v4581_v8, %v11246_v55  ;;  %vm3039_vm3 = vcmp.eq.f32.partialorder %v3038_v34, 8.507059e+37  ;;  %v3041_v2 = vor.u32 1.1754944e-38, %v3040_v3 }
 0x419   : > { %v11394_v43 = vpop.eup %6482  ;;  %v3008_v14 = vand.u32 2147483647, %v11289_v22  ;;  %v11402_v45 = vadd.f32 %v4582_v16, %v4562_v48  ;;  %v11405_v51 = vmul.f32 %v2997_v38, %v11054_v44  ;;  %v3025_v31 = vand.u32 2147483648, %v11300_v50 }
 0x41a   : > { %v11400_v26 = vpop.eup %6484  ;;  %v5724_v57 = vmul.f32 -1.442695, %v11365_v47  ;;  %v3042_v55 = vsel %vm3039_vm3, %v3041_v2, %v3037_v39  ;;  %v3000_v21 = vmul.f32 %v11360_v41, %v11289_v22  ;;  %v11413_v54 = vor.u32 1.1754944e-38, %v3010_v10 }
 0x41b   : > { %v11409_v17 = vpop.eup %6486  ;;  %v3015_v60 = vmul.f32 %v11367_v53, %v11300_v50  ;;  %v3285_v44 = vmul.f32 %v11382_v30, %v11312_v37  ;;  %v3330_v11 = vmul.f32 %v11394_v43, %v11321_v23  ;;  %6488 = vpow2.f32 %v5721_v9 }
 0x41c   : > { %v5722_v20 = vmul.f32 -1.442695, %v11392_v24  ;;  %v3023_v52 = vand.u32 2147483647, %v11300_v50  ;;  %v3300_v19 = vmul.f32 %v11400_v26, %v11326_v6  ;;  %v11426_v40 = vadd.f32 %v1465_v32, %v10980_v27 }
 0x41d   : > { %v11429_v34 = vadd.f32 %v1409_v36, %v10717_v59  ;;  %v11432_v62 = vmul.f32 %v3042_v55, %v11068_v13  ;;  %v11434_v0 = vor.u32 1.1754944e-38, %v3025_v31  ;;  %v3315_v8 = vmul.f32 %v11409_v17, %v11331_v35 }
 0x41e   : > { %6490 = vpow2.f32 %v5724_v57  ;;  %v3001_v15 = vsub.f32 1.0, %v3000_v21  ;;  %vm3004_vm6 = vweird.f32 %v11289_v22  ;;  %v3016_v3 = vsub.f32 1.0, %v3015_v60 }
 0x41f   : > { %v3295_v61 = vand.u32 2147483648, %v11312_v37  ;;  %v11441_v16 = vadd.f32 %v1496_v33, %v10941_v46  ;;  %vm3019_vm11 = vweird.f32 %v11300_v50  ;;  %v3286_v48 = vsub.f32 1.0, %v3285_v44  ;;  %v1412_v33 = vpop.f32.mrf.mxu1 }
 0x420   : > { %v3331_v13 = vsub.f32 1.0, %v3330_v11  ;;  %6492 = vpow2.f32 %v5722_v20  ;;  %v5741_v38 = vmul.f32 -1.442695, %v11429_v34  ;;  %vm3005_vm14 = vweird.f32 %v11360_v41 }
 0x421   : > { %vm3289_vm9 = vweird.f32 %v11312_v37  ;;  %v3293_v28 = vand.u32 2147483647, %v11312_v37  ;;  %v3301_v10 = vsub.f32 1.0, %v3300_v19  ;;  %v5723_v39 = vmul.f32 -1.442695, %v11426_v40  ;;  %v6489_v9 = vpop.eup %6488  ;;  %vm11491_vm7 = vmor %vm3004_vm6, %vm3005_vm14 }
 0x422   : > { %vm3020_vm10 = vweird.f32 %v11367_v53  ;;  %vm3334_vm0 = vweird.f32 %v11321_v23  ;;  %v3338_v2 = vand.u32 2147483647, %v11321_v23  ;;  %v3316_v31 = vsub.f32 1.0, %v3315_v8 }
 0x423   : > { %v3002_v57 = vmul.f32 %v11360_v41, %v3001_v15  ;;  %v3017_v32 = vmul.f32 %v11367_v53, %v3016_v3  ;;  %v11454_v36 = vor.u32 1.1754944e-38, %v3295_v61  ;;  %v5744_v55 = vmul.f32 -1.442695, %v11441_v16  ;;  %vm11503_vm1 = vmor %vm3019_vm11, %vm3020_vm10 }
 0x424   : > { %v6491_v21 = vpop.eup %6490  ;;  %v3287_v60 = vmul.f32 %v11382_v30, %v3286_v48  ;;  %v3332_v44 = vmul.f32 %v11394_v43, %v3331_v13  ;;  %v3340_v11 = vand.u32 2147483648, %v11321_v23  ;;  %6494 = vpow2.f32 %v5741_v38 }
 0x425   : > { %vm11460_vm13 = vcmp.eq.f32.partialorder %v3008_v14, 8.507059e+37  ;;  %vm11464_vm5 = vcmp.eq.f32.partialorder %v3023_v52, 8.507059e+37  ;;  %v3302_v19 = vmul.f32 %v11400_v26, %v3301_v10  ;;  %v11470_v8 = vadd.f32 1.0, %v6489_v9 }
 0x426   : > { %6496 = vpow2.f32 %v5723_v39  ;;  %v6493_v15 = vpop.eup %6492  ;;  %vm11472_vm4 = vcmp.eq.f32.partialorder %v3293_v28, 8.507059e+37  ;;  %vm11476_vm8 = vcmp.eq.f32.partialorder %v3338_v2, 8.507059e+37  ;;  %v3308_v52 = vand.u32 2147483647, %v11326_v6 }
 0x427   : > { %v3317_v61 = vmul.f32 %v11409_v17, %v3316_v31  ;;  %6498 = vpow2.f32 %v5744_v55  ;;  %v3003_v48 = vadd.f32 %v11360_v41, %v3002_v57  ;;  %v3018_v13 = vadd.f32 %v11367_v53, %v3017_v32  ;;  %v1467_v32 = vpop.f32.mrf.mxu3 }
 0x428   : > { %vm3290_vm12 = vweird.f32 %v11382_v30  ;;  %v11485_v38 = vadd.f32 1.0, %v6491_v21  ;;  %v3288_v10 = vadd.f32 %v11382_v30, %v3287_v60  ;;  %v3333_v39 = vadd.f32 %v11394_v43, %v3332_v44 }
 0x429   : > { %vm3335_vm3 = vweird.f32 %v11394_v43  ;;  %v3310_v9 = vand.u32 2147483648, %v11326_v6  ;;  %v3303_v22 = vadd.f32 %v11400_v26, %v3302_v19  ;;  %vm3305_vm6 = vweird.f32 %v11400_v26  ;;  %vm11514_vm14 = vmor %vm3289_vm9, %vm3290_vm12 }
 0x42a   : > { %6500 = vrcp.f32 %v11470_v8  ;;  %v11510_v31 = vadd.f32 1.0, %v6493_v15  ;;  %v6495_v57 = vpop.eup %6494  ;;  %v3341_v50 = vor.u32 1.1754944e-38, %v3340_v11  ;;  %v3318_v55 = vadd.f32 %v11409_v17, %v3317_v61  ;;  %vm11531_vm9 = vmor %vm3334_vm0, %vm3335_vm3 }
 0x42b   : > { %vm3319_vm11 = vweird.f32 %v11331_v35  ;;  %vm3320_vm10 = vweird.f32 %v11409_v17  ;;  %v3007_v60 = vsel %vm11491_vm7, %v11360_v41, %v3003_v48  ;;  %v3022_v37 = vsel %vm11503_vm1, %v11367_v53, %v3018_v13 }
 0x42c   : > { %v6497_v21 = vpop.eup %6496  ;;  %v3325_v11 = vand.u32 2147483648, %v11331_v35  ;;  %6502 = vrcp.f32 %v11485_v38  ;;  %v3292_v41 = vsel %vm11514_vm14, %v11382_v30, %v3288_v10  ;;  %v3337_v53 = vsel %vm11531_vm9, %v11394_v43, %v3333_v39  ;;  %vm11563_vm7 = vmor %vm3319_vm11, %vm3320_vm10 }
 0x42d   : > { %v6499_v19 = vpop.eup %6498  ;;  %vm12553_vm0 = vweird.f32 %v11326_v6  ;;  %vm11551_vm12 = vcmp.eq.f32.partialorder %v3308_v52, 8.507059e+37  ;;  %v3323_v61 = vand.u32 2147483647, %v11331_v35  ;;  %v3311_v48 = vor.u32 1.1754944e-38, %v3310_v9  ;;  %v1438_v52 = vpop.f32.mrf.mxu2 }
 0x42e   : > { %vm11547_vm1 = vmor %vm12553_vm0, %vm3305_vm6  ;;  %6504 = vrcp.f32 %v11510_v31  ;;  %v11568_v43 = vadd.f32 1.0, %v6495_v57  ;;  %v3012_v13 = vsel %vm11460_vm13, %v11413_v54, %v3007_v60  ;;  %v3322_v35 = vsel %vm11563_vm7, %v11409_v17, %v3318_v55 }
 0x42f   : > { %v3307_v30 = vsel %vm11547_vm1, %v11400_v26, %v3303_v22  ;;  %v3027_v26 = vsel %vm11464_vm5, %v11434_v0, %v3022_v37  ;;  %v11579_v28 = vadd.f32 1.0, %v6497_v21  ;;  %v3297_v39 = vsel %vm11472_vm4, %v11454_v36, %v3292_v41 }
 0x430   : > { %v11581_v10 = vpop.eup %6500  ;;  %v3342_v20 = vsel %vm11476_vm8, %v3341_v50, %v3337_v53  ;;  %v3326_v54 = vor.u32 1.1754944e-38, %v3325_v11  ;;  %v11588_v9 = vadd.f32 1.0, %v6499_v19  ;;  %v4913_v0 = vadd.f32 %v11373_v29, %v11405_v51  ;;  %v1499_v50 = vpop.f32.mrf.mxu0 }
 0x431   : > { %v3312_v17 = vsel %vm11551_vm12, %v3311_v48, %v3307_v30  ;;  %vm3324_vm13 = vcmp.eq.f32.partialorder %v3323_v61, 8.507059e+37  ;;  %v11595_v2 = vadd.f32 %v1438_v52, %v10965_v63  ;;  %v4601_v36 = vmul.f32 %v3012_v13, %v11141_v7 }
 0x432   : > { %v11597_v22 = vpop.eup %6502  ;;  %v4602_v3 = vmul.f32 %v3027_v26, %v11175_v49  ;;  %v3327_v14 = vsel %vm3324_vm13, %v3326_v54, %v3322_v35  ;;  %6506 = vrcp.f32 %v11568_v43  ;;  %v4620_v57 = vmul.f32 %v3297_v39, %v11183_v12 }
 0x433   : > { %v4623_v29 = vmul.f32 %v3342_v20, %v11188_v25  ;;  %v3585_v51 = vmul.f32 %v11581_v10, %v11470_v8  ;;  %6508 = vrcp.f32 %v11579_v28  ;;  %v4952_v7 = vadd.f32 %v11385_v5, %v11432_v62  ;;  %v1414_v20 = vpop.f32.mrf.mxu1 }
 0x434   : > { %v11607_v55 = vpop.eup %6504  ;;  %v4621_v49 = vmul.f32 %v3312_v17, %v11196_v4  ;;  %6510 = vrcp.f32 %v11588_v9  ;;  %v11614_v12 = vadd.f32 %v1412_v33, %v10717_v59  ;;  %v4622_v25 = vmul.f32 %v3327_v14, %v11213_v1 }
 0x435   : > { %v3595_v21 = vand.u32 2147483648, %v11470_v8  ;;  %v3630_v60 = vmul.f32 %v11597_v22, %v11485_v38  ;;  %v5742_v37 = vmul.f32 -1.442695, %v11595_v2  ;;  %v4926_v44 = vadd.f32 %v11397_v42, %v4601_v36  ;;  %v1441_v6 = vpop.f32.mrf.mxu2 }
 0x436   : > { %v4939_v5 = vadd.f32 %v11402_v45, %v4602_v3  ;;  %v11624_v4 = vadd.f32 %v1499_v50, %v10941_v46  ;;  %v11626_v62 = vadd.f32 %v4913_v0, %v4620_v57  ;;  %v11628_v11 = vadd.f32 %v4952_v7, %v4623_v29 }
 0x437   : > { %v3586_v19 = vsub.f32 1.0, %v3585_v51  ;;  %v3600_v1 = vmul.f32 %v11607_v55, %v11510_v31  ;;  %v11634_v53 = vadd.f32 %v4926_v44, %v4621_v49  ;;  %v3593_v23 = vand.u32 2147483647, %v11470_v8  ;;  %v1470_v51 = vpop.f32.mrf.mxu3 }
 0x438   : > { %v11632_v41 = vpop.eup %6506  ;;  %v11638_v42 = vadd.f32 %v1467_v32, %v10980_v27  ;;  %v5761_v45 = vmul.f32 -1.442695, %v11614_v12  ;;  %v11643_v61 = vadd.f32 %v4939_v5, %v4622_v25  ;;  %vm3589_vm5 = vweird.f32 %v11470_v8 }
 0x439   : > { %v11641_v15 = vpop.eup %6508  ;;  %v11646_v30 = vor.u32 1.1754944e-38, %v3595_v21  ;;  %v3631_v48 = vsub.f32 1.0, %v3630_v60  ;;  %6512 = vpow2.f32 %v5742_v37  ;;  %v3638_v13 = vand.u32 2147483647, %v11485_v38 }
 0x43a   : > { %v11648_v52 = vpop.eup %6510  ;;  %v3640_v26 = vand.u32 2147483648, %v11485_v38  ;;  %v3610_v35 = vand.u32 2147483648, %v11510_v31  ;;  %v5764_v39 = vmul.f32 -1.442695, %v11624_v4  ;;  %v3587_v54 = vmul.f32 %v11581_v10, %v3586_v19 }
 0x43b   : > { %v3601_v33 = vsub.f32 1.0, %v3600_v1  ;;  %v3885_v0 = vmul.f32 %v11632_v41, %v11568_v43  ;;  %6514 = vpow2.f32 %v5761_v45  ;;  %v3615_v17 = vmul.f32 %v11641_v15, %v11579_v28 }
 0x43c   : > { %v5743_v36 = vmul.f32 -1.442695, %v11638_v42  ;;  %6516 = vpow2.f32 %v5764_v39  ;;  %v11661_v3 = vadd.f32 %v1441_v6, %v10965_v63  ;;  %vm11663_vm4 = vcmp.eq.f32.partialorder %v3593_v23, 8.507059e+37 }
 0x43d   : > { %v3632_v57 = vmul.f32 %v11597_v22, %v3631_v48  ;;  %vm3634_vm8 = vweird.f32 %v11485_v38  ;;  %v3930_v29 = vmul.f32 %v11648_v52, %v11588_v9  ;;  %v11672_v32 = vadd.f32 %v1414_v20, %v10717_v59 }
 0x43e   : > { %vm3590_vm3 = vweird.f32 %v11581_v10  ;;  %v3641_v50 = vor.u32 1.1754944e-38, %v3640_v26  ;;  %vm3604_vm6 = vweird.f32 %v11510_v31  ;;  %v3608_v7 = vand.u32 2147483647, %v11510_v31 }
 0x43f   : > { %v6513_v49 = vpop.eup %6512  ;;  %v3588_v25 = vadd.f32 %v11581_v10, %v3587_v54  ;;  %vm11678_vm14 = vcmp.eq.f32.partialorder %v3638_v13, 8.507059e+37  ;;  %v3602_v60 = vmul.f32 %v11607_v55, %v3601_v33  ;;  %v11683_v37 = vor.u32 1.1754944e-38, %v3610_v35  ;;  %vm11696_vm10 = vmor %vm3589_vm5, %vm3590_vm3 }
 0x440   : > { %v3886_v59 = vsub.f32 1.0, %v3885_v0  ;;  %v3616_v44 = vsub.f32 1.0, %v3615_v17  ;;  %6518 = vpow2.f32 %v5743_v36  ;;  %v5762_v5 = vmul.f32 -1.442695, %v11661_v3  ;;  %v1501_v36 = vpop.f32.mrf.mxu0 }
 0x441   : > { %v11687_v19 = vadd.f32 %v1470_v51, %v10980_v27  ;;  %v6515_v1 = vpop.eup %6514  ;;  %v3633_v23 = vadd.f32 %v11597_v22, %v3632_v57  ;;  %vm3635_vm11 = vweird.f32 %v11597_v22  ;;  %v3931_v45 = vsub.f32 1.0, %v3930_v29 }
 0x442   : > { %v5781_v48 = vmul.f32 -1.442695, %v11672_v32  ;;  %v6517_v6 = vpop.eup %6516  ;;  %vm3605_vm9 = vweird.f32 %v11607_v55  ;;  %vm3619_vm0 = vweird.f32 %v11579_v28  ;;  %vm3889_vm1 = vweird.f32 %v11568_v43  ;;  %vm11718_vm7 = vmor %vm3634_vm8, %vm3635_vm11 }
 0x443   : > { %v11703_v26 = vadd.f32 1.0, %v6513_v49  ;;  %v3592_v35 = vsel %vm11696_vm10, %v11581_v10, %v3588_v25  ;;  %vm11708_vm12 = vcmp.eq.f32.partialorder %v3608_v7, 8.507059e+37  ;;  %v3887_v8 = vmul.f32 %v11632_v41, %v3886_v59  ;;  %vm11741_vm5 = vmor %vm3604_vm6, %vm3605_vm9 }
 0x444   : > { %v3893_v20 = vand.u32 2147483647, %v11568_v43  ;;  %v11714_v54 = vadd.f32 1.0, %v6515_v1  ;;  %v3603_v0 = vadd.f32 %v11607_v55, %v3602_v60  ;;  %v3617_v10 = vmul.f32 %v11641_v15, %v3616_v44 }
 0x445   : > { %6520 = vpow2.f32 %v5762_v5  ;;  %v5763_v17 = vmul.f32 -1.442695, %v11687_v19  ;;  %v3637_v57 = vsel %vm11718_vm7, %v11597_v22, %v3633_v23  ;;  %v3932_v29 = vmul.f32 %v11648_v52, %v3931_v45 }
 0x446   : > { %v11729_v51 = vadd.f32 1.0, %v6517_v6  ;;  %6522 = vpow2.f32 %v5781_v48  ;;  %v6519_v38 = vpop.eup %6518  ;;  %v3597_v7 = vsel %vm11663_vm4, %v11646_v30, %v3592_v35  ;;  %vm3620_vm13 = vweird.f32 %v11641_v15 }
 0x447   : > { %v3895_v49 = vand.u32 2147483648, %v11568_v43  ;;  %6524 = vrcp.f32 %v11703_v26  ;;  %v3888_v25 = vadd.f32 %v11632_v41, %v3887_v8  ;;  %vm3890_vm8 = vweird.f32 %v11632_v41 }
 0x448   : > { %6526 = vrcp.f32 %v11714_v54  ;;  %v11749_v30 = vadd.f32 %v1501_v36, %v10941_v46  ;;  %v3642_v14 = vsel %vm11678_vm14, %v3641_v50, %v3637_v57  ;;  %v3607_v31 = vsel %vm11741_vm5, %v11607_v55, %v3603_v0  ;;  %vm11766_vm3 = vmor %vm3889_vm1, %vm3890_vm8 }
 0x449   : > { %v3618_v60 = vadd.f32 %v11641_v15, %v3617_v10  ;;  %6528 = vpow2.f32 %v5763_v17  ;;  %v3933_v59 = vadd.f32 %v11648_v52, %v3932_v29  ;;  %vm3935_vm4 = vweird.f32 %v11648_v52  ;;  %vm11779_vm14 = vmor %vm3619_vm0, %vm3620_vm13 }
 0x44a   : > { %v11759_v44 = vadd.f32 1.0, %v6519_v38  ;;  %6530 = vrcp.f32 %v11729_v51  ;;  %v3623_v5 = vand.u32 2147483647, %v11579_v28  ;;  %v3625_v50 = vand.u32 2147483648, %v11579_v28 }
 0x44b   : > { %v6521_v46 = vpop.eup %6520  ;;  %vm11770_vm6 = vcmp.eq.f32.partialorder %v3893_v20, 8.507059e+37  ;;  %v3940_v1 = vand.u32 2147483648, %v11588_v9  ;;  %v3892_v43 = vsel %vm11766_vm3, %v11632_v41, %v3888_v25  ;;  %vm3934_vm11 = vweird.f32 %v11588_v9 }
 0x44c   : > { %v6523_v23 = vpop.eup %6522  ;;  %v3938_v48 = vand.u32 2147483647, %v11588_v9  ;;  %v5784_v6 = vmul.f32 -1.442695, %v11749_v30  ;;  %v4640_v35 = vmul.f32 %v3597_v7, %v11355_v56  ;;  %v4643_v28 = vmul.f32 %v3642_v14, %v11365_v47  ;;  %vm11798_vm10 = vmor %vm3934_vm11, %vm3935_vm4  ;;  %v1443_v7 = vpop.f32.mrf.mxu2 }
 0x44d   : > { %v11789_v13 = vpop.eup %6524  ;;  %v3612_v8 = vsel %vm11708_vm12, %v11683_v37, %v3607_v31  ;;  %v3896_v20 = vor.u32 1.1754944e-38, %v3895_v49  ;;  %v3622_v33 = vsel %vm11779_vm14, %v11641_v15, %v3618_v60  ;;  %v3937_v56 = vsel %vm11798_vm10, %v11648_v52, %v3933_v59 }
 0x44e   : > { %v11802_v9 = vpop.eup %6526  ;;  %6532 = vrcp.f32 %v11759_v44  ;;  %v11811_v47 = vadd.f32 1.0, %v6521_v46  ;;  %v3626_v39 = vor.u32 1.1754944e-38, %v3625_v50  ;;  %v3941_v10 = vor.u32 1.1754944e-38, %v3940_v1 }
 0x44f   : > { %v6529_v37 = vpop.eup %6528  ;;  %v3897_v0 = vsel %vm11770_vm6, %v3896_v20, %v3892_v43  ;;  %v11815_v17 = vadd.f32 1.0, %v6523_v23  ;;  %v4641_v15 = vmul.f32 %v3612_v8, %v11392_v24  ;;  %vm3624_vm9 = vcmp.eq.f32.partialorder %v3623_v5, 8.507059e+37  ;;  %v1472_v24 = vpop.f32.mrf.mxu3 }
 0x450   : > { %v11817_v36 = vpop.eup %6530  ;;  %vm3939_vm0 = vcmp.eq.f32.partialorder %v3938_v48, 8.507059e+37  ;;  %6534 = vpow2.f32 %v5784_v6  ;;  %v3627_v52 = vsel %vm3624_vm9, %v3626_v39, %v3622_v33  ;;  %v3900_v29 = vmul.f32 %v11789_v13, %v11703_v26 }
 0x451   : > { %v3942_v57 = vsel %vm3939_vm0, %v3941_v10, %v3937_v56  ;;  %v4185_v38 = vmul.f32 %v11802_v9, %v11714_v54  ;;  %v4915_v49 = vadd.f32 %v11626_v62, %v4640_v35  ;;  %v4954_v22 = vadd.f32 %v11628_v11, %v4643_v28 }
 0x452   : > { %v4660_v25 = vmul.f32 %v3897_v0, %v11429_v34  ;;  %6536 = vrcp.f32 %v11811_v47  ;;  %v3910_v14 = vand.u32 2147483648, %v11703_v26  ;;  %v4230_v31 = vmul.f32 %v11817_v36, %v11729_v51 }
 0x453   : > { %v11831_v60 = vadd.f32 1.0, %v6529_v37  ;;  %6538 = vrcp.f32 %v11815_v17  ;;  %v11837_v62 = vadd.f32 %v11634_v53, %v4641_v15  ;;  %v11840_v11 = vmul.f32 %v3627_v52, %v11426_v40 }
 0x454   : > { %v11834_v59 = vpop.eup %6532  ;;  %v4663_v34 = vmul.f32 %v3942_v57, %v11441_v16  ;;  %v11844_v46 = vadd.f32 %v1443_v7, %v10965_v63  ;;  %v3901_v5 = vsub.f32 1.0, %v3900_v29  ;;  %v3925_v50 = vand.u32 2147483648, %v11759_v44 }
 0x455   : > { %v4186_v55 = vsub.f32 1.0, %v4185_v38  ;;  %v11848_v21 = vadd.f32 %v1472_v24, %v10980_v27  ;;  %v11850_v23 = vadd.f32 %v4915_v49, %v4660_v25  ;;  %vm3904_vm1 = vweird.f32 %v11703_v26 }
 0x456   : > { %v6535_v1 = vpop.eup %6534  ;;  %v3908_v40 = vand.u32 2147483647, %v11703_v26  ;;  %v4195_v53 = vand.u32 2147483648, %v11714_v54  ;;  %v11855_v16 = vor.u32 1.1754944e-38, %v3910_v14  ;;  %v3915_v63 = vmul.f32 %v11834_v59, %v11759_v44 }
 0x457   : > { %v4231_v45 = vsub.f32 1.0, %v4230_v31  ;;  %6540 = vrcp.f32 %v11831_v60  ;;  %v11862_v27 = vadd.f32 %v4954_v22, %v4663_v34  ;;  %v3923_v48 = vand.u32 2147483647, %v11759_v44 }
 0x458   : > { %v11860_v43 = vpop.eup %6536  ;;  %vm4189_vm12 = vweird.f32 %v11714_v54  ;;  %v4193_v6 = vand.u32 2147483647, %v11714_v54  ;;  %v3902_v28 = vmul.f32 %v11789_v13, %v3901_v5  ;;  %v11870_v8 = vor.u32 1.1754944e-38, %v3925_v50 }
 0x459   : > { %v11867_v35 = vpop.eup %6538  ;;  %v4187_v20 = vmul.f32 %v11802_v9, %v4186_v55  ;;  %v11873_v41 = vadd.f32 1.0, %v6535_v1  ;;  %vm3905_vm7 = vweird.f32 %v11789_v13  ;;  %v4196_v33 = vor.u32 1.1754944e-38, %v4195_v53 }
 0x45a   : > { %v4485_v56 = vmul.f32 %v11867_v35, %v11815_v17  ;;  %v5782_v37 = vmul.f32 -1.442695, %v11844_v46  ;;  %v3916_v39 = vsub.f32 1.0, %v3915_v63  ;;  %v4232_v0 = vmul.f32 %v11817_v36, %v4231_v45  ;;  %vm11905_vm4 = vmor %vm3904_vm1, %vm3905_vm7 }
 0x45b   : > { %vm4234_vm13 = vweird.f32 %v11729_v51  ;;  %v4200_v10 = vmul.f32 %v11860_v43, %v11811_v47  ;;  %vm11883_vm5 = vcmp.eq.f32.partialorder %v4193_v6, 8.507059e+37  ;;  %v4238_v52 = vand.u32 2147483647, %v11729_v51 }
 0x45c   : > { %v4240_v57 = vand.u32 2147483648, %v11729_v51  ;;  %v4486_v29 = vsub.f32 1.0, %v4485_v56  ;;  %6542 = vrcp.f32 %v11873_v41  ;;  %v11893_v7 = vadd.f32 %v11789_v13, %v3902_v28 }
 0x45d   : > { %v11890_v38 = vpop.eup %6540  ;;  %v4188_v49 = vadd.f32 %v11802_v9, %v4187_v20  ;;  %vm4190_vm8 = vweird.f32 %v11802_v9  ;;  %v4210_v22 = vand.u32 2147483648, %v11811_v47  ;;  %v4208_v25 = vand.u32 2147483647, %v11811_v47 }
 0x45e   : > { %v4487_v24 = vmul.f32 %v11867_v35, %v4486_v29  ;;  %6544 = vpow2.f32 %v5782_v37  ;;  %v5783_v14 = vmul.f32 -1.442695, %v11848_v21  ;;  %v3917_v34 = vmul.f32 %v11834_v59, %v3916_v39  ;;  %vm11916_vm11 = vmor %vm4189_vm12, %vm4190_vm8 }
 0x45f   : > { %v4233_v5 = vadd.f32 %v11817_v36, %v4232_v0  ;;  %vm4235_vm3 = vweird.f32 %v11817_v36  ;;  %v4201_v50 = vsub.f32 1.0, %v4200_v10  ;;  %vm3919_vm6 = vweird.f32 %v11759_v44 }
 0x460   : > { %vm3920_vm14 = vweird.f32 %v11834_v59  ;;  %vm11920_vm10 = vcmp.eq.f32.partialorder %v4238_v52, 8.507059e+37  ;;  %v4215_v1 = vmul.f32 %v11890_v38, %v11831_v60  ;;  %6546 = vpow2.f32 %v5783_v14  ;;  %vm11941_vm0 = vmor %vm4234_vm13, %vm4235_vm3 }
 0x461   : > { %v3907_v53 = vsel %vm11905_vm4, %v11789_v13, %v11893_v7  ;;  %v4192_v54 = vsel %vm11916_vm11, %v11802_v9, %v4188_v49  ;;  %v4241_v63 = vor.u32 1.1754944e-38, %v4240_v57  ;;  %v11933_v45 = vor.u32 1.1754944e-38, %v4210_v22 }
 0x462   : > { %v6543_v6 = vpop.eup %6542  ;;  %vm11935_vm9 = vcmp.eq.f32.partialorder %v3908_v40, 8.507059e+37  ;;  %v4488_v13 = vadd.f32 %v11867_v35, %v4487_v24  ;;  %vm4490_vm1 = vweird.f32 %v11867_v35  ;;  %v4495_v9 = vand.u32 2147483648, %v11815_v17 }
 0x463   : > { %v367_v56 = vlaneseq  ;;  %v3918_v37 = vadd.f32 %v11834_v59, %v3917_v34  ;;  %v4237_v40 = vsel %vm11941_vm0, %v11817_v36, %v4233_v5  ;;  %v4202_v39 = vmul.f32 %v11860_v43, %v4201_v50 }
 0x464   : > { %vm4204_vm12 = vweird.f32 %v11811_v47  ;;  %v4530_v51 = vmul.f32 %v6543_v6, %v11873_v41  ;;  %v6545_v0 = vpop.eup %6544  ;;  %v4216_v10 = vsub.f32 1.0, %v4215_v1  ;;  %vm4489_vm7 = vweird.f32 %v11815_v17 }
 0x465   : > { %v4493_v52 = vand.u32 2147483647, %v11815_v17  ;;  %vm11957_vm13 = vcmp.lt.s32.totalorder %v367_v56, 512  ;;  %vm11961_vm8 = vcmp.eq.f32.partialorder %v3923_v48, 8.507059e+37  ;;  %v4197_v36 = vsel %vm11883_vm5, %v4196_v33, %v4192_v54  ;;  %vm11970_vm3 = vmor %vm4489_vm7, %vm4490_vm1 }
 0x466   : > { %vm4205_vm4 = vweird.f32 %v11860_v43  ;;  %v4531_v17 = vsub.f32 1.0, %v4530_v51  ;;  %v11974_v49 = vadd.f32 1.0, %v6545_v0  ;;  %v6615_v22 = vmov 0.0   ;;  %v6547_v48 = vpop.eup %6546 }
 0x467   : > { %371 = vst.msk [vmem:[#allocation2 + $0x10] sm:$0xf] %vm11957_vm13, %v6615_v22  ;;  %v4242_v15 = vsel %vm11920_vm10, %v4241_v63, %v4237_v40  ;;  %v4492_v33 = vsel %vm11970_vm3, %v11867_v35, %v4488_v13  ;;  %v4496_v24 = vor.u32 1.1754944e-38, %v4495_v9  ;;  %v4540_v14 = vand.u32 2147483648, %v11873_v41  ;;  %vm11994_vm10 = vmor %vm3919_vm6, %vm3920_vm14 }
 0x468   : > { %v4532_v31 = vmul.f32 %v6543_v6, %v4531_v17  ;;  %vm4535_vm5 = vweird.f32 %v6543_v6  ;;  %v4538_v34 = vand.u32 2147483647, %v11873_v41  ;;  %6548 = vrcp.f32 %v11974_v49  ;;  %vm12013_vm14 = vmor %vm4204_vm12, %vm4205_vm4 }
 0x469   : > { %v4203_v5 = vadd.f32 %v11860_v43, %v4202_v39  ;;  %v4217_v50 = vmul.f32 %v11890_v38, %v4216_v10  ;;  %vm4494_vm11 = vcmp.eq.f32.partialorder %v4493_v52, 8.507059e+37  ;;  %v11988_v55 = vadd.f32 1.0, %v6547_v48 }
 0x46a   : > { %v4683_v26 = vmul.f32 %v4242_v15, %v11624_v4  ;;  %v4497_v1 = vsel %vm4494_vm11, %v4496_v24, %v4492_v33  ;;  %v4533_v54 = vadd.f32 %v6543_v6, %v4532_v31  ;;  %vm4534_vm0 = vweird.f32 %v11873_v41 }
 0x46b   : > { %v4680_v63 = vmul.f32 %v4197_v36, %v11614_v12  ;;  %vm4219_vm1 = vweird.f32 %v11831_v60  ;;  %vm4536_vm7 = vmor %vm4534_vm0, %vm4535_vm5  ;;  %v4541_v20 = vor.u32 1.1754944e-38, %v4540_v14  ;;  %6550 = vrcp.f32 %v11988_v55 }
 0x46c   : > { %v3912_v44 = vsel %vm11935_vm9, %v11855_v16, %v3907_v53  ;;  %v3922_v4 = vsel %vm11994_vm10, %v11834_v59, %v3918_v37  ;;  %v4537_v13 = vsel %vm4536_vm7, %v6543_v6, %v4533_v54  ;;  %vm4539_vm6 = vcmp.eq.f32.partialorder %v4538_v34, 8.507059e+37 }
 0x46d   : > { %v4218_v41 = vadd.f32 %v11890_v38, %v4217_v50  ;;  %vm4220_vm3 = vweird.f32 %v11890_v38  ;;  %v4700_v16 = vmul.f32 %v4497_v1, %v11672_v32  ;;  %v4542_v53 = vsel %vm4539_vm6, %v4541_v20, %v4537_v13 }
 0x46e   : > { %v6549_v28 = vpop.eup %6548  ;;  %v4956_v59 = vadd.f32 %v11862_v27, %v4683_v26  ;;  %v4207_v6 = vsel %vm12013_vm14, %v11860_v43, %v4203_v5  ;;  %v4225_v9 = vand.u32 2147483648, %v11831_v60  ;;  %v4703_v56 = vmul.f32 %v4542_v53, %v11749_v30  ;;  %vm12041_vm12 = vmor %vm4219_vm1, %vm4220_vm3 }
 0x46f   : > { %v3927_v37 = vsel %vm11961_vm8, %v11870_v8, %v3922_v4  ;;  %v4917_v40 = vadd.f32 %v11850_v23, %v4680_v63  ;;  %v4223_v32 = vand.u32 2147483647, %v11831_v60  ;;  %v4500_v39 = vmul.f32 %v6549_v28, %v11974_v49 }
 0x470   : > { %v4941_v27 = vadd.f32 %v11643_v61, %v11840_v11  ;;  %v4661_v51 = vmul.f32 %v3912_v44, %v11595_v2  ;;  %vm4209_vm9 = vcmp.eq.f32.partialorder %v4208_v25, 8.507059e+37  ;;  %v4957_v23 = vadd.f32 %v4956_v59, %v4703_v56 }
 0x471   : > { %v6551_v43 = vpop.eup %6550  ;;  %v4212_v8 = vsel %vm4209_vm9, %v11933_v45, %v4207_v6  ;;  %v4222_v61 = vsel %vm12041_vm12, %v11890_v38, %v4218_v41  ;;  %v4918_v2 = vadd.f32 %v4917_v40, %v4700_v16  ;;  %v4501_v11 = vsub.f32 1.0, %v4500_v39 }
 0x472   : > { %v4662_v47 = vmul.f32 %v3927_v37, %v11638_v42  ;;  %v4226_v25 = vor.u32 1.1754944e-38, %v4225_v9  ;;  %v4510_v0 = vand.u32 2147483648, %v11974_v49  ;;  %v4515_v60 = vmul.f32 %v6551_v43, %v11988_v55 }
 0x473   : > { %vm4224_vm8 = vcmp.eq.f32.partialorder %v4223_v32, 8.507059e+37  ;;  %v4502_v10 = vmul.f32 %v6549_v28, %v4501_v11  ;;  %vm4505_vm4 = vweird.f32 %v6549_v28  ;;  %v4508_v52 = vand.u32 2147483647, %v11974_v49 }
 0x474   : > { %v4681_v45 = vmul.f32 %v4212_v8, %v11661_v3  ;;  %v4227_v29 = vsel %vm4224_vm8, %v4226_v25, %v4222_v61  ;;  %v4958_v36 = vrot.slane %v4957_v23, 4  ;;  %v4516_v7 = vsub.f32 1.0, %v4515_v60  ;;  %v4966_v8 = vld [vmem:[#allocation2 + $0x10] sm:$0xf] }
 0x475   : > { %v4919_v38 = vrot.slane %v4918_v2, 4  ;;  %v4503_v17 = vadd.f32 %v6549_v28, %v4502_v10  ;;  %vm4504_vm5 = vweird.f32 %v11974_v49  ;;  %v4525_v42 = vand.u32 2147483648, %v11988_v55 }
 0x476   : > { %vm4506_vm11 = vmor %vm4504_vm5, %vm4505_vm4  ;;  %v4511_v22 = vor.u32 1.1754944e-38, %v4510_v0  ;;  %v4517_v48 = vmul.f32 %v6551_v43, %v4516_v7  ;;  %vm4520_vm10 = vweird.f32 %v6551_v43  ;;  %v4523_v15 = vand.u32 2147483647, %v11988_v55 }
 0x477   : > { %v4929_v33 = vadd.f32 %v11837_v62, %v4661_v51  ;;  %v4682_v24 = vmul.f32 %v4227_v29, %v11687_v19  ;;  %v4507_v3 = vsel %vm4506_vm11, %v6549_v28, %v4503_v17  ;;  %vm4509_vm0 = vcmp.eq.f32.partialorder %v4508_v52, 8.507059e+37  ;;  %vm12610_vm4 = vmor %vm9128_vm15, %vm9115_vm2 }
 0x478   : > { %v4959_v14 = vadd.f32 %v4958_v36, %v4957_v23  ;;  %v4512_v31 = vsel %vm4509_vm0, %v4511_v22, %v4507_v3  ;;  %v4518_v34 = vadd.f32 %v6551_v43, %v4517_v48  ;;  %vm4519_vm1 = vweird.f32 %v11988_v55  ;;  %v5213_v22 = vld [vmem:[%s9302_s9 + $0x10] sm:$0xf] }
 0x479   : > { %v4930_v49 = vadd.f32 %v4929_v33, %v4681_v45  ;;  %v4701_v5 = vmul.f32 %v4512_v31, %v11844_v46  ;;  %vm4521_vm7 = vmor %vm4519_vm1, %vm4520_vm10  ;;  %v4526_v50 = vor.u32 1.1754944e-38, %v4525_v42  ;;  %v4942_v35 = vadd.f32 %v4941_v27, %v4662_v47  ;;  %v5049_v47 = vld [vmem:[%s12094_s5 + $0x10] sm:$0xf] }
 0x47a   : > { %v4920_v26 = vadd.f32 %v4919_v38, %v4918_v2  ;;  %v4522_v1 = vsel %vm4521_vm7, %v6551_v43, %v4518_v34  ;;  %vm4524_vm6 = vcmp.eq.f32.partialorder %v4523_v15, 8.507059e+37  ;;  %v4960_v19 = vrot.slane %v4959_v14, 2 }
 0x47b   : > { %v4931_v54 = vadd.f32 %v4930_v49, %v4701_v5  ;;  %v4527_v62 = vsel %vm4524_vm6, %v4526_v50, %v4522_v1  ;;  %v4943_v63 = vadd.f32 %v4942_v35, %v4682_v24  ;;  %vm12604_vm14 = vcmask 1040384  }
 0x47c   : > { %v4702_v20 = vmul.f32 %v4527_v62, %v11848_v21  ;;  %v4921_v4 = vrot.slane %v4920_v26, 2  ;;  %v4961_v55 = vadd.f32 %v4960_v19, %v4959_v14  ;;  %vm12605_vm3 = vcmask 1042434   ;;  %vm12607_vm12 = vmmov %vm12604_vm14 }
 0x47d   : > { %v4932_v44 = vrot.slane %v4931_v54, 4  ;;  %vm12606_vm9 = vcmask 1041408  }
 0x47e   : > { %v4944_v13 = vadd.f32 %v4943_v63, %v4702_v20  ;;  %v4922_v46 = vadd.f32 %v4921_v4, %v4920_v26  ;;  %v4962_v59 = vrot.slane %v4961_v55, 1  ;;  %vm12609_vm8 = vmmov %vm12606_vm9 }
 0x47f   : > { %v4933_v12 = vadd.f32 %v4932_v44, %v4931_v54 }
 0x480   : > { %v4945_v41 = vrot.slane %v4944_v13, 4  ;;  %v4923_v56 = vrot.slane %v4922_v46, 1  ;;  %v4963_v32 = vadd.f32 %v4962_v59, %v4961_v55 }
 0x481   : > { %v4934_v16 = vrot.slane %v4933_v12, 2 }
 0x482   : > { %v4946_v53 = vadd.f32 %v4945_v41, %v4944_v13  ;;  %v4924_v21 = vadd.f32 %v4923_v56, %v4922_v46  ;;  %v5003_v30 = vrot.slane %v4963_v32, 5 }
 0x483   : > { %v4935_v28 = vadd.f32 %v4934_v16, %v4933_v12 }
 0x484   : > { %v4947_v6 = vrot.slane %v4946_v53, 2 }
 0x485   : > { %v4936_v9 = vrot.slane %v4935_v28, 1 }
 0x486   : > { %v4948_v37 = vadd.f32 %v4947_v6, %v4946_v53 }
 0x487   : > { %v4937_v40 = vadd.f32 %v4936_v9, %v4935_v28 }
 0x488   : > { %v4949_v39 = vrot.slane %v4948_v37, 1 }
 0x489   : > { %v5001_v27 = vrot.slane %v4937_v40, 7 }
 0x48a   : > { %v4950_v51 = vadd.f32 %v4949_v39, %v4948_v37 }
 0x48b   : > { %v5025_v23 = vsel %vm12604_vm14, %v4924_v21, %v5001_v27 }
 0x48c   : > { %v5002_v43 = vrot.slane %v4950_v51, 6 }
 0x48e   : > { %v5026_v61 = vsel %vm12605_vm3, %v5002_v43, %v5003_v30 }
 0x48f   : > { %v5027_v2 = vsel %vm12606_vm9, %v5025_v23, %v5026_v61 }
 0x490   : > { %v5033_v11 = vadd.f32 %v5027_v2, %v4966_v8 }
 0x492   : > { %5040 = vst.msk [vmem:[#allocation2 + $0x10] sm:$0xf] %vm11957_vm13, %v5033_v11  ;;  %vm12608_vm13 = vmmov %vm12605_vm3 }
 0x499   : > { %v5046_v25 = vld [vmem:[#allocation2 + $0x10] sm:$0xf] }
 0x49a   : > { %v5052_v0 = vsub.f32 %v5046_v25, %v5049_v47 }
 0x49c   : > { %v5055_v60 = vmul.f32 0.015625, %v5052_v0 }
 0x49e   : > { %v5075_v10 = vperm.slane %v5055_v60, 0  ;;  %v5076_v52 = vperm.slane %v5055_v60, 1  ;;  %v5077_v45 = vperm.slane %v5055_v60, 2  ;;  %v5078_v29 = vperm.slane %v5055_v60, 3 }
 0x4a0   : > { %v5107_v36 = vpack.c.bf16 %v5076_v52, %v5075_v10  ;;  %v5108_v7 = vpack.c.bf16 %v5078_v29, %v5077_v45 }
 0x4a2   : > { %v5133_v38 = vrot.slane %v5107_v36, 3  ;;  %v5134_v17 = vrot.slane %v5108_v7, 6  ;;  %v5135_v42 = vrot.slane %v5108_v7, 1 }
 0x4a4   : > { %v5168_v57 = vsel %vm12607_vm12, %v5107_v36, %v5133_v38  ;;  %v5171_v48 = vsel %vm12608_vm13, %v5134_v17, %v5135_v42 }
 0x4a5   : > { %v5172_v15 = vsel %vm12609_vm8, %v5168_v57, %v5171_v48 }
 0x4a6   : > { %v5214_v33 = vsel %vm12610_vm4, %v5172_v15, %v5213_v22 }
 0x4a7   : > { %5215 = vst [vmem:[%s9302_s9 + $0x10] sm:$0xf] %v5214_v33 }
 0x4a8 PF: > { %s17_s23 = sadd.s32 1, %s6610_s23   ;;  %s12611_s21 = smov %s6606_s22 }
 0x4a9   : > { %p14_p8 = scmp.ge.s32.totalorder %s17_s23, 4   ;;  %s12612_s22 = smov %s12614_s25 }
 0x4ab   :  { %16 = sbr.rel (!%p14_p8) target bundleno = 2 (0x2), region = 94 }
 0x4b0   :  { %5244 = vsyncpa [#allocation4], 1 }
 0x4b1   :  { %5246 = vsyncpa [#allocation4 + $0x1], 1 }

</bundles_post_ra>
